<compile_context>
chip_gen: v5e
topology: v5e:2x2
jax: 0.10.0
libtpu: 0.0.40
codegen_flags: <defaults>
</compile_context>

<pallas_src>
from functools import partial
from typing import NamedTuple

import jax
import jax.numpy as jnp
import numpy as np
from jax.experimental import pallas as pl
from jax.experimental.pallas import tpu as pltpu

_LANE = 128
_SUBLANE = 8
_MASK_PAD = -1e30          # additive mask for padded L positions


def _round_up(x, m):
    return ((x + m - 1) // m) * m


def _cdiv(a, b):
    return -(-a // b)


def _vmem_capacity_bytes():
    try:
        return int(pltpu.get_tpu_info().vmem_capacity_bytes)
    except Exception:
        return 64 * 1024 * 1024       # conservative fallback (v7x per-TC VMEM)


class AttnMeta(NamedTuple):
    B: int
    L: int
    H2: int
    Bp: int
    Lp: int
    Hp: int
    block_b: int
    block_l: int          # 0 -> single-pass fused kernel (full L per batch tile)
    vmem_limit: int


def _pick_block_b(batch, lp, hp, stream_itemsize, budget):
    """Largest multiple-of-8 batch tile whose per-step VMEM footprint fits the
    budget. Returns 0 when even 8 rows do not fit (caller uses the L-tiled path)."""
    per_row = (2 * 2 * lp * hp * stream_itemsize   # enc_out + enc_feat, double-buffered
               + lp * hp * 4                       # f32 multiply/reduce intermediate
               + 2 * 4 * lp * 4                    # mask / coverage / attn / new-cov (f32)
               + 2 * 3 * hp * 4)                   # dec_fea / c_t / cov_coef
    tb = (int(budget // max(per_row, 1)) // _SUBLANE) * _SUBLANE
    if tb < _SUBLANE:
        return 0
    bp8 = _round_up(batch, _SUBLANE)
    if bp8 >= 4 * _SUBLANE:                        # keep >=4 grid steps (pipelining / 2 TCs)
        tb = min(tb, max(_SUBLANE, ((bp8 // 4) // _SUBLANE) * _SUBLANE))
    return min(tb, bp8)


def _pick_block_l(lp, hp, stream_itemsize, budget, block_b):
    """L tile (multiple of 128) for the fallback path; one big stream per kernel."""
    per_l = (2 * 2 * block_b * hp * stream_itemsize   # streamed tensor, double-buffered
             + block_b * hp * 4                       # f32 intermediate
             + 4 * block_b * 4 * 4)                   # small 2-D tiles
    tl = max(_LANE, (int(budget // max(per_l, 1)) // _LANE) * _LANE)
    tl = min(tl, lp)
    nl = _cdiv(lp, tl)
    return _round_up(_cdiv(lp, nl), _LANE)


# --------------------------------------------------------------------------
# One-time (per encoder pass) preparation of the streamed tensors.
# --------------------------------------------------------------------------
def prepare_encoder(encoder_outputs, encoder_feature, enc_padding_mask,
                    *, stream_dtype=None, vmem_budget=None):
    """Pad / cast the encoder-side tensors ONCE (they are reused for every
    decoder step) and derive generation-aware tiling meta."""
    B, L, H2 = encoder_outputs.shape
    stream_dtype = jnp.dtype(stream_dtype or encoder_outputs.dtype)
    Lp = _round_up(L, _LANE)
    Hp = _round_up(H2, _LANE)

    cap = _vmem_capacity_bytes()
    vmem_limit = min((cap * 3) // 4, 96 * 1024 * 1024)
    budget = int(vmem_budget) if vmem_budget is not None else vmem_limit // 2

    block_b = _pick_block_b(B, Lp, Hp, stream_dtype.itemsize, budget)
    if block_b:
        block_l = 0
    else:                                   # single batch tile too big -> L tiling
        block_b = _SUBLANE
        block_l = _pick_block_l(Lp, Hp, stream_dtype.itemsize, budget, block_b)
        Lp = _round_up(Lp, block_l)
    Bp = _round_up(B, block_b)

    def pad_big(x):
        return jnp.pad(x.astype(stream_dtype),
                       ((0, Bp - B), (0, Lp - L), (0, Hp - H2)))

    enc_out_p = pad_big(encoder_outputs)
    enc_feat_p = pad_big(encoder_feature)
    # pad L with a large negative (padded positions get ~0 attention weight),
    # pad extra batch rows with 0 (finite; sliced away afterwards).
    mask_p = jnp.pad(jnp.pad(enc_padding_mask.astype(jnp.float32),
                             ((0, 0), (0, Lp - L)), constant_values=_MASK_PAD),
                     ((0, Bp - B), (0, 0)))

    meta = AttnMeta(B, L, H2, Bp, Lp, Hp, block_b, block_l, int(vmem_limit))
    return enc_out_p, enc_feat_p, mask_p, meta


# --------------------------------------------------------------------------
# Kernels
# --------------------------------------------------------------------------
def _attention_kernel(dec_ref, covc_ref, enc_out_ref, enc_feat_ref,
                      mask_ref, cov_ref, c_t_ref, attn_ref, ncov_ref):
    dec = dec_ref[...]                                            # [TB, Hp] f32
    # scores[b,l] = sum_h enc_feat[b,l,h] * dec_fea[b,h]   (VPU mul + reduce, f32)
    scores = jnp.sum(enc_feat_ref[...] * dec[:, None, :], axis=-1)
    # coverage term fused algebraically: (cov * w_c) . dec == cov * (w_c . dec)
    scores = scores + cov_ref[...] * covc_ref[...]
    masked = scores + mask_ref[...]
    m = jnp.max(masked, axis=-1, keepdims=True)
    e = jnp.exp(masked - m)
    denom = jnp.sum(e, axis=-1, keepdims=True)
    attn = e / denom                                              # exact softmax
    # c_t[b,h] = sum_l attn[b,l] * enc_out[b,l,h]           (VPU mul + reduce, f32)
    c_t = jnp.sum(enc_out_ref[...] * attn[:, :, None], axis=1)
    c_t_ref[...] = c_t
    attn_ref[...] = attn
    ncov_ref[...] = cov_ref[...] + attn


def _scores_kernel(dec_ref, covc_ref, enc_feat_ref, mask_ref, cov_ref, scores_ref):
    s = jnp.sum(enc_feat_ref[...] * dec_ref[...][:, None, :], axis=-1)
    scores_ref[...] = s + cov_ref[...] * covc_ref[...] + mask_ref[...]


def _context_kernel(attn_ref, enc_out_ref, c_t_ref, acc_ref):
    @pl.when(pl.program_id(1) == 0)
    def _():
        acc_ref[...] = jnp.zeros_like(acc_ref)

    acc_ref[...] += jnp.sum(enc_out_ref[...] * attn_ref[...][:, :, None], axis=1)

    @pl.when(pl.program_id(1) == pl.num_programs(1) - 1)
    def _():
        c_t_ref[...] = acc_ref[...]


# --------------------------------------------------------------------------
# Per-decoder-step entry point
# --------------------------------------------------------------------------
@partial(jax.jit, static_argnames=("meta",))
def _attention_step_impl(s_t_hat, coverage, enc_out_p, enc_feat_p, mask_p,
                         w_dp, b_dp, w_c, meta):
    f32 = jnp.float32
    B, L, H2 = meta.B, meta.L, meta.H2
    Bp, Lp, Hp = meta.Bp, meta.Lp, meta.Hp
    tb = meta.block_b

    # decode_proj + coverage coefficient hoisted out of the kernel (tiny XLA matmuls).
    dec_fea = s_t_hat.astype(f32) @ jnp.asarray(w_dp, f32).T + jnp.asarray(b_dp, f32)
    cov_coef = dec_fea @ jnp.asarray(w_c, f32)                    # [B, 1]

    dec_p = jnp.pad(dec_fea, ((0, Bp - B), (0, Hp - H2)))
    covc_p = jnp.pad(cov_coef, ((0, Bp - B), (0, 0)))
    cov_p = jnp.pad(coverage.astype(f32), ((0, Bp - B), (0, Lp - L)))

    if meta.block_l == 0:
        # -------- single-pass fused kernel: whole L per batch tile --------
        grid = (Bp // tb,)
        c_t_p, attn_p, ncov_p = pl.pallas_call(
            _attention_kernel,
            out_shape=(jax.ShapeDtypeStruct((Bp, Hp), f32),
                       jax.ShapeDtypeStruct((Bp, Lp), f32),
                       jax.ShapeDtypeStruct((Bp, Lp), f32)),
            grid_spec=pltpu.PrefetchScalarGridSpec(
                num_scalar_prefetch=0, grid=grid,
                in_specs=[
                    pl.BlockSpec((tb, Hp), lambda b: (b, 0)),          # dec_fea
                    pl.BlockSpec((tb, 1), lambda b: (b, 0)),           # cov_coef
                    pl.BlockSpec((tb, Lp, Hp), lambda b: (b, 0, 0)),   # encoder_outputs
                    pl.BlockSpec((tb, Lp, Hp), lambda b: (b, 0, 0)),   # encoder_feature
                    pl.BlockSpec((tb, Lp), lambda b: (b, 0)),          # padding mask
                    pl.BlockSpec((tb, Lp), lambda b: (b, 0)),          # coverage
                ],
                out_specs=(
                    pl.BlockSpec((tb, Hp), lambda b: (b, 0)),          # c_t
                    pl.BlockSpec((tb, Lp), lambda b: (b, 0)),          # attn
                    pl.BlockSpec((tb, Lp), lambda b: (b, 0)),          # new coverage
                )),
            input_output_aliases={5: 2},   # coverage buffer reused for new coverage
            compiler_params=pltpu.CompilerParams(
                dimension_semantics=("parallel",),
                vmem_limit_bytes=meta.vmem_limit),
        )(dec_p, covc_p, enc_out_p, enc_feat_p, mask_p, cov_p)
    else:
        # -------- L-tiled fallback: scores -> XLA softmax [Bp,Lp] -> context --------
        tl = meta.block_l
        grid = (Bp // tb, Lp // tl)
        scores_p = pl.pallas_call(
            _scores_kernel,
            out_shape=jax.ShapeDtypeStruct((Bp, Lp), f32),
            grid_spec=pltpu.PrefetchScalarGridSpec(
                num_scalar_prefetch=0, grid=grid,
                in_specs=[
                    pl.BlockSpec((tb, Hp), lambda b, l: (b, 0)),
                    pl.BlockSpec((tb, 1), lambda b, l: (b, 0)),
                    pl.BlockSpec((tb, tl, Hp), lambda b, l: (b, l, 0)),
                    pl.BlockSpec((tb, tl), lambda b, l: (b, l)),
                    pl.BlockSpec((tb, tl), lambda b, l: (b, l)),
                ],
                out_specs=pl.BlockSpec((tb, tl), lambda b, l: (b, l))),
            compiler_params=pltpu.CompilerParams(
                dimension_semantics=("parallel", "parallel"),
                vmem_limit_bytes=meta.vmem_limit),
        )(dec_p, covc_p, enc_feat_p, mask_p, cov_p)

        attn_p = jax.nn.softmax(scores_p, axis=-1)   # small [Bp, Lp] — plain XLA
        ncov_p = cov_p + attn_p

        c_t_p = pl.pallas_call(
            _context_kernel,
            out_shape=jax.ShapeDtypeStruct((Bp, Hp), f32),
            grid_spec=pltpu.PrefetchScalarGridSpec(
                num_scalar_prefetch=0, grid=grid,
                in_specs=[
                    pl.BlockSpec((tb, tl), lambda b, l: (b, l)),
                    pl.BlockSpec((tb, tl, Hp), lambda b, l: (b, l, 0)),
                ],
                out_specs=pl.BlockSpec((tb, Hp), lambda b, l: (b, 0)),
                scratch_shapes=[pltpu.VMEM((tb, Hp), f32)]),
            compiler_params=pltpu.CompilerParams(
                dimension_semantics=("parallel", "arbitrary"),
                vmem_limit_bytes=meta.vmem_limit),
        )(attn_p, enc_out_p)

    return c_t_p[:B, :H2], attn_p[:B, :L], ncov_p[:B, :L]


def attention_step(s_t_hat, coverage, prepared, w_dp, b_dp, w_c):
    enc_out_p, enc_feat_p, mask_p, meta = prepared
    return _attention_step_impl(s_t_hat, coverage, enc_out_p, enc_feat_p, mask_p,
                                w_dp, b_dp, w_c, meta=meta)


def attention_forward(s_t_hat, encoder_outputs, encoder_feature, enc_padding_mask,
                      coverage, w_dp, b_dp, w_c, *, stream_dtype=None,
                      vmem_budget=None):
    """Convenience one-shot wrapper (prepare + one decoder step)."""
    prepared = prepare_encoder(encoder_outputs, encoder_feature, enc_padding_mask,
                               stream_dtype=stream_dtype, vmem_budget=vmem_budget)
    return attention_step(s_t_hat, coverage, prepared, w_dp, b_dp, w_c)


# --------------------------------------------------------------------------
# Pure-JAX reference (mirrors the PyTorch module)
# --------------------------------------------------------------------------
def attention_reference(s_t_hat, encoder_outputs, encoder_feature,
                        enc_padding_mask, coverage, w_dp, b_dp, w_c):
    dec_fea = s_t_hat @ w_dp.T + b_dp                               # [B, 2H]
    cov_feat = coverage[..., None] * w_c[:, 0][None, None, :]       # [B, L, 2H]
    scores = jnp.einsum('blh,bh->bl', encoder_feature + cov_feat, dec_fea)
    attn = jax.nn.softmax(scores + enc_padding_mask, axis=1)
    c_t = jnp.einsum('bl,blh->bh', attn, encoder_outputs)
    return c_t, attn, coverage + attn


if __name__ == "__main__":
    def build_case(key, B, L, H2):
        ks = jax.random.split(key, 7)
        s_t_hat = jax.random.normal(ks[0], (B, H2), jnp.float32)
        enc_out = jax.random.normal(ks[1], (B, L, H2), jnp.float32)
        enc_feat = jax.random.normal(ks[2], (B, L, H2), jnp.float32)
        coverage = jax.random.uniform(ks[3], (B, L), jnp.float32)
        lengths = jax.random.randint(ks[4], (B,), max(1, L // 2), L + 1)
        pos = jnp.arange(L)[None, :]
        mask = jnp.where(pos < lengths[:, None], 0.0, -1e9).astype(jnp.float32)
        w_dp = 0.02 * jax.random.normal(ks[5], (H2, H2), jnp.float32)
        b_dp = 0.02 * jax.random.normal(ks[6], (H2,), jnp.float32)
        w_c = 0.02 * jax.random.normal(jax.random.fold_in(key, 99), (H2, 1),
                                       jnp.float32)
        return s_t_hat, enc_out, enc_feat, mask, coverage, w_dp, b_dp, w_c

    key = jax.random.PRNGKey(0)

    # --- case 1: f32 streams, tiny shapes, single-pass fused path -----------
    args = build_case(jax.random.fold_in(key, 0), B=2, L=8, H2=64)
    out = attention_forward(*args)
    jax.block_until_ready(out)
    ref = attention_reference(*args)
    for got, want in zip(out, ref):
        np.testing.assert_allclose(np.asarray(got), np.asarray(want),
                                   atol=1e-3, rtol=1e-3)

    # --- case 2: bf16 streamed encoder tensors, multi-step batch grid -------
    s, enc_out, enc_feat, mask, cov, w_dp, b_dp, w_c = build_case(
        jax.random.fold_in(key, 1), B=16, L=24, H2=64)
    prepared = prepare_encoder(enc_out, enc_feat, mask,
                               stream_dtype=jnp.bfloat16,
                               vmem_budget=3 * 1024 * 1024)   # force block_b=8 (2 steps)
    out = attention_step(s, cov, prepared, w_dp, b_dp, w_c)
    jax.block_until_ready(out)
    ref = attention_reference(s, enc_out, enc_feat, mask, cov, w_dp, b_dp, w_c)
    for got, want in zip(out, ref):
        np.testing.assert_allclose(np.asarray(got), np.asarray(want),
                                   atol=3e-2, rtol=3e-2)

    # --- case 3: forced L-tiled fallback path (tiny VMEM budget) ------------
    args = build_case(jax.random.fold_in(key, 2), B=4, L=200, H2=96)
    out = attention_forward(*args, vmem_budget=1 << 20)
    jax.block_until_ready(out)
    ref = attention_reference(*args)
    for got, want in zip(out, ref):
        np.testing.assert_allclose(np.asarray(got), np.asarray(want),
                                   atol=1e-3, rtol=1e-3)

    print("KERNEL_OK")
</pallas_src>

<mosaic_0001>
module attributes {stable_mosaic.version = 11 : i64} {
  func.func @_attention_kernel(%arg0: i32, %arg1: memref<8x128xf32, #tpu.memory_space<vmem>>, %arg2: memref<8x1xf32, #tpu.memory_space<vmem>>, %arg3: memref<8x128x128xf32, #tpu.memory_space<vmem>>, %arg4: memref<8x128x128xf32, #tpu.memory_space<vmem>>, %arg5: memref<8x128xf32, #tpu.memory_space<vmem>>, %arg6: memref<8x128xf32, #tpu.memory_space<vmem>>, %arg7: memref<8x128xf32, #tpu.memory_space<vmem>>, %arg8: memref<8x128xf32, #tpu.memory_space<vmem>>, %arg9: memref<8x128xf32, #tpu.memory_space<vmem>>) attributes {dimension_semantics = [#tpu.dimension_semantics<parallel>], iteration_bounds = array<i64: 1>, scalar_prefetch = 0 : i64, scratch_operands = 0 : i64, tpu.core_type = #tpu.core_type<tc>, window_params = [{transform_indices = @transform_0, window_bounds = array<i64: 8, 128>}, {transform_indices = @transform_1, window_bounds = array<i64: 8, 1>}, {transform_indices = @transform_2, window_bounds = array<i64: 8, 128, 128>}, {transform_indices = @transform_3, window_bounds = array<i64: 8, 128, 128>}, {transform_indices = @transform_4, window_bounds = array<i64: 8, 128>}, {transform_indices = @transform_5, window_bounds = array<i64: 8, 128>}, {transform_indices = @transform_6, window_bounds = array<i64: 8, 128>}, {transform_indices = @transform_7, window_bounds = array<i64: 8, 128>}, {transform_indices = @transform_8, window_bounds = array<i64: 8, 128>}]} {
    %c0 = arith.constant 0 : index
    %c0_0 = arith.constant 0 : index
    %0 = vector.load %arg1[%c0, %c0_0] : memref<8x128xf32, #tpu.memory_space<vmem>>, vector<8x128xf32>
    %c0_1 = arith.constant 0 : index
    %c0_2 = arith.constant 0 : index
    %c0_3 = arith.constant 0 : index
    %1 = vector.load %arg4[%c0_1, %c0_2, %c0_3] : memref<8x128x128xf32, #tpu.memory_space<vmem>>, vector<8x128x128xf32>
    %2 = vector.shape_cast %0 : vector<8x128xf32> to vector<8x1x128xf32>
    %3 = vector.broadcast %2 : vector<8x1x128xf32> to vector<8x128x128xf32>
    %4 = arith.mulf %1, %3 : vector<8x128x128xf32>
    %cst = arith.constant dense<0.000000e+00> : vector<8x128xf32>
    %5 = vector.multi_reduction <add>, %4, %cst [2] : vector<8x128x128xf32> to vector<8x128xf32>
    %c0_4 = arith.constant 0 : index
    %c0_5 = arith.constant 0 : index
    %6 = vector.load %arg6[%c0_4, %c0_5] : memref<8x128xf32, #tpu.memory_space<vmem>>, vector<8x128xf32>
    %c0_6 = arith.constant 0 : index
    %c0_7 = arith.constant 0 : index
    %7 = vector.load %arg2[%c0_6, %c0_7] : memref<8x1xf32, #tpu.memory_space<vmem>>, vector<8x1xf32>
    %8 = vector.broadcast %7 : vector<8x1xf32> to vector<8x128xf32>
    %9 = arith.mulf %6, %8 : vector<8x128xf32>
    %10 = arith.addf %5, %9 : vector<8x128xf32>
    %c0_8 = arith.constant 0 : index
    %c0_9 = arith.constant 0 : index
    %11 = vector.load %arg5[%c0_8, %c0_9] : memref<8x128xf32, #tpu.memory_space<vmem>>, vector<8x128xf32>
    %12 = arith.addf %10, %11 : vector<8x128xf32>
    %cst_10 = arith.constant dense<0xFF800000> : vector<8xf32>
    %13 = vector.multi_reduction <maximumf>, %12, %cst_10 [1] : vector<8x128xf32> to vector<8xf32>
    %14 = vector.shape_cast %13 : vector<8xf32> to vector<8x1xf32>
    %15 = vector.broadcast %14 : vector<8x1xf32> to vector<8x128xf32>
    %16 = arith.subf %12, %15 : vector<8x128xf32>
    %17 = math.exp %16 : vector<8x128xf32>
    %cst_11 = arith.constant dense<0.000000e+00> : vector<8xf32>
    %18 = vector.multi_reduction <add>, %17, %cst_11 [1] : vector<8x128xf32> to vector<8xf32>
    %19 = vector.shape_cast %18 : vector<8xf32> to vector<8x1xf32>
    %20 = vector.broadcast %19 : vector<8x1xf32> to vector<8x128xf32>
    %21 = arith.divf %17, %20 : vector<8x128xf32>
    %c0_12 = arith.constant 0 : index
    %c0_13 = arith.constant 0 : index
    %c0_14 = arith.constant 0 : index
    %22 = vector.load %arg3[%c0_12, %c0_13, %c0_14] : memref<8x128x128xf32, #tpu.memory_space<vmem>>, vector<8x128x128xf32>
    %23 = vector.shape_cast %21 : vector<8x128xf32> to vector<8x128x1xf32>
    %24 = vector.broadcast %23 : vector<8x128x1xf32> to vector<8x128x128xf32>
    %25 = arith.mulf %22, %24 : vector<8x128x128xf32>
    %cst_15 = arith.constant dense<0.000000e+00> : vector<8x128xf32>
    %26 = vector.multi_reduction <add>, %25, %cst_15 [1] : vector<8x128x128xf32> to vector<8x128xf32>
    %c0_16 = arith.constant 0 : index
    %c0_17 = arith.constant 0 : index
    %27 = vector.load %arg7[%c0_16, %c0_17] : memref<8x128xf32, #tpu.memory_space<vmem>>, vector<8x128xf32>
    tpu.vector_store %arg7[%c0_16, %c0_17], %26 {strides = array<i32>} : memref<8x128xf32, #tpu.memory_space<vmem>>, vector<8x128xf32>,
    %c0_18 = arith.constant 0 : index
    %c0_19 = arith.constant 0 : index
    %28 = vector.load %arg8[%c0_18, %c0_19] : memref<8x128xf32, #tpu.memory_space<vmem>>, vector<8x128xf32>
    tpu.vector_store %arg8[%c0_18, %c0_19], %21 {strides = array<i32>} : memref<8x128xf32, #tpu.memory_space<vmem>>, vector<8x128xf32>,
    %c0_20 = arith.constant 0 : index
    %c0_21 = arith.constant 0 : index
    %29 = vector.load %arg6[%c0_20, %c0_21] : memref<8x128xf32, #tpu.memory_space<vmem>>, vector<8x128xf32>
    %30 = arith.addf %29, %21 : vector<8x128xf32>
    %c0_22 = arith.constant 0 : index
    %c0_23 = arith.constant 0 : index
    %31 = vector.load %arg9[%c0_22, %c0_23] : memref<8x128xf32, #tpu.memory_space<vmem>>, vector<8x128xf32>
    tpu.vector_store %arg9[%c0_22, %c0_23], %30 {strides = array<i32>} : memref<8x128xf32, #tpu.memory_space<vmem>>, vector<8x128xf32>,
    return
  }
  func.func @transform_0(%arg0: i32) -> (i32, i32) {
    %c0_i32 = arith.constant 0 : i32
    %c0_i32_0 = arith.constant 0 : i32
    return %arg0, %c0_i32 : i32, i32
  }
  func.func @transform_1(%arg0: i32) -> (i32, i32) {
    %c0_i32 = arith.constant 0 : i32
    %c0_i32_0 = arith.constant 0 : i32
    return %arg0, %c0_i32 : i32, i32
  }
  func.func @transform_2(%arg0: i32) -> (i32, i32, i32) {
    %c0_i32 = arith.constant 0 : i32
    %c0_i32_0 = arith.constant 0 : i32
    %c0_i32_1 = arith.constant 0 : i32
    return %arg0, %c0_i32, %c0_i32_0 : i32, i32, i32
  }
  func.func @transform_3(%arg0: i32) -> (i32, i32, i32) {
    %c0_i32 = arith.constant 0 : i32
    %c0_i32_0 = arith.constant 0 : i32
    %c0_i32_1 = arith.constant 0 : i32
    return %arg0, %c0_i32, %c0_i32_0 : i32, i32, i32
  }
  func.func @transform_4(%arg0: i32) -> (i32, i32) {
    %c0_i32 = arith.constant 0 : i32
    %c0_i32_0 = arith.constant 0 : i32
    return %arg0, %c0_i32 : i32, i32
  }
  func.func @transform_5(%arg0: i32) -> (i32, i32) {
    %c0_i32 = arith.constant 0 : i32
    %c0_i32_0 = arith.constant 0 : i32
    return %arg0, %c0_i32 : i32, i32
  }
  func.func @transform_6(%arg0: i32) -> (i32, i32) {
    %c0_i32 = arith.constant 0 : i32
    %c0_i32_0 = arith.constant 0 : i32
    return %arg0, %c0_i32 : i32, i32
  }
  func.func @transform_7(%arg0: i32) -> (i32, i32) {
    %c0_i32 = arith.constant 0 : i32
    %c0_i32_0 = arith.constant 0 : i32
    return %arg0, %c0_i32 : i32, i32
  }
  func.func @transform_8(%arg0: i32) -> (i32, i32) {
    %c0_i32 = arith.constant 0 : i32
    %c0_i32_0 = arith.constant 0 : i32
    return %arg0, %c0_i32 : i32, i32
  }
}

</mosaic_0001>

<bundles_post_ra>
// kernel: _attention_step_impl.1
= control target key start
LH: loop header
LB: loop body
LE: loop exit
PB: predicated region body
PF: predicated region fallthrough
CT: control target
= control target key end

     0   :  { %14 = vsyncpa [#allocation3], 0  ;;  %s12041_s0 = inlined_call_operand.vmem [shape: f32[8,128], index: 0, kind: input, shape index: {}]   ;;  %s12042_s1 = inlined_call_operand.vmem [shape: f32[8,1], index: 1, kind: input, shape index: {}]   ;;  %s12043_s2 = inlined_call_operand.hbm [shape: f32[8,128,128], index: 2, kind: input, shape index: {}]   ;;  %s12044_s3 = inlined_call_operand.hbm [shape: f32[8,128,128], index: 3, kind: input, shape index: {}]   ;;  %s12045_s4 = inlined_call_operand.vmem [shape: f32[8,128], index: 4, kind: input, shape index: {}]   ;;  %s12046_s5 = inlined_call_operand.vmem [shape: f32[8,128], index: 5, kind: input, shape index: {}, may-alias: {5,8}]   ;;  %s12047_s6 = inlined_call_operand.vmem [shape: f32[8,128], index: 6, kind: output, shape index: {0}]   ;;  %s12048_s7 = inlined_call_operand.vmem [shape: f32[8,128], index: 7, kind: output, shape index: {1}]   ;;  %s12049_s8 = inlined_call_operand.vmem [shape: f32[8,128], index: 8, kind: output, shape index: {2}, may-alias: {5,8}]  }
   0x1   :  { %s24_s29 = sshll.u32 %s12043_s2, 4  ;;  %s25_s29 = int_to_ptr.hbm [resolvable:$true] %s24_s29 }
   0x2   :  { %15 = vsyncpa [#allocation5], 0  ;;  %s6816_s30 = smov [#allocation2]   ;;  %s37_s12 = sshll.u32 %s12044_s3, 4  ;;  %s38_s12 = int_to_ptr.hbm [resolvable:$true] %s37_s12 }
   0x3   :  { %s26_s9 = sshll.u32 %s6816_s30, 4  ;;  %s6817_s13 = smov 128   ;;  %s27_s9 = int_to_ptr.vmem [resolvable:$true] %s26_s9 }
   0x4   :  { %s6818_s14 = smov 8   ;;  %s6819_s15 = smov [#allocation4]  }
   0x5   :  { %32 = dma.hbm_to_vmem [thread:$0]  %s25_s29, 16384, %s27_s9, [#allocation3], %s6817_s13, %s6817_s13, %s6818_s14  }
   0x6   :  { %s39_s16 = sshll.u32 %s6819_s15, 4  ;;  %s40_s16 = int_to_ptr.vmem [resolvable:$true] %s39_s16 }
   0x7   :  { %45 = dma.hbm_to_vmem [thread:$0]  %s38_s12, 16384, %s40_s16, [#allocation5], %s6817_s13, %s6817_s13, %s6818_s14  }
   0x8   :  { %6812 = dma.done.wait [#allocation3], 16384  }
   0x9   :  { %6813 = vsyncadd [#allocation3], 4294950912 }
   0xa   :  { %6814 = dma.done.wait [#allocation5], 16384  }
   0xb   :  { %6815 = vsyncadd [#allocation5], 4294950912  ;;  %v6875_v0 = vld [vmem:[%s12041_s0] sm:$0xff]  ;;  %v64_v4 = vld [vmem:[#allocation4 + $0x28] sm:$0xff]  ;;  %vm3187_vm0 = vcmask 130112   ;;  %vm3191_vm1 = vcmask 195712  }
   0xc   :  { %v63_v1 = vld [vmem:[#allocation4 + $0x20] sm:$0xff]  ;;  %v6878_v2 = vperm.slane %v6875_v0, 0  ;;  %v70_v8 = vld [vmem:[#allocation4 + $0x58] sm:$0xff]  ;;  %v73_v10 = vld [vmem:[#allocation4 + $0x70] sm:$0xff]  ;;  %v188_v12 = vrot.slane %v6875_v0, 1  ;;  %v189_v30 = vrot.slane %v6875_v0, 2 }
   0xd   :  { %v67_v6 = vld [vmem:[#allocation4 + $0x40] sm:$0xff]  ;;  %v76_v14 = vld [vmem:[#allocation4 + $0x88] sm:$0xff]  ;;  %v82_v18 = vld [vmem:[#allocation4 + $0xb8] sm:$0xff]  ;;  %vm3195_vm2 = vcmask 261312   ;;  %vm3199_vm3 = vcmask 326912   ;;  %vm3203_vm4 = vcmask 392512  }
   0xe   :  { %v215_v3 = vmul.f32 %v6878_v2, %v63_v1  ;;  %v216_v5 = vmul.f32 %v6878_v2, %v64_v4  ;;  %v219_v7 = vmul.f32 %v6878_v2, %v67_v6  ;;  %v222_v9 = vmul.f32 %v6878_v2, %v70_v8  ;;  %v79_v16 = vld [vmem:[#allocation4 + $0xa0] sm:$0xff]  ;;  %v61_v20 = vld [vmem:[#allocation4 + $0x10] sm:$0xff]  ;;  %v62_v25 = vld [vmem:[#allocation4 + $0x18] sm:$0xff] }
   0xf   :  { %v225_v11 = vmul.f32 %v6878_v2, %v73_v10  ;;  %v6886_v13 = vperm.slane %v188_v12, 0  ;;  %v85_v21 = vld [vmem:[#allocation4 + $0xd0] sm:$0xff]  ;;  %v213_v22 = vmul.f32 %v6878_v2, %v61_v20  ;;  %v59_v24 = vld [vmem:[#allocation4] sm:$0xff]  ;;  %v88_v26 = vld [vmem:[#allocation4 + $0xe8] sm:$0xff]  ;;  %v214_v28 = vmul.f32 %v6878_v2, %v62_v25 }
  0x10   :  { %347 = vadd.xlane.f32.xlu2 %v215_v3  ;;  %v211_v27 = vmul.f32 %v6878_v2, %v59_v24  ;;  %v6897_v31 = vperm.slane %v189_v30, 0  ;;  %v60_v32 = vld [vmem:[#allocation4 + $0x8] sm:$0xff]  ;;  %v66_v33 = vld [vmem:[#allocation4 + $0x38] sm:$0xff]  ;;  %v91_v34 = vld [vmem:[#allocation4 + $0x100] sm:$0xff]  ;;  %v190_v6 = vrot.slane %v6875_v0, 3  ;;  %vm12348_vm5 = vcmask 458112  }
  0x11   :  { %v228_v15 = vmul.f32 %v6886_v13, %v76_v14  ;;  %v231_v17 = vmul.f32 %v6886_v13, %v79_v16  ;;  %v234_v19 = vmul.f32 %v6886_v13, %v82_v18  ;;  %343 = vadd.xlane.f32.xlu1 %v213_v22  ;;  %v237_v23 = vmul.f32 %v6886_v13, %v85_v21  ;;  %v94_v38 = vld [vmem:[#allocation4 + $0x118] sm:$0xff]  ;;  %v65_v39 = vld [vmem:[#allocation4 + $0x30] sm:$0xff]  ;;  %v68_v45 = vld [vmem:[#allocation4 + $0x48] sm:$0xff] }
  0x12   :  { %339 = vadd.xlane.f32.xlu0 %v211_v27  ;;  %v240_v29 = vmul.f32 %v6886_v13, %v88_v26  ;;  %v212_v35 = vmul.f32 %v6878_v2, %v60_v32  ;;  %v218_v36 = vmul.f32 %v6878_v2, %v66_v33  ;;  %v243_v37 = vmul.f32 %v6897_v31, %v91_v34  ;;  %v69_v41 = vld [vmem:[#allocation4 + $0x50] sm:$0xff]  ;;  %v72_v47 = vld [vmem:[#allocation4 + $0x68] sm:$0xff]  ;;  %v71_v51 = vld [vmem:[#allocation4 + $0x60] sm:$0xff] }
  0x13   :  { %v217_v40 = vmul.f32 %v6878_v2, %v65_v39  ;;  %v246_v42 = vmul.f32 %v6897_v31, %v94_v38  ;;  %v221_v43 = vmul.f32 %v6878_v2, %v69_v41  ;;  %v97_v44 = vld [vmem:[#allocation4 + $0x130] sm:$0xff]  ;;  %v220_v46 = vmul.f32 %v6878_v2, %v68_v45  ;;  %v100_v50 = vld [vmem:[#allocation4 + $0x148] sm:$0xff]  ;;  %v75_v53 = vld [vmem:[#allocation4 + $0x80] sm:$0xff] }
  0x14   :  { %v249_v48 = vmul.f32 %v6897_v31, %v97_v44  ;;  %v224_v49 = vmul.f32 %v6878_v2, %v72_v47  ;;  %v223_v52 = vmul.f32 %v6878_v2, %v71_v51  ;;  %v252_v54 = vmul.f32 %v6897_v31, %v100_v50  ;;  %v103_v56 = vld [vmem:[#allocation4 + $0x160] sm:$0xff]  ;;  %v74_v57 = vld [vmem:[#allocation4 + $0x78] sm:$0xff]  ;;  %v77_v63 = vld [vmem:[#allocation4 + $0x90] sm:$0xff] }
  0x15   :  { %v227_v55 = vmul.f32 %v6886_v13, %v75_v53  ;;  %v226_v58 = vmul.f32 %v6878_v2, %v74_v57  ;;  %v78_v59 = vld [vmem:[#allocation4 + $0x98] sm:$0xff]  ;;  %v255_v60 = vmul.f32 %v6897_v31, %v103_v56  ;;  %v229_v1 = vmul.f32 %v6886_v13, %v77_v63  ;;  %v81_v4 = vld [vmem:[#allocation4 + $0xb0] sm:$0xff]  ;;  %v84_v12 = vld [vmem:[#allocation4 + $0xc8] sm:$0xff] }
  0x16   :  { %v230_v61 = vmul.f32 %v6886_v13, %v78_v59  ;;  %v106_v62 = vld [vmem:[#allocation4 + $0x178] sm:$0xff]  ;;  %v233_v2 = vmul.f32 %v6886_v13, %v81_v4  ;;  %v109_v8 = vld [vmem:[#allocation4 + $0x190] sm:$0xff]  ;;  %v112_v16 = vld [vmem:[#allocation4 + $0x1a8] sm:$0xff]  ;;  %vm3211_vm6 = vcmask 523712   ;;  %vm12201_vm7 = vcmask 589312  }
  0x17   :  { %v87_v20 = vld [vmem:[#allocation4 + $0xe0] sm:$0xff]  ;;  %v86_v24 = vld [vmem:[#allocation4 + $0xd8] sm:$0xff]  ;;  %v89_v32 = vld [vmem:[#allocation4 + $0xf0] sm:$0xff]  ;;  %vm12200_vm8 = vcmask 654912   ;;  %vm12199_vm9 = vcmask 720512   ;;  %vm12202_vm10 = vcmask 786112  }
  0x18   :  { %349 = vadd.xlane.f32.xlu2 %v216_v5  ;;  %v258_v5 = vmul.f32 %v6897_v31, %v106_v62  ;;  %v239_v22 = vmul.f32 %v6886_v13, %v87_v20  ;;  %v238_v25 = vmul.f32 %v6886_v13, %v86_v24  ;;  %v90_v27 = vld [vmem:[#allocation4 + $0xf8] sm:$0xff]  ;;  %v241_v33 = vmul.f32 %v6886_v13, %v89_v32  ;;  %v121_v38 = vld [vmem:[#allocation4 + $0x1f0] sm:$0xff]  ;;  %v92_v39 = vld [vmem:[#allocation4 + $0x108] sm:$0xff] }
  0x19   :  { %345 = vadd.xlane.f32.xlu1 %v214_v28  ;;  %v118_v30 = vld [vmem:[#allocation4 + $0x1d8] sm:$0xff]  ;;  %v95_v47 = vld [vmem:[#allocation4 + $0x120] sm:$0xff]  ;;  %vm3231_vm11 = vcmask 851712   ;;  %vm3235_vm12 = vcmask 917312   ;;  %vm3239_vm13 = vcmask 982912   ;;  %vm12350_vm14 = vcmask 1048512  }
  0x1a   :  { %341 = vadd.xlane.f32.xlu0 %v212_v35  ;;  %v93_v35 = vld [vmem:[#allocation4 + $0x110] sm:$0xff]  ;;  %v99_v50 = vld [vmem:[#allocation4 + $0x140] sm:$0xff]  ;;  %v102_v57 = vld [vmem:[#allocation4 + $0x158] sm:$0xff]  ;;  %vm12198_vm15 = vcmask 1041409  }
  0x1b   :  { %v127_v53 = vld [vmem:[#allocation4 + $0x220] sm:$0xff]  ;;  %v254_v59 = vmul.f32 %v6897_v31, %v102_v57 }
  0x1c   :  { %v111_v20 = vld [vmem:[#allocation4 + $0x1a0] sm:$0xff] }
  0x1d   :  { %v139_v24 = vld [vmem:[#allocation4 + $0x280] sm:$0xff] }
  0x20   :  { %355 = vadd.xlane.f32.xlu2 %v219_v7  ;;  %v6920_v7 = vperm.slane %v190_v6, 0  ;;  %v133_v6 = vld [vmem:[#allocation4 + $0x250] sm:$0xff] }
  0x21   :  { %353 = vadd.xlane.f32.xlu1 %v218_v36 }
  0x22   :  { %351 = vadd.xlane.f32.xlu0 %v217_v40  ;;  %v261_v14 = vmul.f32 %v6920_v7, %v109_v8  ;;  %v264_v21 = vmul.f32 %v6920_v7, %v112_v16  ;;  %v270_v36 = vmul.f32 %v6920_v7, %v118_v30  ;;  %v244_v40 = vmul.f32 %v6897_v31, %v92_v39  ;;  %v107_v16 = vld [vmem:[#allocation4 + $0x180] sm:$0xff] }
  0x28   :  { %361 = vadd.xlane.f32.xlu2 %v222_v9  ;;  %v80_v9 = vld [vmem:[#allocation4 + $0xa8] sm:$0xff] }
  0x29   :  { %359 = vadd.xlane.f32.xlu1 %v221_v43  ;;  %v232_v10 = vmul.f32 %v6886_v13, %v80_v9  ;;  %v273_v43 = vmul.f32 %v6920_v7, %v121_v38  ;;  %v117_v38 = vld [vmem:[#allocation4 + $0x1d0] sm:$0xff] }
  0x2a   :  { %357 = vadd.xlane.f32.xlu0 %v220_v46  ;;  %v124_v46 = vld [vmem:[#allocation4 + $0x208] sm:$0xff] }
  0x30   :  { %367 = vadd.xlane.f32.xlu2 %v225_v11 }
  0x31   :  { %365 = vadd.xlane.f32.xlu1 %v224_v49 }
  0x32   :  { %363 = vadd.xlane.f32.xlu0 %v223_v52  ;;  %v251_v52 = vmul.f32 %v6897_v31, %v99_v50  ;;  %v148_v50 = vld [vmem:[#allocation4 + $0x2c8] sm:$0xff] }
  0x38   :  { %373 = vadd.xlane.f32.xlu2 %v228_v15  ;;  %v236_v15 = vmul.f32 %v6886_v13, %v84_v12 }
  0x39   :  { %371 = vadd.xlane.f32.xlu1 %v227_v55 }
  0x3a   :  { %369 = vadd.xlane.f32.xlu0 %v226_v58 }
  0x40   :  { %379 = vadd.xlane.f32.xlu2 %v231_v17  ;;  %v83_v17 = vld [vmem:[#allocation4 + $0xc0] sm:$0xff] }
  0x41   :  { %377 = vadd.xlane.f32.xlu1 %v230_v61  ;;  %v235_v18 = vmul.f32 %v6886_v13, %v83_v17  ;;  %v101_v61 = vld [vmem:[#allocation4 + $0x150] sm:$0xff]  ;;  %v259_v17 = vmul.f32 %v6920_v7, %v107_v16 }
  0x42   :  { %375 = vadd.xlane.f32.xlu0 %v229_v1  ;;  %v253_v62 = vmul.f32 %v6897_v31, %v101_v61  ;;  %v105_v1 = vld [vmem:[#allocation4 + $0x170] sm:$0xff] }
  0x43   :  { %v157_v16 = vld [vmem:[#allocation4 + $0x310] sm:$0xff] }
  0x48   :  { %385 = vadd.xlane.f32.xlu2 %v234_v19 }
  0x49   :  { %383 = vadd.xlane.f32.xlu1 %v233_v2  ;;  %v104_v2 = vld [vmem:[#allocation4 + $0x168] sm:$0xff] }
  0x4a   :  { %381 = vadd.xlane.f32.xlu0 %v232_v10  ;;  %v256_v8 = vmul.f32 %v6897_v31, %v104_v2  ;;  %v108_v10 = vld [vmem:[#allocation4 + $0x188] sm:$0xff] }
  0x50   :  { %391 = vadd.xlane.f32.xlu2 %v237_v23  ;;  %v115_v23 = vld [vmem:[#allocation4 + $0x1c0] sm:$0xff] }
  0x51   :  { %389 = vadd.xlane.f32.xlu1 %v236_v15  ;;  %v267_v28 = vmul.f32 %v6920_v7, %v115_v23  ;;  %v136_v15 = vld [vmem:[#allocation4 + $0x268] sm:$0xff] }
  0x52   :  { %387 = vadd.xlane.f32.xlu0 %v235_v18 }
  0x58   :  { %397 = vadd.xlane.f32.xlu2 %v240_v29  ;;  %v242_v29 = vmul.f32 %v6886_v13, %v90_v27  ;;  %v191_v13 = vrot.slane %v6875_v0, 4 }
  0x59   :  { %395 = vadd.xlane.f32.xlu1 %v239_v22  ;;  %v263_v22 = vmul.f32 %v6920_v7, %v111_v20 }
  0x5a   :  { %393 = vadd.xlane.f32.xlu0 %v238_v25  ;;  %v6948_v45 = vperm.slane %v191_v13, 0  ;;  %v110_v25 = vld [vmem:[#allocation4 + $0x198] sm:$0xff] }
  0x5b   :  { %v262_v27 = vmul.f32 %v6920_v7, %v110_v25  ;;  %v160_v25 = vld [vmem:[#allocation4 + $0x328] sm:$0xff] }
  0x5c   :  { %v276_v51 = vmul.f32 %v6948_v45, %v124_v46  ;;  %v279_v58 = vmul.f32 %v6948_v45, %v127_v53  ;;  %v285_v12 = vmul.f32 %v6948_v45, %v133_v6  ;;  %v120_v46 = vld [vmem:[#allocation4 + $0x1e8] sm:$0xff]  ;;  %v125_v6 = vld [vmem:[#allocation4 + $0x210] sm:$0xff] }
  0x5d   :  { %v277_v2 = vmul.f32 %v6948_v45, %v125_v6  ;;  %v143_v6 = vld [vmem:[#allocation4 + $0x2a0] sm:$0xff] }
  0x60   :  { %403 = vadd.xlane.f32.xlu2 %v243_v37  ;;  %v245_v37 = vmul.f32 %v6897_v31, %v93_v35  ;;  %v113_v35 = vld [vmem:[#allocation4 + $0x1b0] sm:$0xff] }
  0x61   :  { %401 = vadd.xlane.f32.xlu1 %v242_v29  ;;  %v114_v29 = vld [vmem:[#allocation4 + $0x1b8] sm:$0xff] }
  0x62   :  { %399 = vadd.xlane.f32.xlu0 %v241_v33  ;;  %v266_v32 = vmul.f32 %v6920_v7, %v114_v29  ;;  %v142_v33 = vld [vmem:[#allocation4 + $0x298] sm:$0xff] }
  0x68   :  { %409 = vadd.xlane.f32.xlu2 %v246_v42  ;;  %v96_v42 = vld [vmem:[#allocation4 + $0x128] sm:$0xff] }
  0x69   :  { %407 = vadd.xlane.f32.xlu1 %v245_v37  ;;  %v248_v44 = vmul.f32 %v6897_v31, %v96_v42  ;;  %v145_v42 = vld [vmem:[#allocation4 + $0x2b0] sm:$0xff] }
  0x6a   :  { %405 = vadd.xlane.f32.xlu0 %v244_v40  ;;  %v269_v40 = vmul.f32 %v6920_v7, %v117_v38  ;;  %v134_v38 = vld [vmem:[#allocation4 + $0x258] sm:$0xff] }
  0x70   :  { %415 = vadd.xlane.f32.xlu2 %v249_v48  ;;  %v247_v48 = vmul.f32 %v6897_v31, %v95_v47 }
  0x71   :  { %413 = vadd.xlane.f32.xlu1 %v248_v44 }
  0x72   :  { %411 = vadd.xlane.f32.xlu0 %v247_v48  ;;  %v272_v48 = vmul.f32 %v6920_v7, %v120_v46  ;;  %v166_v46 = vld [vmem:[#allocation4 + $0x358] sm:$0xff] }
  0x78   :  { %421 = vadd.xlane.f32.xlu2 %v252_v54  ;;  %v98_v54 = vld [vmem:[#allocation4 + $0x138] sm:$0xff] }
  0x79   :  { %419 = vadd.xlane.f32.xlu1 %v251_v52  ;;  %v250_v55 = vmul.f32 %v6897_v31, %v98_v54  ;;  %v123_v54 = vld [vmem:[#allocation4 + $0x200] sm:$0xff] }
  0x7a   :  { %v275_v57 = vmul.f32 %v6948_v45, %v123_v54 }
  0x7b   :  { %417 = vadd.xlane.f32.xlu0 %v250_v55 }
  0x80   :  { %427 = vadd.xlane.f32.xlu2 %v255_v60  ;;  %v130_v60 = vld [vmem:[#allocation4 + $0x238] sm:$0xff] }
  0x81   :  { %425 = vadd.xlane.f32.xlu1 %v254_v59  ;;  %v282_v4 = vmul.f32 %v6948_v45, %v130_v60  ;;  %v122_v59 = vld [vmem:[#allocation4 + $0x1f8] sm:$0xff] }
  0x82   :  { %v274_v60 = vmul.f32 %v6920_v7, %v122_v59 }
  0x83   :  { %v6915_v3 = vpop.xlane.xlu2 %347  ;;  %423 = vadd.xlane.f32.xlu0 %v253_v62  ;;  %v126_v62 = vld [vmem:[#allocation4 + $0x218] sm:$0xff] }
  0x84   :  { %12351 = vst [vmem:[#allocation8_spill] sm:$0xff] %v6915_v3 }
  0x88   :  { %433 = vadd.xlane.f32.xlu2 %v258_v5  ;;  %v257_v5 = vmul.f32 %v6897_v31, %v105_v1  ;;  %v192_v31 = vrot.slane %v6875_v0, 5 }
  0x8a   :  { %431 = vadd.xlane.f32.xlu1 %v257_v5  ;;  %v6976_v23 = vperm.slane %v192_v31, 0  ;;  %v154_v5 = vld [vmem:[#allocation4 + $0x2f8] sm:$0xff]  ;;  %v132_v31 = vld [vmem:[#allocation4 + $0x248] sm:$0xff] }
  0x8b   :  { %v6923_v11 = vpop.xlane.xlu2 %349  ;;  %429 = vadd.xlane.f32.xlu0 %v256_v8 }
  0x8c   :  { %12352 = vst [vmem:[#allocation9_spill] sm:$0xff] %v6923_v11  ;;  %v291_v30 = vmul.f32 %v6976_v23, %v139_v24  ;;  %v294_v39 = vmul.f32 %v6976_v23, %v142_v33  ;;  %v297_v47 = vmul.f32 %v6976_v23, %v145_v42  ;;  %v300_v55 = vmul.f32 %v6976_v23, %v148_v50  ;;  %v138_v42 = vld [vmem:[#allocation4 + $0x278] sm:$0xff] }
  0x8d   :  { %v284_v24 = vmul.f32 %v6948_v45, %v132_v31  ;;  %v150_v31 = vld [vmem:[#allocation4 + $0x2d8] sm:$0xff] }
  0x90   :  { %439 = vadd.xlane.f32.xlu2 %v261_v14  ;;  %v260_v14 = vmul.f32 %v6920_v7, %v108_v10  ;;  %v129_v10 = vld [vmem:[#allocation4 + $0x230] sm:$0xff] }
  0x92   :  { %437 = vadd.xlane.f32.xlu1 %v260_v14  ;;  %v281_v14 = vmul.f32 %v6948_v45, %v129_v10 }
  0x93   :  { %v6928_v19 = vpop.xlane.xlu2 %355  ;;  %435 = vadd.xlane.f32.xlu0 %v259_v17  ;;  %v128_v17 = vld [vmem:[#allocation4 + $0x228] sm:$0xff] }
  0x94   :  { %12353 = vst [vmem:[#allocation10_spill] sm:$0xff] %v6928_v19  ;;  %v280_v20 = vmul.f32 %v6948_v45, %v128_v17 }
  0x98   :  { %445 = vadd.xlane.f32.xlu2 %v264_v21  ;;  %v288_v21 = vmul.f32 %v6948_v45, %v136_v15 }
  0x9a   :  { %443 = vadd.xlane.f32.xlu1 %v263_v22 }
  0x9b   :  { %v6933_v26 = vpop.xlane.xlu2 %361  ;;  %441 = vadd.xlane.f32.xlu0 %v262_v27  ;;  %v131_v27 = vld [vmem:[#allocation4 + $0x240] sm:$0xff] }
  0x9c   :  { %12354 = vst [vmem:[#allocation11_spill] sm:$0xff] %v6933_v26  ;;  %v283_v29 = vmul.f32 %v6948_v45, %v131_v27  ;;  %v149_v27 = vld [vmem:[#allocation4 + $0x2d0] sm:$0xff] }
  0xa0   :  { %451 = vadd.xlane.f32.xlu2 %v267_v28 }
  0xa2   :  { %449 = vadd.xlane.f32.xlu1 %v266_v32  ;;  %v135_v32 = vld [vmem:[#allocation4 + $0x260] sm:$0xff] }
  0xa3   :  { %v6938_v34 = vpop.xlane.xlu2 %367 }
  0xa4   :  { %12355 = vst [vmem:[#allocation12_spill] sm:$0xff] %v6938_v34 }
  0xa8   :  { %457 = vadd.xlane.f32.xlu2 %v270_v36  ;;  %v265_v36 = vmul.f32 %v6920_v7, %v113_v35  ;;  %v287_v35 = vmul.f32 %v6948_v45, %v135_v32 }
  0xaa   :  { %447 = vadd.xlane.f32.xlu0 %v265_v36  ;;  %455 = vadd.xlane.f32.xlu1 %v269_v40  ;;  %v163_v36 = vld [vmem:[#allocation4 + $0x340] sm:$0xff] }
  0xab   :  { %v6943_v41 = vpop.xlane.xlu2 %373 }
  0xac   :  { %12356 = vst [vmem:[#allocation13_spill] sm:$0xff] %v6943_v41 }
  0xb0   :  { %463 = vadd.xlane.f32.xlu2 %v273_v43  ;;  %v116_v43 = vld [vmem:[#allocation4 + $0x1c8] sm:$0xff] }
  0xb1   :  { %v268_v13 = vmul.f32 %v6920_v7, %v116_v43 }
  0xb2   :  { %461 = vadd.xlane.f32.xlu1 %v272_v48 }
  0xb3   :  { %v6951_v49 = vpop.xlane.xlu2 %379  ;;  %453 = vadd.xlane.f32.xlu0 %v268_v13  ;;  %v290_v13 = vmul.f32 %v6948_v45, %v138_v42 }
  0xb4   :  { %12357 = vst [vmem:[#allocation14_spill] sm:$0xff] %v6951_v49 }
  0xb8   :  { %469 = vadd.xlane.f32.xlu2 %v276_v51  ;;  %v119_v51 = vld [vmem:[#allocation4 + $0x1e0] sm:$0xff] }
  0xb9   :  { %v271_v52 = vmul.f32 %v6920_v7, %v119_v51  ;;  %v193_v7 = vrot.slane %v6875_v0, 6  ;;  %v141_v51 = vld [vmem:[#allocation4 + $0x290] sm:$0xff] }
  0xba   :  { %467 = vadd.xlane.f32.xlu1 %v275_v57  ;;  %v293_v54 = vmul.f32 %v6976_v23, %v141_v51  ;;  %v140_v57 = vld [vmem:[#allocation4 + $0x288] sm:$0xff]  ;;  %v155_v51 = vld [vmem:[#allocation4 + $0x300] sm:$0xff] }
  0xbb   :  { %v6956_v56 = vpop.xlane.xlu2 %385  ;;  %459 = vadd.xlane.f32.xlu0 %v271_v52  ;;  %v7009_v15 = vperm.slane %v193_v7, 0 }
  0xbc   :  { %12358 = vst [vmem:[#allocation15_spill] sm:$0xff] %v6956_v56 }
  0xbd   :  { %v309_v22 = vmul.f32 %v7009_v15, %v157_v16  ;;  %v312_v33 = vmul.f32 %v7009_v15, %v160_v25  ;;  %v315_v43 = vmul.f32 %v7009_v15, %v163_v36  ;;  %v318_v52 = vmul.f32 %v7009_v15, %v166_v46  ;;  %v146_v16 = vld [vmem:[#allocation4 + $0x2b8] sm:$0xff] }
  0xbe   :  { %v298_v17 = vmul.f32 %v6976_v23, %v146_v16  ;;  %v178_v25 = vld [vmem:[#allocation4 + $0x3b8] sm:$0xff] }
  0xc0   :  { %475 = vadd.xlane.f32.xlu2 %v279_v58  ;;  %v151_v58 = vld [vmem:[#allocation4 + $0x2e0] sm:$0xff] }
  0xc1   :  { %v303_v1 = vmul.f32 %v6976_v23, %v151_v58  ;;  %v292_v58 = vmul.f32 %v6976_v23, %v140_v57 }
  0xc3   :  { %v6961_v63 = vpop.xlane.xlu2 %391  ;;  %465 = vadd.xlane.f32.xlu0 %v274_v60  ;;  %v144_v60 = vld [vmem:[#allocation4 + $0x2a8] sm:$0xff] }
  0xc4   :  { %12359 = vst [vmem:[#allocation16_spill] sm:$0xff] %v6961_v63 }
  0xc8   :  { %481 = vadd.xlane.f32.xlu2 %v282_v4  ;;  %v278_v4 = vmul.f32 %v6948_v45, %v126_v62 }
  0xca   :  { %473 = vadd.xlane.f32.xlu1 %v278_v4 }
  0xcb   :  { %v6966_v9 = vpop.xlane.xlu2 %397  ;;  %471 = vadd.xlane.f32.xlu0 %v277_v2  ;;  %v295_v2 = vmul.f32 %v6976_v23, %v143_v6  ;;  %v161_v6 = vld [vmem:[#allocation4 + $0x330] sm:$0xff] }
  0xcc   :  { %12360 = vst [vmem:[#allocation17_spill] sm:$0xff] %v6966_v9 }
  0xd0   :  { %487 = vadd.xlane.f32.xlu2 %v285_v12  ;;  %v306_v12 = vmul.f32 %v6976_v23, %v154_v5  ;;  %v172_v5 = vld [vmem:[#allocation4 + $0x388] sm:$0xff] }
  0xd2   :  { %479 = vadd.xlane.f32.xlu1 %v281_v14 }
  0xd3   :  { %v6971_v18 = vpop.xlane.xlu2 %403  ;;  %477 = vadd.xlane.f32.xlu0 %v280_v20 }
  0xd4   :  { %12361 = vst [vmem:[#allocation18_spill] sm:$0xff] %v6971_v18 }
  0xd8   :  { %493 = vadd.xlane.f32.xlu2 %v288_v21 }
  0xda   :  { %485 = vadd.xlane.f32.xlu1 %v284_v24  ;;  %v302_v24 = vmul.f32 %v6976_v23, %v150_v31  ;;  %v168_v31 = vld [vmem:[#allocation4 + $0x368] sm:$0xff] }
  0xdb   :  { %v6979_v28 = vpop.xlane.xlu2 %409  ;;  %483 = vadd.xlane.f32.xlu0 %v283_v29  ;;  %v301_v29 = vmul.f32 %v6976_v23, %v149_v27 }
  0xdc   :  { %12362 = vst [vmem:[#allocation19_spill] sm:$0xff] %v6979_v28 }
  0xe0   :  { %499 = vadd.xlane.f32.xlu2 %v291_v30 }
  0xe2   :  { %491 = vadd.xlane.f32.xlu1 %v287_v35 }
  0xe3   :  { %v6984_v37 = vpop.xlane.xlu2 %415 }
  0xe4   :  { %12363 = vst [vmem:[#allocation20_spill] sm:$0xff] %v6984_v37 }
  0xe8   :  { %505 = vadd.xlane.f32.xlu2 %v294_v39  ;;  %v286_v39 = vmul.f32 %v6948_v45, %v134_v38  ;;  %v181_v38 = vld [vmem:[#allocation4 + $0x3d0] sm:$0xff] }
  0xea   :  { %489 = vadd.xlane.f32.xlu0 %v286_v39  ;;  %497 = vadd.xlane.f32.xlu1 %v290_v13  ;;  %v152_v39 = vld [vmem:[#allocation4 + $0x2e8] sm:$0xff] }
  0xeb   :  { %v6989_v44 = vpop.xlane.xlu2 %421  ;;  %v304_v42 = vmul.f32 %v6976_v23, %v152_v39  ;;  %v156_v13 = vld [vmem:[#allocation4 + $0x308] sm:$0xff] }
  0xec   :  { %12364 = vst [vmem:[#allocation21_spill] sm:$0xff] %v6989_v44 }
  0xf0   :  { %511 = vadd.xlane.f32.xlu2 %v297_v47  ;;  %v137_v47 = vld [vmem:[#allocation4 + $0x270] sm:$0xff] }
  0xf1   :  { %v289_v48 = vmul.f32 %v6948_v45, %v137_v47  ;;  %v194_v45 = vrot.slane %v6875_v0, 7  ;;  %v175_v0 = vld [vmem:[#allocation4 + $0x3a0] sm:$0xff]  ;;  %v308_v47 = vmul.f32 %v7009_v15, %v156_v13 }
  0xf2   :  { %503 = vadd.xlane.f32.xlu1 %v293_v54 }
  0xf3   :  { %v6994_v53 = vpop.xlane.xlu2 %427  ;;  %495 = vadd.xlane.f32.xlu0 %v289_v48  ;;  %v7037_v4 = vperm.slane %v194_v45, 0  ;;  %v184_v48 = vld [vmem:[#allocation4 + $0x3e8] sm:$0xff] }
  0xf4   :  { %12365 = vst [vmem:[#allocation22_spill] sm:$0xff] %v6994_v53 }
  0xf5   :  { %v324_v7 = vmul.f32 %v7037_v4, %v172_v5  ;;  %v330_v35 = vmul.f32 %v7037_v4, %v178_v25  ;;  %v333_v46 = vmul.f32 %v7037_v4, %v181_v38  ;;  %v336_v57 = vmul.f32 %v7037_v4, %v184_v48  ;;  %v167_v25 = vld [vmem:[#allocation4 + $0x360] sm:$0xff] }
  0xf6   :  { %v319_v27 = vmul.f32 %v7009_v15, %v167_v25 }
  0xf8   :  { %517 = vadd.xlane.f32.xlu2 %v300_v55  ;;  %v169_v55 = vld [vmem:[#allocation4 + $0x370] sm:$0xff] }
  0xf9   :  { %v321_v62 = vmul.f32 %v7009_v15, %v169_v55  ;;  %v159_v55 = vld [vmem:[#allocation4 + $0x320] sm:$0xff] }
  0xfb   :  { %v6999_v61 = vpop.xlane.xlu2 %433  ;;  %501 = vadd.xlane.f32.xlu0 %v292_v58  ;;  %v12051_v58 = vmov 0  }
  0xfc   :  { %12366 = vst [vmem:[#allocation23_spill] sm:$0xff] %v6999_v61  ;;  %6267 = vset.pattern.permute.xlu2 %v12051_v58 }
 0x100   :  { %523 = vadd.xlane.f32.xlu2 %v303_v1  ;;  %v296_v1 = vmul.f32 %v6976_v23, %v144_v60  ;;  %v158_v60 = vld [vmem:[#allocation4 + $0x318] sm:$0xff] }
 0x102   :  { %509 = vadd.xlane.f32.xlu1 %v296_v1  ;;  %v162_v1 = vld [vmem:[#allocation4 + $0x338] sm:$0xff] }
 0x103   :  { %v7004_v8 = vpop.xlane.xlu2 %439  ;;  %507 = vadd.xlane.f32.xlu0 %v295_v2  ;;  %v314_v5 = vmul.f32 %v7009_v15, %v162_v1  ;;  %v313_v2 = vmul.f32 %v7009_v15, %v161_v6  ;;  %v183_v6 = vld [vmem:[#allocation4 + $0x3e0] sm:$0xff] }
 0x104   :  { %12367 = vst [vmem:[#allocation24_spill] sm:$0xff] %v7004_v8 }
 0x108   :  { %529 = vadd.xlane.f32.xlu2 %v306_v12  ;;  %v147_v12 = vld [vmem:[#allocation4 + $0x2c0] sm:$0xff] }
 0x109   :  { %v299_v14 = vmul.f32 %v6976_v23, %v147_v12 }
 0x10b   :  { %v7012_v21 = vpop.xlane.xlu2 %445  ;;  %515 = vadd.xlane.f32.xlu1 %v299_v14  ;;  %513 = vadd.xlane.f32.xlu0 %v298_v17 }
 0x10c   :  { %12368 = vst [vmem:[#allocation25_spill] sm:$0xff] %v7012_v21 }
 0x110   :  { %535 = vadd.xlane.f32.xlu2 %v309_v22  ;;  %v327_v22 = vmul.f32 %v7037_v4, %v175_v0  ;;  %v164_v0 = vld [vmem:[#allocation4 + $0x348] sm:$0xff] }
 0x111   :  { %v316_v16 = vmul.f32 %v7009_v15, %v164_v0 }
 0x113   :  { %v7017_v30 = vpop.xlane.xlu2 %451  ;;  %521 = vadd.xlane.f32.xlu1 %v302_v24  ;;  %519 = vadd.xlane.f32.xlu0 %v301_v29  ;;  %v596_v24 = vld [vmem:[%s12042_s1] sm:$0xff] }
 0x114   :  { %12369 = vst [vmem:[#allocation26_spill] sm:$0xff] %v7017_v30 }
 0x118   :  { %541 = vadd.xlane.f32.xlu2 %v312_v33  ;;  %v153_v33 = vld [vmem:[#allocation4 + $0x2f0] sm:$0xff] }
 0x119   :  { %v305_v36 = vmul.f32 %v6976_v23, %v153_v33  ;;  %v311_v23 = vmul.f32 %v7009_v15, %v159_v55  ;;  %v171_v33 = vld [vmem:[#allocation4 + $0x380] sm:$0xff]  ;;  %v176_v55 = vld [vmem:[#allocation4 + $0x3a8] sm:$0xff] }
 0x11b   :  { %v7022_v40 = vpop.xlane.xlu2 %457  ;;  %527 = vadd.xlane.f32.xlu1 %v305_v36  ;;  %525 = vadd.xlane.f32.xlu0 %v304_v42  ;;  %v170_v36 = vld [vmem:[#allocation4 + $0x378] sm:$0xff] }
 0x11c   :  { %12370 = vst [vmem:[#allocation27_spill] sm:$0xff] %v7022_v40  ;;  %v322_v38 = vmul.f32 %v7009_v15, %v170_v36  ;;  %v174_v42 = vld [vmem:[#allocation4 + $0x398] sm:$0xff] }
 0x11d   :  { %v326_v13 = vmul.f32 %v7037_v4, %v174_v42 }
 0x120   :  { %547 = vadd.xlane.f32.xlu2 %v315_v43 }
 0x123   :  { %v7027_v50 = vpop.xlane.xlu2 %463  ;;  %533 = vadd.xlane.f32.xlu1 %v308_v47 }
 0x124   :  { %12371 = vst [vmem:[#allocation28_spill] sm:$0xff] %v7027_v50 }
 0x128   :  { %553 = vadd.xlane.f32.xlu2 %v318_v52  ;;  %v307_v52 = vmul.f32 %v7009_v15, %v155_v51  ;;  %v177_v51 = vld [vmem:[#allocation4 + $0x3b0] sm:$0xff] }
 0x12a   :  { %531 = vadd.xlane.f32.xlu0 %v307_v52  ;;  %v329_v52 = vmul.f32 %v7037_v4, %v177_v51 }
 0x12b   :  { %v7032_v59 = vpop.xlane.xlu2 %469  ;;  %539 = vadd.xlane.f32.xlu1 %v311_v23  ;;  %v180_v23 = vld [vmem:[#allocation4 + $0x3c8] sm:$0xff] }
 0x12c   :  { %12372 = vst [vmem:[#allocation29_spill] sm:$0xff] %v7032_v59 }
 0x130   :  { %559 = vadd.xlane.f32.xlu2 %v321_v62  ;;  %v310_v62 = vmul.f32 %v7009_v15, %v158_v60  ;;  %v332_v60 = vmul.f32 %v7037_v4, %v180_v23 }
 0x132   :  { %537 = vadd.xlane.f32.xlu0 %v310_v62  ;;  %v179_v62 = vld [vmem:[#allocation4 + $0x3c0] sm:$0xff] }
 0x133   :  { %v7040_v10 = vpop.xlane.xlu2 %475  ;;  %545 = vadd.xlane.f32.xlu1 %v314_v5  ;;  %v331_v1 = vmul.f32 %v7037_v4, %v179_v62 }
 0x134   :  { %12373 = vst [vmem:[#allocation30_spill] sm:$0xff] %v7040_v10 }
 0x138   :  { %565 = vadd.xlane.f32.xlu2 %v324_v7  ;;  %v165_v7 = vld [vmem:[#allocation4 + $0x350] sm:$0xff] }
 0x139   :  { %v317_v14 = vmul.f32 %v7009_v15, %v165_v7  ;;  %v182_v7 = vld [vmem:[#allocation4 + $0x3d8] sm:$0xff] }
 0x13a   :  { %543 = vadd.xlane.f32.xlu0 %v313_v2  ;;  %v335_v2 = vmul.f32 %v7037_v4, %v183_v6 }
 0x13b   :  { %v7045_v20 = vpop.xlane.xlu2 %481  ;;  %551 = vadd.xlane.f32.xlu1 %v317_v14  ;;  %v334_v14 = vmul.f32 %v7037_v4, %v182_v7 }
 0x13c   :  { %12374 = vst [vmem:[#allocation31_spill] sm:$0xff] %v7045_v20 }
 0x140   :  { %571 = vadd.xlane.f32.xlu2 %v327_v22  ;;  %v320_v22 = vmul.f32 %v7009_v15, %v168_v31  ;;  %v328_v15 = vmul.f32 %v7037_v4, %v176_v55 }
 0x142   :  { %549 = vadd.xlane.f32.xlu0 %v316_v16  ;;  %v186_v16 = vld [vmem:[#allocation4 + $0x3f8] sm:$0xff] }
 0x143   :  { %v7050_v32 = vpop.xlane.xlu2 %487  ;;  %557 = vadd.xlane.f32.xlu1 %v320_v22  ;;  %v338_v31 = vmul.f32 %v7037_v4, %v186_v16  ;;  %v185_v22 = vld [vmem:[#allocation4 + $0x3f0] sm:$0xff] }
 0x144   :  { %12375 = vst [vmem:[#allocation32_spill] sm:$0xff] %v7050_v32 }
 0x148   :  { %577 = vadd.xlane.f32.xlu2 %v330_v35  ;;  %v323_v35 = vmul.f32 %v7037_v4, %v171_v33 }
 0x14a   :  { %555 = vadd.xlane.f32.xlu0 %v319_v27  ;;  %v12050_v27 = vlaneseq }
 0x14b   :  { %v7055_v43 = vpop.xlane.xlu2 %493  ;;  %563 = vadd.xlane.f32.xlu1 %v323_v35 }
 0x14c   :  { %12376 = vst [vmem:[#allocation33_spill] sm:$0xff] %v7055_v43  ;;  %v7110_v35 = vshrl.u32 %v12050_v27, 7 }
 0x14e   :  { %v7113_v36 = vadd.s32 8, %v7110_v35  ;;  %v7144_v23 = vadd.s32 24, %v7110_v35  ;;  %v7170_v7 = vadd.s32 40, %v7110_v35  ;;  %v7182_v16 = vadd.s32 72, %v7110_v35 }
 0x14f   :  { %v7296_v59 = vadd.s32 96, %v7110_v35 }
 0x150   :  { %583 = vadd.xlane.f32.xlu2 %v333_v46  ;;  %v173_v46 = vld [vmem:[#allocation4 + $0x390] sm:$0xff]  ;;  %6282 = vset.pattern.permute.xlu0 %v7113_v36 }
 0x151   :  { %v325_v47 = vmul.f32 %v7037_v4, %v173_v46  ;;  %6268 = vset.pattern.permute.xlu1 %v7113_v36 }
 0x152   :  { %561 = vadd.xlane.f32.xlu0 %v322_v38  ;;  %v7116_v38 = vadd.s32 16, %v7110_v35 }
 0x153   :  { %v7060_v54 = vpop.xlane.xlu2 %499  ;;  %569 = vadd.xlane.f32.xlu1 %v326_v13 }
 0x154   :  { %12377 = vst [vmem:[#allocation34_spill] sm:$0xff] %v7060_v54 }
 0x158   :  { %589 = vadd.xlane.f32.xlu2 %v336_v57 }
 0x15a   :  { %567 = vadd.xlane.f32.xlu0 %v325_v47  ;;  %v595_v47 = vld [vmem:[%s12046_s5] sm:$0xff] }
 0x15b   :  { %v7066_v45 = vpop.xlane.xlu2 %505  ;;  %575 = vadd.xlane.f32.xlu1 %v329_v52 }
 0x15c   :  { %12378 = vst [vmem:[#allocation35_spill] sm:$0xff] %v7066_v45 }
 0x162   :  { %573 = vadd.xlane.f32.xlu0 %v328_v15 }
 0x163   :  { %v7070_v12 = vpop.xlane.xlu2 %511  ;;  %581 = vadd.xlane.f32.xlu1 %v332_v60  ;;  %v7147_v60 = vadd.s32 32, %v7110_v35 }
 0x164   :  { %12379 = vst [vmem:[#allocation36_spill] sm:$0xff] %v7070_v12  ;;  %v7269_v12 = vadd.s32 56, %v7110_v35 }
 0x16a   :  { %579 = vadd.xlane.f32.xlu0 %v331_v1  ;;  %v7158_v1 = vld [vmem:[%s12045_s4] sm:$0xff] }
 0x16b   :  { %v7074_v17 = vpop.xlane.xlu2 %517  ;;  %587 = vadd.xlane.f32.xlu1 %v335_v2  ;;  %v7161_v6 = vperm.slane %v7158_v1, 3  ;;  %v7167_v2 = vadd.s32 48, %v7110_v35 }
 0x16c   :  { %12380 = vst [vmem:[#allocation37_spill] sm:$0xff] %v7074_v17 }
 0x170   :  { %599 = vperm.xlu2 %6267, %v596_v24   ;;  %v337_v24 = vmul.f32 %v7037_v4, %v185_v22  ;;  %v7194_v22 = vadd.s32 80, %v7110_v35 }
 0x172   :  { %585 = vadd.xlane.f32.xlu0 %v334_v14  ;;  %v7179_v14 = vadd.s32 64, %v7110_v35 }
 0x173   :  { %v7081_v29 = vpop.xlane.xlu2 %523  ;;  %593 = vadd.xlane.f32.xlu1 %v338_v31  ;;  %v7191_v31 = vadd.s32 88, %v7110_v35 }
 0x174   :  { %12381 = vst [vmem:[#allocation38_spill] sm:$0xff] %v7081_v29 }
 0x178   :  { %6269 = vset.pattern.permute.xlu2 %v7116_v38 }
 0x17a   :  { %591 = vadd.xlane.f32.xlu0 %v337_v24  ;;  %v7199_v24 = vpop.xlane.xlu0 %339 }
 0x17b   :  { %v7085_v39 = vpop.xlane.xlu2 %529  ;;  %12393 = vst [vmem:[#allocation50_spill] sm:$0xff] %v7199_v24 }
 0x17c   :  { %12382 = vst [vmem:[#allocation39_spill] sm:$0xff] %v7085_v39 }
 0x182   :  { %v7210_v27 = vpop.xlane.xlu0 %341 }
 0x183   :  { %v7089_v48 = vpop.xlane.xlu2 %535 }
 0x184   :  { %12383 = vst [vmem:[#allocation40_spill] sm:$0xff] %v7089_v48  ;;  %v7254_v48 = vperm.slane %v7158_v1, 4 }
 0x18a   :  { %v7215_v58 = vpop.xlane.xlu0 %351 }
 0x18b   :  { %v7093_v57 = vpop.xlane.xlu2 %541 }
 0x18c   :  { %12384 = vst [vmem:[#allocation41_spill] sm:$0xff] %v7093_v57 }
 0x193   :  { %v7097_v5 = vpop.xlane.xlu2 %547 }
 0x194   :  { %12385 = vst [vmem:[#allocation42_spill] sm:$0xff] %v7097_v5 }
 0x19b   :  { %v7101_v0 = vpop.xlane.xlu2 %553 }
 0x19c   :  { %12386 = vst [vmem:[#allocation43_spill] sm:$0xff] %v7101_v0 }
 0x1a3   :  { %v7105_v25 = vpop.xlane.xlu2 %559 }
 0x1a4   :  { %12387 = vst [vmem:[#allocation44_spill] sm:$0xff] %v7105_v25 }
 0x1ab   :  { %v7107_v33 = vpop.xlane.xlu2 %565 }
 0x1ac   :  { %12388 = vst [vmem:[#allocation45_spill] sm:$0xff] %v7107_v33 }
 0x1b3   :  { %v7121_v4 = vpop.xlane.xlu2 %571 }
 0x1b4   :  { %12389 = vst [vmem:[#allocation46_spill] sm:$0xff] %v7121_v4 }
 0x1bb   :  { %v7123_v42 = vpop.xlane.xlu2 %577 }
 0x1bc   :  { %12390 = vst [vmem:[#allocation47_spill] sm:$0xff] %v7123_v42  ;;  %v7228_v42 = vpop.xlane.xlu1 %343 }
 0x1bd   :  { %12394 = vst [vmem:[#allocation51_spill] sm:$0xff] %v7228_v42 }
 0x1c3   :  { %v7125_v13 = vpop.xlane.xlu2 %583 }
 0x1c4   :  { %12391 = vst [vmem:[#allocation48_spill] sm:$0xff] %v7125_v13  ;;  %v7226_v13 = vpop.xlane.xlu0 %357  ;;  %v7240_v25 = vpop.xlane.xlu1 %345 }
 0x1c5   :  { %12395 = vst [vmem:[#allocation52_spill] sm:$0xff] %v7240_v25 }
 0x1cb   :  { %v7127_v46 = vpop.xlane.xlu2 %589 }
 0x1cc   :  { %12392 = vst [vmem:[#allocation49_spill] sm:$0xff] %v7127_v46  ;;  %v7221_v46 = vadd.s32 120, %v7110_v35  ;;  %v7233_v4 = vpop.xlane.xlu0 %363  ;;  %v7251_v57 = vpop.xlane.xlu1 %353 }
 0x1cd   :  { %12396 = vst [vmem:[#allocation53_spill] sm:$0xff] %v7251_v57 }
 0x1d3   :  { %v600_v51 = vpop.permute.xlu2 %599 }
 0x1d4   :  { %v7132_v52 = vmul.f32 %v600_v51, %v595_v47  ;;  %v7205_v47 = vadd.s32 104, %v7110_v35  ;;  %v7208_v51 = vadd.s32 112, %v7110_v35  ;;  %v7243_v0 = vpop.xlane.xlu0 %369  ;;  %v7261_v29 = vpop.xlane.xlu1 %359 }
 0x1d5   :  { %12397 = vst [vmem:[#allocation54_spill] sm:$0xff] %v7261_v29 }
 0x1d6   :  { %v7135_v55 = vperm.slane %v7132_v52, 0  ;;  %v7138_v15 = vperm.slane %v7132_v52, 1  ;;  %v7150_v62 = vperm.slane %v7132_v52, 6  ;;  %v7236_v33 = vperm.slane %v7132_v52, 2 }
 0x1d7   :  { %v7246_v5 = vperm.slane %v7132_v52, 7 }
 0x1d8   :  { %712 = vperm.xlu0 %6282, %v7138_v15   ;;  %621 = vperm.xlu2 %6269, %v7135_v55  }
 0x1d9   :  { %615 = vperm.xlu1 %6268, %v7135_v55  }
 0x1dc   :  { %v7256_v39 = vpop.xlane.xlu0 %375  ;;  %v7271_v45 = vpop.xlane.xlu1 %365 }
 0x1dd   :  { %12398 = vst [vmem:[#allocation55_spill] sm:$0xff] %v7271_v45  ;;  %v7432_v45 = vperm.slane %v7132_v52, 4 }
 0x1e0   :  { %1197 = vperm.xlu0 %6282, %v7150_v62   ;;  %6270 = vset.pattern.permute.xlu2 %v7144_v23 }
 0x1e1   :  { %6271 = vset.pattern.permute.xlu1 %v7147_v60 }
 0x1e4   :  { %v7266_v17 = vpop.xlane.xlu0 %381  ;;  %v7280_v43 = vpop.xlane.xlu1 %371 }
 0x1e5   :  { %12399 = vst [vmem:[#allocation56_spill] sm:$0xff] %v7280_v43 }
 0x1e8   :  { %1940 = vperm.xlu0 %6282, %v7161_v6   ;;  %627 = vperm.xlu2 %6270, %v7135_v55  }
 0x1e9   :  { %633 = vperm.xlu1 %6271, %v7135_v55  }
 0x1ec   :  { %v7276_v54 = vpop.xlane.xlu0 %387  ;;  %v7288_v20 = vpop.xlane.xlu1 %377 }
 0x1ed   :  { %12400 = vst [vmem:[#allocation57_spill] sm:$0xff] %v7288_v20 }
 0x1f0   :  { %6411 = vset.pattern.permute.xlu0 %v7167_v2  ;;  %6272 = vset.pattern.permute.xlu2 %v7170_v7 }
 0x1f1   :  { %6273 = vset.pattern.permute.xlu1 %v7167_v2 }
 0x1f4   :  { %v7283_v32 = vpop.xlane.xlu0 %393  ;;  %v7298_v50 = vpop.xlane.xlu1 %383 }
 0x1f5   :  { %12401 = vst [vmem:[#allocation58_spill] sm:$0xff] %v7298_v50 }
 0x1f8   :  { %742 = vperm.xlu0 %6411, %v7138_v15   ;;  %639 = vperm.xlu2 %6272, %v7135_v55  }
 0x1f9   :  { %645 = vperm.xlu1 %6273, %v7135_v55  }
 0x1fc   :  { %v7293_v10 = vpop.xlane.xlu0 %399  ;;  %v7305_v30 = vpop.xlane.xlu1 %389 }
 0x1fd   :  { %12402 = vst [vmem:[#allocation59_spill] sm:$0xff] %v7305_v30 }
 0x200   :  { %1227 = vperm.xlu0 %6411, %v7150_v62   ;;  %6274 = vset.pattern.permute.xlu2 %v7179_v14 }
 0x201   :  { %6275 = vset.pattern.permute.xlu1 %v7182_v16 }
 0x204   :  { %v7303_v40 = vpop.xlane.xlu0 %405  ;;  %v7314_v8 = vpop.xlane.xlu1 %395 }
 0x205   :  { %12403 = vst [vmem:[#allocation60_spill] sm:$0xff] %v7314_v8  ;;  %v7357_v8 = vperm.slane %v7158_v1, 0 }
 0x208   :  { %1970 = vperm.xlu0 %6411, %v7161_v6   ;;  %657 = vperm.xlu2 %6274, %v7135_v55  }
 0x209   :  { %663 = vperm.xlu1 %6275, %v7135_v55  }
 0x20c   :  { %v7310_v21 = vpop.xlane.xlu0 %411  ;;  %v7320_v61 = vpop.xlane.xlu1 %401 }
 0x20d   :  { %12404 = vst [vmem:[#allocation61_spill] sm:$0xff] %v7320_v61 }
 0x210   :  { %6416 = vset.pattern.permute.xlu0 %v7191_v31  ;;  %6276 = vset.pattern.permute.xlu2 %v7194_v22 }
 0x211   :  { %6277 = vset.pattern.permute.xlu1 %v7191_v31 }
 0x214   :  { %v7322_v53 = vpop.xlane.xlu0 %417  ;;  %v7327_v44 = vpop.xlane.xlu1 %407 }
 0x215   :  { %12405 = vst [vmem:[#allocation62_spill] sm:$0xff] %v7327_v44 }
 0x218   :  { %772 = vperm.xlu0 %6416, %v7138_v15   ;;  %669 = vperm.xlu2 %6276, %v7135_v55  }
 0x219   :  { %675 = vperm.xlu1 %6277, %v7135_v55  }
 0x21c   :  { %v7329_v37 = vpop.xlane.xlu0 %423 }
 0x220   :  { %1257 = vperm.xlu0 %6416, %v7150_v62   ;;  %6278 = vset.pattern.permute.xlu2 %v7205_v47 }
 0x221   :  { %6279 = vset.pattern.permute.xlu1 %v7208_v51 }
 0x224   :  { %v7336_v28 = vpop.xlane.xlu0 %429 }
 0x228   :  { %2000 = vperm.xlu0 %6416, %v7161_v6   ;;  %687 = vperm.xlu2 %6278, %v7135_v55  }
 0x229   :  { %693 = vperm.xlu1 %6279, %v7135_v55  }
 0x22c   :  { %v7346_v61 = vpop.xlane.xlu0 %435 }
 0x230   :  { %6421 = vset.pattern.permute.xlu0 %v7110_v35  ;;  %6280 = vset.pattern.permute.xlu2 %v7221_v46 }
 0x231   :  { %6281 = vset.pattern.permute.xlu1 %v7110_v35 }
 0x234   :  { %v7359_v9 = vpop.xlane.xlu0 %441 }
 0x238   :  { %609 = vperm.xlu0 %6421, %v7135_v55   ;;  %699 = vperm.xlu2 %6280, %v7135_v55  }
 0x239   :  { %706 = vperm.xlu1 %6281, %v7138_v15  }
 0x23c   :  { %v7369_v63 = vpop.xlane.xlu0 %447 }
 0x240   :  { %803 = vperm.xlu0 %6421, %v7236_v33   ;;  %6283 = vset.pattern.permute.xlu2 %v7116_v38 }
 0x241   :  { %6284 = vset.pattern.permute.xlu1 %v7144_v23 }
 0x244   :  { %v7379_v50 = vpop.xlane.xlu0 %453 }
 0x245   :  { %12412 = vst [vmem:[#allocation69_spill] sm:$0xff] %v7379_v50 }
 0x248   :  { %1288 = vperm.xlu0 %6421, %v7246_v5   ;;  %718 = vperm.xlu2 %6283, %v7138_v15  }
 0x249   :  { %724 = vperm.xlu1 %6284, %v7138_v15  }
 0x24c   :  { %v7386_v56 = vpop.xlane.xlu0 %459 }
 0x24d   :  { %12414 = vst [vmem:[#allocation71_spill] sm:$0xff] %v7386_v56 }
 0x250   :  { %2031 = vperm.xlu0 %6421, %v7254_v48   ;;  %6285 = vset.pattern.permute.xlu2 %v7147_v60 }
 0x251   :  { %6286 = vset.pattern.permute.xlu1 %v7170_v7 }
 0x254   :  { %v7393_v20 = vpop.xlane.xlu0 %465 }
 0x255   :  { %12416 = vst [vmem:[#allocation73_spill] sm:$0xff] %v7393_v20 }
 0x258   :  { %6426 = vset.pattern.permute.xlu0 %v7170_v7  ;;  %730 = vperm.xlu2 %6285, %v7138_v15  }
 0x259   :  { %736 = vperm.xlu1 %6286, %v7138_v15  }
 0x25c   :  { %v7403_v49 = vpop.xlane.xlu0 %471 }
 0x25d   :  { %12418 = vst [vmem:[#allocation75_spill] sm:$0xff] %v7403_v49 }
 0x260   :  { %833 = vperm.xlu0 %6426, %v7236_v33   ;;  %6287 = vset.pattern.permute.xlu2 %v7269_v12 }
 0x261   :  { %6288 = vset.pattern.permute.xlu1 %v7179_v14 }
 0x268   :  { %1318 = vperm.xlu0 %6426, %v7246_v5   ;;  %748 = vperm.xlu2 %6287, %v7138_v15  }
 0x269   :  { %754 = vperm.xlu1 %6288, %v7138_v15  }
 0x270   :  { %2061 = vperm.xlu0 %6426, %v7254_v48   ;;  %6289 = vset.pattern.permute.xlu2 %v7182_v16 }
 0x271   :  { %6290 = vset.pattern.permute.xlu1 %v7194_v22 }
 0x278   :  { %6431 = vset.pattern.permute.xlu0 %v7194_v22  ;;  %760 = vperm.xlu2 %6289, %v7138_v15  }
 0x279   :  { %766 = vperm.xlu1 %6290, %v7138_v15  }
 0x280   :  { %863 = vperm.xlu0 %6431, %v7236_v33   ;;  %6291 = vset.pattern.permute.xlu2 %v7296_v59 }
 0x281   :  { %6292 = vset.pattern.permute.xlu1 %v7205_v47 }
 0x288   :  { %1348 = vperm.xlu0 %6431, %v7246_v5   ;;  %778 = vperm.xlu2 %6291, %v7138_v15  }
 0x289   :  { %784 = vperm.xlu1 %6292, %v7138_v15  }
 0x290   :  { %2091 = vperm.xlu0 %6431, %v7254_v48   ;;  %6293 = vset.pattern.permute.xlu2 %v7208_v51 }
 0x291   :  { %6294 = vset.pattern.permute.xlu1 %v7221_v46 }
 0x298   :  { %6436 = vset.pattern.permute.xlu0 %v7221_v46  ;;  %790 = vperm.xlu2 %6293, %v7138_v15  }
 0x299   :  { %796 = vperm.xlu1 %6294, %v7138_v15   ;;  %v7334_v15 = vpop.xlane.xlu1 %413 }
 0x29a   :  { %12406 = vst [vmem:[#allocation63_spill] sm:$0xff] %v7334_v15  ;;  %v7349_v15 = vperm.slane %v7132_v52, 3 }
 0x2a0   :  { %893 = vperm.xlu0 %6436, %v7236_v33   ;;  %6295 = vset.pattern.permute.xlu2 %v7113_v36 }
 0x2a1   :  { %6296 = vset.pattern.permute.xlu1 %v7116_v38  ;;  %v7343_v44 = vpop.xlane.xlu1 %419 }
 0x2a2   :  { %12407 = vst [vmem:[#allocation64_spill] sm:$0xff] %v7343_v44  ;;  %v7365_v44 = vperm.slane %v7158_v1, 5 }
 0x2a4   :  { %12409 = vst [vmem:[#allocation66_spill] sm:$0xff] %v7365_v44 }
 0x2a8   :  { %1378 = vperm.xlu0 %6436, %v7246_v5   ;;  %809 = vperm.xlu2 %6295, %v7236_v33  }
 0x2a9   :  { %815 = vperm.xlu1 %6296, %v7236_v33   ;;  %v7354_v18 = vpop.xlane.xlu1 %425 }
 0x2aa   :  { %12408 = vst [vmem:[#allocation65_spill] sm:$0xff] %v7354_v18 }
 0x2b0   :  { %2121 = vperm.xlu0 %6436, %v7254_v48   ;;  %6297 = vset.pattern.permute.xlu2 %v7144_v23 }
 0x2b1   :  { %6298 = vset.pattern.permute.xlu1 %v7147_v60  ;;  %v7367_v30 = vpop.xlane.xlu1 %431 }
 0x2b2   :  { %12410 = vst [vmem:[#allocation67_spill] sm:$0xff] %v7367_v30 }
 0x2b8   :  { %6441 = vset.pattern.permute.xlu0 %v7147_v60  ;;  %821 = vperm.xlu2 %6297, %v7236_v33  }
 0x2b9   :  { %827 = vperm.xlu1 %6298, %v7236_v33   ;;  %v7374_v18 = vpop.xlane.xlu1 %437 }
 0x2ba   :  { %12411 = vst [vmem:[#allocation68_spill] sm:$0xff] %v7374_v18 }
 0x2c0   :  { %924 = vperm.xlu0 %6441, %v7349_v15   ;;  %6299 = vset.pattern.permute.xlu2 %v7167_v2 }
 0x2c1   :  { %6300 = vset.pattern.permute.xlu1 %v7269_v12  ;;  %v7383_v30 = vpop.xlane.xlu1 %443 }
 0x2c2   :  { %12413 = vst [vmem:[#allocation70_spill] sm:$0xff] %v7383_v30 }
 0x2c8   :  { %1667 = vperm.xlu0 %6441, %v7357_v8   ;;  %839 = vperm.xlu2 %6299, %v7236_v33  }
 0x2c9   :  { %845 = vperm.xlu1 %6300, %v7236_v33   ;;  %v7391_v18 = vpop.xlane.xlu1 %449 }
 0x2ca   :  { %12415 = vst [vmem:[#allocation72_spill] sm:$0xff] %v7391_v18  ;;  %v7410_v18 = vpop.xlane.xlu0 %477 }
 0x2cb   :  { %12420 = vst [vmem:[#allocation77_spill] sm:$0xff] %v7410_v18 }
 0x2d0   :  { %2152 = vperm.xlu0 %6441, %v7365_v44   ;;  %6301 = vset.pattern.permute.xlu2 %v7179_v14 }
 0x2d1   :  { %6302 = vset.pattern.permute.xlu1 %v7182_v16  ;;  %v7398_v30 = vpop.xlane.xlu1 %455 }
 0x2d2   :  { %12417 = vst [vmem:[#allocation74_spill] sm:$0xff] %v7398_v30 }
 0x2d8   :  { %6446 = vset.pattern.permute.xlu0 %v7182_v16  ;;  %851 = vperm.xlu2 %6301, %v7236_v33  }
 0x2d9   :  { %857 = vperm.xlu1 %6302, %v7236_v33   ;;  %v7405_v43 = vpop.xlane.xlu1 %461 }
 0x2da   :  { %12419 = vst [vmem:[#allocation76_spill] sm:$0xff] %v7405_v43 }
 0x2e0   :  { %954 = vperm.xlu0 %6446, %v7349_v15   ;;  %6303 = vset.pattern.permute.xlu2 %v7191_v31 }
 0x2e1   :  { %6304 = vset.pattern.permute.xlu1 %v7296_v59  ;;  %v7414_v30 = vpop.xlane.xlu1 %467 }
 0x2e2   :  { %12421 = vst [vmem:[#allocation78_spill] sm:$0xff] %v7414_v30 }
 0x2e8   :  { %1697 = vperm.xlu0 %6446, %v7357_v8   ;;  %869 = vperm.xlu2 %6303, %v7236_v33  }
 0x2e9   :  { %875 = vperm.xlu1 %6304, %v7236_v33   ;;  %v7422_v43 = vpop.xlane.xlu1 %473 }
 0x2ea   :  { %12423 = vst [vmem:[#allocation80_spill] sm:$0xff] %v7422_v43  ;;  %v7438_v43 = vperm.slane %v7158_v1, 1 }
 0x2f0   :  { %2182 = vperm.xlu0 %6446, %v7365_v44   ;;  %6305 = vset.pattern.permute.xlu2 %v7205_v47 }
 0x2f1   :  { %6306 = vset.pattern.permute.xlu1 %v7208_v51  ;;  %v7429_v30 = vpop.xlane.xlu1 %479 }
 0x2f2   :  { %12425 = vst [vmem:[#allocation82_spill] sm:$0xff] %v7429_v30  ;;  %v7448_v30 = vperm.slane %v7158_v1, 6 }
 0x2f4   :  { %12428 = vst [vmem:[#allocation85_spill] sm:$0xff] %v7448_v30 }
 0x2f8   :  { %6451 = vset.pattern.permute.xlu0 %v7208_v51  ;;  %881 = vperm.xlu2 %6305, %v7236_v33  }
 0x2f9   :  { %887 = vperm.xlu1 %6306, %v7236_v33   ;;  %v7417_v33 = vpop.xlane.xlu0 %483  ;;  %v7442_v29 = vpop.xlane.xlu1 %485 }
 0x2fa   :  { %12422 = vst [vmem:[#allocation79_spill] sm:$0xff] %v7417_v33 }
 0x2fb   :  { %12427 = vst [vmem:[#allocation84_spill] sm:$0xff] %v7442_v29 }
 0x300   :  { %984 = vperm.xlu0 %6451, %v7349_v15   ;;  %6307 = vset.pattern.permute.xlu2 %v7110_v35 }
 0x301   :  { %6308 = vset.pattern.permute.xlu1 %v7113_v36  ;;  %v7427_v41 = vpop.xlane.xlu0 %489  ;;  %v7454_v57 = vpop.xlane.xlu1 %491 }
 0x302   :  { %12424 = vst [vmem:[#allocation81_spill] sm:$0xff] %v7427_v41 }
 0x303   :  { %12430 = vst [vmem:[#allocation87_spill] sm:$0xff] %v7454_v57 }
 0x308   :  { %1727 = vperm.xlu0 %6451, %v7357_v8   ;;  %900 = vperm.xlu2 %6307, %v7349_v15  }
 0x309   :  { %906 = vperm.xlu1 %6308, %v7349_v15   ;;  %v7440_v34 = vpop.xlane.xlu0 %495  ;;  %v7460_v29 = vpop.xlane.xlu1 %497 }
 0x30a   :  { %12426 = vst [vmem:[#allocation83_spill] sm:$0xff] %v7440_v34 }
 0x30b   :  { %12431 = vst [vmem:[#allocation88_spill] sm:$0xff] %v7460_v29 }
 0x310   :  { %2212 = vperm.xlu0 %6451, %v7365_v44   ;;  %6309 = vset.pattern.permute.xlu2 %v7116_v38 }
 0x311   :  { %6310 = vset.pattern.permute.xlu1 %v7144_v23  ;;  %v7450_v26 = vpop.xlane.xlu0 %501  ;;  %v7467_v3 = vpop.xlane.xlu1 %503 }
 0x312   :  { %12429 = vst [vmem:[#allocation86_spill] sm:$0xff] %v7450_v26 }
 0x313   :  { %12433 = vst [vmem:[#allocation90_spill] sm:$0xff] %v7467_v3 }
 0x318   :  { %6456 = vset.pattern.permute.xlu0 %v7144_v23  ;;  %912 = vperm.xlu2 %6309, %v7349_v15  }
 0x319   :  { %918 = vperm.xlu1 %6310, %v7349_v15   ;;  %v7462_v19 = vpop.xlane.xlu0 %507  ;;  %v7474_v11 = vpop.xlane.xlu1 %509 }
 0x31a   :  { %12432 = vst [vmem:[#allocation89_spill] sm:$0xff] %v7462_v19 }
 0x31b   :  { %12435 = vst [vmem:[#allocation92_spill] sm:$0xff] %v7474_v11 }
 0x320   :  { %1015 = vperm.xlu0 %6456, %v7432_v45   ;;  %6311 = vset.pattern.permute.xlu2 %v7170_v7 }
 0x321   :  { %6312 = vset.pattern.permute.xlu1 %v7167_v2  ;;  %v7469_v57 = vpop.xlane.xlu0 %513  ;;  %v7483_v3 = vpop.xlane.xlu1 %515 }
 0x322   :  { %12434 = vst [vmem:[#allocation91_spill] sm:$0xff] %v7469_v57 }
 0x323   :  { %12437 = vst [vmem:[#allocation94_spill] sm:$0xff] %v7483_v3 }
 0x328   :  { %1758 = vperm.xlu0 %6456, %v7438_v43   ;;  %930 = vperm.xlu2 %6311, %v7349_v15  }
 0x329   :  { %936 = vperm.xlu1 %6312, %v7349_v15   ;;  %v7476_v29 = vpop.xlane.xlu0 %519  ;;  %v7491_v11 = vpop.xlane.xlu1 %521 }
 0x32a   :  { %12436 = vst [vmem:[#allocation93_spill] sm:$0xff] %v7476_v29 }
 0x32b   :  { %12439 = vst [vmem:[#allocation96_spill] sm:$0xff] %v7491_v11 }
 0x330   :  { %2243 = vperm.xlu0 %6456, %v7448_v30   ;;  %6313 = vset.pattern.permute.xlu2 %v7269_v12 }
 0x331   :  { %6314 = vset.pattern.permute.xlu1 %v7179_v14  ;;  %v7486_v42 = vpop.xlane.xlu0 %525  ;;  %v7498_v3 = vpop.xlane.xlu1 %527 }
 0x332   :  { %12438 = vst [vmem:[#allocation95_spill] sm:$0xff] %v7486_v42 }
 0x333   :  { %12441 = vst [vmem:[#allocation98_spill] sm:$0xff] %v7498_v3  ;;  %v7513_v3 = vperm.slane %v7132_v52, 5 }
 0x338   :  { %6461 = vset.pattern.permute.xlu0 %v7179_v14  ;;  %942 = vperm.xlu2 %6313, %v7349_v15  }
 0x339   :  { %948 = vperm.xlu1 %6314, %v7349_v15   ;;  %v7493_v25 = vpop.xlane.xlu0 %531  ;;  %v7505_v42 = vpop.xlane.xlu1 %533 }
 0x33a   :  { %12440 = vst [vmem:[#allocation97_spill] sm:$0xff] %v7493_v25 }
 0x33b   :  { %12443 = vst [vmem:[#allocation100_spill] sm:$0xff] %v7505_v42  ;;  %v7521_v42 = vperm.slane %v7158_v1, 2 }
 0x340   :  { %1045 = vperm.xlu0 %6461, %v7432_v45   ;;  %6315 = vset.pattern.permute.xlu2 %v7194_v22 }
 0x341   :  { %6316 = vset.pattern.permute.xlu1 %v7191_v31  ;;  %v7500_v24 = vpop.xlane.xlu0 %537  ;;  %v7517_v11 = vpop.xlane.xlu1 %539 }
 0x342   :  { %12442 = vst [vmem:[#allocation99_spill] sm:$0xff] %v7500_v24 }
 0x343   :  { %12445 = vst [vmem:[#allocation102_spill] sm:$0xff] %v7517_v11 }
 0x348   :  { %1788 = vperm.xlu0 %6461, %v7438_v43   ;;  %960 = vperm.xlu2 %6315, %v7349_v15  }
 0x349   :  { %966 = vperm.xlu1 %6316, %v7349_v15   ;;  %v7528_v52 = vpop.xlane.xlu1 %545 }
 0x34a   :  { %12447 = vst [vmem:[#allocation104_spill] sm:$0xff] %v7528_v52 }
 0x350   :  { %2273 = vperm.xlu0 %6461, %v7448_v30   ;;  %6317 = vset.pattern.permute.xlu2 %v7296_v59 }
 0x351   :  { %6318 = vset.pattern.permute.xlu1 %v7205_v47  ;;  %v7538_v11 = vpop.xlane.xlu1 %551 }
 0x352   :  { %12450 = vst [vmem:[#allocation107_spill] sm:$0xff] %v7538_v11 }
 0x358   :  { %6466 = vset.pattern.permute.xlu0 %v7205_v47  ;;  %972 = vperm.xlu2 %6317, %v7349_v15  }
 0x359   :  { %978 = vperm.xlu1 %6318, %v7349_v15  }
 0x360   :  { %1075 = vperm.xlu0 %6466, %v7432_v45   ;;  %6319 = vset.pattern.permute.xlu2 %v7221_v46 }
 0x361   :  { %6320 = vset.pattern.permute.xlu1 %v7110_v35 }
 0x368   :  { %1818 = vperm.xlu0 %6466, %v7438_v43   ;;  %990 = vperm.xlu2 %6319, %v7349_v15   ;;  %v7510_v15 = vpop.xlane.xlu0 %543 }
 0x369   :  { %997 = vperm.xlu1 %6320, %v7432_v45   ;;  %12444 = vst [vmem:[#allocation101_spill] sm:$0xff] %v7510_v15  ;;  %v7531_v15 = vperm.slane %v7158_v1, 7  ;;  %v7545_v1 = vpop.xlane.xlu1 %557 }
 0x36a   :  { %12452 = vst [vmem:[#allocation109_spill] sm:$0xff] %v7545_v1 }
 0x36b   :  { %12448 = vst [vmem:[#allocation105_spill] sm:$0xff] %v7531_v15 }
 0x370   :  { %2303 = vperm.xlu0 %6466, %v7448_v30   ;;  %6321 = vset.pattern.permute.xlu2 %v7113_v36  ;;  %v7523_v24 = vpop.xlane.xlu0 %549 }
 0x371   :  { %6322 = vset.pattern.permute.xlu1 %v7116_v38  ;;  %12446 = vst [vmem:[#allocation103_spill] sm:$0xff] %v7523_v24  ;;  %v7554_v11 = vpop.xlane.xlu1 %563 }
 0x372   :  { %12454 = vst [vmem:[#allocation111_spill] sm:$0xff] %v7554_v11 }
 0x378   :  { %6471 = vset.pattern.permute.xlu0 %v7116_v38  ;;  %1003 = vperm.xlu2 %6321, %v7432_v45   ;;  %v7533_v25 = vpop.xlane.xlu0 %555 }
 0x379   :  { %1009 = vperm.xlu1 %6322, %v7432_v45   ;;  %12449 = vst [vmem:[#allocation106_spill] sm:$0xff] %v7533_v25  ;;  %v7562_v1 = vpop.xlane.xlu1 %569 }
 0x37a   :  { %12456 = vst [vmem:[#allocation113_spill] sm:$0xff] %v7562_v1 }
 0x380   :  { %1106 = vperm.xlu0 %6471, %v7513_v3   ;;  %6323 = vset.pattern.permute.xlu2 %v7147_v60  ;;  %v7543_v52 = vpop.xlane.xlu0 %561 }
 0x381   :  { %6324 = vset.pattern.permute.xlu1 %v7170_v7  ;;  %12451 = vst [vmem:[#allocation108_spill] sm:$0xff] %v7543_v52  ;;  %v7569_v11 = vpop.xlane.xlu1 %575 }
 0x382   :  { %12458 = vst [vmem:[#allocation115_spill] sm:$0xff] %v7569_v11 }
 0x388   :  { %1849 = vperm.xlu0 %6471, %v7521_v42   ;;  %1021 = vperm.xlu2 %6323, %v7432_v45   ;;  %v7550_v25 = vpop.xlane.xlu0 %567 }
 0x389   :  { %1027 = vperm.xlu1 %6324, %v7432_v45   ;;  %12453 = vst [vmem:[#allocation110_spill] sm:$0xff] %v7550_v25  ;;  %v7576_v25 = vpop.xlane.xlu1 %581 }
 0x38a   :  { %12460 = vst [vmem:[#allocation117_spill] sm:$0xff] %v7576_v25  ;;  %v12466_v25 = vmov 0  }
 0x390   :  { %2334 = vperm.xlu0 %6471, %v7531_v15   ;;  %6325 = vset.pattern.permute.xlu2 %v7167_v2  ;;  %v7557_v24 = vpop.xlane.xlu0 %573 }
 0x391   :  { %6326 = vset.pattern.permute.xlu1 %v7269_v12  ;;  %12455 = vst [vmem:[#allocation112_spill] sm:$0xff] %v7557_v24  ;;  %v7585_v11 = vpop.xlane.xlu1 %587 }
 0x392   :  { %12462 = vst [vmem:[#allocation119_spill] sm:$0xff] %v7585_v11 }
 0x398   :  { %6476 = vset.pattern.permute.xlu0 %v7269_v12  ;;  %1033 = vperm.xlu2 %6325, %v7432_v45   ;;  %v7564_v52 = vpop.xlane.xlu0 %579 }
 0x399   :  { %1039 = vperm.xlu1 %6326, %v7432_v45   ;;  %12457 = vst [vmem:[#allocation114_spill] sm:$0xff] %v7564_v52 }
 0x3a0   :  { %651 = vperm.xlu0 %6476, %v7135_v55   ;;  %6327 = vset.pattern.permute.xlu2 %v7182_v16  ;;  %v7574_v24 = vpop.xlane.xlu0 %585 }
 0x3a1   :  { %6328 = vset.pattern.permute.xlu1 %v7194_v22  ;;  %12459 = vst [vmem:[#allocation116_spill] sm:$0xff] %v7574_v24 }
 0x3a8   :  { %1136 = vperm.xlu0 %6476, %v7513_v3   ;;  %1051 = vperm.xlu2 %6327, %v7432_v45   ;;  %v7581_v1 = vpop.xlane.xlu0 %591 }
 0x3a9   :  { %1057 = vperm.xlu1 %6328, %v7432_v45   ;;  %12461 = vst [vmem:[#allocation118_spill] sm:$0xff] %v7581_v1 }
 0x3b0   :  { %1879 = vperm.xlu0 %6476, %v7521_v42   ;;  %6329 = vset.pattern.permute.xlu2 %v7191_v31  ;;  %v7588_v52 = vpop.permute.xlu0 %712 }
 0x3b1   :  { %6330 = vset.pattern.permute.xlu1 %v7296_v59  ;;  %12463 = vst [vmem:[#allocation120_spill] sm:$0xff] %v7588_v52 }
 0x3b8   :  { %2364 = vperm.xlu0 %6476, %v7531_v15   ;;  %1063 = vperm.xlu2 %6329, %v7432_v45  }
 0x3b9   :  { %1069 = vperm.xlu1 %6330, %v7432_v45  }
 0x3c0   :  { %6481 = vset.pattern.permute.xlu0 %v7296_v59  ;;  %6331 = vset.pattern.permute.xlu2 %v7208_v51 }
 0x3c1   :  { %6332 = vset.pattern.permute.xlu1 %v7221_v46 }
 0x3c8   :  { %681 = vperm.xlu0 %6481, %v7135_v55   ;;  %1081 = vperm.xlu2 %6331, %v7432_v45   ;;  %v7593_v55 = vpop.xlane.xlu1 %593 }
 0x3c9   :  { %1087 = vperm.xlu1 %6332, %v7432_v45   ;;  %12464 = vst [vmem:[#allocation121_spill] sm:$0xff] %v7593_v55  ;;  %v7595_v45 = vpop.permute.xlu0 %1197  ;;  %v7609_v55 = vpop.permute.xlu2 %621 }
 0x3ca   :  { %12465 = vst [vmem:[#allocation122_spill] sm:$0xff] %v7595_v45 }
 0x3cb   :  { %12468 = vst [vmem:[#allocation124_spill] sm:$0xff] %v7609_v55 }
 0x3d0   :  { %1166 = vperm.xlu0 %6481, %v7513_v3   ;;  %6333 = vset.pattern.permute.xlu2 %v7110_v35  ;;  %v7600_v11 = vpop.permute.xlu1 %615 }
 0x3d1   :  { %6334 = vset.pattern.permute.xlu1 %v7113_v36  ;;  %v7615_v24 = vpop.permute.xlu2 %627 }
 0x3d2   :  { %12469 = vst [vmem:[#allocation125_spill] sm:$0xff] %v7615_v24 }
 0x3d8   :  { %1909 = vperm.xlu0 %6481, %v7521_v42   ;;  %1094 = vperm.xlu2 %6333, %v7513_v3   ;;  %v7605_v1 = vpop.permute.xlu1 %633 }
 0x3d9   :  { %1100 = vperm.xlu1 %6334, %v7513_v3   ;;  %12467 = vst [vmem:[#allocation123_spill] sm:$0xff] %v7605_v1  ;;  %v7621_v1 = vpop.permute.xlu2 %639 }
 0x3da   :  { %12470 = vst [vmem:[#allocation126_spill] sm:$0xff] %v7621_v1 }
 0x3e0   :  { %6335 = vset.pattern.permute.xlu2 %v7144_v23  ;;  %2394 = vperm.xlu0 %6481, %v7531_v15   ;;  %v7611_v45 = vpop.permute.xlu1 %645  ;;  %v7625_v15 = vpop.permute.xlu0 %1940 }
 0x3e1   :  { %6336 = vset.pattern.permute.xlu1 %v7147_v60  ;;  %12472 = vst [vmem:[#allocation128_spill] sm:$0xff] %v7625_v15  ;;  %v7629_v55 = vpop.permute.xlu2 %657 }
 0x3e2   :  { %12473 = vst [vmem:[#allocation129_spill] sm:$0xff] %v7629_v55 }
 0x3e8   :  { %1112 = vperm.xlu2 %6335, %v7513_v3   ;;  %6490 = vset.pattern.permute.xlu0 %v12466_v25  ;;  %v7617_v52 = vpop.permute.xlu1 %663  ;;  %v7635_v24 = vpop.permute.xlu0 %742 }
 0x3e9   :  { %1118 = vperm.xlu1 %6336, %v7513_v3   ;;  %12475 = vst [vmem:[#allocation131_spill] sm:$0xff] %v7635_v24  ;;  %v7637_v57 = vpop.permute.xlu2 %669 }
 0x3ea   :  { %12476 = vst [vmem:[#allocation132_spill] sm:$0xff] %v7637_v57 }
 0x3f0   :  { %6337 = vset.pattern.permute.xlu2 %v7170_v7  ;;  %v7623_v25 = vpop.permute.xlu1 %675  ;;  %v7647_v55 = vpop.permute.xlu0 %1227 }
 0x3f1   :  { %6338 = vset.pattern.permute.xlu1 %v7167_v2  ;;  %12471 = vst [vmem:[#allocation127_spill] sm:$0xff] %v7623_v25  ;;  %v7643_v15 = vpop.permute.xlu2 %687 }
 0x3f2   :  { %12478 = vst [vmem:[#allocation134_spill] sm:$0xff] %v7643_v15 }
 0x3f3   :  { %12480 = vst [vmem:[#allocation136_spill] sm:$0xff] %v7647_v55 }
 0x3f8   :  { %1124 = vperm.xlu2 %6337, %v7513_v3   ;;  %v7631_v29 = vpop.permute.xlu1 %693  ;;  %v7655_v57 = vpop.permute.xlu0 %1970 }
 0x3f9   :  { %1130 = vperm.xlu1 %6338, %v7513_v3   ;;  %12474 = vst [vmem:[#allocation130_spill] sm:$0xff] %v7631_v29  ;;  %v7651_v29 = vpop.permute.xlu2 %699 }
 0x3fa   :  { %12481 = vst [vmem:[#allocation137_spill] sm:$0xff] %v7655_v57 }
 0x400   :  { %6339 = vset.pattern.permute.xlu2 %v7179_v14  ;;  %v7639_v1 = vpop.permute.xlu1 %706 }
 0x401   :  { %6340 = vset.pattern.permute.xlu1 %v7182_v16  ;;  %12477 = vst [vmem:[#allocation133_spill] sm:$0xff] %v7639_v1  ;;  %v7659_v1 = vpop.permute.xlu2 %718 }
 0x408   :  { %1142 = vperm.xlu2 %6339, %v7513_v3   ;;  %v7645_v25 = vpop.permute.xlu1 %724 }
 0x409   :  { %1148 = vperm.xlu1 %6340, %v7513_v3   ;;  %12479 = vst [vmem:[#allocation135_spill] sm:$0xff] %v7645_v25  ;;  %v7663_v25 = vpop.permute.xlu0 %772  ;;  %v7667_v55 = vpop.permute.xlu2 %730 }
 0x40a   :  { %12482 = vst [vmem:[#allocation138_spill] sm:$0xff] %v7667_v55 }
 0x410   :  { %6341 = vset.pattern.permute.xlu2 %v7194_v22  ;;  %v7653_v24 = vpop.permute.xlu1 %736 }
 0x411   :  { %6342 = vset.pattern.permute.xlu1 %v7191_v31  ;;  %v7671_v26 = vpop.permute.xlu0 %1257  ;;  %v7675_v34 = vpop.permute.xlu2 %748 }
 0x412   :  { %12484 = vst [vmem:[#allocation140_spill] sm:$0xff] %v7671_v26 }
 0x413   :  { %12485 = vst [vmem:[#allocation141_spill] sm:$0xff] %v7675_v34 }
 0x418   :  { %1154 = vperm.xlu2 %6341, %v7513_v3   ;;  %v7661_v15 = vpop.permute.xlu1 %754 }
 0x419   :  { %1160 = vperm.xlu1 %6342, %v7513_v3   ;;  %v7679_v41 = vpop.permute.xlu0 %2000  ;;  %v7683_v33 = vpop.permute.xlu2 %760 }
 0x41a   :  { %12487 = vst [vmem:[#allocation143_spill] sm:$0xff] %v7679_v41 }
 0x41b   :  { %12488 = vst [vmem:[#allocation144_spill] sm:$0xff] %v7683_v33 }
 0x420   :  { %6343 = vset.pattern.permute.xlu2 %v7205_v47  ;;  %v7669_v19 = vpop.permute.xlu1 %766 }
 0x421   :  { %6344 = vset.pattern.permute.xlu1 %v7208_v51  ;;  %12483 = vst [vmem:[#allocation139_spill] sm:$0xff] %v7669_v19  ;;  %v7691_v26 = vpop.permute.xlu2 %778 }
 0x422   :  { %12491 = vst [vmem:[#allocation147_spill] sm:$0xff] %v7691_v26 }
 0x428   :  { %1172 = vperm.xlu2 %6343, %v7513_v3   ;;  %v7677_v30 = vpop.permute.xlu1 %784 }
 0x429   :  { %1178 = vperm.xlu1 %6344, %v7513_v3   ;;  %12486 = vst [vmem:[#allocation142_spill] sm:$0xff] %v7677_v30  ;;  %v7697_v41 = vpop.permute.xlu2 %790 }
 0x430   :  { %6345 = vset.pattern.permute.xlu2 %v7221_v46  ;;  %v7685_v55 = vpop.permute.xlu1 %796 }
 0x431   :  { %6346 = vset.pattern.permute.xlu1 %v7110_v35  ;;  %12489 = vst [vmem:[#allocation145_spill] sm:$0xff] %v7685_v55  ;;  %v7705_v55 = vpop.permute.xlu2 %809 }
 0x438   :  { %1184 = vperm.xlu2 %6345, %v7513_v3   ;;  %v7689_v3 = vpop.permute.xlu0 %609  ;;  %v7693_v19 = vpop.permute.xlu1 %815 }
 0x439   :  { %1191 = vperm.xlu1 %6346, %v7150_v62   ;;  %12490 = vst [vmem:[#allocation146_spill] sm:$0xff] %v7689_v3 }
 0x43a   :  { %12492 = vst [vmem:[#allocation148_spill] sm:$0xff] %v7693_v19  ;;  %v7713_v19 = vpop.permute.xlu2 %821 }
 0x43b   :  { %12495 = vst [vmem:[#allocation151_spill] sm:$0xff] %v7713_v19 }
 0x440   :  { %6347 = vset.pattern.permute.xlu2 %v7116_v38  ;;  %v7699_v30 = vpop.permute.xlu1 %827  ;;  %v7701_v33 = vpop.permute.xlu0 %803 }
 0x441   :  { %6348 = vset.pattern.permute.xlu1 %v7144_v23  ;;  %12493 = vst [vmem:[#allocation149_spill] sm:$0xff] %v7701_v33 }
 0x442   :  { %v7721_v33 = vpop.permute.xlu2 %839 }
 0x443   :  { %12498 = vst [vmem:[#allocation154_spill] sm:$0xff] %v7721_v33 }
 0x448   :  { %1203 = vperm.xlu2 %6347, %v7150_v62   ;;  %v7707_v34 = vpop.permute.xlu1 %845  ;;  %v7709_v26 = vpop.permute.xlu0 %1288 }
 0x449   :  { %1209 = vperm.xlu1 %6348, %v7150_v62   ;;  %12494 = vst [vmem:[#allocation150_spill] sm:$0xff] %v7709_v26 }
 0x44a   :  { %v7729_v26 = vpop.permute.xlu2 %851 }
 0x44b   :  { %12501 = vst [vmem:[#allocation157_spill] sm:$0xff] %v7729_v26 }
 0x450   :  { %6349 = vset.pattern.permute.xlu2 %v7147_v60  ;;  %v7715_v3 = vpop.permute.xlu1 %857  ;;  %v7717_v18 = vpop.permute.xlu0 %2031 }
 0x451   :  { %6350 = vset.pattern.permute.xlu1 %v7170_v7  ;;  %12496 = vst [vmem:[#allocation152_spill] sm:$0xff] %v7715_v3 }
 0x452   :  { %12497 = vst [vmem:[#allocation153_spill] sm:$0xff] %v7717_v18  ;;  %v7737_v3 = vpop.permute.xlu2 %869 }
 0x453   :  { %12504 = vst [vmem:[#allocation160_spill] sm:$0xff] %v7737_v3 }
 0x458   :  { %1215 = vperm.xlu2 %6349, %v7150_v62   ;;  %v7723_v49 = vpop.permute.xlu1 %875  ;;  %v7725_v20 = vpop.permute.xlu0 %833 }
 0x459   :  { %1221 = vperm.xlu1 %6350, %v7150_v62   ;;  %12499 = vst [vmem:[#allocation155_spill] sm:$0xff] %v7723_v49 }
 0x45a   :  { %12500 = vst [vmem:[#allocation156_spill] sm:$0xff] %v7725_v20  ;;  %v7745_v20 = vpop.permute.xlu2 %881 }
 0x460   :  { %6351 = vset.pattern.permute.xlu2 %v7269_v12  ;;  %v7731_v19 = vpop.permute.xlu1 %887  ;;  %v7735_v18 = vpop.permute.xlu0 %1318 }
 0x461   :  { %6352 = vset.pattern.permute.xlu1 %v7179_v14  ;;  %12502 = vst [vmem:[#allocation158_spill] sm:$0xff] %v7731_v19 }
 0x462   :  { %12503 = vst [vmem:[#allocation159_spill] sm:$0xff] %v7735_v18  ;;  %v7751_v19 = vpop.permute.xlu2 %900 }
 0x468   :  { %1233 = vperm.xlu2 %6351, %v7150_v62   ;;  %v7739_v33 = vpop.permute.xlu1 %906  ;;  %v7743_v49 = vpop.permute.xlu0 %2061 }
 0x469   :  { %1239 = vperm.xlu1 %6352, %v7150_v62   ;;  %12505 = vst [vmem:[#allocation161_spill] sm:$0xff] %v7739_v33 }
 0x46a   :  { %12506 = vst [vmem:[#allocation162_spill] sm:$0xff] %v7743_v49  ;;  %v7759_v33 = vpop.permute.xlu2 %912 }
 0x46b   :  { %12508 = vst [vmem:[#allocation164_spill] sm:$0xff] %v7759_v33 }
 0x470   :  { %6353 = vset.pattern.permute.xlu2 %v7182_v16  ;;  %v7747_v26 = vpop.permute.xlu1 %918  ;;  %v7755_v3 = vpop.permute.xlu0 %863 }
 0x471   :  { %6354 = vset.pattern.permute.xlu1 %v7194_v22 }
 0x472   :  { %v7767_v56 = vpop.permute.xlu2 %930 }
 0x473   :  { %12511 = vst [vmem:[#allocation167_spill] sm:$0xff] %v7767_v56 }
 0x478   :  { %1245 = vperm.xlu2 %6353, %v7150_v62   ;;  %v7753_v18 = vpop.permute.xlu1 %936  ;;  %v7763_v44 = vpop.permute.xlu0 %1348 }
 0x479   :  { %1251 = vperm.xlu1 %6354, %v7150_v62   ;;  %12507 = vst [vmem:[#allocation163_spill] sm:$0xff] %v7753_v18 }
 0x47a   :  { %12510 = vst [vmem:[#allocation166_spill] sm:$0xff] %v7763_v44  ;;  %v7775_v18 = vpop.permute.xlu2 %942 }
 0x47b   :  { %12514 = vst [vmem:[#allocation170_spill] sm:$0xff] %v7775_v18 }
 0x480   :  { %6355 = vset.pattern.permute.xlu2 %v7296_v59  ;;  %v7761_v49 = vpop.permute.xlu1 %948  ;;  %v7771_v57 = vpop.permute.xlu0 %2091 }
 0x481   :  { %6356 = vset.pattern.permute.xlu1 %v7205_v47  ;;  %12509 = vst [vmem:[#allocation165_spill] sm:$0xff] %v7761_v49 }
 0x482   :  { %12513 = vst [vmem:[#allocation169_spill] sm:$0xff] %v7771_v57 }
 0x488   :  { %1263 = vperm.xlu2 %6355, %v7150_v62   ;;  %v7769_v50 = vpop.permute.xlu1 %966  ;;  %v7779_v49 = vpop.permute.xlu0 %893 }
 0x489   :  { %1269 = vperm.xlu1 %6356, %v7150_v62   ;;  %12512 = vst [vmem:[#allocation168_spill] sm:$0xff] %v7769_v50 }
 0x48a   :  { %12516 = vst [vmem:[#allocation172_spill] sm:$0xff] %v7779_v49 }
 0x490   :  { %6357 = vset.pattern.permute.xlu2 %v7208_v51  ;;  %v7777_v33 = vpop.permute.xlu1 %978  ;;  %v7789_v57 = vpop.permute.xlu0 %1378 }
 0x491   :  { %6358 = vset.pattern.permute.xlu1 %v7221_v46  ;;  %12515 = vst [vmem:[#allocation171_spill] sm:$0xff] %v7777_v33 }
 0x492   :  { %12519 = vst [vmem:[#allocation175_spill] sm:$0xff] %v7789_v57 }
 0x498   :  { %1275 = vperm.xlu2 %6357, %v7150_v62   ;;  %v7785_v44 = vpop.permute.xlu1 %997  ;;  %v7797_v33 = vpop.permute.xlu0 %2121 }
 0x499   :  { %1281 = vperm.xlu1 %6358, %v7150_v62   ;;  %v7783_v62 = vpop.permute.xlu2 %960  ;;  %12518 = vst [vmem:[#allocation174_spill] sm:$0xff] %v7785_v44 }
 0x49a   :  { %12517 = vst [vmem:[#allocation173_spill] sm:$0xff] %v7783_v62 }
 0x49b   :  { %12522 = vst [vmem:[#allocation178_spill] sm:$0xff] %v7797_v33 }
 0x4a0   :  { %6359 = vset.pattern.permute.xlu2 %v7113_v36  ;;  %v7793_v18 = vpop.permute.xlu1 %1009  ;;  %v7809_v49 = vpop.permute.xlu0 %924 }
 0x4a1   :  { %6360 = vset.pattern.permute.xlu1 %v7116_v38  ;;  %v7791_v50 = vpop.permute.xlu2 %972  ;;  %12521 = vst [vmem:[#allocation177_spill] sm:$0xff] %v7793_v18 }
 0x4a2   :  { %12520 = vst [vmem:[#allocation176_spill] sm:$0xff] %v7791_v50 }
 0x4a3   :  { %12527 = vst [vmem:[#allocation183_spill] sm:$0xff] %v7809_v49 }
 0x4a8   :  { %1294 = vperm.xlu2 %6359, %v7246_v5   ;;  %v7801_v62 = vpop.permute.xlu1 %1027 }
 0x4a9   :  { %1300 = vperm.xlu1 %6360, %v7246_v5   ;;  %v7799_v56 = vpop.permute.xlu2 %990  ;;  %12524 = vst [vmem:[#allocation180_spill] sm:$0xff] %v7801_v62 }
 0x4aa   :  { %12523 = vst [vmem:[#allocation179_spill] sm:$0xff] %v7799_v56  ;;  %v7817_v56 = vpop.permute.xlu0 %1667 }
 0x4ab   :  { %12530 = vst [vmem:[#allocation186_spill] sm:$0xff] %v7817_v56 }
 0x4b0   :  { %6361 = vset.pattern.permute.xlu2 %v7144_v23  ;;  %v7807_v57 = vpop.permute.xlu1 %1039 }
 0x4b1   :  { %6362 = vset.pattern.permute.xlu1 %v7147_v60  ;;  %v7805_v44 = vpop.permute.xlu2 %1003  ;;  %12526 = vst [vmem:[#allocation182_spill] sm:$0xff] %v7807_v57 }
 0x4b2   :  { %12525 = vst [vmem:[#allocation181_spill] sm:$0xff] %v7805_v44  ;;  %v7825_v57 = vpop.permute.xlu0 %2152 }
 0x4b3   :  { %12533 = vst [vmem:[#allocation189_spill] sm:$0xff] %v7825_v57 }
 0x4b8   :  { %1306 = vperm.xlu2 %6361, %v7246_v5   ;;  %v7815_v33 = vpop.permute.xlu1 %1057 }
 0x4b9   :  { %1312 = vperm.xlu1 %6362, %v7246_v5   ;;  %v7813_v18 = vpop.permute.xlu2 %1021  ;;  %12529 = vst [vmem:[#allocation185_spill] sm:$0xff] %v7815_v33 }
 0x4ba   :  { %12528 = vst [vmem:[#allocation184_spill] sm:$0xff] %v7813_v18  ;;  %v7833_v33 = vpop.permute.xlu0 %954 }
 0x4bb   :  { %12536 = vst [vmem:[#allocation192_spill] sm:$0xff] %v7833_v33 }
 0x4c0   :  { %6363 = vset.pattern.permute.xlu2 %v7167_v2  ;;  %v7823_v44 = vpop.permute.xlu1 %1069 }
 0x4c1   :  { %6364 = vset.pattern.permute.xlu1 %v7269_v12  ;;  %v7821_v62 = vpop.permute.xlu2 %1033  ;;  %12532 = vst [vmem:[#allocation188_spill] sm:$0xff] %v7823_v44 }
 0x4c2   :  { %12531 = vst [vmem:[#allocation187_spill] sm:$0xff] %v7821_v62  ;;  %v7843_v44 = vpop.permute.xlu0 %1697 }
 0x4c8   :  { %1324 = vperm.xlu2 %6363, %v7246_v5   ;;  %v7831_v18 = vpop.permute.xlu1 %1087 }
 0x4c9   :  { %1330 = vperm.xlu1 %6364, %v7246_v5   ;;  %v7829_v49 = vpop.permute.xlu2 %1051  ;;  %12535 = vst [vmem:[#allocation191_spill] sm:$0xff] %v7831_v18 }
 0x4ca   :  { %12534 = vst [vmem:[#allocation190_spill] sm:$0xff] %v7829_v49  ;;  %v7851_v18 = vpop.permute.xlu0 %2182 }
 0x4cb   :  { %12541 = vst [vmem:[#allocation197_spill] sm:$0xff] %v7851_v18 }
 0x4d0   :  { %6365 = vset.pattern.permute.xlu2 %v7179_v14  ;;  %v7839_v62 = vpop.permute.xlu1 %1100 }
 0x4d1   :  { %6366 = vset.pattern.permute.xlu1 %v7182_v16  ;;  %v7837_v56 = vpop.permute.xlu2 %1063  ;;  %12538 = vst [vmem:[#allocation194_spill] sm:$0xff] %v7839_v62 }
 0x4d2   :  { %12537 = vst [vmem:[#allocation193_spill] sm:$0xff] %v7837_v56 }
 0x4d8   :  { %1336 = vperm.xlu2 %6365, %v7246_v5   ;;  %v7847_v49 = vpop.permute.xlu1 %1118 }
 0x4d9   :  { %1342 = vperm.xlu1 %6366, %v7246_v5   ;;  %v7845_v57 = vpop.permute.xlu2 %1081  ;;  %12540 = vst [vmem:[#allocation196_spill] sm:$0xff] %v7847_v49 }
 0x4da   :  { %12539 = vst [vmem:[#allocation195_spill] sm:$0xff] %v7845_v57  ;;  %v7863_v57 = vpop.permute.xlu0 %984 }
 0x4db   :  { %12546 = vst [vmem:[#allocation202_spill] sm:$0xff] %v7863_v57 }
 0x4e0   :  { %6367 = vset.pattern.permute.xlu2 %v7191_v31  ;;  %v7855_v56 = vpop.permute.xlu1 %1130 }
 0x4e1   :  { %6368 = vset.pattern.permute.xlu1 %v7296_v59  ;;  %v7853_v50 = vpop.permute.xlu2 %1094  ;;  %12543 = vst [vmem:[#allocation199_spill] sm:$0xff] %v7855_v56 }
 0x4e2   :  { %12542 = vst [vmem:[#allocation198_spill] sm:$0xff] %v7853_v50  ;;  %v7871_v50 = vpop.permute.xlu0 %1727 }
 0x4e3   :  { %12549 = vst [vmem:[#allocation205_spill] sm:$0xff] %v7871_v50 }
 0x4e8   :  { %1354 = vperm.xlu2 %6367, %v7246_v5   ;;  %v7861_v33 = vpop.permute.xlu1 %1148 }
 0x4e9   :  { %1360 = vperm.xlu1 %6368, %v7246_v5   ;;  %v7859_v62 = vpop.permute.xlu2 %1112  ;;  %12545 = vst [vmem:[#allocation201_spill] sm:$0xff] %v7861_v33 }
 0x4ea   :  { %12544 = vst [vmem:[#allocation200_spill] sm:$0xff] %v7859_v62  ;;  %v7879_v33 = vpop.permute.xlu0 %2212 }
 0x4eb   :  { %12552 = vst [vmem:[#allocation208_spill] sm:$0xff] %v7879_v33 }
 0x4f0   :  { %6369 = vset.pattern.permute.xlu2 %v7205_v47  ;;  %v7869_v18 = vpop.permute.xlu1 %1160 }
 0x4f1   :  { %6370 = vset.pattern.permute.xlu1 %v7208_v51  ;;  %v7867_v49 = vpop.permute.xlu2 %1124  ;;  %12548 = vst [vmem:[#allocation204_spill] sm:$0xff] %v7869_v18 }
 0x4f2   :  { %12547 = vst [vmem:[#allocation203_spill] sm:$0xff] %v7867_v49  ;;  %v7887_v18 = vpop.permute.xlu0 %1015 }
 0x4f3   :  { %12555 = vst [vmem:[#allocation211_spill] sm:$0xff] %v7887_v18 }
 0x4f8   :  { %1366 = vperm.xlu2 %6369, %v7246_v5   ;;  %v7877_v56 = vpop.permute.xlu1 %1178 }
 0x4f9   :  { %1372 = vperm.xlu1 %6370, %v7246_v5   ;;  %v7875_v5 = vpop.permute.xlu2 %1142  ;;  %12551 = vst [vmem:[#allocation207_spill] sm:$0xff] %v7877_v56 }
 0x4fa   :  { %12550 = vst [vmem:[#allocation206_spill] sm:$0xff] %v7875_v5  ;;  %v7897_v33 = vpop.permute.xlu0 %1758 }
 0x4fb   :  { %12558 = vst [vmem:[#allocation214_spill] sm:$0xff] %v7897_v33 }
 0x500   :  { %6371 = vset.pattern.permute.xlu2 %v7110_v35  ;;  %v7885_v49 = vpop.permute.xlu1 %1191 }
 0x501   :  { %6372 = vset.pattern.permute.xlu1 %v7113_v36  ;;  %v7883_v62 = vpop.permute.xlu2 %1154  ;;  %12554 = vst [vmem:[#allocation210_spill] sm:$0xff] %v7885_v49 }
 0x502   :  { %12553 = vst [vmem:[#allocation209_spill] sm:$0xff] %v7883_v62  ;;  %v7905_v18 = vpop.permute.xlu0 %2243 }
 0x503   :  { %12561 = vst [vmem:[#allocation217_spill] sm:$0xff] %v7905_v18 }
 0x508   :  { %1643 = vperm.xlu2 %6371, %v7357_v8   ;;  %v7893_v5 = vpop.permute.xlu1 %1209 }
 0x509   :  { %1649 = vperm.xlu1 %6372, %v7357_v8   ;;  %v7891_v57 = vpop.permute.xlu2 %1172  ;;  %12557 = vst [vmem:[#allocation213_spill] sm:$0xff] %v7893_v5 }
 0x50a   :  { %12556 = vst [vmem:[#allocation212_spill] sm:$0xff] %v7891_v57 }
 0x510   :  { %6373 = vset.pattern.permute.xlu2 %v7116_v38  ;;  %v7901_v50 = vpop.permute.xlu1 %1221 }
 0x511   :  { %6374 = vset.pattern.permute.xlu1 %v7144_v23  ;;  %v7899_v56 = vpop.permute.xlu2 %1184  ;;  %12560 = vst [vmem:[#allocation216_spill] sm:$0xff] %v7901_v50 }
 0x512   :  { %12559 = vst [vmem:[#allocation215_spill] sm:$0xff] %v7899_v56  ;;  %v7917_v56 = vpop.permute.xlu0 %1045 }
 0x513   :  { %12566 = vst [vmem:[#allocation222_spill] sm:$0xff] %v7917_v56 }
 0x518   :  { %1655 = vperm.xlu2 %6373, %v7357_v8   ;;  %v7909_v57 = vpop.permute.xlu1 %1239 }
 0x519   :  { %1661 = vperm.xlu1 %6374, %v7357_v8   ;;  %v7907_v49 = vpop.permute.xlu2 %1203  ;;  %12563 = vst [vmem:[#allocation219_spill] sm:$0xff] %v7909_v57 }
 0x51a   :  { %12562 = vst [vmem:[#allocation218_spill] sm:$0xff] %v7907_v49  ;;  %v7925_v49 = vpop.permute.xlu0 %1788 }
 0x520   :  { %6375 = vset.pattern.permute.xlu2 %v7170_v7  ;;  %v7915_v33 = vpop.permute.xlu1 %1251 }
 0x521   :  { %6376 = vset.pattern.permute.xlu1 %v7167_v2  ;;  %v7913_v5 = vpop.permute.xlu2 %1215  ;;  %12565 = vst [vmem:[#allocation221_spill] sm:$0xff] %v7915_v33 }
 0x522   :  { %12564 = vst [vmem:[#allocation220_spill] sm:$0xff] %v7913_v5  ;;  %v7933_v33 = vpop.permute.xlu0 %2273 }
 0x523   :  { %12571 = vst [vmem:[#allocation227_spill] sm:$0xff] %v7933_v33 }
 0x528   :  { %1673 = vperm.xlu2 %6375, %v7357_v8   ;;  %v7923_v18 = vpop.permute.xlu1 %1269 }
 0x529   :  { %1679 = vperm.xlu1 %6376, %v7357_v8   ;;  %v7921_v50 = vpop.permute.xlu2 %1233  ;;  %12568 = vst [vmem:[#allocation224_spill] sm:$0xff] %v7923_v18 }
 0x52a   :  { %12567 = vst [vmem:[#allocation223_spill] sm:$0xff] %v7921_v50  ;;  %v7941_v18 = vpop.permute.xlu0 %1075 }
 0x52b   :  { %12574 = vst [vmem:[#allocation230_spill] sm:$0xff] %v7941_v18 }
 0x530   :  { %6377 = vset.pattern.permute.xlu2 %v7269_v12  ;;  %v7931_v5 = vpop.permute.xlu1 %1281 }
 0x531   :  { %6378 = vset.pattern.permute.xlu1 %v7179_v14  ;;  %v7929_v57 = vpop.permute.xlu2 %1245  ;;  %12570 = vst [vmem:[#allocation226_spill] sm:$0xff] %v7931_v5 }
 0x532   :  { %12569 = vst [vmem:[#allocation225_spill] sm:$0xff] %v7929_v57  ;;  %v7951_v33 = vpop.permute.xlu0 %1818 }
 0x533   :  { %12577 = vst [vmem:[#allocation233_spill] sm:$0xff] %v7951_v33 }
 0x538   :  { %1685 = vperm.xlu2 %6377, %v7357_v8   ;;  %v7939_v50 = vpop.permute.xlu1 %1300 }
 0x539   :  { %1691 = vperm.xlu1 %6378, %v7357_v8   ;;  %v7937_v62 = vpop.permute.xlu2 %1263  ;;  %12573 = vst [vmem:[#allocation229_spill] sm:$0xff] %v7939_v50 }
 0x53a   :  { %12572 = vst [vmem:[#allocation228_spill] sm:$0xff] %v7937_v62  ;;  %v7959_v18 = vpop.permute.xlu0 %2303 }
 0x53b   :  { %12580 = vst [vmem:[#allocation236_spill] sm:$0xff] %v7959_v18 }
 0x540   :  { %6379 = vset.pattern.permute.xlu2 %v7194_v22  ;;  %v7947_v57 = vpop.permute.xlu1 %1312 }
 0x541   :  { %6380 = vset.pattern.permute.xlu1 %v7191_v31  ;;  %v7945_v56 = vpop.permute.xlu2 %1275  ;;  %12576 = vst [vmem:[#allocation232_spill] sm:$0xff] %v7947_v57 }
 0x542   :  { %12575 = vst [vmem:[#allocation231_spill] sm:$0xff] %v7945_v56 }
 0x548   :  { %1703 = vperm.xlu2 %6379, %v7357_v8   ;;  %v7955_v62 = vpop.permute.xlu1 %1330 }
 0x549   :  { %1709 = vperm.xlu1 %6380, %v7357_v8   ;;  %v7953_v5 = vpop.permute.xlu2 %1294  ;;  %12579 = vst [vmem:[#allocation235_spill] sm:$0xff] %v7955_v62 }
 0x54a   :  { %12578 = vst [vmem:[#allocation234_spill] sm:$0xff] %v7953_v5  ;;  %v7971_v5 = vpop.permute.xlu0 %1106 }
 0x54b   :  { %12585 = vst [vmem:[#allocation241_spill] sm:$0xff] %v7971_v5 }
 0x550   :  { %6381 = vset.pattern.permute.xlu2 %v7296_v59  ;;  %v7963_v56 = vpop.permute.xlu1 %1342 }
 0x551   :  { %6382 = vset.pattern.permute.xlu1 %v7205_v47  ;;  %v7961_v50 = vpop.permute.xlu2 %1306  ;;  %12582 = vst [vmem:[#allocation238_spill] sm:$0xff] %v7963_v56 }
 0x552   :  { %12581 = vst [vmem:[#allocation237_spill] sm:$0xff] %v7961_v50  ;;  %v7979_v50 = vpop.permute.xlu0 %1849 }
 0x553   :  { %12588 = vst [vmem:[#allocation244_spill] sm:$0xff] %v7979_v50 }
 0x558   :  { %1715 = vperm.xlu2 %6381, %v7357_v8  }
 0x559   :  { %1721 = vperm.xlu1 %6382, %v7357_v8   ;;  %v7967_v57 = vpop.permute.xlu2 %1324 }
 0x55a   :  { %12583 = vst [vmem:[#allocation239_spill] sm:$0xff] %v7967_v57  ;;  %v7989_v5 = vpop.permute.xlu0 %2334 }
 0x55b   :  { %v7969_v33 = vpop.permute.xlu1 %1360  ;;  %12591 = vst [vmem:[#allocation247_spill] sm:$0xff] %v7989_v5  ;;  %v1517_v5 = vadd.f32 %v7617_v52, %v7226_v13 }
 0x55c   :  { %12584 = vst [vmem:[#allocation240_spill] sm:$0xff] %v7969_v33 }
 0x560   :  { %6383 = vset.pattern.permute.xlu2 %v7221_v46 }
 0x561   :  { %6384 = vset.pattern.permute.xlu1 %v7110_v35  ;;  %v7975_v62 = vpop.permute.xlu2 %1336 }
 0x562   :  { %12586 = vst [vmem:[#allocation242_spill] sm:$0xff] %v7975_v62  ;;  %v7996_v50 = vpop.permute.xlu0 %651 }
 0x563   :  { %12593 = vst [vmem:[#allocation249_spill] sm:$0xff] %v7996_v50 }
 0x568   :  { %1733 = vperm.xlu2 %6383, %v7357_v8   ;;  %v1509_v8 = vadd.f32 %v7600_v11, %v7210_v27 }
 0x569   :  { %1740 = vperm.xlu1 %6384, %v7438_v43   ;;  %v7985_v33 = vpop.permute.xlu2 %1354 }
 0x56a   :  { %12589 = vst [vmem:[#allocation245_spill] sm:$0xff] %v7985_v33 }
 0x56b   :  { %v7977_v18 = vpop.permute.xlu1 %1372 }
 0x56c   :  { %12587 = vst [vmem:[#allocation243_spill] sm:$0xff] %v7977_v18 }
 0x570   :  { %6385 = vset.pattern.permute.xlu2 %v7113_v36 }
 0x571   :  { %6386 = vset.pattern.permute.xlu1 %v7116_v38  ;;  %v7994_v18 = vpop.permute.xlu2 %1366 }
 0x572   :  { %12592 = vst [vmem:[#allocation248_spill] sm:$0xff] %v7994_v18 }
 0x578   :  { %1746 = vperm.xlu2 %6385, %v7438_v43  }
 0x579   :  { %1752 = vperm.xlu1 %6386, %v7438_v43   ;;  %v8000_v11 = vpop.permute.xlu2 %1643 }
 0x57b   :  { %v1650_v56 = vpop.permute.xlu1 %1649 }
 0x57c   :  { %v7987_v57 = vadd.f32 %v1650_v56, %v1509_v8  ;;  %v8004_v56 = vpop.permute.xlu0 %1136 }
 0x57e   :  { %12590 = vst [vmem:[#allocation246_spill] sm:$0xff] %v7987_v57  ;;  %2802 = vperm.xlu0 %6490, %v7987_v57   ;;  %v1514_v57 = vadd.f32 %v7611_v45, %v7215_v58  ;;  %v8028_v58 = vadd.f32 %v7843_v44, %v1517_v5  ;;  %v1523_v5 = vadd.f32 %v7651_v29, %v7243_v0 }
 0x580   :  { %6387 = vset.pattern.permute.xlu2 %v7147_v60  ;;  %12596 = vst [vmem:[#allocation252_spill] sm:$0xff] %v8028_v58 }
 0x581   :  { %6388 = vset.pattern.permute.xlu1 %v7170_v7  ;;  %v8006_v27 = vpop.permute.xlu2 %1655 }
 0x582   :  { %12594 = vst [vmem:[#allocation250_spill] sm:$0xff] %v8006_v27 }
 0x584   :  { %v8016_v62 = vpop.permute.xlu0 %1879 }
 0x588   :  { %1764 = vperm.xlu2 %6387, %v7438_v43  }
 0x589   :  { %1770 = vperm.xlu1 %6388, %v7438_v43   ;;  %v8014_v18 = vpop.permute.xlu2 %1673 }
 0x58b   :  { %v8008_v8 = vpop.permute.xlu1 %1661 }
 0x58c   :  { %v8030_v45 = vpop.permute.xlu0 %2364 }
 0x58d   :  { %12597 = vst [vmem:[#allocation253_spill] sm:$0xff] %v8030_v45 }
 0x590   :  { %6389 = vset.pattern.permute.xlu2 %v7167_v2 }
 0x591   :  { %6390 = vset.pattern.permute.xlu1 %v7269_v12 }
 0x592   :  { %v8025_v27 = vpop.permute.xlu2 %1685 }
 0x598   :  { %1776 = vperm.xlu2 %6389, %v7438_v43  }
 0x599   :  { %1782 = vperm.xlu1 %6390, %v7438_v43  }
 0x59b   :  { %v1680_v33 = vpop.permute.xlu1 %1679 }
 0x59c   :  { %v8018_v50 = vadd.f32 %v1680_v33, %v1514_v57  ;;  %v682_v33 = vpop.permute.xlu0 %681 }
 0x59d   :  { %v1520_v13 = vadd.f32 %v682_v33, %v7233_v4 }
 0x59e   :  { %12595 = vst [vmem:[#allocation251_spill] sm:$0xff] %v8018_v50  ;;  %2817 = vperm.xlu0 %6490, %v8018_v50   ;;  %v12631_v50 = vld [vmem:[#allocation162_spill] sm:$0xff] }
 0x5a0   :  { %6391 = vset.pattern.permute.xlu2 %v7182_v16 }
 0x5a1   :  { %6392 = vset.pattern.permute.xlu1 %v7194_v22 }
 0x5a2   :  { %v8035_v57 = vpop.permute.xlu2 %1703 }
 0x5a6   :  { %2826 = vperm.xlu0 %6490, %v8028_v58  }
 0x5a8   :  { %1794 = vperm.xlu2 %6391, %v7438_v43  }
 0x5a9   :  { %1800 = vperm.xlu1 %6392, %v7438_v43  }
 0x5ab   :  { %v8054_v33 = vpop.permute.xlu1 %1691 }
 0x5b0   :  { %6393 = vset.pattern.permute.xlu2 %v7191_v31 }
 0x5b1   :  { %6394 = vset.pattern.permute.xlu1 %v7296_v59 }
 0x5b2   :  { %v1716_v52 = vpop.permute.xlu2 %1715 }
 0x5b3   :  { %v8040_v44 = vadd.f32 %v1716_v52, %v1520_v13 }
 0x5b5   :  { %12598 = vst [vmem:[#allocation254_spill] sm:$0xff] %v8040_v44  ;;  %2835 = vperm.xlu0 %6490, %v8040_v44  }
 0x5b8   :  { %1806 = vperm.xlu2 %6393, %v7438_v43  }
 0x5b9   :  { %1812 = vperm.xlu1 %6394, %v7438_v43  }
 0x5bb   :  { %v8058_v13 = vpop.permute.xlu1 %1709 }
 0x5c0   :  { %6395 = vset.pattern.permute.xlu2 %v7208_v51 }
 0x5c1   :  { %6396 = vset.pattern.permute.xlu1 %v7221_v46 }
 0x5c2   :  { %v1734_v58 = vpop.permute.xlu2 %1733 }
 0x5c3   :  { %v8049_v4 = vadd.f32 %v1734_v58, %v1523_v5 }
 0x5c5   :  { %12599 = vst [vmem:[#allocation255_spill] sm:$0xff] %v8049_v4  ;;  %2844 = vperm.xlu0 %6490, %v8049_v4   ;;  %v1529_v4 = vadd.f32 %v7653_v24, %v7266_v17  ;;  %v1535_v24 = vadd.f32 %v7663_v25, %v7283_v32 }
 0x5c8   :  { %1824 = vperm.xlu2 %6395, %v7438_v43  }
 0x5c9   :  { %1830 = vperm.xlu1 %6396, %v7438_v43   ;;  %v1526_v43 = vadd.f32 %v7659_v1, %v7256_v39 }
 0x5cb   :  { %v8062_v29 = vpop.permute.xlu1 %1721 }
 0x5d0   :  { %6397 = vset.pattern.permute.xlu2 %v7110_v35 }
 0x5d1   :  { %6398 = vset.pattern.permute.xlu1 %v7113_v36 }
 0x5d2   :  { %v8077_v5 = vpop.permute.xlu2 %1746 }
 0x5d8   :  { %1837 = vperm.xlu2 %6397, %v7521_v42  }
 0x5d9   :  { %1843 = vperm.xlu1 %6398, %v7521_v42  }
 0x5db   :  { %v8066_v0 = vpop.permute.xlu1 %1740 }
 0x5e0   :  { %6399 = vset.pattern.permute.xlu2 %v7144_v23 }
 0x5e1   :  { %6400 = vset.pattern.permute.xlu1 %v7147_v60 }
 0x5e2   :  { %v8083_v44 = vpop.permute.xlu2 %1764 }
 0x5e8   :  { %1855 = vperm.xlu2 %6399, %v7521_v42  }
 0x5e9   :  { %1861 = vperm.xlu1 %6400, %v7521_v42  }
 0x5eb   :  { %v1753_v58 = vpop.permute.xlu1 %1752 }
 0x5ec   :  { %v8072_v52 = vadd.f32 %v1753_v58, %v1526_v43  ;;  %v1532_v43 = vadd.f32 %v7661_v15, %v7276_v54 }
 0x5ee   :  { %12600 = vst [vmem:[#allocation256_spill] sm:$0xff] %v8072_v52  ;;  %2853 = vperm.xlu0 %6490, %v8072_v52   ;;  %v8095_v52 = vadd.f32 %v7925_v49, %v1532_v43  ;;  %v1538_v49 = vadd.f32 %v7697_v41, %v7293_v10  ;;  %v1541_v43 = vadd.f32 %v7705_v55, %v7303_v40 }
 0x5f0   :  { %6401 = vset.pattern.permute.xlu2 %v7170_v7  ;;  %12602 = vst [vmem:[#allocation258_spill] sm:$0xff] %v8095_v52 }
 0x5f1   :  { %6402 = vset.pattern.permute.xlu1 %v7167_v2 }
 0x5f2   :  { %v8092_v58 = vpop.permute.xlu2 %1776 }
 0x5f8   :  { %1867 = vperm.xlu2 %6401, %v7521_v42  }
 0x5f9   :  { %1873 = vperm.xlu1 %6402, %v7521_v42  }
 0x5fb   :  { %v1771_v39 = vpop.permute.xlu1 %1770 }
 0x5fc   :  { %v8085_v1 = vadd.f32 %v1771_v39, %v1529_v4 }
 0x5fe   :  { %12601 = vst [vmem:[#allocation257_spill] sm:$0xff] %v8085_v1  ;;  %2862 = vperm.xlu0 %6490, %v8085_v1  }
 0x600   :  { %6403 = vset.pattern.permute.xlu2 %v7179_v14 }
 0x601   :  { %6404 = vset.pattern.permute.xlu1 %v7182_v16 }
 0x602   :  { %v8100_v17 = vpop.permute.xlu2 %1794 }
 0x606   :  { %2871 = vperm.xlu0 %6490, %v8095_v52  }
 0x608   :  { %1885 = vperm.xlu2 %6403, %v7521_v42  }
 0x609   :  { %1891 = vperm.xlu1 %6404, %v7521_v42  }
 0x60b   :  { %v8120_v25 = vpop.permute.xlu1 %1782 }
 0x610   :  { %6405 = vset.pattern.permute.xlu2 %v7194_v22 }
 0x611   :  { %6406 = vset.pattern.permute.xlu1 %v7191_v31 }
 0x612   :  { %v1807_v54 = vpop.permute.xlu2 %1806 }
 0x613   :  { %v8106_v15 = vadd.f32 %v1807_v54, %v1535_v24 }
 0x615   :  { %12603 = vst [vmem:[#allocation259_spill] sm:$0xff] %v8106_v15  ;;  %2880 = vperm.xlu0 %6490, %v8106_v15  }
 0x618   :  { %1897 = vperm.xlu2 %6405, %v7521_v42  }
 0x619   :  { %1903 = vperm.xlu1 %6406, %v7521_v42  }
 0x61b   :  { %v8124_v39 = vpop.permute.xlu1 %1800 }
 0x620   :  { %6407 = vset.pattern.permute.xlu2 %v7205_v47 }
 0x621   :  { %6408 = vset.pattern.permute.xlu1 %v7208_v51 }
 0x622   :  { %v1825_v4 = vpop.permute.xlu2 %1824 }
 0x623   :  { %v8115_v32 = vadd.f32 %v1825_v4, %v1538_v49  ;;  %v1544_v49 = vadd.f32 %v7699_v30, %v7310_v21  ;;  %v1550_v30 = vadd.f32 %v7755_v3, %v7329_v37 }
 0x625   :  { %12604 = vst [vmem:[#allocation260_spill] sm:$0xff] %v8115_v32  ;;  %2889 = vperm.xlu0 %6490, %v8115_v32   ;;  %v12626_v32 = vld [vmem:[#allocation177_spill] sm:$0xff] }
 0x628   :  { %1915 = vperm.xlu2 %6407, %v7521_v42  }
 0x629   :  { %1921 = vperm.xlu1 %6408, %v7521_v42  }
 0x62b   :  { %v8128_v41 = vpop.permute.xlu1 %1812 }
 0x630   :  { %6409 = vset.pattern.permute.xlu2 %v7221_v46 }
 0x631   :  { %6410 = vset.pattern.permute.xlu1 %v7110_v35 }
 0x638   :  { %1927 = vperm.xlu2 %6409, %v7521_v42   ;;  %v8143_v42 = vpop.permute.xlu2 %1837 }
 0x639   :  { %1934 = vperm.xlu1 %6410, %v7161_v6  }
 0x63b   :  { %v8132_v10 = vpop.permute.xlu1 %1830 }
 0x640   :  { %6412 = vset.pattern.permute.xlu2 %v7116_v38 }
 0x641   :  { %6413 = vset.pattern.permute.xlu1 %v7144_v23 }
 0x642   :  { %v8149_v4 = vpop.permute.xlu2 %1855 }
 0x648   :  { %1946 = vperm.xlu2 %6412, %v7161_v6  }
 0x649   :  { %1952 = vperm.xlu1 %6413, %v7161_v6  }
 0x64b   :  { %v1844_v24 = vpop.permute.xlu1 %1843 }
 0x64c   :  { %v8138_v54 = vadd.f32 %v1844_v24, %v1541_v43  ;;  %v1547_v43 = vadd.f32 %v7707_v34, %v7322_v53 }
 0x64e   :  { %12605 = vst [vmem:[#allocation261_spill] sm:$0xff] %v8138_v54  ;;  %2898 = vperm.xlu0 %6490, %v8138_v54   ;;  %v8161_v54 = vadd.f32 %v8016_v62, %v1547_v43  ;;  %v1553_v62 = vadd.f32 %v7745_v20, %v7336_v28  ;;  %v1556_v43 = vadd.f32 %v7751_v19, %v7346_v61 }
 0x650   :  { %6414 = vset.pattern.permute.xlu2 %v7147_v60  ;;  %12607 = vst [vmem:[#allocation263_spill] sm:$0xff] %v8161_v54 }
 0x651   :  { %6415 = vset.pattern.permute.xlu1 %v7170_v7 }
 0x652   :  { %v8158_v24 = vpop.permute.xlu2 %1867 }
 0x658   :  { %1958 = vperm.xlu2 %6414, %v7161_v6  }
 0x659   :  { %1964 = vperm.xlu1 %6415, %v7161_v6  }
 0x65b   :  { %v1862_v40 = vpop.permute.xlu1 %1861 }
 0x65c   :  { %v8151_v55 = vadd.f32 %v1862_v40, %v1544_v49 }
 0x65e   :  { %12606 = vst [vmem:[#allocation262_spill] sm:$0xff] %v8151_v55  ;;  %2907 = vperm.xlu0 %6490, %v8151_v55   ;;  %v12625_v55 = vld [vmem:[#allocation75_spill] sm:$0xff] }
 0x65f   :  { %v1574_v15 = vadd.f32 %v12626_v32, %v12625_v55  ;;  %v12634_v32 = vld [vmem:[#allocation79_spill] sm:$0xff]  ;;  %v12635_v55 = vld [vmem:[#allocation222_spill] sm:$0xff] }
 0x660   :  { %6417 = vset.pattern.permute.xlu2 %v7269_v12 }
 0x661   :  { %6418 = vset.pattern.permute.xlu1 %v7179_v14 }
 0x662   :  { %v8166_v21 = vpop.permute.xlu2 %1885 }
 0x666   :  { %2916 = vperm.xlu0 %6490, %v8161_v54  }
 0x668   :  { %1976 = vperm.xlu2 %6417, %v7161_v6  }
 0x669   :  { %1982 = vperm.xlu1 %6418, %v7161_v6  }
 0x66b   :  { %v8186_v3 = vpop.permute.xlu1 %1873 }
 0x670   :  { %6419 = vset.pattern.permute.xlu2 %v7182_v16 }
 0x671   :  { %6420 = vset.pattern.permute.xlu1 %v7194_v22 }
 0x672   :  { %v1898_v34 = vpop.permute.xlu2 %1897 }
 0x673   :  { %v8172_v53 = vadd.f32 %v1898_v34, %v1550_v30 }
 0x675   :  { %12608 = vst [vmem:[#allocation264_spill] sm:$0xff] %v8172_v53  ;;  %2925 = vperm.xlu0 %6490, %v8172_v53  }
 0x678   :  { %1988 = vperm.xlu2 %6419, %v7161_v6  }
 0x679   :  { %1994 = vperm.xlu1 %6420, %v7161_v6  }
 0x67b   :  { %v8190_v40 = vpop.permute.xlu1 %1891 }
 0x680   :  { %6422 = vset.pattern.permute.xlu2 %v7296_v59 }
 0x681   :  { %6423 = vset.pattern.permute.xlu1 %v7205_v47 }
 0x682   :  { %v1916_v49 = vpop.permute.xlu2 %1915 }
 0x683   :  { %v8181_v37 = vadd.f32 %v1916_v49, %v1553_v62  ;;  %v1559_v62 = vadd.f32 %v7747_v26, %v7359_v9  ;;  %v12616_v9 = vld [vmem:[#allocation192_spill] sm:$0xff] }
 0x685   :  { %12609 = vst [vmem:[#allocation265_spill] sm:$0xff] %v8181_v37  ;;  %2934 = vperm.xlu0 %6490, %v8181_v37   ;;  %v12613_v37 = vld [vmem:[#allocation137_spill] sm:$0xff] }
 0x688   :  { %2006 = vperm.xlu2 %6422, %v7161_v6  }
 0x689   :  { %2012 = vperm.xlu1 %6423, %v7161_v6  }
 0x68b   :  { %v8194_v28 = vpop.permute.xlu1 %1903 }
 0x690   :  { %6424 = vset.pattern.permute.xlu2 %v7208_v51 }
 0x691   :  { %6425 = vset.pattern.permute.xlu1 %v7221_v46 }
 0x698   :  { %2018 = vperm.xlu2 %6424, %v7161_v6  }
 0x699   :  { %2024 = vperm.xlu1 %6425, %v7161_v6   ;;  %v8209_v6 = vpop.permute.xlu2 %1927 }
 0x69b   :  { %v8198_v20 = vpop.permute.xlu1 %1921 }
 0x6a0   :  { %6427 = vset.pattern.permute.xlu2 %v7113_v36 }
 0x6a1   :  { %6428 = vset.pattern.permute.xlu1 %v7116_v38 }
 0x6a2   :  { %v8215_v49 = vpop.permute.xlu2 %1946 }
 0x6a8   :  { %2037 = vperm.xlu2 %6427, %v7254_v48  }
 0x6a9   :  { %2043 = vperm.xlu1 %6428, %v7254_v48  }
 0x6ab   :  { %v1935_v30 = vpop.permute.xlu1 %1934 }
 0x6ac   :  { %v8204_v34 = vadd.f32 %v1935_v30, %v1556_v43  ;;  %v12612_v43 = vld [vmem:[#allocation163_spill] sm:$0xff] }
 0x6ad   :  { %v1562_v30 = vadd.f32 %v12612_v43, %v7369_v63  ;;  %v12615_v63 = vld [vmem:[#allocation69_spill] sm:$0xff] }
 0x6ae   :  { %12610 = vst [vmem:[#allocation266_spill] sm:$0xff] %v8204_v34  ;;  %2943 = vperm.xlu0 %6490, %v8204_v34  }
 0x6af   :  { %v8227_v53 = vadd.f32 %v12613_v37, %v1562_v30  ;;  %v12618_v37 = vld [vmem:[#allocation71_spill] sm:$0xff]  ;;  %v12619_v30 = vld [vmem:[#allocation176_spill] sm:$0xff] }
 0x6b0   :  { %6429 = vset.pattern.permute.xlu2 %v7144_v23 }
 0x6b1   :  { %6430 = vset.pattern.permute.xlu1 %v7147_v60  ;;  %12614 = vst [vmem:[#allocation163_spill] sm:$0xff] %v8227_v53 }
 0x6b2   :  { %v8224_v34 = vpop.permute.xlu2 %1958 }
 0x6b8   :  { %2049 = vperm.xlu2 %6429, %v7254_v48  }
 0x6b9   :  { %2055 = vperm.xlu1 %6430, %v7254_v48  }
 0x6bb   :  { %v1953_v19 = vpop.permute.xlu1 %1952 }
 0x6bc   :  { %v8217_v61 = vadd.f32 %v1953_v19, %v1559_v62  ;;  %v1565_v62 = vadd.f32 %v12616_v9, %v12615_v63 }
 0x6be   :  { %12611 = vst [vmem:[#allocation267_spill] sm:$0xff] %v8217_v61  ;;  %2952 = vperm.xlu0 %6490, %v8217_v61  }
 0x6c0   :  { %6432 = vset.pattern.permute.xlu2 %v7167_v2 }
 0x6c1   :  { %6433 = vset.pattern.permute.xlu1 %v7269_v12 }
 0x6c2   :  { %v8232_v26 = vpop.permute.xlu2 %1976 }
 0x6c6   :  { %2961 = vperm.xlu0 %6490, %v8227_v53   ;;  %v1568_v53 = vadd.f32 %v12619_v30, %v12618_v37  ;;  %v12622_v37 = vld [vmem:[#allocation73_spill] sm:$0xff]  ;;  %v12623_v30 = vld [vmem:[#allocation179_spill] sm:$0xff] }
 0x6c8   :  { %2067 = vperm.xlu2 %6432, %v7254_v48  }
 0x6c9   :  { %2073 = vperm.xlu1 %6433, %v7254_v48  }
 0x6cb   :  { %v8252_v9 = vpop.permute.xlu1 %1964 }
 0x6d0   :  { %6434 = vset.pattern.permute.xlu2 %v7179_v14 }
 0x6d1   :  { %6435 = vset.pattern.permute.xlu1 %v7182_v16 }
 0x6d2   :  { %v1989_v19 = vpop.permute.xlu2 %1988 }
 0x6d3   :  { %v8238_v43 = vadd.f32 %v1989_v19, %v1565_v62  ;;  %v12621_v19 = vld [vmem:[#allocation66_spill] sm:$0xff] }
 0x6d5   :  { %12617 = vst [vmem:[#allocation137_spill] sm:$0xff] %v8238_v43  ;;  %2970 = vperm.xlu0 %6490, %v8238_v43  }
 0x6d8   :  { %2079 = vperm.xlu2 %6434, %v7254_v48  }
 0x6d9   :  { %2085 = vperm.xlu1 %6435, %v7254_v48  }
 0x6db   :  { %v8256_v62 = vpop.permute.xlu1 %1982 }
 0x6e0   :  { %6437 = vset.pattern.permute.xlu2 %v7191_v31 }
 0x6e1   :  { %6438 = vset.pattern.permute.xlu1 %v7296_v59 }
 0x6e2   :  { %v2007_v61 = vpop.permute.xlu2 %2006 }
 0x6e3   :  { %v8247_v63 = vadd.f32 %v2007_v61, %v1568_v53 }
 0x6e5   :  { %12620 = vst [vmem:[#allocation69_spill] sm:$0xff] %v8247_v63  ;;  %2979 = vperm.xlu0 %6490, %v8247_v63   ;;  %v1571_v63 = vadd.f32 %v12623_v30, %v12622_v37  ;;  %v12629_v30 = vld [vmem:[#allocation180_spill] sm:$0xff] }
 0x6e8   :  { %2097 = vperm.xlu2 %6437, %v7254_v48  }
 0x6e9   :  { %2103 = vperm.xlu1 %6438, %v7254_v48  }
 0x6eb   :  { %v8260_v53 = vpop.permute.xlu1 %1994 }
 0x6f0   :  { %6439 = vset.pattern.permute.xlu2 %v7205_v47 }
 0x6f1   :  { %6440 = vset.pattern.permute.xlu1 %v7208_v51 }
 0x6f8   :  { %2109 = vperm.xlu2 %6439, %v7254_v48  }
 0x6f9   :  { %2115 = vperm.xlu1 %6440, %v7254_v48   ;;  %v8275_v48 = vpop.permute.xlu2 %2018 }
 0x6fb   :  { %v8264_v61 = vpop.permute.xlu1 %2012 }
 0x700   :  { %6442 = vset.pattern.permute.xlu2 %v7110_v35 }
 0x701   :  { %6443 = vset.pattern.permute.xlu1 %v7113_v36 }
 0x702   :  { %v8281_v52 = vpop.permute.xlu2 %2037 }
 0x708   :  { %2128 = vperm.xlu2 %6442, %v12621_v19  }
 0x709   :  { %2134 = vperm.xlu1 %6443, %v12621_v19  }
 0x70b   :  { %v2025_v43 = vpop.permute.xlu1 %2024 }
 0x70c   :  { %v8270_v54 = vadd.f32 %v2025_v43, %v1571_v63  ;;  %v12628_v63 = vld [vmem:[#allocation77_spill] sm:$0xff] }
 0x70e   :  { %12624 = vst [vmem:[#allocation192_spill] sm:$0xff] %v8270_v54  ;;  %2988 = vperm.xlu0 %6490, %v8270_v54   ;;  %v1577_v54 = vadd.f32 %v12629_v30, %v12628_v63 }
 0x710   :  { %6444 = vset.pattern.permute.xlu2 %v7116_v38  ;;  %v8293_v45 = vadd.f32 %v12631_v50, %v1577_v54  ;;  %v12637_v50 = vld [vmem:[#allocation81_spill] sm:$0xff] }
 0x711   :  { %6445 = vset.pattern.permute.xlu1 %v7144_v23  ;;  %v12638_v54 = vld [vmem:[#allocation193_spill] sm:$0xff] }
 0x712   :  { %v8290_v1 = vpop.permute.xlu2 %2049  ;;  %12632 = vst [vmem:[#allocation66_spill] sm:$0xff] %v8293_v45 }
 0x713   :  { %12630 = vst [vmem:[#allocation176_spill] sm:$0xff] %v8290_v1 }
 0x718   :  { %2140 = vperm.xlu2 %6444, %v12621_v19  }
 0x719   :  { %2146 = vperm.xlu1 %6445, %v12621_v19  }
 0x71b   :  { %v2044_v37 = vpop.permute.xlu1 %2043 }
 0x71c   :  { %v8283_v43 = vadd.f32 %v2044_v37, %v1574_v15  ;;  %v1580_v37 = vadd.f32 %v12635_v55, %v12634_v32 }
 0x71e   :  { %12627 = vst [vmem:[#allocation71_spill] sm:$0xff] %v8283_v43  ;;  %2997 = vperm.xlu0 %6490, %v8283_v43  }
 0x720   :  { %6447 = vset.pattern.permute.xlu2 %v7170_v7 }
 0x721   :  { %6448 = vset.pattern.permute.xlu1 %v7167_v2 }
 0x722   :  { %v8298_v15 = vpop.permute.xlu2 %2067 }
 0x723   :  { %12633 = vst [vmem:[#allocation73_spill] sm:$0xff] %v8298_v15 }
 0x726   :  { %3006 = vperm.xlu0 %6490, %v8293_v45   ;;  %v1583_v45 = vadd.f32 %v12638_v54, %v12637_v50  ;;  %v12645_v50 = vld [vmem:[#allocation83_spill] sm:$0xff] }
 0x727   :  { %v12646_v54 = vld [vmem:[#allocation195_spill] sm:$0xff] }
 0x728   :  { %2158 = vperm.xlu2 %6447, %v12621_v19  }
 0x729   :  { %2164 = vperm.xlu1 %6448, %v12621_v19  }
 0x72b   :  { %v8318_v55 = vpop.permute.xlu1 %2055 }
 0x72c   :  { %12640 = vst [vmem:[#allocation177_spill] sm:$0xff] %v8318_v55 }
 0x730   :  { %6449 = vset.pattern.permute.xlu2 %v7269_v12 }
 0x731   :  { %6450 = vset.pattern.permute.xlu1 %v7179_v14 }
 0x732   :  { %v2080_v63 = vpop.permute.xlu2 %2079 }
 0x733   :  { %v8304_v30 = vadd.f32 %v2080_v63, %v1580_v37  ;;  %v12644_v63 = vld [vmem:[#allocation85_spill] sm:$0xff] }
 0x735   :  { %12636 = vst [vmem:[#allocation179_spill] sm:$0xff] %v8304_v30  ;;  %3015 = vperm.xlu0 %6490, %v8304_v30  }
 0x738   :  { %2170 = vperm.xlu2 %6449, %v12621_v19  }
 0x739   :  { %2176 = vperm.xlu1 %6450, %v12621_v19  }
 0x73b   :  { %v8322_v37 = vpop.permute.xlu1 %2073 }
 0x73c   :  { %12641 = vst [vmem:[#allocation77_spill] sm:$0xff] %v8322_v37 }
 0x740   :  { %6452 = vset.pattern.permute.xlu2 %v7194_v22 }
 0x741   :  { %6453 = vset.pattern.permute.xlu1 %v7191_v31 }
 0x742   :  { %v2098_v43 = vpop.permute.xlu2 %2097 }
 0x743   :  { %v8313_v32 = vadd.f32 %v2098_v43, %v1583_v45 }
 0x745   :  { %12639 = vst [vmem:[#allocation75_spill] sm:$0xff] %v8313_v32  ;;  %3024 = vperm.xlu0 %6490, %v8313_v32   ;;  %v1586_v32 = vadd.f32 %v12646_v54, %v12645_v50  ;;  %v12653_v54 = vld [vmem:[#allocation196_spill] sm:$0xff] }
 0x748   :  { %2188 = vperm.xlu2 %6452, %v12621_v19  }
 0x749   :  { %2194 = vperm.xlu1 %6453, %v12621_v19  }
 0x74b   :  { %v8326_v45 = vpop.permute.xlu1 %2085 }
 0x74c   :  { %12642 = vst [vmem:[#allocation180_spill] sm:$0xff] %v8326_v45 }
 0x750   :  { %6454 = vset.pattern.permute.xlu2 %v7296_v59 }
 0x751   :  { %6455 = vset.pattern.permute.xlu1 %v7205_v47 }
 0x752   :  { %v8341_v45 = vpop.permute.xlu2 %2109 }
 0x753   :  { %12648 = vst [vmem:[#allocation222_spill] sm:$0xff] %v8341_v45  ;;  %v12654_v45 = vld [vmem:[#allocation189_spill] sm:$0xff] }
 0x758   :  { %2200 = vperm.xlu2 %6454, %v12621_v19  }
 0x759   :  { %2206 = vperm.xlu1 %6455, %v12621_v19  }
 0x75b   :  { %v8330_v43 = vpop.permute.xlu1 %2103 }
 0x75c   :  { %12643 = vst [vmem:[#allocation162_spill] sm:$0xff] %v8330_v43  ;;  %v12650_v43 = vld [vmem:[#allocation194_spill] sm:$0xff] }
 0x760   :  { %6457 = vset.pattern.permute.xlu2 %v7221_v46 }
 0x761   :  { %6458 = vset.pattern.permute.xlu1 %v7110_v35 }
 0x762   :  { %v8347_v1 = vpop.permute.xlu2 %2128 }
 0x768   :  { %2218 = vperm.xlu2 %6457, %v12621_v19   ;;  %v12649_v19 = vld [vmem:[#allocation86_spill] sm:$0xff] }
 0x769   :  { %2225 = vperm.xlu1 %6458, %v12644_v63   ;;  %v1589_v37 = vadd.f32 %v12650_v43, %v12649_v19  ;;  %v12656_v43 = vld [vmem:[#allocation91_spill] sm:$0xff] }
 0x76a   :  { %v1595_v19 = vadd.f32 %v8004_v56, %v12656_v43 }
 0x76b   :  { %v2116_v30 = vpop.permute.xlu1 %2115 }
 0x76c   :  { %v8336_v15 = vadd.f32 %v2116_v30, %v1586_v32  ;;  %v12652_v32 = vld [vmem:[#allocation89_spill] sm:$0xff] }
 0x76e   :  { %12647 = vst [vmem:[#allocation79_spill] sm:$0xff] %v8336_v15  ;;  %3033 = vperm.xlu0 %6490, %v8336_v15   ;;  %v1592_v15 = vadd.f32 %v12653_v54, %v12652_v32 }
 0x770   :  { %6459 = vset.pattern.permute.xlu2 %v7113_v36  ;;  %v8359_v55 = vadd.f32 %v12654_v45, %v1592_v15  ;;  %v12658_v15 = vld [vmem:[#allocation93_spill] sm:$0xff] }
 0x771   :  { %6460 = vset.pattern.permute.xlu1 %v7116_v38  ;;  %v12659_v45 = vld [vmem:[#allocation209_spill] sm:$0xff] }
 0x772   :  { %v8356_v38 = vpop.permute.xlu2 %2140  ;;  %12655 = vst [vmem:[#allocation193_spill] sm:$0xff] %v8359_v55  ;;  %v1598_v54 = vadd.f32 %v12659_v45, %v12658_v15 }
 0x778   :  { %2231 = vperm.xlu2 %6459, %v12644_v63  }
 0x779   :  { %2237 = vperm.xlu1 %6460, %v12644_v63  }
 0x77b   :  { %v2135_v50 = vpop.permute.xlu1 %2134 }
 0x77c   :  { %v8349_v30 = vadd.f32 %v2135_v50, %v1589_v37 }
 0x77e   :  { %12651 = vst [vmem:[#allocation81_spill] sm:$0xff] %v8349_v30  ;;  %3042 = vperm.xlu0 %6490, %v8349_v30   ;;  %v12668_v30 = vld [vmem:[#allocation97_spill] sm:$0xff] }
 0x780   :  { %6462 = vset.pattern.permute.xlu2 %v7147_v60 }
 0x781   :  { %6463 = vset.pattern.permute.xlu1 %v7170_v7 }
 0x782   :  { %v8364_v37 = vpop.permute.xlu2 %2158 }
 0x786   :  { %3051 = vperm.xlu0 %6490, %v8359_v55  }
 0x788   :  { %2249 = vperm.xlu2 %6462, %v12644_v63  }
 0x789   :  { %2255 = vperm.xlu1 %6463, %v12644_v63  }
 0x790   :  { %6464 = vset.pattern.permute.xlu2 %v7167_v2 }
 0x791   :  { %6465 = vset.pattern.permute.xlu1 %v7269_v12  ;;  %v8384_v12 = vpop.permute.xlu1 %2146 }
 0x792   :  { %v2171_v50 = vpop.permute.xlu2 %2170 }
 0x793   :  { %v8370_v32 = vadd.f32 %v2171_v50, %v1595_v19  ;;  %v12663_v50 = vld [vmem:[#allocation95_spill] sm:$0xff] }
 0x795   :  { %12657 = vst [vmem:[#allocation85_spill] sm:$0xff] %v8370_v32  ;;  %3060 = vperm.xlu0 %6490, %v8370_v32   ;;  %v12667_v32 = vld [vmem:[#allocation105_spill] sm:$0xff] }
 0x798   :  { %2261 = vperm.xlu2 %6464, %v12644_v63  }
 0x799   :  { %2267 = vperm.xlu1 %6465, %v12644_v63  }
 0x79b   :  { %v8388_v43 = vpop.permute.xlu1 %2164 }
 0x7a0   :  { %6467 = vset.pattern.permute.xlu2 %v7182_v16 }
 0x7a1   :  { %6468 = vset.pattern.permute.xlu1 %v7194_v22 }
 0x7a2   :  { %v2189_v55 = vpop.permute.xlu2 %2188 }
 0x7a3   :  { %v8379_v56 = vadd.f32 %v2189_v55, %v1598_v54 }
 0x7a5   :  { %12660 = vst [vmem:[#allocation83_spill] sm:$0xff] %v8379_v56  ;;  %3069 = vperm.xlu0 %6490, %v8379_v56  }
 0x7a8   :  { %2279 = vperm.xlu2 %6467, %v12644_v63  }
 0x7a9   :  { %2285 = vperm.xlu1 %6468, %v12644_v63  }
 0x7ab   :  { %v8392_v55 = vpop.permute.xlu1 %2176 }
 0x7ac   :  { %12661 = vst [vmem:[#allocation195_spill] sm:$0xff] %v8392_v55 }
 0x7b0   :  { %6469 = vset.pattern.permute.xlu2 %v7191_v31 }
 0x7b1   :  { %6470 = vset.pattern.permute.xlu1 %v7296_v59  ;;  %v12664_v59 = vld [vmem:[#allocation212_spill] sm:$0xff] }
 0x7b2   :  { %v1601_v15 = vadd.f32 %v12664_v59, %v12663_v50  ;;  %v8407_v56 = vpop.permute.xlu2 %2200 }
 0x7b3   :  { %12666 = vst [vmem:[#allocation89_spill] sm:$0xff] %v8407_v56 }
 0x7b8   :  { %2291 = vperm.xlu2 %6469, %v12644_v63  }
 0x7b9   :  { %2297 = vperm.xlu1 %6470, %v12644_v63  }
 0x7bb   :  { %v8396_v19 = vpop.permute.xlu1 %2194 }
 0x7bc   :  { %12662 = vst [vmem:[#allocation86_spill] sm:$0xff] %v8396_v19 }
 0x7c0   :  { %6472 = vset.pattern.permute.xlu2 %v7208_v51 }
 0x7c1   :  { %6473 = vset.pattern.permute.xlu1 %v7221_v46 }
 0x7c2   :  { %v8413_v55 = vpop.permute.xlu2 %2218 }
 0x7c8   :  { %2309 = vperm.xlu2 %6472, %v12644_v63  }
 0x7c9   :  { %2315 = vperm.xlu1 %6473, %v12644_v63   ;;  %v12669_v63 = vld [vmem:[#allocation210_spill] sm:$0xff] }
 0x7ca   :  { %v1604_v19 = vadd.f32 %v12669_v63, %v12668_v30  ;;  %v12676_v63 = vld [vmem:[#allocation136_spill] sm:$0xff] }
 0x7cb   :  { %v2207_v45 = vpop.permute.xlu1 %2206 }
 0x7cc   :  { %v8402_v54 = vadd.f32 %v2207_v45, %v1601_v15  ;;  %v12671_v15 = vld [vmem:[#allocation99_spill] sm:$0xff] }
 0x7ce   :  { %12665 = vst [vmem:[#allocation194_spill] sm:$0xff] %v8402_v54  ;;  %3078 = vperm.xlu0 %6490, %v8402_v54   ;;  %v12673_v54 = vld [vmem:[#allocation217_spill] sm:$0xff] }
 0x7d0   :  { %6474 = vset.pattern.permute.xlu2 %v7110_v35  ;;  %v12672_v35 = vld [vmem:[#allocation213_spill] sm:$0xff] }
 0x7d1   :  { %6475 = vset.pattern.permute.xlu1 %v7113_v36  ;;  %v1607_v45 = vadd.f32 %v12672_v35, %v12671_v15  ;;  %v12679_v15 = vld [vmem:[#allocation225_spill] sm:$0xff] }
 0x7d2   :  { %v8422_v36 = vpop.permute.xlu2 %2231 }
 0x7d3   :  { %v8425_v56 = vadd.f32 %v12673_v54, %v1607_v45  ;;  %v12678_v54 = vld [vmem:[#allocation103_spill] sm:$0xff] }
 0x7d4   :  { %v1613_v35 = vadd.f32 %v12679_v15, %v12678_v54  ;;  %v12684_v54 = vld [vmem:[#allocation50_spill] sm:$0xff] }
 0x7d5   :  { %12674 = vst [vmem:[#allocation189_spill] sm:$0xff] %v8425_v56  ;;  %v12685_v15 = vld [vmem:[#allocation146_spill] sm:$0xff] }
 0x7d8   :  { %2322 = vperm.xlu2 %6474, %v12667_v32  }
 0x7d9   :  { %2328 = vperm.xlu1 %6475, %v12667_v32  }
 0x7db   :  { %v2226_v50 = vpop.permute.xlu1 %2225 }
 0x7dc   :  { %v8415_v59 = vadd.f32 %v2226_v50, %v1604_v19  ;;  %v12675_v19 = vld [vmem:[#allocation101_spill] sm:$0xff] }
 0x7de   :  { %12670 = vst [vmem:[#allocation196_spill] sm:$0xff] %v8415_v59  ;;  %3087 = vperm.xlu0 %6490, %v8415_v59   ;;  %v12696_v59 = vld [vmem:[#allocation9_spill] sm:$0xff] }
 0x7e0   :  { %6477 = vset.pattern.permute.xlu2 %v7144_v23  ;;  %v1610_v23 = vadd.f32 %v12676_v63, %v12675_v19 }
 0x7e1   :  { %6478 = vset.pattern.permute.xlu1 %v7147_v60 }
 0x7e2   :  { %v8430_v30 = vpop.permute.xlu2 %2249 }
 0x7e6   :  { %3096 = vperm.xlu0 %6490, %v8425_v56  }
 0x7e8   :  { %2340 = vperm.xlu2 %6477, %v12667_v32  }
 0x7e9   :  { %2346 = vperm.xlu1 %6478, %v12667_v32  }
 0x7f0   :  { %6479 = vset.pattern.permute.xlu2 %v7170_v7 }
 0x7f1   :  { %6480 = vset.pattern.permute.xlu1 %v7167_v2  ;;  %v8450_v2 = vpop.permute.xlu1 %2237 }
 0x7f2   :  { %v2262_v60 = vpop.permute.xlu2 %2261 }
 0x7f3   :  { %v8436_v50 = vadd.f32 %v2262_v60, %v1610_v23 }
 0x7f5   :  { %12677 = vst [vmem:[#allocation91_spill] sm:$0xff] %v8436_v50  ;;  %3105 = vperm.xlu0 %6490, %v8436_v50   ;;  %v12695_v50 = vld [vmem:[#allocation124_spill] sm:$0xff] }
 0x7f8   :  { %2352 = vperm.xlu2 %6479, %v12667_v32  }
 0x7f9   :  { %2358 = vperm.xlu1 %6480, %v12667_v32  }
 0x800   :  { %6482 = vset.pattern.permute.xlu2 %v7179_v14  ;;  %v8454_v14 = vpop.permute.xlu1 %2255 }
 0x801   :  { %6483 = vset.pattern.permute.xlu1 %v7182_v16 }
 0x802   :  { %v2280_v7 = vpop.permute.xlu2 %2279 }
 0x803   :  { %v8445_v45 = vadd.f32 %v2280_v7, %v1613_v35  ;;  %v1508_v35 = vadd.f32 %v12685_v15, %v12684_v54  ;;  %v12691_v54 = vld [vmem:[#allocation108_spill] sm:$0xff]  ;;  %v12692_v15 = vld [vmem:[#allocation226_spill] sm:$0xff] }
 0x805   :  { %12680 = vst [vmem:[#allocation93_spill] sm:$0xff] %v8445_v45  ;;  %3114 = vperm.xlu0 %6490, %v8445_v45   ;;  %v12694_v45 = vld [vmem:[#allocation51_spill] sm:$0xff] }
 0x806   :  { %v1510_v56 = vadd.f32 %v12695_v50, %v12694_v45  ;;  %v12705_v45 = vld [vmem:[#allocation8_spill] sm:$0xff] }
 0x808   :  { %2370 = vperm.xlu2 %6482, %v12667_v32  }
 0x809   :  { %2376 = vperm.xlu1 %6483, %v12667_v32  }
 0x80b   :  { %v8458_v16 = vpop.permute.xlu1 %2267 }
 0x810   :  { %6484 = vset.pattern.permute.xlu2 %v7194_v22  ;;  %v12681_v22 = vld [vmem:[#allocation106_spill] sm:$0xff] }
 0x811   :  { %6485 = vset.pattern.permute.xlu1 %v7191_v31  ;;  %v12682_v31 = vld [vmem:[#allocation228_spill] sm:$0xff] }
 0x812   :  { %v1616_v63 = vadd.f32 %v12682_v31, %v12681_v22  ;;  %v8478_v7 = vpop.permute.xlu2 %2291  ;;  %v12688_v22 = vld [vmem:[#allocation52_spill] sm:$0xff]  ;;  %v12689_v31 = vld [vmem:[#allocation125_spill] sm:$0xff] }
 0x818   :  { %2382 = vperm.xlu2 %6484, %v12667_v32  }
 0x819   :  { %2388 = vperm.xlu1 %6485, %v12667_v32  }
 0x81b   :  { %v8462_v19 = vpop.permute.xlu1 %2285 }
 0x820   :  { %6486 = vset.pattern.permute.xlu2 %v7205_v47  ;;  %v8474_v47 = vadd.f32 %v8000_v11, %v1508_v35  ;;  %v1619_v11 = vadd.f32 %v12692_v15, %v12691_v54  ;;  %v12701_v54 = vld [vmem:[#allocation229_spill] sm:$0xff] }
 0x821   :  { %6487 = vset.pattern.permute.xlu1 %v7208_v51  ;;  %v12687_v51 = vmov 0  }
 0x822   :  { %12686 = vst [vmem:[#allocation95_spill] sm:$0xff] %v8474_v47  ;;  %v8489_v35 = vpop.permute.xlu2 %2309 }
 0x828   :  { %2400 = vperm.xlu2 %6486, %v12667_v32  }
 0x829   :  { %2406 = vperm.xlu1 %6487, %v12667_v32  }
 0x82b   :  { %v2298_v23 = vpop.permute.xlu1 %2297 }
 0x82c   :  { %v8468_v60 = vadd.f32 %v2298_v23, %v1616_v63  ;;  %v1511_v63 = vadd.f32 %v12689_v31, %v12688_v22  ;;  %v12697_v22 = vld [vmem:[#allocation126_spill] sm:$0xff] }
 0x82d   :  { %v1513_v31 = vadd.f32 %v12697_v22, %v12696_v59  ;;  %v12703_v59 = vld [vmem:[#allocation247_spill] sm:$0xff]  ;;  %v12707_v22 = vld [vmem:[#allocation10_spill] sm:$0xff] }
 0x82e   :  { %12683 = vst [vmem:[#allocation209_spill] sm:$0xff] %v8468_v60  ;;  %3123 = vperm.xlu0 %6490, %v8468_v60   ;;  %v8484_v23 = vadd.f32 %v8008_v8, %v1511_v63  ;;  %v12698_v8 = vld [vmem:[#allocation250_spill] sm:$0xff] }
 0x82f   :  { %v12700_v63 = vld [vmem:[#allocation110_spill] sm:$0xff] }
 0x830   :  { %6488 = vset.pattern.permute.xlu2 %v7221_v46  ;;  %12690 = vst [vmem:[#allocation212_spill] sm:$0xff] %v8484_v23  ;;  %v1622_v15 = vadd.f32 %v12701_v54, %v12700_v63 }
 0x831   :  { %6489 = vset.pattern.permute.xlu1 %v12687_v51 }
 0x832   :  { %2799 = vperm.xlu1 %6489, %v8474_v47   ;;  %v8505_v47 = vadd.f32 %v8014_v18, %v1513_v31  ;;  %v8513_v50 = vadd.f32 %v12703_v59, %v1622_v15  ;;  %v12709_v18 = vld [vmem:[#allocation186_spill] sm:$0xff]  ;;  %v12712_v15 = vld [vmem:[#allocation53_spill] sm:$0xff] }
 0x833   :  { %v12713_v59 = vld [vmem:[#allocation249_spill] sm:$0xff] }
 0x834   :  { %12702 = vst [vmem:[#allocation210_spill] sm:$0xff] %v8505_v47 }
 0x835   :  { %12704 = vst [vmem:[#allocation99_spill] sm:$0xff] %v8513_v50 }
 0x838   :  { %2412 = vperm.xlu2 %6488, %v12667_v32   ;;  %v8500_v32 = vadd.f32 %v12698_v8, %v1510_v56  ;;  %v12706_v56 = vld [vmem:[#allocation123_spill] sm:$0xff]  ;;  %v12708_v8 = vld [vmem:[#allocation129_spill] sm:$0xff] }
 0x839   :  { %v1516_v63 = vadd.f32 %v12708_v8, %v12707_v22 }
 0x83a   :  { %2808 = vperm.xlu1 %6489, %v8484_v23   ;;  %12699 = vst [vmem:[#allocation97_spill] sm:$0xff] %v8500_v32 }
 0x83b   :  { %v2316_v46 = vpop.permute.xlu1 %2315 }
 0x83c   :  { %v8492_v60 = vadd.f32 %v2316_v46, %v1619_v11  ;;  %v8509_v11 = vpop.permute.xlu2 %2322  ;;  %v1512_v46 = vadd.f32 %v12706_v56, %v12705_v45  ;;  %v1515_v45 = vadd.f32 %v12713_v59, %v12712_v15  ;;  %v12714_v56 = vld [vmem:[#allocation11_spill] sm:$0xff]  ;;  %v12721_v15 = vld [vmem:[#allocation54_spill] sm:$0xff]  ;;  %v12722_v59 = vld [vmem:[#allocation132_spill] sm:$0xff] }
 0x83e   :  { %12693 = vst [vmem:[#allocation105_spill] sm:$0xff] %v8492_v60  ;;  %3132 = vperm.xlu0 %6490, %v8492_v60   ;;  %v8521_v31 = vadd.f32 %v12709_v18, %v1512_v46  ;;  %v12715_v60 = vld [vmem:[#allocation127_spill] sm:$0xff]  ;;  %v8535_v8 = vadd.f32 %v8025_v27, %v1515_v45  ;;  %v12723_v27 = vld [vmem:[#allocation12_spill] sm:$0xff] }
 0x83f   :  { %v1519_v22 = vadd.f32 %v12715_v60, %v12714_v56  ;;  %v12724_v60 = vld [vmem:[#allocation130_spill] sm:$0xff]  ;;  %v12726_v56 = vld [vmem:[#allocation205_spill] sm:$0xff] }
 0x840   :  { %6491 = vset.pattern.permute.xlu2 %v12687_v51  ;;  %12710 = vst [vmem:[#allocation213_spill] sm:$0xff] %v8521_v31  ;;  %v8524_v51 = vadd.f32 %v8054_v33, %v1516_v63  ;;  %v12718_v33 = vld [vmem:[#allocation112_spill] sm:$0xff]  ;;  %v12719_v63 = vld [vmem:[#allocation159_spill] sm:$0xff]  ;;  %v1522_v45 = vadd.f32 %v12724_v60, %v12723_v27 }
 0x841   :  { %2805 = vperm.xlu2 %6491, %v8500_v32   ;;  %12716 = vst [vmem:[#allocation101_spill] sm:$0xff] %v8535_v8  ;;  %v8538_v46 = vadd.f32 %v8058_v13, %v1519_v22  ;;  %v1625_v18 = vadd.f32 %v12719_v63, %v12718_v33  ;;  %v12729_v33 = vld [vmem:[#allocation134_spill] sm:$0xff] }
 0x842   :  { %2814 = vperm.xlu1 %6489, %v8505_v47   ;;  %12711 = vst [vmem:[#allocation217_spill] sm:$0xff] %v8524_v51  ;;  %v8555_v22 = vadd.f32 %v12726_v56, %v1522_v45 }
 0x843   :  { %12717 = vst [vmem:[#allocation136_spill] sm:$0xff] %v8538_v46 }
 0x844   :  { %v8527_v54 = vpop.permute.xlu2 %2340  ;;  %12727 = vst [vmem:[#allocation106_spill] sm:$0xff] %v8555_v22 }
 0x846   :  { %3141 = vperm.xlu0 %6490, %v8513_v50  }
 0x849   :  { %2811 = vperm.xlu2 %6491, %v8521_v31   ;;  %v1518_v31 = vadd.f32 %v12722_v59, %v12721_v15  ;;  %v12731_v15 = vld [vmem:[#allocation120_spill] sm:$0xff] }
 0x84a   :  { %2823 = vperm.xlu1 %6489, %v8524_v51  }
 0x84b   :  { %v8552_v13 = vadd.f32 %v8035_v57, %v1518_v31  ;;  %v12734_v57 = vld [vmem:[#allocation114_spill] sm:$0xff] }
 0x84c   :  { %v12735_v31 = vld [vmem:[#allocation242_spill] sm:$0xff] }
 0x84d   :  { %12725 = vst [vmem:[#allocation225_spill] sm:$0xff] %v8552_v13  ;;  %v1628_v60 = vadd.f32 %v12735_v31, %v12734_v57  ;;  %v12743_v57 = vld [vmem:[#allocation57_spill] sm:$0xff]  ;;  %v12744_v31 = vld [vmem:[#allocation135_spill] sm:$0xff] }
 0x851   :  { %2820 = vperm.xlu2 %6491, %v8535_v8  }
 0x852   :  { %2832 = vperm.xlu1 %6489, %v8538_v46   ;;  %v2353_v50 = vpop.permute.xlu2 %2352 }
 0x853   :  { %v8544_v51 = vadd.f32 %v2353_v50, %v1625_v18  ;;  %v12728_v50 = vld [vmem:[#allocation55_spill] sm:$0xff]  ;;  %v12730_v18 = vld [vmem:[#allocation13_spill] sm:$0xff] }
 0x854   :  { %v1521_v63 = vadd.f32 %v12729_v33, %v12728_v50  ;;  %v1525_v59 = vadd.f32 %v12731_v15, %v12730_v18  ;;  %v12737_v50 = vld [vmem:[#allocation56_spill] sm:$0xff]  ;;  %v12738_v33 = vld [vmem:[#allocation133_spill] sm:$0xff] }
 0x855   :  { %12720 = vst [vmem:[#allocation103_spill] sm:$0xff] %v8544_v51  ;;  %3150 = vperm.xlu0 %6490, %v8544_v51  }
 0x856   :  { %v8564_v51 = vadd.f32 %v8062_v29, %v1521_v63  ;;  %v8567_v27 = vadd.f32 %v8077_v5, %v1525_v59  ;;  %v12739_v29 = vld [vmem:[#allocation14_spill] sm:$0xff]  ;;  %v8588_v59 = vpop.permute.xlu1 %2328 }
 0x857   :  { %v12740_v63 = vld [vmem:[#allocation138_spill] sm:$0xff] }
 0x858   :  { %12732 = vst [vmem:[#allocation228_spill] sm:$0xff] %v8564_v51  ;;  %v1528_v18 = vadd.f32 %v12740_v63, %v12739_v29  ;;  %v12747_v63 = vld [vmem:[#allocation214_spill] sm:$0xff] }
 0x859   :  { %2829 = vperm.xlu2 %6491, %v8552_v13   ;;  %12733 = vst [vmem:[#allocation50_spill] sm:$0xff] %v8567_v27  ;;  %v12839_v13 = vld [vmem:[#allocation173_spill] sm:$0xff] }
 0x85a   :  { %2841 = vperm.xlu1 %6489, %v8555_v22   ;;  %v1524_v22 = vadd.f32 %v12738_v33, %v12737_v50  ;;  %v8584_v15 = vadd.f32 %v8083_v44, %v1528_v18  ;;  %v12745_v50 = vld [vmem:[#allocation15_spill] sm:$0xff]  ;;  %v12746_v33 = vld [vmem:[#allocation141_spill] sm:$0xff]  ;;  %v12750_v18 = vld [vmem:[#allocation58_spill] sm:$0xff] }
 0x85b   :  { %v1531_v29 = vadd.f32 %v12746_v33, %v12745_v50  ;;  %v12756_v33 = vld [vmem:[#allocation59_spill] sm:$0xff] }
 0x85c   :  { %v8581_v5 = vadd.f32 %v8066_v0, %v1524_v22  ;;  %12742 = vst [vmem:[#allocation125_spill] sm:$0xff] %v8584_v15 }
 0x85d   :  { %v8600_v44 = vadd.f32 %v8120_v25, %v1531_v29  ;;  %v12757_v29 = vld [vmem:[#allocation144_spill] sm:$0xff] }
 0x85e   :  { %12741 = vst [vmem:[#allocation52_spill] sm:$0xff] %v8581_v5  ;;  %v8604_v22 = vpop.permute.xlu1 %2346 }
 0x85f   :  { %12749 = vst [vmem:[#allocation226_spill] sm:$0xff] %v8600_v44 }
 0x861   :  { %2838 = vperm.xlu2 %6491, %v8564_v51  }
 0x862   :  { %2850 = vperm.xlu1 %6489, %v8567_v27   ;;  %v2371_v45 = vpop.permute.xlu2 %2370  ;;  %v12830_v27 = vld [vmem:[#allocation168_spill] sm:$0xff] }
 0x863   :  { %v8573_v56 = vadd.f32 %v2371_v45, %v1628_v60  ;;  %v1527_v60 = vadd.f32 %v12744_v31, %v12743_v57  ;;  %v8592_v45 = vpop.permute.xlu0 %1166  ;;  %v12752_v31 = vld [vmem:[#allocation16_spill] sm:$0xff] }
 0x865   :  { %12736 = vst [vmem:[#allocation146_spill] sm:$0xff] %v8573_v56  ;;  %3159 = vperm.xlu0 %6490, %v8573_v56   ;;  %v8597_v0 = vadd.f32 %v12747_v63, %v1527_v60  ;;  %v12751_v56 = vld [vmem:[#allocation131_spill] sm:$0xff]  ;;  %v1533_v63 = vadd.f32 %v12757_v29, %v12756_v33  ;;  %v12763_v33 = vld [vmem:[#allocation60_spill] sm:$0xff] }
 0x866   :  { %v1530_v57 = vadd.f32 %v12751_v56, %v12750_v18  ;;  %v12758_v56 = vld [vmem:[#allocation17_spill] sm:$0xff]  ;;  %v12759_v18 = vld [vmem:[#allocation142_spill] sm:$0xff]  ;;  %v12764_v29 = vld [vmem:[#allocation147_spill] sm:$0xff] }
 0x867   :  { %12748 = vst [vmem:[#allocation108_spill] sm:$0xff] %v8597_v0 }
 0x868   :  { %v8611_v50 = vadd.f32 %v8092_v58, %v1530_v57  ;;  %v8627_v58 = vadd.f32 %v8100_v17, %v1533_v63  ;;  %v12761_v57 = vld [vmem:[#allocation233_spill] sm:$0xff]  ;;  %v12769_v63 = vld [vmem:[#allocation116_spill] sm:$0xff] }
 0x869   :  { %2847 = vperm.xlu2 %6491, %v8581_v5   ;;  %v12753_v5 = vld [vmem:[#allocation139_spill] sm:$0xff] }
 0x86a   :  { %2859 = vperm.xlu1 %6489, %v8584_v15   ;;  %v1534_v51 = vadd.f32 %v12753_v5, %v12752_v31  ;;  %12754 = vst [vmem:[#allocation51_spill] sm:$0xff] %v8611_v50 }
 0x86b   :  { %v1910_v46 = vpop.permute.xlu0 %1909  ;;  %v8618_v25 = vpop.permute.xlu1 %2358  ;;  %12760 = vst [vmem:[#allocation9_spill] sm:$0xff] %v8627_v58 }
 0x86c   :  { %v8614_v60 = vadd.f32 %v8124_v39, %v1534_v51 }
 0x86e   :  { %12755 = vst [vmem:[#allocation124_spill] sm:$0xff] %v8614_v60 }
 0x871   :  { %2856 = vperm.xlu2 %6491, %v8597_v0   ;;  %v1537_v0 = vadd.f32 %v12759_v18, %v12758_v56  ;;  %v12765_v56 = vld [vmem:[#allocation18_spill] sm:$0xff]  ;;  %v12766_v18 = vld [vmem:[#allocation149_spill] sm:$0xff] }
 0x872   :  { %2868 = vperm.xlu1 %6489, %v8600_v44   ;;  %v8633_v51 = vpop.permute.xlu2 %2382 }
 0x873   :  { %v8624_v5 = vpop.permute.xlu0 %2394  ;;  %v8630_v39 = vadd.f32 %v12761_v57, %v1537_v0  ;;  %v12770_v57 = vld [vmem:[#allocation245_spill] sm:$0xff] }
 0x875   :  { %12762 = vst [vmem:[#allocation126_spill] sm:$0xff] %v8630_v39 }
 0x879   :  { %2865 = vperm.xlu2 %6491, %v8611_v50   ;;  %v1536_v50 = vadd.f32 %v12764_v29, %v12763_v33 }
 0x87a   :  { %2877 = vperm.xlu1 %6489, %v8614_v60   ;;  %v1540_v60 = vadd.f32 %v12766_v18, %v12765_v56  ;;  %v12772_v56 = vld [vmem:[#allocation61_spill] sm:$0xff] }
 0x87b   :  { %v8636_v31 = vpop.permute.xlu1 %2376  ;;  %v8642_v8 = vpop.permute.xlu0 %2802  ;;  %v8645_v17 = vadd.f32 %v8128_v41, %v1536_v50  ;;  %v12773_v18 = vld [vmem:[#allocation145_spill] sm:$0xff]  ;;  %v12774_v41 = vld [vmem:[#allocation19_spill] sm:$0xff] }
 0x87c   :  { %v8648_v0 = vadd.f32 %v8143_v42, %v1540_v60  ;;  %v1539_v44 = vadd.f32 %v12773_v18, %v12772_v56  ;;  %v12775_v50 = vld [vmem:[#allocation151_spill] sm:$0xff]  ;;  %v12780_v18 = vld [vmem:[#allocation20_spill] sm:$0xff] }
 0x87d   :  { %12767 = vst [vmem:[#allocation250_spill] sm:$0xff] %v8645_v17  ;;  %v1543_v47 = vadd.f32 %v12775_v50, %v12774_v41  ;;  %v12781_v41 = vld [vmem:[#allocation154_spill] sm:$0xff] }
 0x87e   :  { %12768 = vst [vmem:[#allocation110_spill] sm:$0xff] %v8648_v0  ;;  %v8666_v60 = vadd.f32 %v8132_v10, %v1539_v44  ;;  %v1546_v50 = vadd.f32 %v12781_v41, %v12780_v18  ;;  %v12786_v44 = vld [vmem:[#allocation243_spill] sm:$0xff]  ;;  %v12790_v41 = vld [vmem:[#allocation21_spill] sm:$0xff] }
 0x87f   :  { %v12788_v18 = vld [vmem:[#allocation63_spill] sm:$0xff] }
 0x880   :  { %12776 = vst [vmem:[#allocation247_spill] sm:$0xff] %v8666_v60  ;;  %v8683_v10 = vadd.f32 %v8186_v3, %v1546_v50  ;;  %v12791_v3 = vld [vmem:[#allocation152_spill] sm:$0xff] }
 0x881   :  { %2874 = vperm.xlu2 %6491, %v8627_v58   ;;  %v1631_v58 = vadd.f32 %v12770_v57, %v12769_v63  ;;  %v8669_v63 = vadd.f32 %v8149_v4, %v1543_v47  ;;  %v12778_v57 = vld [vmem:[#allocation62_spill] sm:$0xff]  ;;  %v1549_v50 = vadd.f32 %v12791_v3, %v12790_v41 }
 0x882   :  { %2886 = vperm.xlu1 %6489, %v8630_v39   ;;  %v8653_v39 = vpop.permute.xlu2 %2400  ;;  %12784 = vst [vmem:[#allocation10_spill] sm:$0xff] %v8683_v10  ;;  %v12785_v47 = vld [vmem:[#allocation118_spill] sm:$0xff] }
 0x883   :  { %v8663_v42 = vpop.permute.xlu0 %2817  ;;  %12777 = vst [vmem:[#allocation8_spill] sm:$0xff] %v8669_v63  ;;  %v12796_v3 = vld [vmem:[#allocation22_spill] sm:$0xff] }
 0x889   :  { %2883 = vperm.xlu2 %6491, %v8645_v17  }
 0x88a   :  { %2895 = vperm.xlu1 %6489, %v8648_v0   ;;  %v12803_v0 = vld [vmem:[#allocation23_spill] sm:$0xff] }
 0x88b   :  { %v2389_v33 = vpop.permute.xlu1 %2388  ;;  %v8685_v4 = vpop.permute.xlu0 %2826 }
 0x88c   :  { %v8656_v29 = vadd.f32 %v2389_v33, %v1631_v58  ;;  %v12779_v33 = vld [vmem:[#allocation148_spill] sm:$0xff] }
 0x88d   :  { %v1542_v56 = vadd.f32 %v12779_v33, %v12778_v57 }
 0x88e   :  { %12771 = vst [vmem:[#allocation229_spill] sm:$0xff] %v8656_v29  ;;  %3168 = vperm.xlu0 %6490, %v8656_v29   ;;  %v12782_v29 = vld [vmem:[#allocation244_spill] sm:$0xff] }
 0x88f   :  { %v8680_v17 = vadd.f32 %v12782_v29, %v1542_v56  ;;  %v12789_v29 = vld [vmem:[#allocation156_spill] sm:$0xff] }
 0x890   :  { %v1545_v56 = vadd.f32 %v12789_v29, %v12788_v18  ;;  %v12794_v18 = vld [vmem:[#allocation64_spill] sm:$0xff]  ;;  %v12795_v29 = vld [vmem:[#allocation157_spill] sm:$0xff] }
 0x891   :  { %2892 = vperm.xlu2 %6491, %v8666_v60   ;;  %12783 = vst [vmem:[#allocation123_spill] sm:$0xff] %v8680_v17  ;;  %v1634_v60 = vadd.f32 %v12786_v44, %v12785_v47  ;;  %v8704_v47 = vadd.f32 %v8190_v40, %v1549_v50  ;;  %v1548_v41 = vadd.f32 %v12795_v29, %v12794_v18  ;;  %v12802_v18 = vld [vmem:[#allocation160_spill] sm:$0xff] }
 0x892   :  { %2904 = vperm.xlu1 %6489, %v8669_v63   ;;  %v8673_v58 = vpop.permute.xlu2 %2412 }
 0x893   :  { %12793 = vst [vmem:[#allocation53_spill] sm:$0xff] %v8704_v47  ;;  %v8706_v44 = vpop.permute.xlu0 %2835 }
 0x899   :  { %2901 = vperm.xlu2 %6491, %v8680_v17   ;;  %v8701_v17 = vadd.f32 %v8158_v24, %v1545_v56  ;;  %v8719_v56 = vadd.f32 %v8166_v21, %v1548_v41 }
 0x89a   :  { %2913 = vperm.xlu1 %6489, %v8683_v10   ;;  %v12801_v10 = vld [vmem:[#allocation65_spill] sm:$0xff] }
 0x89b   :  { %v2407_v63 = vpop.permute.xlu1 %2406  ;;  %v8691_v57 = vpop.permute.xlu2 %2805  ;;  %12792 = vst [vmem:[#allocation186_spill] sm:$0xff] %v8701_v17  ;;  %v1551_v29 = vadd.f32 %v12802_v18, %v12801_v10  ;;  %v12808_v10 = vld [vmem:[#allocation67_spill] sm:$0xff]  ;;  %v12809_v18 = vld [vmem:[#allocation158_spill] sm:$0xff] }
 0x89c   :  { %v8693_v33 = vadd.f32 %v2407_v63, %v1634_v60  ;;  %12798 = vst [vmem:[#allocation249_spill] sm:$0xff] %v8719_v56  ;;  %v8723_v50 = vpop.permute.xlu0 %2844 }
 0x89d   :  { %12800 = vst [vmem:[#allocation127_spill] sm:$0xff] %v8723_v50  ;;  %v8736_v21 = vadd.f32 %v8194_v28, %v1551_v29 }
 0x89e   :  { %12787 = vst [vmem:[#allocation129_spill] sm:$0xff] %v8693_v33  ;;  %3177 = vperm.xlu0 %6490, %v8693_v33   ;;  %v12797_v33 = vld [vmem:[#allocation155_spill] sm:$0xff] }
 0x89f   :  { %v1552_v24 = vadd.f32 %v12797_v33, %v12796_v3  ;;  %v12804_v33 = vld [vmem:[#allocation172_spill] sm:$0xff]  ;;  %12805 = vst [vmem:[#allocation112_spill] sm:$0xff] %v8736_v21 }
 0x8a0   :  { %v1555_v3 = vadd.f32 %v12804_v33, %v12803_v0  ;;  %v12810_v0 = vld [vmem:[#allocation24_spill] sm:$0xff] }
 0x8a1   :  { %2910 = vperm.xlu2 %6491, %v8701_v17   ;;  %v8721_v40 = vadd.f32 %v1910_v46, %v1552_v24  ;;  %v12811_v33 = vld [vmem:[#allocation164_spill] sm:$0xff] }
 0x8a2   :  { %2922 = vperm.xlu1 %6489, %v8704_v47   ;;  %v8739_v46 = vadd.f32 %v8209_v6, %v1555_v3  ;;  %v1558_v28 = vadd.f32 %v12811_v33, %v12810_v0  ;;  %v12818_v0 = vld [vmem:[#allocation167_spill] sm:$0xff] }
 0x8a3   :  { %v8710_v60 = vpop.permute.xlu2 %2811  ;;  %12799 = vst [vmem:[#allocation11_spill] sm:$0xff] %v8721_v40 }
 0x8a4   :  { %v8712_v63 = vpop.permute.xlu1 %2799  ;;  %12806 = vst [vmem:[#allocation159_spill] sm:$0xff] %v8739_v46  ;;  %v8741_v41 = vpop.permute.xlu0 %2853  ;;  %v8757_v6 = vadd.f32 %v8215_v49, %v1558_v28 }
 0x8a6   :  { %12813 = vst [vmem:[#allocation12_spill] sm:$0xff] %v8757_v6 }
 0x8a9   :  { %2919 = vperm.xlu2 %6491, %v8719_v56  }
 0x8aa   :  { %2931 = vperm.xlu1 %6489, %v8721_v40   ;;  %v1554_v40 = vadd.f32 %v12809_v18, %v12808_v10  ;;  %v12817_v18 = vld [vmem:[#allocation25_spill] sm:$0xff] }
 0x8ab   :  { %v8727_v17 = vpop.permute.xlu2 %2820 }
 0x8ac   :  { %v8729_v47 = vpop.permute.xlu1 %2808  ;;  %v8754_v29 = vadd.f32 %v8198_v20, %v1554_v40  ;;  %v8759_v3 = vpop.permute.xlu0 %2862  ;;  %v1561_v20 = vadd.f32 %v12818_v0, %v12817_v18  ;;  %v12819_v40 = vld [vmem:[#allocation128_spill] sm:$0xff]  ;;  %v12825_v18 = vld [vmem:[#allocation26_spill] sm:$0xff]  ;;  %v12826_v0 = vld [vmem:[#allocation165_spill] sm:$0xff] }
 0x8ae   :  { %12812 = vst [vmem:[#allocation132_spill] sm:$0xff] %v8754_v29  ;;  %v8775_v49 = vadd.f32 %v8252_v9, %v1561_v20 }
 0x8b0   :  { %12821 = vst [vmem:[#allocation55_spill] sm:$0xff] %v8775_v49 }
 0x8b1   :  { %2928 = vperm.xlu2 %6491, %v8736_v21   ;;  %v12814_v21 = vld [vmem:[#allocation68_spill] sm:$0xff] }
 0x8b2   :  { %2940 = vperm.xlu1 %6489, %v8739_v46   ;;  %v12815_v46 = vld [vmem:[#allocation161_spill] sm:$0xff] }
 0x8b3   :  { %v8745_v24 = vpop.permute.xlu2 %2829  ;;  %v1557_v15 = vadd.f32 %v12815_v46, %v12814_v21 }
 0x8b4   :  { %12807 = vst [vmem:[#allocation54_spill] sm:$0xff] %v8745_v24  ;;  %v8747_v56 = vpop.permute.xlu1 %2814  ;;  %v8779_v28 = vpop.permute.xlu0 %2871 }
 0x8b5   :  { %v8772_v33 = vadd.f32 %v12819_v40, %v1557_v15  ;;  %v1564_v15 = vadd.f32 %v12826_v0, %v12825_v18  ;;  %v12832_v18 = vld [vmem:[#allocation72_spill] sm:$0xff]  ;;  %v12833_v0 = vld [vmem:[#allocation170_spill] sm:$0xff] }
 0x8b7   :  { %12820 = vst [vmem:[#allocation205_spill] sm:$0xff] %v8772_v33  ;;  %v8793_v9 = vadd.f32 %v8256_v62, %v1564_v15  ;;  %v12835_v62 = vld [vmem:[#allocation143_spill] sm:$0xff] }
 0x8b9   :  { %2937 = vperm.xlu2 %6491, %v8754_v29   ;;  %v12823_v29 = vld [vmem:[#allocation70_spill] sm:$0xff]  ;;  %12828 = vst [vmem:[#allocation120_spill] sm:$0xff] %v8793_v9 }
 0x8ba   :  { %2949 = vperm.xlu1 %6489, %v8757_v6   ;;  %v12824_v6 = vld [vmem:[#allocation183_spill] sm:$0xff] }
 0x8bb   :  { %v8765_v32 = vpop.permute.xlu2 %2838  ;;  %v1560_v23 = vadd.f32 %v12824_v6, %v12823_v29 }
 0x8bc   :  { %12816 = vst [vmem:[#allocation130_spill] sm:$0xff] %v8765_v32  ;;  %v8767_v10 = vpop.permute.xlu1 %2823  ;;  %v8797_v20 = vpop.permute.xlu0 %2880 }
 0x8bd   :  { %v8790_v40 = vadd.f32 %v8224_v34, %v1560_v23  ;;  %v1563_v34 = vadd.f32 %v12833_v0, %v12832_v18  ;;  %v12840_v18 = vld [vmem:[#allocation28_spill] sm:$0xff]  ;;  %v12841_v0 = vld [vmem:[#allocation202_spill] sm:$0xff] }
 0x8bf   :  { %12827 = vst [vmem:[#allocation13_spill] sm:$0xff] %v8790_v40  ;;  %v8808_v23 = vadd.f32 %v8232_v26, %v1563_v34  ;;  %v1570_v26 = vadd.f32 %v12841_v0, %v12840_v18  ;;  %v12847_v18 = vld [vmem:[#allocation29_spill] sm:$0xff] }
 0x8c0   :  { %v12848_v0 = vld [vmem:[#allocation181_spill] sm:$0xff] }
 0x8c1   :  { %2946 = vperm.xlu2 %6491, %v8772_v33   ;;  %12834 = vst [vmem:[#allocation242_spill] sm:$0xff] %v8808_v23 }
 0x8c2   :  { %2958 = vperm.xlu1 %6489, %v8775_v49   ;;  %v12829_v49 = vld [vmem:[#allocation27_spill] sm:$0xff] }
 0x8c3   :  { %v8781_v21 = vpop.permute.xlu2 %2847  ;;  %v1567_v29 = vadd.f32 %v12830_v27, %v12829_v49  ;;  %v12838_v49 = vld [vmem:[#allocation74_spill] sm:$0xff] }
 0x8c4   :  { %v8783_v46 = vpop.permute.xlu1 %2832  ;;  %v1566_v32 = vadd.f32 %v12839_v13, %v12838_v49  ;;  %v12845_v13 = vld [vmem:[#allocation76_spill] sm:$0xff]  ;;  %v12846_v49 = vld [vmem:[#allocation171_spill] sm:$0xff] }
 0x8c5   :  { %12822 = vst [vmem:[#allocation134_spill] sm:$0xff] %v8783_v46  ;;  %v8811_v15 = vadd.f32 %v12835_v62, %v1567_v29  ;;  %v8829_v29 = vadd.f32 %v8275_v48, %v1570_v26  ;;  %v12851_v26 = vld [vmem:[#allocation78_spill] sm:$0xff] }
 0x8c6   :  { %v8826_v34 = vadd.f32 %v8260_v53, %v1566_v32  ;;  %v1573_v53 = vadd.f32 %v12848_v0, %v12847_v18  ;;  %v12856_v18 = vld [vmem:[#allocation184_spill] sm:$0xff] }
 0x8c7   :  { %12836 = vst [vmem:[#allocation56_spill] sm:$0xff] %v8811_v15 }
 0x8c8   :  { %12842 = vst [vmem:[#allocation14_spill] sm:$0xff] %v8826_v34  ;;  %v8847_v48 = vadd.f32 %v8281_v52, %v1573_v53  ;;  %v12859_v52 = vld [vmem:[#allocation177_spill] sm:$0xff] }
 0x8c9   :  { %2955 = vperm.xlu2 %6491, %v8790_v40   ;;  %v8815_v40 = vpop.permute.xlu0 %2889  ;;  %12843 = vst [vmem:[#allocation138_spill] sm:$0xff] %v8829_v29 }
 0x8ca   :  { %2967 = vperm.xlu1 %6489, %v8793_v9   ;;  %12837 = vst [vmem:[#allocation133_spill] sm:$0xff] %v8815_v40 }
 0x8cb   :  { %v8799_v33 = vpop.permute.xlu2 %2856  ;;  %12850 = vst [vmem:[#allocation15_spill] sm:$0xff] %v8847_v48 }
 0x8cc   :  { %v8803_v6 = vpop.permute.xlu1 %2841 }
 0x8cd   :  { %12831 = vst [vmem:[#allocation114_spill] sm:$0xff] %v8803_v6  ;;  %v1569_v6 = vadd.f32 %v12846_v49, %v12845_v13  ;;  %v12855_v49 = vld [vmem:[#allocation30_spill] sm:$0xff] }
 0x8cf   :  { %v8844_v32 = vadd.f32 %v8264_v61, %v1569_v6  ;;  %v1576_v61 = vadd.f32 %v12856_v18, %v12855_v49  ;;  %v12857_v6 = vld [vmem:[#allocation153_spill] sm:$0xff]  ;;  %v12866_v49 = vld [vmem:[#allocation31_spill] sm:$0xff]  ;;  %v12867_v18 = vld [vmem:[#allocation182_spill] sm:$0xff] }
 0x8d1   :  { %2964 = vperm.xlu2 %6491, %v8808_v23   ;;  %v8833_v62 = vpop.permute.xlu0 %2898  ;;  %12849 = vst [vmem:[#allocation135_spill] sm:$0xff] %v8844_v32  ;;  %v8865_v53 = vadd.f32 %v12859_v52, %v1576_v61  ;;  %v12870_v61 = vld [vmem:[#allocation77_spill] sm:$0xff] }
 0x8d2   :  { %2976 = vperm.xlu1 %6489, %v8811_v15  }
 0x8d3   :  { %v8817_v9 = vpop.permute.xlu2 %2865  ;;  %12860 = vst [vmem:[#allocation131_spill] sm:$0xff] %v8865_v53 }
 0x8d4   :  { %v8819_v27 = vpop.permute.xlu1 %2850 }
 0x8d9   :  { %2973 = vperm.xlu2 %6491, %v8826_v34   ;;  %v12852_v34 = vld [vmem:[#allocation174_spill] sm:$0xff] }
 0x8da   :  { %2985 = vperm.xlu1 %6489, %v8829_v29   ;;  %v1572_v29 = vadd.f32 %v12852_v34, %v12851_v26 }
 0x8db   :  { %v8835_v23 = vpop.permute.xlu2 %2874 }
 0x8dc   :  { %12844 = vst [vmem:[#allocation57_spill] sm:$0xff] %v8835_v23  ;;  %v8837_v15 = vpop.permute.xlu1 %2859  ;;  %v8853_v23 = vpop.permute.xlu0 %2907  ;;  %v8862_v0 = vadd.f32 %v12857_v6, %v1572_v29  ;;  %v1579_v29 = vadd.f32 %v12867_v18, %v12866_v49  ;;  %v12868_v6 = vld [vmem:[#allocation176_spill] sm:$0xff] }
 0x8dd   :  { %12853 = vst [vmem:[#allocation141_spill] sm:$0xff] %v8853_v23 }
 0x8de   :  { %12858 = vst [vmem:[#allocation58_spill] sm:$0xff] %v8862_v0  ;;  %v8883_v52 = vadd.f32 %v12870_v61, %v1579_v29  ;;  %v12881_v29 = vld [vmem:[#allocation169_spill] sm:$0xff] }
 0x8e0   :  { %12871 = vst [vmem:[#allocation17_spill] sm:$0xff] %v8883_v52 }
 0x8e1   :  { %2982 = vperm.xlu2 %6491, %v8844_v32   ;;  %v12863_v32 = vld [vmem:[#allocation80_spill] sm:$0xff] }
 0x8e2   :  { %2994 = vperm.xlu1 %6489, %v8847_v48   ;;  %v12864_v48 = vld [vmem:[#allocation211_spill] sm:$0xff] }
 0x8e3   :  { %v8855_v24 = vpop.permute.xlu2 %2883 }
 0x8e4   :  { %12854 = vst [vmem:[#allocation214_spill] sm:$0xff] %v8855_v24  ;;  %v8857_v13 = vpop.permute.xlu1 %2868  ;;  %v1575_v24 = vadd.f32 %v12864_v48, %v12863_v32  ;;  %v8875_v46 = vpop.permute.xlu0 %2916 }
 0x8e5   :  { %12865 = vst [vmem:[#allocation59_spill] sm:$0xff] %v8875_v46  ;;  %v12877_v46 = vld [vmem:[#allocation187_spill] sm:$0xff] }
 0x8e6   :  { %v8880_v23 = vadd.f32 %v12868_v6, %v1575_v24  ;;  %v12879_v24 = vld [vmem:[#allocation73_spill] sm:$0xff] }
 0x8e8   :  { %12869 = vst [vmem:[#allocation144_spill] sm:$0xff] %v8880_v23 }
 0x8e9   :  { %2991 = vperm.xlu2 %6491, %v8862_v0  }
 0x8ea   :  { %3003 = vperm.xlu1 %6489, %v8865_v53   ;;  %v12873_v53 = vld [vmem:[#allocation32_spill] sm:$0xff] }
 0x8eb   :  { %v8869_v34 = vpop.permute.xlu2 %2892 }
 0x8ec   :  { %12861 = vst [vmem:[#allocation16_spill] sm:$0xff] %v8869_v34  ;;  %v8871_v26 = vpop.permute.xlu1 %2877  ;;  %v12874_v34 = vld [vmem:[#allocation185_spill] sm:$0xff]  ;;  %v8895_v18 = vpop.permute.xlu0 %2925 }
 0x8ed   :  { %12862 = vst [vmem:[#allocation139_spill] sm:$0xff] %v8871_v26  ;;  %v1582_v32 = vadd.f32 %v12874_v34, %v12873_v53  ;;  %v12876_v26 = vld [vmem:[#allocation82_spill] sm:$0xff]  ;;  %v12885_v34 = vld [vmem:[#allocation84_spill] sm:$0xff] }
 0x8ee   :  { %v1578_v49 = vadd.f32 %v12877_v46, %v12876_v26  ;;  %12878 = vst [vmem:[#allocation60_spill] sm:$0xff] %v8895_v18  ;;  %v12888_v26 = vld [vmem:[#allocation33_spill] sm:$0xff] }
 0x8ef   :  { %v8901_v61 = vadd.f32 %v12881_v29, %v1582_v32  ;;  %v12892_v32 = vld [vmem:[#allocation222_spill] sm:$0xff] }
 0x8f0   :  { %v8898_v6 = vadd.f32 %v12879_v24, %v1578_v49  ;;  %v12890_v24 = vld [vmem:[#allocation180_spill] sm:$0xff] }
 0x8f1   :  { %3000 = vperm.xlu2 %6491, %v8880_v23   ;;  %12882 = vst [vmem:[#allocation18_spill] sm:$0xff] %v8901_v61 }
 0x8f2   :  { %3012 = vperm.xlu1 %6489, %v8883_v52   ;;  %12880 = vst [vmem:[#allocation147_spill] sm:$0xff] %v8898_v6  ;;  %v12886_v52 = vld [vmem:[#allocation190_spill] sm:$0xff] }
 0x8f3   :  { %v8887_v0 = vpop.permute.xlu2 %2901 }
 0x8f4   :  { %12872 = vst [vmem:[#allocation142_spill] sm:$0xff] %v8887_v0  ;;  %v8891_v48 = vpop.permute.xlu1 %2886  ;;  %v8911_v46 = vpop.permute.xlu0 %2934  ;;  %v12889_v0 = vld [vmem:[#allocation230_spill] sm:$0xff] }
 0x8f5   :  { %12875 = vst [vmem:[#allocation233_spill] sm:$0xff] %v8891_v48  ;;  %v1581_v48 = vadd.f32 %v12886_v52, %v12885_v34  ;;  %v1585_v49 = vadd.f32 %v12889_v0, %v12888_v26  ;;  %v12896_v52 = vld [vmem:[#allocation87_spill] sm:$0xff]  ;;  %v12897_v34 = vld [vmem:[#allocation188_spill] sm:$0xff]  ;;  %v12898_v0 = vld [vmem:[#allocation34_spill] sm:$0xff] }
 0x8f6   :  { %12887 = vst [vmem:[#allocation245_spill] sm:$0xff] %v8911_v46  ;;  %v12899_v26 = vld [vmem:[#allocation198_spill] sm:$0xff] }
 0x8f7   :  { %v8916_v18 = vadd.f32 %v12890_v24, %v1581_v48  ;;  %v8919_v29 = vadd.f32 %v12892_v32, %v1585_v49  ;;  %v1588_v48 = vadd.f32 %v12899_v26, %v12898_v0  ;;  %v12900_v24 = vld [vmem:[#allocation162_spill] sm:$0xff]  ;;  %v12903_v32 = vld [vmem:[#allocation88_spill] sm:$0xff]  ;;  %v12907_v0 = vld [vmem:[#allocation35_spill] sm:$0xff] }
 0x8f8   :  { %v12908_v26 = vld [vmem:[#allocation200_spill] sm:$0xff] }
 0x8f9   :  { %3009 = vperm.xlu2 %6491, %v8898_v6   ;;  %12891 = vst [vmem:[#allocation61_spill] sm:$0xff] %v8916_v18  ;;  %v8937_v49 = vadd.f32 %v8347_v1, %v1588_v48 }
 0x8fa   :  { %3021 = vperm.xlu1 %6489, %v8901_v61   ;;  %12893 = vst [vmem:[#allocation145_spill] sm:$0xff] %v8919_v29 }
 0x8fb   :  { %v8905_v23 = vpop.permute.xlu2 %2910  ;;  %12902 = vst [vmem:[#allocation148_spill] sm:$0xff] %v8937_v49 }
 0x8fc   :  { %12883 = vst [vmem:[#allocation149_spill] sm:$0xff] %v8905_v23  ;;  %v8907_v53 = vpop.permute.xlu1 %2895  ;;  %v1584_v23 = vadd.f32 %v12897_v34, %v12896_v52 }
 0x8fd   :  { %12884 = vst [vmem:[#allocation116_spill] sm:$0xff] %v8907_v53  ;;  %v8929_v53 = vpop.permute.xlu0 %2943 }
 0x8fe   :  { %v8934_v46 = vadd.f32 %v12900_v24, %v1584_v23  ;;  %v1591_v23 = vadd.f32 %v12908_v26, %v12907_v0  ;;  %v12909_v24 = vld [vmem:[#allocation178_spill] sm:$0xff] }
 0x900   :  { %12901 = vst [vmem:[#allocation62_spill] sm:$0xff] %v8934_v46  ;;  %v8955_v1 = vadd.f32 %v8384_v12, %v1591_v23 }
 0x901   :  { %3018 = vperm.xlu2 %6491, %v8916_v18   ;;  %v12904_v18 = vld [vmem:[#allocation191_spill] sm:$0xff] }
 0x902   :  { %3030 = vperm.xlu1 %6489, %v8919_v29   ;;  %v1587_v29 = vadd.f32 %v12904_v18, %v12903_v32  ;;  %12911 = vst [vmem:[#allocation118_spill] sm:$0xff] %v8955_v1  ;;  %v12914_v32 = vld [vmem:[#allocation90_spill] sm:$0xff] }
 0x903   :  { %v8923_v6 = vpop.permute.xlu2 %2919 }
 0x904   :  { %12894 = vst [vmem:[#allocation19_spill] sm:$0xff] %v8923_v6  ;;  %v8925_v61 = vpop.permute.xlu1 %2904 }
 0x905   :  { %12895 = vst [vmem:[#allocation151_spill] sm:$0xff] %v8925_v61  ;;  %v8947_v34 = vpop.permute.xlu0 %2952  ;;  %v8952_v61 = vadd.f32 %v12909_v24, %v1587_v29  ;;  %v12920_v24 = vld [vmem:[#allocation37_spill] sm:$0xff] }
 0x907   :  { %12910 = vst [vmem:[#allocation244_spill] sm:$0xff] %v8952_v61 }
 0x909   :  { %3027 = vperm.xlu2 %6491, %v8934_v46   ;;  %v12915_v46 = vld [vmem:[#allocation241_spill] sm:$0xff] }
 0x90a   :  { %3039 = vperm.xlu1 %6489, %v8937_v49   ;;  %v1590_v49 = vadd.f32 %v12915_v46, %v12914_v32 }
 0x90b   :  { %v8943_v6 = vpop.permute.xlu2 %2928 }
 0x90c   :  { %12905 = vst [vmem:[#allocation20_spill] sm:$0xff] %v8943_v6  ;;  %v8945_v52 = vpop.permute.xlu1 %2913  ;;  %v12916_v6 = vld [vmem:[#allocation36_spill] sm:$0xff]  ;;  %v8970_v29 = vadd.f32 %v8356_v38, %v1590_v49 }
 0x90d   :  { %12906 = vst [vmem:[#allocation154_spill] sm:$0xff] %v8945_v52  ;;  %v12917_v52 = vld [vmem:[#allocation199_spill] sm:$0xff]  ;;  %v8967_v26 = vpop.permute.xlu0 %2961 }
 0x90e   :  { %v1594_v0 = vadd.f32 %v12917_v52, %v12916_v6  ;;  %12918 = vst [vmem:[#allocation156_spill] sm:$0xff] %v8970_v29  ;;  %v12923_v6 = vld [vmem:[#allocation92_spill] sm:$0xff]  ;;  %v12924_v52 = vld [vmem:[#allocation203_spill] sm:$0xff] }
 0x910   :  { %v8973_v12 = vadd.f32 %v8388_v43, %v1594_v0  ;;  %v12926_v43 = vld [vmem:[#allocation197_spill] sm:$0xff] }
 0x911   :  { %3036 = vperm.xlu2 %6491, %v8952_v61   ;;  %v12921_v61 = vld [vmem:[#allocation201_spill] sm:$0xff] }
 0x912   :  { %3048 = vperm.xlu1 %6489, %v8955_v1   ;;  %12919 = vst [vmem:[#allocation21_spill] sm:$0xff] %v8973_v12  ;;  %v1597_v46 = vadd.f32 %v12921_v61, %v12920_v24  ;;  %v1593_v1 = vadd.f32 %v12924_v52, %v12923_v6  ;;  %v12930_v24 = vld [vmem:[#allocation94_spill] sm:$0xff] }
 0x913   :  { %v8959_v18 = vpop.permute.xlu2 %2937  ;;  %v12932_v6 = vld [vmem:[#allocation38_spill] sm:$0xff] }
 0x914   :  { %12912 = vst [vmem:[#allocation243_spill] sm:$0xff] %v8959_v18  ;;  %v8961_v48 = vpop.permute.xlu1 %2922  ;;  %v8988_v38 = vadd.f32 %v8364_v37, %v1593_v1  ;;  %v8991_v49 = vadd.f32 %v12926_v43, %v1597_v46  ;;  %v1600_v52 = vadd.f32 %v8592_v45, %v12932_v6  ;;  %v12933_v37 = vld [vmem:[#allocation195_spill] sm:$0xff]  ;;  %v12935_v46 = vld [vmem:[#allocation89_spill] sm:$0xff] }
 0x915   :  { %12913 = vst [vmem:[#allocation63_spill] sm:$0xff] %v8961_v48  ;;  %v8985_v18 = vpop.permute.xlu0 %2970  ;;  %v12941_v45 = vld [vmem:[#allocation39_spill] sm:$0xff] }
 0x916   :  { %12925 = vst [vmem:[#allocation64_spill] sm:$0xff] %v8988_v38  ;;  %v9009_v43 = vadd.f32 %v12935_v46, %v1600_v52  ;;  %v12942_v6 = vld [vmem:[#allocation215_spill] sm:$0xff]  ;;  %v12947_v46 = vld [vmem:[#allocation98_spill] sm:$0xff] }
 0x917   :  { %12927 = vst [vmem:[#allocation157_spill] sm:$0xff] %v8991_v49  ;;  %v1603_v48 = vadd.f32 %v12942_v6, %v12941_v45  ;;  %v12952_v45 = vld [vmem:[#allocation218_spill] sm:$0xff] }
 0x918   :  { %12936 = vst [vmem:[#allocation160_spill] sm:$0xff] %v9009_v43 }
 0x919   :  { %3045 = vperm.xlu2 %6491, %v8970_v29   ;;  %v12931_v29 = vld [vmem:[#allocation206_spill] sm:$0xff]  ;;  %v9027_v52 = vadd.f32 %v8413_v55, %v1603_v48 }
 0x91a   :  { %3057 = vperm.xlu1 %6489, %v8973_v12   ;;  %v1596_v12 = vadd.f32 %v12931_v29, %v12930_v24  ;;  %v12939_v29 = vld [vmem:[#allocation96_spill] sm:$0xff] }
 0x91b   :  { %v8977_v23 = vpop.permute.xlu2 %2946  ;;  %v12940_v24 = vld [vmem:[#allocation204_spill] sm:$0xff]  ;;  %12946 = vst [vmem:[#allocation24_spill] sm:$0xff] %v9027_v52 }
 0x91c   :  { %v8981_v32 = vpop.permute.xlu1 %2931  ;;  %v9006_v1 = vadd.f32 %v12933_v37, %v1596_v12  ;;  %v12944_v12 = vld [vmem:[#allocation86_spill] sm:$0xff] }
 0x91d   :  { %12922 = vst [vmem:[#allocation152_spill] sm:$0xff] %v8981_v32  ;;  %v9003_v32 = vpop.permute.xlu0 %2979 }
 0x91e   :  { %12934 = vst [vmem:[#allocation65_spill] sm:$0xff] %v9006_v1 }
 0x921   :  { %3054 = vperm.xlu2 %6491, %v8988_v38  }
 0x922   :  { %3066 = vperm.xlu1 %6489, %v8991_v49  }
 0x923   :  { %v8995_v0 = vpop.permute.xlu2 %2955 }
 0x924   :  { %12928 = vst [vmem:[#allocation22_spill] sm:$0xff] %v8995_v0  ;;  %v8997_v61 = vpop.permute.xlu1 %2940 }
 0x925   :  { %12929 = vst [vmem:[#allocation155_spill] sm:$0xff] %v8997_v61  ;;  %v1599_v61 = vadd.f32 %v12940_v24, %v12939_v29  ;;  %v9021_v0 = vpop.permute.xlu0 %2988  ;;  %v12951_v24 = vld [vmem:[#allocation40_spill] sm:$0xff] }
 0x926   :  { %12943 = vst [vmem:[#allocation67_spill] sm:$0xff] %v9021_v0  ;;  %v1606_v6 = vadd.f32 %v12952_v45, %v12951_v24  ;;  %v12960_v24 = vld [vmem:[#allocation41_spill] sm:$0xff]  ;;  %v12961_v45 = vld [vmem:[#allocation216_spill] sm:$0xff] }
 0x927   :  { %v9024_v37 = vadd.f32 %v12944_v12, %v1599_v61 }
 0x928   :  { %v9045_v55 = vadd.f32 %v8450_v2, %v1606_v6 }
 0x929   :  { %3063 = vperm.xlu2 %6491, %v9006_v1   ;;  %12945 = vst [vmem:[#allocation158_spill] sm:$0xff] %v9024_v37  ;;  %v12948_v1 = vld [vmem:[#allocation207_spill] sm:$0xff] }
 0x92a   :  { %3075 = vperm.xlu1 %6489, %v9009_v43   ;;  %v1602_v43 = vadd.f32 %v12948_v1, %v12947_v46  ;;  %12955 = vst [vmem:[#allocation25_spill] sm:$0xff] %v9045_v55  ;;  %v12958_v46 = vld [vmem:[#allocation100_spill] sm:$0xff] }
 0x92b   :  { %v9013_v38 = vpop.permute.xlu2 %2964 }
 0x92c   :  { %12937 = vst [vmem:[#allocation23_spill] sm:$0xff] %v9013_v38  ;;  %v9015_v49 = vpop.permute.xlu1 %2949 }
 0x92d   :  { %12938 = vst [vmem:[#allocation172_spill] sm:$0xff] %v9015_v49  ;;  %v12953_v49 = vld [vmem:[#allocation208_spill] sm:$0xff]  ;;  %v9042_v12 = vpop.permute.xlu0 %2997 }
 0x92e   :  { %v9040_v61 = vadd.f32 %v12953_v49, %v1602_v43  ;;  %v1609_v49 = vadd.f32 %v12961_v45, %v12960_v24  ;;  %v12967_v24 = vld [vmem:[#allocation102_spill] sm:$0xff]  ;;  %v12968_v45 = vld [vmem:[#allocation220_spill] sm:$0xff] }
 0x930   :  { %12954 = vst [vmem:[#allocation161_spill] sm:$0xff] %v9040_v61  ;;  %v9061_v2 = vadd.f32 %v8454_v14, %v1609_v49  ;;  %v12970_v14 = vld [vmem:[#allocation227_spill] sm:$0xff] }
 0x931   :  { %3072 = vperm.xlu2 %6491, %v9024_v37   ;;  %v12959_v37 = vld [vmem:[#allocation122_spill] sm:$0xff] }
 0x932   :  { %3084 = vperm.xlu1 %6489, %v9027_v52   ;;  %v1605_v52 = vadd.f32 %v12959_v37, %v12958_v46  ;;  %12963 = vst [vmem:[#allocation183_spill] sm:$0xff] %v9061_v2 }
 0x933   :  { %v9033_v38 = vpop.permute.xlu2 %2973 }
 0x934   :  { %12949 = vst [vmem:[#allocation164_spill] sm:$0xff] %v9033_v38  ;;  %v9035_v29 = vpop.permute.xlu1 %2958  ;;  %v9058_v43 = vadd.f32 %v8422_v36, %v1605_v52  ;;  %v1608_v36 = vadd.f32 %v12968_v45, %v12967_v24  ;;  %v12976_v24 = vld [vmem:[#allocation43_spill] sm:$0xff]  ;;  %v12977_v45 = vld [vmem:[#allocation140_spill] sm:$0xff] }
 0x935   :  { %12950 = vst [vmem:[#allocation68_spill] sm:$0xff] %v9035_v29  ;;  %v9063_v6 = vpop.permute.xlu0 %3006 }
 0x936   :  { %12962 = vst [vmem:[#allocation70_spill] sm:$0xff] %v9058_v43  ;;  %v9076_v52 = vadd.f32 %v8430_v30, %v1608_v36  ;;  %v1615_v30 = vadd.f32 %v12977_v45, %v12976_v24  ;;  %v12983_v24 = vld [vmem:[#allocation44_spill] sm:$0xff]  ;;  %v12984_v45 = vld [vmem:[#allocation231_spill] sm:$0xff] }
 0x938   :  { %12969 = vst [vmem:[#allocation165_spill] sm:$0xff] %v9076_v52 }
 0x939   :  { %3081 = vperm.xlu2 %6491, %v9040_v61  }
 0x93a   :  { %3093 = vperm.xlu1 %6489, %v9045_v55   ;;  %v12964_v55 = vld [vmem:[#allocation42_spill] sm:$0xff] }
 0x93b   :  { %v9049_v48 = vpop.permute.xlu2 %2982 }
 0x93c   :  { %12956 = vst [vmem:[#allocation167_spill] sm:$0xff] %v9049_v48  ;;  %v9051_v1 = vpop.permute.xlu1 %2967  ;;  %v12965_v48 = vld [vmem:[#allocation219_spill] sm:$0xff] }
 0x93d   :  { %12957 = vst [vmem:[#allocation128_spill] sm:$0xff] %v9051_v1  ;;  %v1612_v37 = vadd.f32 %v12965_v48, %v12964_v55  ;;  %v9081_v38 = vpop.permute.xlu0 %3015  ;;  %v12974_v48 = vld [vmem:[#allocation104_spill] sm:$0xff] }
 0x93f   :  { %v9079_v49 = vadd.f32 %v12970_v14, %v1612_v37  ;;  %v9097_v37 = vadd.f32 %v8478_v7, %v1615_v30 }
 0x941   :  { %3090 = vperm.xlu2 %6491, %v9058_v43   ;;  %12971 = vst [vmem:[#allocation27_spill] sm:$0xff] %v9079_v49 }
 0x942   :  { %3102 = vperm.xlu1 %6489, %v9061_v2   ;;  %v12975_v2 = vld [vmem:[#allocation223_spill] sm:$0xff]  ;;  %12979 = vst [vmem:[#allocation143_spill] sm:$0xff] %v9097_v37 }
 0x943   :  { %v9067_v61 = vpop.permute.xlu2 %2991 }
 0x944   :  { %v9071_v46 = vpop.permute.xlu1 %2976 }
 0x945   :  { %12966 = vst [vmem:[#allocation26_spill] sm:$0xff] %v9071_v46  ;;  %v1611_v46 = vadd.f32 %v12975_v2, %v12974_v48  ;;  %v9099_v14 = vpop.permute.xlu0 %3024  ;;  %v12981_v2 = vld [vmem:[#allocation107_spill] sm:$0xff]  ;;  %v12982_v48 = vld [vmem:[#allocation221_spill] sm:$0xff] }
 0x947   :  { %v9094_v36 = vadd.f32 %v8458_v16, %v1611_v46  ;;  %v1618_v16 = vadd.f32 %v12984_v45, %v12983_v24  ;;  %v12993_v24 = vld [vmem:[#allocation234_spill] sm:$0xff] }
 0x949   :  { %3099 = vperm.xlu2 %6491, %v9076_v52   ;;  %12978 = vst [vmem:[#allocation170_spill] sm:$0xff] %v9094_v36  ;;  %v9115_v7 = vadd.f32 %v8489_v35, %v1618_v16 }
 0x94a   :  { %3111 = vperm.xlu1 %6489, %v9079_v49  }
 0x94b   :  { %v9085_v43 = vpop.permute.xlu2 %3000  ;;  %12986 = vst [vmem:[#allocation28_spill] sm:$0xff] %v9115_v7 }
 0x94c   :  { %12972 = vst [vmem:[#allocation168_spill] sm:$0xff] %v9085_v43  ;;  %v9087_v55 = vpop.permute.xlu1 %2985 }
 0x94d   :  { %12973 = vst [vmem:[#allocation72_spill] sm:$0xff] %v9087_v55  ;;  %v1614_v55 = vadd.f32 %v12982_v48, %v12981_v2  ;;  %v9117_v30 = vpop.permute.xlu0 %3033  ;;  %v12992_v48 = vld [vmem:[#allocation45_spill] sm:$0xff] }
 0x94e   :  { %12987 = vst [vmem:[#allocation202_spill] sm:$0xff] %v9117_v30 }
 0x94f   :  { %v9112_v46 = vadd.f32 %v8462_v19, %v1614_v55  ;;  %v1621_v19 = vadd.f32 %v12993_v24, %v12992_v48  ;;  %v12994_v55 = vld [vmem:[#allocation236_spill] sm:$0xff]  ;;  %v13001_v48 = vld [vmem:[#allocation46_spill] sm:$0xff] }
 0x950   :  { %v13002_v24 = vld [vmem:[#allocation232_spill] sm:$0xff] }
 0x951   :  { %3108 = vperm.xlu2 %6491, %v9094_v36   ;;  %12985 = vst [vmem:[#allocation173_spill] sm:$0xff] %v9112_v46  ;;  %v12988_v36 = vld [vmem:[#allocation109_spill] sm:$0xff]  ;;  %v9133_v35 = vadd.f32 %v8588_v59, %v1621_v19 }
 0x952   :  { %3120 = vperm.xlu1 %6489, %v9097_v37   ;;  %v12989_v37 = vld [vmem:[#allocation224_spill] sm:$0xff] }
 0x953   :  { %v9103_v52 = vpop.permute.xlu2 %3009  ;;  %12996 = vst [vmem:[#allocation181_spill] sm:$0xff] %v9133_v35 }
 0x954   :  { %12980 = vst [vmem:[#allocation74_spill] sm:$0xff] %v9103_v52  ;;  %v9105_v49 = vpop.permute.xlu1 %2994  ;;  %v1617_v52 = vadd.f32 %v12989_v37, %v12988_v36 }
 0x955   :  { %v9135_v16 = vpop.permute.xlu0 %3042 }
 0x956   :  { %v9130_v45 = vadd.f32 %v12994_v55, %v1617_v52  ;;  %v1624_v52 = vadd.f32 %v13002_v24, %v13001_v48  ;;  %v13009_v48 = vld [vmem:[#allocation113_spill] sm:$0xff] }
 0x957   :  { %v13010_v24 = vld [vmem:[#allocation237_spill] sm:$0xff] }
 0x958   :  { %12995 = vst [vmem:[#allocation29_spill] sm:$0xff] %v9130_v45  ;;  %v9151_v59 = vadd.f32 %v8604_v22, %v1624_v52  ;;  %v13012_v22 = vld [vmem:[#allocation253_spill] sm:$0xff] }
 0x959   :  { %3117 = vperm.xlu2 %6491, %v9112_v46   ;;  %v12999_v46 = vld [vmem:[#allocation111_spill] sm:$0xff] }
 0x95a   :  { %3129 = vperm.xlu1 %6489, %v9115_v7   ;;  %v13000_v7 = vld [vmem:[#allocation150_spill] sm:$0xff]  ;;  %13004 = vst [vmem:[#allocation184_spill] sm:$0xff] %v9151_v59 }
 0x95b   :  { %v9123_v1 = vpop.permute.xlu2 %3018 }
 0x95c   :  { %12990 = vst [vmem:[#allocation76_spill] sm:$0xff] %v9123_v1  ;;  %v9125_v2 = vpop.permute.xlu1 %3003  ;;  %v1620_v1 = vadd.f32 %v13000_v7, %v12999_v46 }
 0x95d   :  { %12991 = vst [vmem:[#allocation171_spill] sm:$0xff] %v9125_v2  ;;  %v9155_v19 = vpop.permute.xlu0 %3051 }
 0x95e   :  { %v9148_v55 = vadd.f32 %v8509_v11, %v1620_v1  ;;  %v1623_v11 = vadd.f32 %v13010_v24, %v13009_v48  ;;  %v13018_v48 = vld [vmem:[#allocation48_spill] sm:$0xff]  ;;  %v13019_v24 = vld [vmem:[#allocation166_spill] sm:$0xff] }
 0x960   :  { %13003 = vst [vmem:[#allocation30_spill] sm:$0xff] %v9148_v55  ;;  %v9166_v1 = vadd.f32 %v8527_v54, %v1623_v11  ;;  %v1630_v54 = vadd.f32 %v13019_v24, %v13018_v48  ;;  %v13026_v48 = vld [vmem:[#allocation49_spill] sm:$0xff]  ;;  %v13027_v24 = vld [vmem:[#allocation248_spill] sm:$0xff] }
 0x961   :  { %3126 = vperm.xlu2 %6491, %v9130_v45  }
 0x962   :  { %3138 = vperm.xlu1 %6489, %v9133_v35   ;;  %v13006_v35 = vld [vmem:[#allocation47_spill] sm:$0xff]  ;;  %13011 = vst [vmem:[#allocation80_spill] sm:$0xff] %v9166_v1 }
 0x963   :  { %v9139_v36 = vpop.permute.xlu2 %3027 }
 0x964   :  { %12997 = vst [vmem:[#allocation78_spill] sm:$0xff] %v9139_v36  ;;  %v9141_v37 = vpop.permute.xlu1 %3012  ;;  %v13007_v36 = vld [vmem:[#allocation235_spill] sm:$0xff] }
 0x965   :  { %12998 = vst [vmem:[#allocation174_spill] sm:$0xff] %v9141_v37  ;;  %v1627_v46 = vadd.f32 %v13007_v36, %v13006_v35  ;;  %v13016_v36 = vld [vmem:[#allocation115_spill] sm:$0xff] }
 0x967   :  { %v9169_v52 = vadd.f32 %v13012_v22, %v1627_v46  ;;  %v9187_v46 = vadd.f32 %v8633_v51, %v1630_v54  ;;  %v13030_v54 = vld [vmem:[#allocation119_spill] sm:$0xff] }
 0x969   :  { %3135 = vperm.xlu2 %6491, %v9148_v55   ;;  %13013 = vst [vmem:[#allocation211_spill] sm:$0xff] %v9169_v52  ;;  %v9173_v55 = vpop.permute.xlu0 %3060 }
 0x96a   :  { %3147 = vperm.xlu1 %6489, %v9151_v59   ;;  %13021 = vst [vmem:[#allocation77_spill] sm:$0xff] %v9187_v46 }
 0x96b   :  { %v9157_v45 = vpop.permute.xlu2 %3036 }
 0x96c   :  { %13005 = vst [vmem:[#allocation153_spill] sm:$0xff] %v9157_v45  ;;  %v9161_v7 = vpop.permute.xlu1 %3021  ;;  %v13017_v45 = vld [vmem:[#allocation239_spill] sm:$0xff] }
 0x96d   :  { %13008 = vst [vmem:[#allocation177_spill] sm:$0xff] %v9161_v7  ;;  %v1626_v7 = vadd.f32 %v13017_v45, %v13016_v36  ;;  %v13024_v45 = vld [vmem:[#allocation117_spill] sm:$0xff]  ;;  %v13025_v36 = vld [vmem:[#allocation238_spill] sm:$0xff] }
 0x96f   :  { %v9184_v11 = vadd.f32 %v8618_v25, %v1626_v7  ;;  %v1633_v25 = vadd.f32 %v13027_v24, %v13026_v48  ;;  %v13038_v48 = vld [vmem:[#allocation121_spill] sm:$0xff]  ;;  %v13039_v24 = vld [vmem:[#allocation175_spill] sm:$0xff] }
 0x971   :  { %3144 = vperm.xlu2 %6491, %v9166_v1   ;;  %13020 = vst [vmem:[#allocation176_spill] sm:$0xff] %v9184_v11  ;;  %v9191_v22 = vpop.permute.xlu0 %3069  ;;  %v9205_v51 = vadd.f32 %v8653_v39, %v1633_v25 }
 0x972   :  { %3156 = vperm.xlu1 %6489, %v9169_v52  }
 0x973   :  { %v9175_v59 = vpop.permute.xlu2 %3045  ;;  %13029 = vst [vmem:[#allocation187_spill] sm:$0xff] %v9205_v51 }
 0x974   :  { %13014 = vst [vmem:[#allocation31_spill] sm:$0xff] %v9175_v59  ;;  %v9177_v35 = vpop.permute.xlu1 %3030 }
 0x975   :  { %13015 = vst [vmem:[#allocation182_spill] sm:$0xff] %v9177_v35  ;;  %v1629_v35 = vadd.f32 %v13025_v36, %v13024_v45 }
 0x977   :  { %v9202_v7 = vadd.f32 %v8636_v31, %v1629_v35 }
 0x979   :  { %3153 = vperm.xlu2 %6491, %v9184_v11   ;;  %13028 = vst [vmem:[#allocation82_spill] sm:$0xff] %v9202_v7  ;;  %v13031_v11 = vld [vmem:[#allocation240_spill] sm:$0xff] }
 0x97a   :  { %3165 = vperm.xlu1 %6489, %v9187_v46   ;;  %v1632_v46 = vadd.f32 %v13031_v11, %v13030_v54  ;;  %v1635_v11 = vadd.f32 %v13039_v24, %v13038_v48  ;;  %v13047_v24 = vlaneseq }
 0x97b   :  { %v9193_v1 = vpop.permute.xlu2 %3054 }
 0x97c   :  { %13022 = vst [vmem:[#allocation32_spill] sm:$0xff] %v9193_v1  ;;  %v9195_v52 = vpop.permute.xlu1 %3039  ;;  %v9211_v1 = vpop.permute.xlu0 %3078  ;;  %v9218_v36 = vadd.f32 %v8624_v5, %v1632_v46  ;;  %v9230_v25 = vadd.f32 %v8673_v58, %v1635_v11  ;;  %v9252_v11 = vand.u32 127, %v13047_v24 }
 0x97d   :  { %13023 = vst [vmem:[#allocation185_spill] sm:$0xff] %v9195_v52  ;;  %v13065_v52 = vld [vmem:[#allocation139_spill] sm:$0xff] }
 0x97e   :  { %13032 = vst [vmem:[#allocation73_spill] sm:$0xff] %v9211_v1  ;;  %v9283_v43 = vadd.s32 4294967248, %v9252_v11 }
 0x97f   :  { %13035 = vst [vmem:[#allocation190_spill] sm:$0xff] %v9218_v36 }
 0x980   :  { %13040 = vst [vmem:[#allocation180_spill] sm:$0xff] %v9230_v25 }
 0x981   :  { %3162 = vperm.xlu2 %6491, %v9202_v7  }
 0x982   :  { %3174 = vperm.xlu1 %6489, %v9205_v51  }
 0x983   :  { %v9213_v37 = vpop.permute.xlu2 %3063 }
 0x984   :  { %13033 = vst [vmem:[#allocation169_spill] sm:$0xff] %v9213_v37  ;;  %v9215_v45 = vpop.permute.xlu1 %3048  ;;  %v9221_v39 = vpop.permute.xlu0 %3087 }
 0x985   :  { %13034 = vst [vmem:[#allocation84_spill] sm:$0xff] %v9215_v45  ;;  %v9289_v45 = vadd.s32 4294967256, %v9252_v11 }
 0x989   :  { %3171 = vperm.xlu2 %6491, %v9218_v36  }
 0x98b   :  { %v9223_v31 = vpop.permute.xlu2 %3072 }
 0x98c   :  { %13036 = vst [vmem:[#allocation33_spill] sm:$0xff] %v9223_v31  ;;  %v9225_v35 = vpop.permute.xlu1 %3057  ;;  %v9237_v46 = vpop.permute.xlu0 %3096 }
 0x98d   :  { %13037 = vst [vmem:[#allocation230_spill] sm:$0xff] %v9225_v35  ;;  %v9268_v35 = vadd.s32 4294967272, %v9252_v11 }
 0x98f   :  { %v3194_v59 = vperm.slane %v8729_v47, %v9268_v35  ;;  %v9295_v47 = vadd.s32 4294967200, %v9252_v11 }
 0x991   :  { %3180 = vperm.xlu2 %6491, %v9230_v25   ;;  %v9255_v25 = vadd.s32 4294967288, %v9252_v11 }
 0x993   :  { %v9233_v54 = vpop.permute.xlu2 %3081  ;;  %v3246_v24 = vperm.slane %v8819_v27, %v9255_v25  ;;  %v9286_v27 = vadd.s32 4294967224, %v9252_v11 }
 0x994   :  { %13041 = vst [vmem:[#allocation222_spill] sm:$0xff] %v9233_v54  ;;  %v9235_v5 = vpop.permute.xlu1 %3066  ;;  %v9243_v51 = vpop.permute.xlu0 %3105 }
 0x995   :  { %13042 = vst [vmem:[#allocation87_spill] sm:$0xff] %v9235_v5 }
 0x99b   :  { %v9239_v36 = vpop.permute.xlu2 %3090 }
 0x99c   :  { %13043 = vst [vmem:[#allocation188_spill] sm:$0xff] %v9239_v36  ;;  %v9241_v7 = vpop.permute.xlu1 %3075  ;;  %v9249_v58 = vpop.permute.xlu0 %3114 }
 0x99d   :  { %13044 = vst [vmem:[#allocation34_spill] sm:$0xff] %v9241_v7  ;;  %v3184_v7 = vperm.slane %v8712_v63, %v9252_v11  ;;  %v3245_v63 = vperm.slane %v8781_v21, %v9252_v11  ;;  %v9300_v21 = vadd.s32 4294967264, %v9252_v11 }
 0x9a3   :  { %v9245_v31 = vpop.permute.xlu2 %3099 }
 0x9a4   :  { %13045 = vst [vmem:[#allocation198_spill] sm:$0xff] %v9245_v31  ;;  %v9247_v48 = vpop.permute.xlu1 %3084  ;;  %v9261_v5 = vpop.permute.xlu0 %3123  ;;  %v9273_v31 = vadd.s32 4294967280, %v9252_v11 }
 0x9a5   :  { %13046 = vst [vmem:[#allocation162_spill] sm:$0xff] %v9247_v48  ;;  %v3186_v48 = vperm.slane %v8642_v8, %v9255_v25 }
 0x9a6   :  { %13050 = vst [vmem:[#allocation35_spill] sm:$0xff] %v9261_v5  ;;  %v3190_v8 = vperm.slane %v8691_v57, %v9273_v31  ;;  %v3248_v57 = vperm.slane %v8741_v41, %v9273_v31  ;;  %v3198_v41 = vperm.slane %v8710_v60, %v9300_v21 }
 0x9ab   :  { %v9257_v54 = vpop.permute.xlu2 %3108 }
 0x9ac   :  { %13048 = vst [vmem:[#allocation88_spill] sm:$0xff] %v9257_v54  ;;  %v9259_v37 = vpop.permute.xlu1 %3093  ;;  %v3188_v54 = vsel %vm3187_vm0, %v3186_v48, %v3184_v7  ;;  %v3247_v7 = vsel %vm3187_vm0, %v3246_v24, %v3245_v63  ;;  %v9309_v63 = vpop.permute.xlu0 %3132 }
 0x9ad   :  { %13049 = vst [vmem:[#allocation191_spill] sm:$0xff] %v9259_v37  ;;  %v3192_v2 = vsel %vm3191_vm1, %v3190_v8, %v3188_v54  ;;  %v9306_v37 = vadd.s32 4294967176, %v9252_v11  ;;  %v3249_v36 = vsel %vm3191_vm1, %v3248_v57, %v3247_v7  ;;  %v3252_v54 = vperm.slane %v8837_v15, %v9300_v21 }
 0x9ae   :  { %v3196_v24 = vsel %vm3195_vm2, %v3194_v59, %v3192_v2  ;;  %13054 = vst [vmem:[#allocation241_spill] sm:$0xff] %v9309_v63  ;;  %v9319_v8 = vadd.s32 4294967232, %v9252_v11  ;;  %v3250_v2 = vperm.slane %v8799_v33, %v9268_v35  ;;  %v3206_v59 = vperm.slane %v8663_v42, %v9283_v43  ;;  %v13091_v63 = vld [vmem:[#allocation68_spill] sm:$0xff] }
 0x9af   :  { %13053 = vst [vmem:[#allocation90_spill] sm:$0xff] %v9306_v37  ;;  %v3200_v60 = vsel %vm3199_vm3, %v3198_v41, %v3196_v24  ;;  %v9335_v33 = vadd.s32 4294967208, %v9252_v11  ;;  %v9338_v42 = vadd.s32 4294967184, %v9252_v11  ;;  %v3254_v24 = vperm.slane %v8759_v3, %v9289_v45 }
 0x9b0   :  { %v3251_v57 = vsel %vm3195_vm2, %v3250_v2, %v3249_v36  ;;  %v3260_v41 = vperm.slane %v8779_v28, %v9319_v8  ;;  %v9349_v36 = vadd.s32 4294967216, %v9252_v11  ;;  %v3214_v3 = vperm.slane %v8767_v10, %v9319_v8 }
 0x9b1   :  { %13055 = vst [vmem:[#allocation36_spill] sm:$0xff] %v9338_v42  ;;  %v3277_v10 = vperm.slane %v8833_v62, %v9255_v25 }
 0x9b3   :  { %v9292_v48 = vpop.permute.xlu2 %3117 }
 0x9b4   :  { %13051 = vst [vmem:[#allocation200_spill] sm:$0xff] %v9292_v48  ;;  %v9303_v29 = vpop.permute.xlu1 %3102  ;;  %v3202_v48 = vperm.slane %v8747_v56, %v9289_v45  ;;  %v3218_v56 = vperm.slane %v8685_v4, %v9286_v27  ;;  %v3253_v4 = vsel %vm3199_vm3, %v3252_v54, %v3251_v57  ;;  %v9380_v50 = vpop.permute.xlu0 %3141 }
 0x9b5   :  { %13052 = vst [vmem:[#allocation178_spill] sm:$0xff] %v9303_v29  ;;  %v3255_v57 = vsel %vm3203_vm4, %v3254_v24, %v3253_v4  ;;  %v13060_v4 = vld [vmem:[#allocation59_spill] sm:$0xff] }
 0x9b6   :  { %v3204_v15 = vsel %vm3203_vm4, %v3202_v48, %v3200_v60  ;;  %v9346_v48 = vadd.s32 4294967240, %v9252_v11  ;;  %v9354_v60 = vadd.s32 4294967192, %v9252_v11 }
 0x9b7   :  { %v3208_v29 = vsel %vm12348_vm5, %v3206_v59, %v3204_v15  ;;  %v3256_v15 = vperm.slane %v8817_v9, %v9283_v43  ;;  %v13062_v59 = vld [vmem:[#allocation245_spill] sm:$0xff] }
 0x9b8   :  { %13057 = vst [vmem:[#allocation37_spill] sm:$0xff] %v9354_v60  ;;  %v3210_v28 = vperm.slane %v8727_v17, %v9346_v48  ;;  %v3258_v7 = vperm.slane %v8857_v13, %v9346_v48  ;;  %v13059_v17 = vld [vmem:[#allocation141_spill] sm:$0xff] }
 0x9b9   :  { %v3257_v9 = vsel %vm12348_vm5, %v3256_v15, %v3255_v57  ;;  %v3264_v57 = vperm.slane %v13065_v52, %v9349_v36 }
 0x9ba   :  { %v3259_v13 = vsel %vm3211_vm6, %v3258_v7, %v3257_v9  ;;  %v13063_v7 = vld [vmem:[#allocation134_spill] sm:$0xff] }
 0x9bb   :  { %v9351_v2 = vpop.permute.xlu2 %3126  ;;  %v3226_v9 = vperm.slane %v13063_v7, %v9335_v33  ;;  %v13066_v7 = vld [vmem:[#allocation57_spill] sm:$0xff] }
 0x9bc   :  { %13056 = vst [vmem:[#allocation199_spill] sm:$0xff] %v9351_v2  ;;  %v9359_v54 = vpop.permute.xlu1 %3111  ;;  %v3266_v2 = vperm.slane %v8797_v20, %v9335_v33  ;;  %v3212_v20 = vsel %vm3211_vm6, %v3210_v28, %v3208_v29  ;;  %v13064_v29 = vld [vmem:[#allocation54_spill] sm:$0xff]  ;;  %v3262_v15 = vperm.slane %v13066_v7, %v9286_v27  ;;  %v9434_v0 = vpop.permute.xlu0 %3150 }
 0x9bd   :  { %13058 = vst [vmem:[#allocation201_spill] sm:$0xff] %v9359_v54  ;;  %v3216_v62 = vsel %vm12201_vm7, %v3214_v3, %v3212_v20  ;;  %v3222_v28 = vperm.slane %v13064_v29, %v9349_v36  ;;  %v3261_v3 = vsel %vm12201_vm7, %v3260_v41, %v3259_v13  ;;  %v13067_v54 = vld [vmem:[#allocation116_spill] sm:$0xff]  ;;  %v3400_v13 = vperm.slane %v9221_v39, %v9252_v11  ;;  %v13070_v39 = vld [vmem:[#allocation114_spill] sm:$0xff] }
 0x9be   :  { %v3220_v20 = vsel %vm12200_vm8, %v3218_v56, %v3216_v62  ;;  %v3276_v29 = vperm.slane %v13067_v54, %v9252_v11  ;;  %v3263_v54 = vsel %vm12200_vm8, %v3262_v15, %v3261_v3  ;;  %v13068_v3 = vld [vmem:[#allocation151_spill] sm:$0xff]  ;;  %v13069_v41 = vperm.slane %v8706_v44, %v9295_v47  ;;  %v13076_v44 = vld [vmem:[#allocation172_spill] sm:$0xff] }
 0x9bf   :  { %v3224_v56 = vsel %vm12199_vm9, %v3222_v28, %v3220_v20  ;;  %v3265_v28 = vsel %vm12199_vm9, %v3264_v57, %v3263_v54  ;;  %v3281_v15 = vperm.slane %v13068_v3, %v9268_v35  ;;  %v3238_v57 = vperm.slane %v13070_v39, %v9338_v42  ;;  %v13071_v54 = vld [vmem:[#allocation142_spill] sm:$0xff] }
 0x9c0   :  { %v3228_v7 = vsel %vm12202_vm10, %v3226_v9, %v3224_v56  ;;  %v3278_v56 = vsel %vm3187_vm0, %v3277_v10, %v3276_v29  ;;  %v3279_v62 = vperm.slane %v13071_v54, %v9273_v31  ;;  %v13072_v20 = vld [vmem:[#allocation130_spill] sm:$0xff]  ;;  %v3267_v10 = vsel %vm12202_vm10, %v3266_v2, %v3265_v28  ;;  %v13073_v29 = vld [vmem:[#allocation233_spill] sm:$0xff] }
 0x9c1   :  { %v3232_v52 = vsel %vm3231_vm11, %v13069_v41, %v3228_v7  ;;  %v3234_v9 = vperm.slane %v13072_v20, %v9354_v60  ;;  %v3270_v3 = vperm.slane %v13073_v29, %v9354_v60  ;;  %v13074_v41 = vld [vmem:[#allocation214_spill] sm:$0xff]  ;;  %v3308_v54 = vperm.slane %v8977_v23, %v9255_v25 }
 0x9c2   :  { %v3268_v7 = vperm.slane %v13074_v41, %v9295_v47  ;;  %v3280_v39 = vsel %vm3191_vm1, %v3279_v62, %v3278_v56  ;;  %v3310_v30 = vperm.slane %v13076_v44, %v9273_v31  ;;  %v3339_v23 = vperm.slane %v9105_v49, %v9255_v25  ;;  %v13078_v49 = vld [vmem:[#allocation154_spill] sm:$0xff]  ;;  %v13080_v41 = vld [vmem:[#allocation127_spill] sm:$0xff] }
 0x9c3   :  { %v9407_v40 = vpop.permute.xlu2 %3135  ;;  %v3236_v28 = vsel %vm3235_vm12, %v3234_v9, %v3232_v52  ;;  %v3282_v29 = vsel %vm3195_vm2, %v3281_v15, %v3280_v39  ;;  %v3287_v44 = vperm.slane %v13078_v49, %v9283_v43  ;;  %v13081_v52 = vperm.slane %v13080_v41, %v9306_v37  ;;  %v13085_v41 = vld [vmem:[#allocation16_spill] sm:$0xff] }
 0x9c4   :  { %v9414_v24 = vpop.permute.xlu1 %3120  ;;  %v3240_v62 = vsel %vm3239_vm13, %v3238_v57, %v3236_v28  ;;  %v3269_v56 = vsel %vm3231_vm11, %v3268_v7, %v3267_v10  ;;  %v9491_v9 = vpop.permute.xlu0 %3159  ;;  %v13077_v57 = vperm.slane %v13059_v17, %v9300_v21  ;;  %v13079_v7 = vperm.slane %v8929_v53, %v9252_v11  ;;  %v13082_v17 = vld [vmem:[#allocation149_spill] sm:$0xff] }
 0x9c5   :  { %v3271_v15 = vsel %vm3235_vm12, %v3270_v3, %v3269_v56  ;;  %v3338_v28 = vperm.slane %v9067_v61, %v9252_v11  ;;  %v3244_v3 = vsel %vm12350_vm14, %v13081_v52, %v3240_v62  ;;  %v3285_v56 = vperm.slane %v13082_v17, %v9289_v45  ;;  %v13084_v61 = vld [vmem:[#allocation188_spill] sm:$0xff]  ;;  %v13086_v52 = vld [vmem:[#allocation133_spill] sm:$0xff] }
 0x9c6   :  { %v3284_v10 = vsel %vm3199_vm3, %v13077_v57, %v3282_v29  ;;  %v3309_v39 = vsel %vm3187_vm0, %v3308_v54, %v13079_v7  ;;  %v13083_v57 = vld [vmem:[#allocation185_spill] sm:$0xff]  ;;  %v3401_v7 = vperm.slane %v13084_v61, %v9255_v25  ;;  %v3274_v62 = vperm.slane %v13085_v41, %v9306_v37 }
 0x9c7   :  { %v3311_v29 = vsel %vm3191_vm1, %v3310_v30, %v3309_v39  ;;  %v3369_v49 = vperm.slane %v13083_v57, %v9252_v11  ;;  %v3340_v54 = vsel %vm3187_vm0, %v3339_v23, %v3338_v28  ;;  %v13087_v17 = vperm.slane %v13086_v52, %v9338_v42  ;;  %v13088_v57 = vld [vmem:[#allocation191_spill] sm:$0xff]  ;;  %v13089_v23 = vld [vmem:[#allocation22_spill] sm:$0xff] }
 0x9c8   :  { %v3286_v39 = vsel %vm3203_vm4, %v3285_v56, %v3284_v10  ;;  %v3403_v2 = vperm.slane %v13088_v57, %v9273_v31  ;;  %v3314_v28 = vperm.slane %v13089_v23, %v9300_v21  ;;  %v13090_v61 = vperm.slane %v8947_v34, %v9268_v35  ;;  %v13093_v56 = vld [vmem:[#allocation171_spill] sm:$0xff]  ;;  %v13095_v34 = vld [vmem:[#allocation84_spill] sm:$0xff] }
 0x9c9   :  { %v3273_v30 = vsel %vm3239_vm13, %v13087_v17, %v3271_v15  ;;  %v3288_v53 = vsel %vm12348_vm5, %v3287_v44, %v3286_v39  ;;  %v3316_v52 = vperm.slane %v13091_v63, %v9289_v45  ;;  %v13092_v15 = vperm.slane %v9042_v12, %v9273_v31  ;;  %v13096_v63 = vld [vmem:[#allocation168_spill] sm:$0xff]  ;;  %v13097_v12 = vld [vmem:[#allocation31_spill] sm:$0xff] }
 0x9ca   :  { %v3313_v41 = vsel %vm3195_vm2, %v13090_v61, %v3311_v29  ;;  %v3345_v44 = vperm.slane %v13093_v56, %v9300_v21  ;;  %v13094_v17 = vperm.slane %v9135_v16, %v9255_v25  ;;  %v3374_v29 = vperm.slane %v13095_v34, %v9268_v35  ;;  %v13099_v34 = vld [vmem:[#allocation19_spill] sm:$0xff] }
 0x9cb   :  { %v9471_v1 = vpop.permute.xlu2 %3144  ;;  %v3342_v10 = vsel %vm3191_vm1, %v13092_v15, %v3340_v54  ;;  %v3275_v57 = vsel %vm12350_vm14, %v3274_v62, %v3273_v30  ;;  %v3343_v23 = vperm.slane %v13096_v63, %v9268_v35  ;;  %v3372_v61 = vperm.slane %v13097_v12, %v9273_v31 }
 0x9cc   :  { %v9473_v20 = vpop.permute.xlu1 %3129  ;;  %v3371_v39 = vsel %vm3187_vm0, %v13094_v17, %v3369_v49  ;;  %v3402_v54 = vsel %vm3187_vm0, %v3401_v7, %v3400_v13  ;;  %v9558_v56 = vpop.permute.xlu0 %3168  ;;  %v13098_v16 = vperm.slane %v13060_v4, %v9346_v48  ;;  %v3315_v17 = vsel %vm3199_vm3, %v3314_v28, %v3313_v41 }
 0x9cd   :  { %13075 = vst [vmem:[#allocation92_spill] sm:$0xff] %v9473_v20  ;;  %v3404_v62 = vsel %vm3191_vm1, %v3403_v2, %v3402_v54  ;;  %v3291_v63 = vperm.slane %v13099_v34, %v9319_v8  ;;  %v3317_v13 = vsel %vm3203_vm4, %v3316_v52, %v3315_v17  ;;  %v3344_v7 = vsel %vm3195_vm2, %v3343_v23, %v3342_v10 }
 0x9ce   :  { %v3290_v49 = vsel %vm3211_vm6, %v13098_v16, %v3288_v53  ;;  %v3373_v12 = vsel %vm3191_vm1, %v3372_v61, %v3371_v39  ;;  %v9573_v5 = vsel %vm12198_vm15, %v3275_v57, %v3244_v3  ;;  %v3346_v4 = vsel %vm3199_vm3, %v3345_v44, %v3344_v7  ;;  %v13101_v3 = vld [vmem:[#allocation178_spill] sm:$0xff]  ;;  %v13102_v44 = vld [vmem:[#allocation63_spill] sm:$0xff] }
 0x9cf   :  { %v3375_v53 = vsel %vm3195_vm2, %v3374_v29, %v3373_v12  ;;  %v3431_v2 = vperm.slane %v9407_v40, %v9252_v11  ;;  %v3292_v28 = vsel %vm12201_vm7, %v3291_v63, %v3290_v49  ;;  %v13100_v41 = vperm.slane %v9237_v46, %v9268_v35  ;;  %v13104_v57 = vld [vmem:[#allocation198_spill] sm:$0xff]  ;;  %v13111_v12 = vld [vmem:[#allocation32_spill] sm:$0xff] }
 0x9d0   :  { %v3409_v10 = vperm.slane %v13101_v3, %v9289_v45  ;;  %v3293_v39 = vperm.slane %v13102_v44, %v9286_v27  ;;  %v13103_v29 = vperm.slane %v8967_v26, %v9283_v43  ;;  %v3407_v23 = vperm.slane %v13104_v57, %v9300_v21  ;;  %v13106_v16 = vld [vmem:[#allocation174_spill] sm:$0xff] }
 0x9d1   :  { %v3406_v52 = vsel %vm3195_vm2, %v13100_v41, %v3404_v62  ;;  %v13105_v46 = vperm.slane %v9063_v6, %v9289_v45  ;;  %v3351_v49 = vperm.slane %v13106_v16, %v9346_v48  ;;  %v13107_v17 = vperm.slane %v9155_v19, %v9300_v21  ;;  %v13108_v62 = vld [vmem:[#allocation230_spill] sm:$0xff]  ;;  %v13112_v41 = vld [vmem:[#allocation23_spill] sm:$0xff] }
 0x9d2   :  { %v3319_v40 = vsel %vm12348_vm5, %v13103_v29, %v3317_v13  ;;  %v3380_v34 = vperm.slane %v13108_v62, %v9283_v43  ;;  %v13109_v13 = vld [vmem:[#allocation128_spill] sm:$0xff]  ;;  %v13110_v7 = vld [vmem:[#allocation74_spill] sm:$0xff]  ;;  %v3320_v19 = vperm.slane %v13112_v41, %v9346_v48  ;;  %v13113_v3 = vperm.slane %v9380_v50, %v9273_v31 }
 0x9d3   :  { %v9556_v15 = vpop.permute.xlu2 %3153  ;;  %v3348_v54 = vsel %vm3203_vm4, %v13105_v46, %v3346_v4  ;;  %v3377_v26 = vsel %vm3199_vm3, %v13107_v17, %v3375_v53  ;;  %v3349_v6 = vperm.slane %v13110_v7, %v9283_v43  ;;  %v3378_v4 = vperm.slane %v13111_v12, %v9289_v45 }
 0x9d4   :  { %v3139_v20 = vpop.permute.xlu1 %3138  ;;  %v3294_v57 = vsel %vm12200_vm8, %v3293_v39, %v3292_v28  ;;  %v13115_v39 = vperm.slane %v9243_v51, %v9283_v43  ;;  %v13121_v12 = vperm.slane %v9081_v38, %v9319_v8  ;;  %v13126_v38 = vld [vmem:[#allocation76_spill] sm:$0xff]  ;;  %vm12203_vm15 = vcmask 1042434  }
 0x9d5   :  { %v3432_v30 = vperm.slane %v3139_v20, %v9255_v25  ;;  %v3452_v20 = vperm.slane %v9558_v56, %v9335_v33  ;;  %v3350_v46 = vsel %vm12348_vm5, %v3349_v6, %v3348_v54  ;;  %v3379_v16 = vsel %vm3203_vm4, %v3378_v4, %v3377_v26 }
 0x9d6   :  { %v3352_v50 = vsel %vm3211_vm6, %v3351_v49, %v3350_v46  ;;  %v3355_v46 = vperm.slane %v13126_v38, %v9286_v27 }
 0x9d7   :  { %v3433_v61 = vsel %vm3187_vm0, %v3432_v30, %v3431_v2  ;;  %v3322_v30 = vperm.slane %v13109_v13, %v9319_v8  ;;  %v3408_v2 = vsel %vm3199_vm3, %v3407_v23, %v3406_v52  ;;  %v3436_v52 = vperm.slane %v9471_v1, %v9268_v35  ;;  %v13114_v23 = vld [vmem:[#allocation20_spill] sm:$0xff]  ;;  %v13116_v1 = vld [vmem:[#allocation201_spill] sm:$0xff] }
 0x9d8   :  { %v3410_v53 = vsel %vm3203_vm4, %v3409_v10, %v3408_v2  ;;  %v3435_v44 = vsel %vm3191_vm1, %v13113_v3, %v3433_v61  ;;  %v3297_v17 = vperm.slane %v13114_v23, %v9335_v33  ;;  %v3321_v10 = vsel %vm3211_vm6, %v3320_v19, %v3319_v40  ;;  %v13117_v13 = vld [vmem:[#allocation60_spill] sm:$0xff]  ;;  %v13122_v2 = vld [vmem:[#allocation177_spill] sm:$0xff]  ;;  %v13124_v3 = vld [vmem:[#allocation87_spill] sm:$0xff] }
 0x9d9   :  { %v3381_v61 = vsel %vm12348_vm5, %v3380_v34, %v3379_v16  ;;  %v3323_v28 = vsel %vm12201_vm7, %v3322_v30, %v3321_v10  ;;  %v3412_v54 = vsel %vm12348_vm5, %v13115_v39, %v3410_v53  ;;  %v3415_v26 = vperm.slane %v13116_v1, %v9319_v8  ;;  %v13119_v34 = vld [vmem:[#allocation152_spill] sm:$0xff]  ;;  %v13127_v16 = vld [vmem:[#allocation169_spill] sm:$0xff] }
 0x9da   :  { %v13118_v40 = vperm.slane %v13117_v13, %v9349_v36  ;;  %v3299_v7 = vperm.slane %v13119_v34, %v9295_v47  ;;  %v13120_v30 = vld [vmem:[#allocation88_spill] sm:$0xff]  ;;  %v3354_v4 = vsel %vm12201_vm7, %v13121_v12, %v3352_v50  ;;  %v3357_v41 = vperm.slane %v13122_v2, %v9349_v36  ;;  %v13131_v34 = vld [vmem:[#allocation243_spill] sm:$0xff] }
 0x9db   :  { %v9634_v62 = vpop.permute.xlu2 %3162  ;;  %v3413_v6 = vperm.slane %v13120_v30, %v9346_v48  ;;  %v13123_v19 = vperm.slane %v9173_v55, %v9346_v48  ;;  %v13128_v55 = vld [vmem:[#allocation26_spill] sm:$0xff]  ;;  %v13129_v39 = vperm.slane %v9434_v0, %v9289_v45  ;;  %v13130_v1 = vld [vmem:[#allocation164_spill] sm:$0xff]  ;;  %v3356_v13 = vsel %vm12200_vm8, %v3355_v46, %v3354_v4 }
 0x9dc   :  { %v3148_v63 = vpop.permute.xlu1 %3147  ;;  %v3296_v49 = vsel %vm12199_vm9, %v13118_v40, %v3294_v57  ;;  %v13125_v57 = vperm.slane %v8985_v18, %v9286_v27  ;;  %v3328_v50 = vperm.slane %v13128_v55, %v9335_v33  ;;  %v3442_v40 = vperm.slane %v9556_v15, %v9283_v43 }
 0x9dd   :  { %v3438_v29 = vperm.slane %v3148_v63, %v9300_v21  ;;  %v3437_v63 = vsel %vm3195_vm2, %v3436_v52, %v3435_v44  ;;  %v3383_v53 = vsel %vm3211_vm6, %v13123_v19, %v3381_v61  ;;  %v3386_v44 = vperm.slane %v13124_v3, %v9286_v27 }
 0x9de   :  { %v3384_v52 = vperm.slane %v13127_v16, %v9319_v8  ;;  %v3414_v23 = vsel %vm3211_vm6, %v3413_v6, %v3412_v54  ;;  %v3298_v30 = vsel %vm12202_vm10, %v3297_v17, %v3296_v49  ;;  %v3358_v0 = vsel %vm12199_vm9, %v3357_v41, %v3356_v13  ;;  %v13133_v49 = vld [vmem:[#allocation200_spill] sm:$0xff]  ;;  %v13138_v16 = vld [vmem:[#allocation167_spill] sm:$0xff] }
 0x9df   :  { %v3439_v51 = vsel %vm3199_vm3, %v3438_v29, %v3437_v63  ;;  %v3325_v29 = vsel %vm12200_vm8, %v13125_v57, %v3323_v28  ;;  %v3416_v61 = vsel %vm12201_vm7, %v3415_v26, %v3414_v23  ;;  %v3326_v63 = vperm.slane %v13130_v1, %v9349_v36  ;;  %v13139_v23 = vld [vmem:[#allocation78_spill] sm:$0xff] }
 0x9e0   :  { %v3441_v18 = vsel %vm3203_vm4, %v13129_v39, %v3439_v51  ;;  %v3385_v54 = vsel %vm12201_vm7, %v3384_v52, %v3383_v53  ;;  %v3303_v26 = vperm.slane %v13131_v34, %v9338_v42  ;;  %v13132_v12 = vperm.slane %v9249_v58, %v9286_v27  ;;  %v13142_v39 = vld [vmem:[#allocation72_spill] sm:$0xff] }
 0x9e1   :  { %v3387_v6 = vsel %vm12200_vm8, %v3386_v44, %v3385_v54  ;;  %v3327_v51 = vsel %vm12199_vm9, %v3326_v63, %v3325_v29  ;;  %v3421_v2 = vperm.slane %v9414_v24, %v9335_v33  ;;  %v3443_v15 = vsel %vm12348_vm5, %v3442_v40, %v3441_v18  ;;  %v13135_v44 = vld [vmem:[#allocation182_spill] sm:$0xff]  ;;  %v3178_v54 = vpop.permute.xlu0 %3177 }
 0x9e2   :  { %v3418_v4 = vsel %vm12200_vm8, %v13132_v12, %v3416_v61  ;;  %v3300_v19 = vsel %vm3231_vm11, %v3299_v7, %v3298_v30  ;;  %v3329_v17 = vsel %vm12202_vm10, %v3328_v50, %v3327_v51  ;;  %v3419_v41 = vperm.slane %v13133_v49, %v9349_v36  ;;  %v13137_v29 = vld [vmem:[#allocation34_spill] sm:$0xff]  ;;  %v13148_v49 = vld [vmem:[#allocation92_spill] sm:$0xff] }
 0x9e3   :  { %v13134_v58 = vperm.slane %v9099_v14, %v9335_v33  ;;  %v3363_v24 = vperm.slane %v13135_v44, %v9354_v60  ;;  %v13136_v57 = vperm.slane %v9191_v22, %v9349_v36  ;;  %v3392_v38 = vperm.slane %v13137_v29, %v9295_v47  ;;  %v3172_v46 = vpop.permute.xlu2 %3171 }
 0x9e4   :  { %v3157_v10 = vpop.permute.xlu1 %3156  ;;  %v3332_v52 = vperm.slane %v13138_v16, %v9354_v60  ;;  %v3361_v14 = vperm.slane %v13139_v23, %v9295_v47  ;;  %v3420_v50 = vsel %vm12199_vm9, %v3419_v41, %v3418_v4  ;;  %v13141_v22 = vperm.slane %v9003_v32, %v9295_v47  ;;  %v13154_v23 = vld [vmem:[#allocation162_spill] sm:$0xff] }
 0x9e5   :  { %v3444_v28 = vperm.slane %v3157_v10, %v9346_v48  ;;  %v3360_v3 = vsel %vm12202_vm10, %v13134_v58, %v3358_v0  ;;  %v3389_v7 = vsel %vm12199_vm9, %v13136_v57, %v3387_v6  ;;  %v13140_v10 = vld [vmem:[#allocation33_spill] sm:$0xff]  ;;  %v3334_v18 = vperm.slane %v13142_v39, %v9338_v42  ;;  %v13149_v58 = vld [vmem:[#allocation199_spill] sm:$0xff]  ;;  %v13150_v57 = vld [vmem:[#allocation202_spill] sm:$0xff] }
 0x9e6   :  { %v3390_v55 = vperm.slane %v13140_v10, %v9335_v33  ;;  %v3331_v61 = vsel %vm3231_vm11, %v13141_v22, %v3329_v17  ;;  %v13143_v1 = vperm.slane %v9491_v9, %v9319_v8  ;;  %v3362_v40 = vsel %vm3231_vm11, %v3361_v14, %v3360_v3  ;;  %v13145_v9 = vld [vmem:[#allocation155_spill] sm:$0xff] }
 0x9e7   :  { %v3445_v53 = vsel %vm3211_vm6, %v3444_v28, %v3443_v15  ;;  %v3422_v28 = vsel %vm12202_vm10, %v3421_v2, %v3420_v50  ;;  %v3448_v32 = vperm.slane %v9634_v62, %v9286_v27  ;;  %v13144_v0 = vperm.slane %v13062_v59, %v9354_v60  ;;  %v13146_v15 = vld [vmem:[#allocation35_spill] sm:$0xff] }
 0x9e8   :  { %v3447_v63 = vsel %vm12201_vm7, %v13143_v1, %v3445_v53  ;;  %v3391_v34 = vsel %vm12202_vm10, %v3390_v55, %v3389_v7  ;;  %v3305_v51 = vperm.slane %v13145_v9, %v9306_v37  ;;  %v3364_v12 = vsel %vm3235_vm12, %v3363_v24, %v3362_v40  ;;  %v13155_v55 = vld [vmem:[#allocation153_spill] sm:$0xff]  ;;  %v13157_v39 = vld [vmem:[#allocation67_spill] sm:$0xff] }
 0x9e9   :  { %v3302_v6 = vsel %vm3235_vm12, %v13144_v0, %v3300_v19  ;;  %v3393_v4 = vsel %vm3231_vm11, %v3392_v38, %v3391_v34  ;;  %v3333_v2 = vsel %vm3235_vm12, %v3332_v52, %v3331_v61  ;;  %v13147_v17 = vperm.slane %v13146_v15, %v9295_v47  ;;  %v13152_v38 = vld [vmem:[#allocation73_spill] sm:$0xff] }
 0x9ea   :  { %v3427_v41 = vperm.slane %v13148_v49, %v9338_v42  ;;  %v3449_v59 = vsel %vm12200_vm8, %v3448_v32, %v3447_v63  ;;  %v3458_v19 = vperm.slane %v3178_v54, %v9338_v42  ;;  %v3335_v53 = vsel %vm3239_vm13, %v3334_v18, %v3333_v2 }
 0x9eb   :  { %v3424_v62 = vsel %vm3231_vm11, %v13147_v17, %v3422_v28  ;;  %v3425_v3 = vperm.slane %v13149_v58, %v9354_v60  ;;  %v3304_v24 = vsel %vm3239_vm13, %v3303_v26, %v3302_v6  ;;  %v13151_v7 = vperm.slane %v13150_v57, %v9338_v42  ;;  %v13156_v26 = vld [vmem:[#allocation222_spill] sm:$0xff]  ;;  %v3181_v40 = vpop.permute.xlu2 %3180  ;;  %v13161_v58 = vld [vmem:[#allocation225_spill] sm:$0xff] }
 0x9ec   :  { %v3166_v13 = vpop.permute.xlu1 %3165  ;;  %v13153_v16 = vperm.slane %v13152_v38, %v9354_v60  ;;  %v3398_v14 = vperm.slane %v13154_v23, %v9306_v37  ;;  %v3306_v10 = vsel %vm12350_vm14, %v3305_v51, %v3304_v24  ;;  %v3367_v50 = vperm.slane %v13155_v55, %v9306_v37  ;;  %v13163_v24 = vld [vmem:[#allocation95_spill] sm:$0xff]  ;;  %v13165_v23 = vld [vmem:[#allocation212_spill] sm:$0xff] }
 0x9ed   :  { %v3450_v30 = vperm.slane %v3166_v13, %v9349_v36  ;;  %v3366_v29 = vsel %vm3239_vm13, %v13151_v7, %v3364_v12  ;;  %v3396_v22 = vperm.slane %v13156_v26, %v9338_v42  ;;  %v3426_v61 = vsel %vm3235_vm12, %v3425_v3, %v3424_v62  ;;  %v13162_v3 = vld [vmem:[#allocation246_spill] sm:$0xff] }
 0x9ee   :  { %v3395_v52 = vsel %vm3235_vm12, %v13153_v16, %v3393_v4  ;;  %v13158_v18 = vperm.slane %v13157_v39, %v9306_v37  ;;  %v3428_v1 = vsel %vm3239_vm13, %v3427_v41, %v3426_v61  ;;  %v3454_v54 = vperm.slane %v3172_v46, %v9295_v47  ;;  %v13164_v16 = vld [vmem:[#allocation50_spill] sm:$0xff] }
 0x9ef   :  { %v3451_v44 = vsel %vm12199_vm9, %v3450_v30, %v3449_v59  ;;  %vm12349_vm9 = vcmask 1043459   ;;  %v3397_v13 = vsel %vm3239_vm13, %v3396_v22, %v3395_v52  ;;  %v3368_v32 = vsel %vm12350_vm14, %v3367_v50, %v3366_v29 }
 0x9f0   :  { %v3337_v28 = vsel %vm12350_vm14, %v13158_v18, %v3335_v53  ;;  %v3453_v63 = vsel %vm12202_vm10, %v3452_v20, %v3451_v44  ;;  %vm12347_vm8 = vcmask 1044484   ;;  %v3465_v30 = vsel %vm12203_vm15, %v3306_v10, %v9573_v5  ;;  %v13159_v20 = vld [vmem:[#allocation241_spill] sm:$0xff] }
 0x9f1   :  { %v3399_v0 = vsel %vm12350_vm14, %v3398_v14, %v3397_v13  ;;  %vm12346_vm7 = vcmask 1045509   ;;  %v3455_v56 = vsel %vm3231_vm11, %v3454_v54, %v3453_v63  ;;  %v13160_v9 = vperm.slane %v13159_v20, %v9306_v37  ;;  %v13166_v10 = vld [vmem:[#allocation97_spill] sm:$0xff]  ;;  %v13171_v63 = vld [vmem:[#allocation210_spill] sm:$0xff] }
 0x9f2   :  { %v3467_v51 = vsel %vm12349_vm9, %v3337_v28, %v3465_v30  ;;  %vm12345_vm10 = vcmask 1046534   ;;  %v3460_v12 = vperm.slane %v3181_v40, %v9306_v37  ;;  %vm12344_vm15 = vcmask 1047559   ;;  %v13170_v28 = vld [vmem:[#allocation125_spill] sm:$0xff]  ;;  %v13176_v20 = vld [vmem:[#allocation226_spill] sm:$0xff] }
 0x9f3   :  { %v3430_v46 = vsel %vm12350_vm14, %v13160_v9, %v3428_v1  ;;  %v3469_v5 = vsel %vm12347_vm8, %v3368_v32, %v3467_v51  ;;  %v13172_v54 = vld [vmem:[#allocation213_spill] sm:$0xff] }
 0x9f4   :  { %v3175_v34 = vpop.permute.xlu1 %3174  ;;  %v3471_v15 = vsel %vm12346_vm7, %v3399_v0, %v3469_v5  ;;  %vm13481_vm7 = vcmask 654912  }
 0x9f5   :  { %v3456_v6 = vperm.slane %v3175_v34, %v9354_v60  ;;  %v3473_v62 = vsel %vm12345_vm10, %v3430_v46, %v3471_v15  ;;  %v13177_v46 = vld [vmem:[#allocation101_spill] sm:$0xff] }
 0x9f7   :  { %v3457_v4 = vsel %vm3235_vm12, %v3456_v6, %v3455_v56 }
 0x9f8   :  { %v3459_v2 = vsel %vm3239_vm13, %v3458_v19, %v3457_v4 }
 0x9f9   :  { %v3461_v17 = vsel %vm12350_vm14, %v3460_v12, %v3459_v2  ;;  %v13178_v12 = vld [vmem:[#allocation251_spill] sm:$0xff] }
 0x9fa   :  { %v3475_v49 = vsel %vm12344_vm15, %v3461_v17, %v3473_v62  ;;  %vm13479_vm15 = vcmask 589312  }
 0x9fb   :  { %3477 = vmax.xlane.f32.xlu1 %v3475_v49  ;;  %vm13480_vm10 = vmmov %vm13479_vm15 }
 0xa6e   :  { %v9809_v41 = vpop.xlane.xlu1 %3477 }
 0xa6f   :  { %v9812_v59 = vperm.slane %v9809_v41, 0  ;;  %v9815_v53 = vperm.slane %v9809_v41, 1 }
 0xa71   :  { %v3506_v19 = vsub.f32 %v13161_v58, %v9812_v59  ;;  %v3497_v44 = vsub.f32 %v13162_v3, %v9812_v59  ;;  %v3496_v57 = vsub.f32 %v13163_v24, %v9812_v59  ;;  %v3513_v52 = vsub.f32 %v13164_v16, %v9815_v53  ;;  %v13182_v58 = vld [vmem:[#allocation124_spill] sm:$0xff]  ;;  %v13184_v24 = vld [vmem:[#allocation217_spill] sm:$0xff] }
 0xa72   :  { %v3499_v14 = vsub.f32 %v13165_v23, %v9812_v59  ;;  %v3498_v55 = vsub.f32 %v13166_v10, %v9812_v59  ;;  %v3516_v1 = vsub.f32 %v13170_v28, %v9815_v53  ;;  %v3501_v13 = vsub.f32 %v13171_v63, %v9812_v59  ;;  %v13183_v3 = vld [vmem:[#allocation252_spill] sm:$0xff] }
 0xa73   :  { %v3644_v7 = vmul.f32 1.442695, %v3506_v19  ;;  %v3626_v29 = vmul.f32 1.442695, %v3497_v44  ;;  %v3624_v38 = vmul.f32 1.442695, %v3496_v57  ;;  %v3500_v40 = vsub.f32 %v13172_v54, %v9812_v59 }
 0xa74   :  { %v3658_v50 = vmul.f32 1.442695, %v3513_v52  ;;  %v3630_v26 = vmul.f32 1.442695, %v3499_v14  ;;  %v3628_v61 = vmul.f32 1.442695, %v3498_v55  ;;  %v3519_v9 = vsub.f32 %v13176_v20, %v9815_v53 }
 0xa75   :  { %6492 = vpow2.f32 %v3644_v7  ;;  %v3664_v34 = vmul.f32 1.442695, %v3516_v1  ;;  %v3634_v32 = vmul.f32 1.442695, %v3501_v13  ;;  %v3632_v0 = vmul.f32 1.442695, %v3500_v40 }
 0xa76   :  { %6494 = vpow2.f32 %v3626_v29  ;;  %v3503_v51 = vsub.f32 %v13177_v46, %v9812_v59  ;;  %v3502_v4 = vsub.f32 %v13178_v12, %v9812_v59  ;;  %v3670_v5 = vmul.f32 1.442695, %v3519_v9  ;;  %v13188_v14 = vld [vmem:[#allocation126_spill] sm:$0xff]  ;;  %v13196_v46 = vld [vmem:[#allocation228_spill] sm:$0xff] }
 0xa77   :  { %6496 = vpow2.f32 %v3624_v38  ;;  %v3522_v19 = vsub.f32 %v13182_v58, %v9815_v53  ;;  %v3505_v44 = vsub.f32 %v13183_v3, %v9812_v59  ;;  %v3504_v57 = vsub.f32 %v13184_v24, %v9812_v59  ;;  %v13189_v55 = vld [vmem:[#allocation254_spill] sm:$0xff] }
 0xa78   :  { %6498 = vpow2.f32 %v3658_v50  ;;  %v3638_v2 = vmul.f32 1.442695, %v3503_v51  ;;  %v3636_v17 = vmul.f32 1.442695, %v3502_v4  ;;  %v3525_v10 = vsub.f32 %v13188_v14, %v9815_v53  ;;  %v13195_v20 = vld [vmem:[#allocation106_spill] sm:$0xff] }
 0xa79   :  { %6500 = vpow2.f32 %v3630_v26  ;;  %v3676_v7 = vmul.f32 1.442695, %v3522_v19  ;;  %v3642_v29 = vmul.f32 1.442695, %v3505_v44  ;;  %v3640_v16 = vmul.f32 1.442695, %v3504_v57 }
 0xa7a   :  { %6502 = vpow2.f32 %v3628_v61  ;;  %v3508_v50 = vsub.f32 %v13189_v55, %v9812_v59  ;;  %v13190_v26 = vld [vmem:[#allocation136_spill] sm:$0xff]  ;;  %v9890_v28 = vperm.slane %v9809_v41, 2  ;;  %v3682_v1 = vmul.f32 1.442695, %v3525_v10  ;;  %v13202_v57 = vld [vmem:[#allocation255_spill] sm:$0xff] }
 0xa7b   :  { %v9829_v22 = vpop.eup %6492  ;;  %6504 = vpow2.f32 %v3664_v34  ;;  %v3507_v61 = vsub.f32 %v13190_v26, %v9812_v59  ;;  %v3510_v9 = vsub.f32 %v13195_v20, %v9812_v59  ;;  %v3509_v51 = vsub.f32 %v13196_v46, %v9812_v59  ;;  %v13200_v19 = vld [vmem:[#allocation8_spill] sm:$0xff]  ;;  %v13206_v26 = vld [vmem:[#allocation10_spill] sm:$0xff] }
 0xa7c   :  { %13167 = vst [vmem:[#allocation203_spill] sm:$0xff] %v9829_v22  ;;  %v9831_v39 = vpop.eup %6494  ;;  %4039 = vperm.xlu1 %6489, %v9829_v22   ;;  %6506 = vpow2.f32 %v3634_v32  ;;  %v3648_v63 = vmul.f32 1.442695, %v3508_v50  ;;  %v13194_v32 = vld [vmem:[#allocation110_spill] sm:$0xff]  ;;  %v3531_v3 = vsub.f32 %v13200_v19, %v9890_v28  ;;  %v13201_v44 = vld [vmem:[#allocation52_spill] sm:$0xff] }
 0xa7d   :  { %13168 = vst [vmem:[#allocation197_spill] sm:$0xff] %v9831_v39  ;;  %v9834_v18 = vpop.eup %6496  ;;  %4012 = vperm.xlu2 %6491, %v9831_v39   ;;  %6508 = vpow2.f32 %v3632_v0  ;;  %v3646_v54 = vmul.f32 1.442695, %v3507_v61  ;;  %v3528_v0 = vsub.f32 %v13194_v32, %v9890_v28  ;;  %v3652_v4 = vmul.f32 1.442695, %v3510_v9 }
 0xa7e   :  { %13169 = vst [vmem:[#allocation94_spill] sm:$0xff] %v9834_v18  ;;  %4009 = vperm.xlu0 %6490, %v9834_v18   ;;  %v9844_v30 = vpop.eup %6498  ;;  %6510 = vpow2.f32 %v3670_v5  ;;  %v3512_v24 = vsub.f32 %v13201_v44, %v9815_v53  ;;  %v3534_v61 = vsub.f32 %v13206_v26, %v9890_v28  ;;  %v13218_v26 = vld [vmem:[#allocation11_spill] sm:$0xff] }
 0xa7f   :  { %13173 = vst [vmem:[#allocation206_spill] sm:$0xff] %v9844_v30  ;;  %v9846_v6 = vpop.eup %6500  ;;  %6512 = vpow2.f32 %v3638_v2  ;;  %v3688_v12 = vmul.f32 1.442695, %v3528_v0  ;;  %v3650_v2 = vmul.f32 1.442695, %v3509_v51 }
 0xa80   :  { %13174 = vst [vmem:[#allocation38_spill] sm:$0xff] %v9846_v6  ;;  %v9849_v56 = vpop.eup %6502  ;;  %6514 = vpow2.f32 %v3636_v17  ;;  %v3700_v32 = vmul.f32 1.442695, %v3534_v61  ;;  %v3540_v61 = vsub.f32 %v13218_v26, %v9890_v28  ;;  %v9983_v26 = vperm.slane %v9809_v41, 3 }
 0xa81   :  { %13175 = vst [vmem:[#allocation195_spill] sm:$0xff] %v9849_v56  ;;  %v9859_v15 = vpop.eup %6504  ;;  %6516 = vpow2.f32 %v3676_v7  ;;  %v3511_v7 = vsub.f32 %v13202_v57, %v9812_v59  ;;  %v13207_v59 = vld [vmem:[#allocation108_spill] sm:$0xff] }
 0xa82   :  { %13179 = vst [vmem:[#allocation89_spill] sm:$0xff] %v9859_v15  ;;  %v9861_v62 = vpop.eup %6506  ;;  %6518 = vpow2.f32 %v3642_v29  ;;  %v3694_v29 = vmul.f32 1.442695, %v3531_v3  ;;  %v13214_v3 = vld [vmem:[#allocation257_spill] sm:$0xff] }
 0xa83   :  { %13180 = vst [vmem:[#allocation96_spill] sm:$0xff] %v9861_v62  ;;  %v9864_v49 = vpop.eup %6508  ;;  %6520 = vpow2.f32 %v3640_v16  ;;  %v3656_v16 = vmul.f32 1.442695, %v3512_v24  ;;  %v3654_v10 = vmul.f32 1.442695, %v3511_v7  ;;  %v3517_v44 = vsub.f32 %v13214_v3, %v9815_v53 }
 0xa84   :  { %4060 = vperm.xlu1 %6489, %v9844_v30   ;;  %13181 = vst [vmem:[#allocation204_spill] sm:$0xff] %v9864_v49  ;;  %v9874_v38 = vpop.eup %6510  ;;  %6522 = vpow2.f32 %v3682_v1  ;;  %v3515_v1 = vsub.f32 %v13207_v59, %v9815_v53  ;;  %v13219_v59 = vld [vmem:[#allocation9_spill] sm:$0xff] }
 0xa85   :  { %4018 = vperm.xlu2 %6491, %v9846_v6   ;;  %13185 = vst [vmem:[#allocation39_spill] sm:$0xff] %v9874_v38  ;;  %v9876_v52 = vpop.eup %6512  ;;  %6524 = vpow2.f32 %v3648_v63  ;;  %v13208_v63 = vld [vmem:[#allocation256_spill] sm:$0xff] }
 0xa86   :  { %4015 = vperm.xlu0 %6490, %v9849_v56   ;;  %13186 = vst [vmem:[#allocation215_spill] sm:$0xff] %v9876_v52  ;;  %v9879_v23 = vpop.eup %6514  ;;  %6526 = vpow2.f32 %v3646_v54  ;;  %v3514_v54 = vsub.f32 %v13208_v63, %v9815_v53  ;;  %v3662_v0 = vmul.f32 1.442695, %v3515_v1  ;;  %v3521_v1 = vsub.f32 %v13219_v59, %v9815_v53  ;;  %v13220_v63 = vld [vmem:[#allocation258_spill] sm:$0xff] }
 0xa87   :  { %13187 = vst [vmem:[#allocation86_spill] sm:$0xff] %v9879_v23  ;;  %v9892_v13 = vpop.eup %6516  ;;  %6528 = vpow2.f32 %v3688_v12  ;;  %v13212_v12 = vld [vmem:[#allocation53_spill] sm:$0xff] }
 0xa88   :  { %13191 = vst [vmem:[#allocation98_spill] sm:$0xff] %v9892_v13  ;;  %v9894_v40 = vpop.eup %6518  ;;  %6530 = vpow2.f32 %v3652_v4  ;;  %v3660_v9 = vmul.f32 1.442695, %v3514_v54  ;;  %v3537_v4 = vsub.f32 %v13212_v12, %v9890_v28  ;;  %v3520_v54 = vsub.f32 %v13220_v63, %v9815_v53 }
 0xa89   :  { %13192 = vst [vmem:[#allocation207_spill] sm:$0xff] %v9894_v40  ;;  %v9897_v34 = vpop.eup %6520  ;;  %6532 = vpow2.f32 %v3650_v2  ;;  %v13213_v2 = vld [vmem:[#allocation51_spill] sm:$0xff] }
 0xa8a   :  { %13193 = vst [vmem:[#allocation40_spill] sm:$0xff] %v9897_v34  ;;  %v9907_v5 = vpop.eup %6522  ;;  %6534 = vpow2.f32 %v3694_v29  ;;  %v3518_v19 = vsub.f32 %v13213_v2, %v9815_v53  ;;  %v3706_v24 = vmul.f32 1.442695, %v3537_v4  ;;  %v3666_v29 = vmul.f32 1.442695, %v3517_v44  ;;  %v13225_v44 = vld [vmem:[#allocation250_spill] sm:$0xff] }
 0xa8b   :  { %13197 = vst [vmem:[#allocation218_spill] sm:$0xff] %v9907_v5  ;;  %v9909_v17 = vpop.eup %6524  ;;  %6536 = vpow2.f32 %v3656_v16  ;;  %v3672_v12 = vmul.f32 1.442695, %v3520_v54 }
 0xa8c   :  { %4069 = vperm.xlu1 %6489, %v9859_v15   ;;  %13198 = vst [vmem:[#allocation208_spill] sm:$0xff] %v9909_v17  ;;  %v9912_v58 = vpop.eup %6526  ;;  %6538 = vpow2.f32 %v3654_v10  ;;  %v3668_v57 = vmul.f32 1.442695, %v3518_v19  ;;  %v13224_v19 = vld [vmem:[#allocation159_spill] sm:$0xff] }
 0xa8d   :  { %4024 = vperm.xlu2 %6491, %v9861_v62   ;;  %13199 = vst [vmem:[#allocation100_spill] sm:$0xff] %v9912_v58  ;;  %v9922_v14 = vpop.eup %6528  ;;  %6540 = vpow2.f32 %v3700_v32  ;;  %v3712_v32 = vmul.f32 1.442695, %v3540_v61  ;;  %v3543_v3 = vsub.f32 %v13224_v19, %v9890_v28  ;;  %v13231_v19 = vld [vmem:[#allocation247_spill] sm:$0xff] }
 0xa8e   :  { %4021 = vperm.xlu0 %6490, %v9864_v49   ;;  %13203 = vst [vmem:[#allocation122_spill] sm:$0xff] %v9922_v14  ;;  %v9924_v55 = vpop.eup %6530  ;;  %6542 = vpow2.f32 %v3662_v0  ;;  %v3674_v0 = vmul.f32 1.442695, %v3521_v1 }
 0xa8f   :  { %13204 = vst [vmem:[#allocation41_spill] sm:$0xff] %v9924_v55  ;;  %v9927_v50 = vpop.eup %6532  ;;  %6544 = vpow2.f32 %v3660_v9  ;;  %v3718_v61 = vmul.f32 1.442695, %v3543_v3  ;;  %v3527_v3 = vsub.f32 %v13231_v19, %v9815_v53  ;;  %v13238_v19 = vld [vmem:[#allocation261_spill] sm:$0xff] }
 0xa90   :  { %13205 = vst [vmem:[#allocation216_spill] sm:$0xff] %v9927_v50  ;;  %v9937_v20 = vpop.eup %6534  ;;  %6546 = vpow2.f32 %v3706_v24  ;;  %v3524_v24 = vsub.f32 %v13225_v44, %v9815_v53  ;;  %v13232_v44 = vld [vmem:[#allocation260_spill] sm:$0xff] }
 0xa91   :  { %13209 = vst [vmem:[#allocation42_spill] sm:$0xff] %v9937_v20  ;;  %v9939_v46 = vpop.eup %6536  ;;  %6548 = vpow2.f32 %v3668_v57  ;;  %v13226_v57 = vld [vmem:[#allocation259_spill] sm:$0xff] }
 0xa92   :  { %13210 = vst [vmem:[#allocation219_spill] sm:$0xff] %v9939_v46  ;;  %v9942_v51 = vpop.eup %6538  ;;  %6550 = vpow2.f32 %v3666_v29  ;;  %v3523_v29 = vsub.f32 %v13226_v57, %v9815_v53  ;;  %v3680_v59 = vmul.f32 1.442695, %v3524_v24  ;;  %v3526_v24 = vsub.f32 %v13232_v44, %v9815_v53  ;;  %v13237_v53 = vld [vmem:[#allocation123_spill] sm:$0xff] }
 0xa93   :  { %13211 = vst [vmem:[#allocation102_spill] sm:$0xff] %v9942_v51  ;;  %v9952_v7 = vpop.eup %6540  ;;  %6552 = vpow2.f32 %v3712_v32 }
 0xa94   :  { %4078 = vperm.xlu1 %6489, %v9874_v38   ;;  %13215 = vst [vmem:[#allocation220_spill] sm:$0xff] %v9952_v7  ;;  %v9954_v16 = vpop.eup %6542  ;;  %6554 = vpow2.f32 %v3674_v0  ;;  %v3678_v63 = vmul.f32 1.442695, %v3523_v29  ;;  %v13230_v0 = vld [vmem:[#allocation12_spill] sm:$0xff]  ;;  %v3686_v29 = vmul.f32 1.442695, %v3527_v3  ;;  %v3529_v3 = vsub.f32 %v13238_v19, %v9890_v28 }
 0xa95   :  { %4030 = vperm.xlu2 %6491, %v9876_v52   ;;  %13216 = vst [vmem:[#allocation227_spill] sm:$0xff] %v9954_v16  ;;  %v9957_v10 = vpop.eup %6544  ;;  %6556 = vpow2.f32 %v3672_v12  ;;  %v3546_v12 = vsub.f32 %v13230_v0, %v9983_v26  ;;  %v3530_v0 = vsub.f32 %v13237_v53, %v9890_v28  ;;  %v13244_v19 = vld [vmem:[#allocation262_spill] sm:$0xff] }
 0xa96   :  { %4027 = vperm.xlu0 %6490, %v9879_v23   ;;  %13217 = vst [vmem:[#allocation104_spill] sm:$0xff] %v9957_v10  ;;  %v9967_v9 = vpop.eup %6546  ;;  %6558 = vpow2.f32 %v3718_v61 }
 0xa97   :  { %13221 = vst [vmem:[#allocation223_spill] sm:$0xff] %v9967_v9  ;;  %v9969_v4 = vpop.eup %6548  ;;  %6560 = vpow2.f32 %v3680_v59  ;;  %v3724_v57 = vmul.f32 1.442695, %v3546_v12  ;;  %v13236_v59 = vld [vmem:[#allocation55_spill] sm:$0xff] }
 0xa98   :  { %13222 = vst [vmem:[#allocation43_spill] sm:$0xff] %v9969_v4  ;;  %v9972_v2 = vpop.eup %6550  ;;  %6562 = vpow2.f32 %v3678_v63  ;;  %v3549_v63 = vsub.f32 %v13236_v59, %v9983_v26 }
 0xa99   :  { %13223 = vst [vmem:[#allocation140_spill] sm:$0xff] %v9972_v2  ;;  %v9985_v1 = vpop.eup %6552  ;;  %6564 = vpow2.f32 %v3724_v57  ;;  %v3690_v57 = vmul.f32 1.442695, %v3529_v3  ;;  %v3532_v3 = vsub.f32 %v13244_v19, %v9890_v28  ;;  %v13250_v19 = vld [vmem:[#allocation263_spill] sm:$0xff] }
 0xa9a   :  { %13227 = vst [vmem:[#allocation107_spill] sm:$0xff] %v9985_v1  ;;  %v9987_v54 = vpop.eup %6554  ;;  %6566 = vpow2.f32 %v3686_v29  ;;  %v3730_v44 = vmul.f32 1.442695, %v3549_v63  ;;  %v13242_v29 = vld [vmem:[#allocation120_spill] sm:$0xff]  ;;  %v13243_v63 = vld [vmem:[#allocation186_spill] sm:$0xff] }
 0xa9b   :  { %13228 = vst [vmem:[#allocation221_spill] sm:$0xff] %v9987_v54  ;;  %v9990_v32 = vpop.eup %6556  ;;  %v3533_v53 = vsub.f32 %v13243_v63, %v9890_v28 }
 0xa9c   :  { %4087 = vperm.xlu1 %6489, %v9892_v13   ;;  %13229 = vst [vmem:[#allocation44_spill] sm:$0xff] %v9990_v32 }
 0xa9d   :  { %4036 = vperm.xlu2 %6491, %v9894_v40  }
 0xa9e   :  { %4033 = vperm.xlu0 %6490, %v9897_v34  }
 0xaa4   :  { %4096 = vperm.xlu1 %6489, %v9907_v5  }
 0xaa5   :  { %4045 = vperm.xlu2 %6491, %v9909_v17  }
 0xaa6   :  { %4042 = vperm.xlu0 %6490, %v9912_v58  }
 0xaac   :  { %4105 = vperm.xlu1 %6489, %v9922_v14  }
 0xaad   :  { %4051 = vperm.xlu2 %6491, %v9924_v55  }
 0xaae   :  { %4048 = vperm.xlu0 %6490, %v9927_v50  }
 0xab4   :  { %4114 = vperm.xlu1 %6489, %v9937_v20  }
 0xab5   :  { %4057 = vperm.xlu2 %6491, %v9939_v46  }
 0xab6   :  { %4054 = vperm.xlu0 %6490, %v9942_v51  }
 0xabc   :  { %4123 = vperm.xlu1 %6489, %v9952_v7  }
 0xabd   :  { %4066 = vperm.xlu2 %6491, %v9954_v16  }
 0xabe   :  { %4063 = vperm.xlu0 %6490, %v9957_v10  }
 0xac4   :  { %4132 = vperm.xlu1 %6489, %v9967_v9  }
 0xac5   :  { %4075 = vperm.xlu2 %6491, %v9969_v4  }
 0xac6   :  { %4072 = vperm.xlu0 %6490, %v9972_v2   ;;  %v3684_v2 = vmul.f32 1.442695, %v3526_v24  ;;  %v3692_v24 = vmul.f32 1.442695, %v3530_v0 }
 0xac8   :  { %6568 = vpow2.f32 %v3684_v2  ;;  %v3552_v2 = vsub.f32 %v13242_v29, %v9983_v26 }
 0xac9   :  { %6570 = vpow2.f32 %v3730_v44  ;;  %v3696_v44 = vmul.f32 1.442695, %v3532_v3  ;;  %v3535_v3 = vsub.f32 %v13250_v19, %v9890_v28 }
 0xaca   :  { %6572 = vpow2.f32 %v3692_v24  ;;  %v13248_v24 = vld [vmem:[#allocation56_spill] sm:$0xff] }
 0xacb   :  { %6574 = vpow2.f32 %v3690_v57  ;;  %v3555_v57 = vsub.f32 %v13248_v24, %v9983_v26 }
 0xacc   :  { %4141 = vperm.xlu1 %6489, %v9985_v1   ;;  %v10000_v1 = vpop.eup %6558 }
 0xacd   :  { %4084 = vperm.xlu2 %6491, %v9987_v54   ;;  %13233 = vst [vmem:[#allocation231_spill] sm:$0xff] %v10000_v1  ;;  %v10002_v54 = vpop.eup %6560 }
 0xace   :  { %4081 = vperm.xlu0 %6490, %v9990_v32   ;;  %13234 = vst [vmem:[#allocation109_spill] sm:$0xff] %v10002_v54  ;;  %v10005_v61 = vpop.eup %6562 }
 0xacf   :  { %13235 = vst [vmem:[#allocation224_spill] sm:$0xff] %v10005_v61 }
 0xad4   :  { %4150 = vperm.xlu1 %6489, %v10000_v1   ;;  %v10017_v1 = vpop.eup %6564 }
 0xad5   :  { %4093 = vperm.xlu2 %6491, %v10002_v54   ;;  %13239 = vst [vmem:[#allocation45_spill] sm:$0xff] %v10017_v1  ;;  %v10019_v54 = vpop.eup %6566 }
 0xad6   :  { %4090 = vperm.xlu0 %6490, %v10005_v61   ;;  %13240 = vst [vmem:[#allocation234_spill] sm:$0xff] %v10019_v54  ;;  %v10022_v59 = vpop.eup %6568  ;;  %v3698_v61 = vmul.f32 1.442695, %v3533_v53 }
 0xad7   :  { %v10013_v12 = vpop.permute.xlu2 %4012  ;;  %13241 = vst [vmem:[#allocation236_spill] sm:$0xff] %v10022_v59  ;;  %v10034_v32 = vpop.eup %6570 }
 0xad8   :  { %13245 = vst [vmem:[#allocation111_spill] sm:$0xff] %v10034_v32 }
 0xadc   :  { %4159 = vperm.xlu1 %6489, %v10017_v1   ;;  %v3736_v1 = vmul.f32 1.442695, %v3552_v2  ;;  %v13249_v2 = vld [vmem:[#allocation249_spill] sm:$0xff] }
 0xadd   :  { %4102 = vperm.xlu2 %6491, %v10019_v54   ;;  %v10036_v54 = vpop.eup %6572  ;;  %v3536_v63 = vsub.f32 %v13249_v2, %v9890_v28 }
 0xade   :  { %4099 = vperm.xlu0 %6490, %v10022_v59   ;;  %13246 = vst [vmem:[#allocation150_spill] sm:$0xff] %v10036_v54  ;;  %v10039_v29 = vpop.eup %6574  ;;  %6576 = vpow2.f32 %v3736_v1  ;;  %v3702_v1 = vmul.f32 1.442695, %v3535_v3  ;;  %v13256_v3 = vld [vmem:[#allocation264_spill] sm:$0xff] }
 0xadf   :  { %v10030_v0 = vpop.permute.xlu2 %4018  ;;  %13247 = vst [vmem:[#allocation46_spill] sm:$0xff] %v10039_v29  ;;  %6578 = vpow2.f32 %v3698_v61  ;;  %v3704_v59 = vmul.f32 1.442695, %v3536_v63  ;;  %v13254_v61 = vld [vmem:[#allocation138_spill] sm:$0xff] }
 0xae0   :  { %6580 = vpow2.f32 %v3696_v44  ;;  %v3558_v44 = vsub.f32 %v13254_v61, %v9983_v26 }
 0xae2   :  { %v3748_v61 = vmul.f32 1.442695, %v3558_v44  ;;  %v13261_v44 = vld [vmem:[#allocation132_spill] sm:$0xff] }
 0xae4   :  { %4168 = vperm.xlu1 %6489, %v10034_v32   ;;  %v3742_v32 = vmul.f32 1.442695, %v3555_v57  ;;  %v10051_v4 = vpop.eup %6576  ;;  %v13255_v57 = vld [vmem:[#allocation112_spill] sm:$0xff] }
 0xae5   :  { %4111 = vperm.xlu2 %6491, %v10036_v54   ;;  %13251 = vst [vmem:[#allocation232_spill] sm:$0xff] %v10051_v4  ;;  %v10053_v54 = vpop.eup %6578  ;;  %v3539_v63 = vsub.f32 %v13255_v57, %v9890_v28 }
 0xae6   :  { %4108 = vperm.xlu0 %6490, %v10039_v29   ;;  %13252 = vst [vmem:[#allocation47_spill] sm:$0xff] %v10053_v54  ;;  %v10056_v24 = vpop.eup %6580  ;;  %6582 = vpow2.f32 %v3742_v32  ;;  %v10073_v32 = vperm.slane %v9809_v41, 4 }
 0xae7   :  { %v10047_v53 = vpop.permute.xlu2 %4024  ;;  %13253 = vst [vmem:[#allocation235_spill] sm:$0xff] %v10056_v24  ;;  %6584 = vpow2.f32 %v3704_v59 }
 0xae8   :  { %6586 = vpow2.f32 %v3702_v1  ;;  %v13260_v1 = vld [vmem:[#allocation15_spill] sm:$0xff] }
 0xae9   :  { %6588 = vpow2.f32 %v3748_v61 }
 0xaec   :  { %4177 = vperm.xlu1 %6489, %v10051_v4   ;;  %v3538_v4 = vsub.f32 %v13256_v3, %v9890_v28  ;;  %v3561_v3 = vsub.f32 %v13260_v1, %v10073_v32 }
 0xaed   :  { %4120 = vperm.xlu2 %6491, %v10053_v54   ;;  %v3710_v54 = vmul.f32 1.442695, %v3539_v63 }
 0xaee   :  { %4117 = vperm.xlu0 %6490, %v10056_v24   ;;  %v10062_v2 = vpop.permute.xlu1 %4039  ;;  %v10075_v24 = vpop.eup %6582  ;;  %v3708_v9 = vmul.f32 1.442695, %v3538_v4  ;;  %v3542_v4 = vsub.f32 %v13261_v44, %v9890_v28  ;;  %v3754_v61 = vmul.f32 1.442695, %v3561_v3 }
 0xaef   :  { %v10066_v19 = vpop.permute.xlu2 %4030  ;;  %13257 = vst [vmem:[#allocation113_spill] sm:$0xff] %v10075_v24  ;;  %v10077_v59 = vpop.eup %6584  ;;  %6590 = vpow2.f32 %v3710_v54 }
 0xaf0   :  { %v10070_v29 = vpop.permute.xlu0 %4009  ;;  %13258 = vst [vmem:[#allocation237_spill] sm:$0xff] %v10077_v59  ;;  %v10080_v57 = vpop.eup %6586  ;;  %6592 = vpow2.f32 %v3708_v9  ;;  %v13266_v9 = vld [vmem:[#allocation131_spill] sm:$0xff] }
 0xaf1   :  { %13259 = vst [vmem:[#allocation253_spill] sm:$0xff] %v10080_v57  ;;  %v10096_v51 = vpop.eup %6588  ;;  %6594 = vpow2.f32 %v3754_v61  ;;  %v3564_v44 = vsub.f32 %v13266_v9, %v10073_v32 }
 0xaf2   :  { %13263 = vst [vmem:[#allocation115_spill] sm:$0xff] %v10096_v51 }
 0xaf3   :  { %v3760_v61 = vmul.f32 1.442695, %v3564_v44  ;;  %v13273_v44 = vld [vmem:[#allocation13_spill] sm:$0xff] }
 0xaf4   :  { %4186 = vperm.xlu1 %6489, %v10075_v24   ;;  %v13262_v24 = vld [vmem:[#allocation265_spill] sm:$0xff] }
 0xaf5   :  { %4129 = vperm.xlu2 %6491, %v10077_v59   ;;  %v3541_v16 = vsub.f32 %v13262_v24, %v9890_v28  ;;  %v3716_v59 = vmul.f32 1.442695, %v3542_v4  ;;  %v13267_v24 = vld [vmem:[#allocation205_spill] sm:$0xff]  ;;  %v13268_v4 = vld [vmem:[#allocation266_spill] sm:$0xff] }
 0xaf6   :  { %4126 = vperm.xlu0 %6490, %v10080_v57   ;;  %v10086_v10 = vpop.permute.xlu1 %4060  ;;  %v10098_v57 = vpop.eup %6590 }
 0xaf7   :  { %v10090_v63 = vpop.permute.xlu2 %4036  ;;  %v3714_v1 = vmul.f32 1.442695, %v3541_v16  ;;  %13264 = vst [vmem:[#allocation239_spill] sm:$0xff] %v10098_v57  ;;  %v10101_v54 = vpop.eup %6592  ;;  %6596 = vpow2.f32 %v3716_v59  ;;  %v3545_v16 = vsub.f32 %v13267_v24, %v9983_v26 }
 0xaf8   :  { %v10094_v7 = vpop.permute.xlu0 %4015  ;;  %13265 = vst [vmem:[#allocation48_spill] sm:$0xff] %v10101_v54  ;;  %v10117_v20 = vpop.eup %6594 }
 0xaf9   :  { %6598 = vpow2.f32 %v3714_v1  ;;  %13269 = vst [vmem:[#allocation166_spill] sm:$0xff] %v10117_v20  ;;  %v13272_v1 = vld [vmem:[#allocation17_spill] sm:$0xff] }
 0xafa   :  { %6600 = vpow2.f32 %v3760_v61  ;;  %v3567_v24 = vsub.f32 %v13272_v1, %v10073_v32 }
 0xafc   :  { %4195 = vperm.xlu1 %6489, %v10096_v51   ;;  %v3544_v51 = vsub.f32 %v13268_v4, %v9983_v26  ;;  %v3766_v61 = vmul.f32 1.442695, %v3567_v24  ;;  %v13280_v24 = vld [vmem:[#allocation242_spill] sm:$0xff] }
 0xafd   :  { %4138 = vperm.xlu2 %6491, %v10098_v57   ;;  %v3722_v57 = vmul.f32 1.442695, %v3545_v16 }
 0xafe   :  { %4135 = vperm.xlu0 %6490, %v10101_v54   ;;  %v10107_v28 = vpop.permute.xlu1 %4069  ;;  %v3720_v9 = vmul.f32 1.442695, %v3544_v51  ;;  %v10119_v54 = vpop.eup %6596  ;;  %v3548_v51 = vsub.f32 %v13273_v44, %v9983_v26 }
 0xaff   :  { %v10111_v3 = vpop.permute.xlu2 %4045  ;;  %13270 = vst [vmem:[#allocation117_spill] sm:$0xff] %v10119_v54  ;;  %v10122_v59 = vpop.eup %6598  ;;  %6602 = vpow2.f32 %v3722_v57 }
 0xb00   :  { %v10115_v46 = vpop.permute.xlu0 %4021  ;;  %13271 = vst [vmem:[#allocation238_spill] sm:$0xff] %v10122_v59  ;;  %6604 = vpow2.f32 %v3720_v9  ;;  %v10138_v14 = vpop.eup %6600  ;;  %v13279_v9 = vld [vmem:[#allocation18_spill] sm:$0xff] }
 0xb01   :  { %13276 = vst [vmem:[#allocation248_spill] sm:$0xff] %v10138_v14  ;;  %6606 = vpow2.f32 %v3766_v61  ;;  %v3570_v44 = vsub.f32 %v13279_v9, %v10073_v32 }
 0xb03   :  { %v3772_v61 = vmul.f32 1.442695, %v3570_v44  ;;  %v13287_v44 = vld [vmem:[#allocation14_spill] sm:$0xff] }
 0xb04   :  { %4204 = vperm.xlu1 %6489, %v10117_v20   ;;  %v13275_v20 = vld [vmem:[#allocation267_spill] sm:$0xff] }
 0xb05   :  { %4147 = vperm.xlu2 %6491, %v10119_v54   ;;  %v3547_v50 = vsub.f32 %v13275_v20, %v9983_v26  ;;  %v3728_v54 = vmul.f32 1.442695, %v3548_v51 }
 0xb06   :  { %4144 = vperm.xlu0 %6490, %v10122_v59   ;;  %v10128_v4 = vpop.permute.xlu1 %4078  ;;  %v10140_v59 = vpop.eup %6602 }
 0xb07   :  { %v10132_v16 = vpop.permute.xlu2 %4051  ;;  %v3726_v1 = vmul.f32 1.442695, %v3547_v50  ;;  %13277 = vst [vmem:[#allocation119_spill] sm:$0xff] %v10140_v59  ;;  %v10143_v57 = vpop.eup %6604  ;;  %6608 = vpow2.f32 %v3728_v54  ;;  %v3551_v50 = vsub.f32 %v13280_v24, %v9983_v26 }
 0xb08   :  { %13274 = vst [vmem:[#allocation49_spill] sm:$0xff] %v10132_v16  ;;  %v10136_v55 = vpop.permute.xlu0 %4027  ;;  %v10159_v5 = vpop.eup %6606 }
 0xb09   :  { %13278 = vst [vmem:[#allocation240_spill] sm:$0xff] %v10143_v57  ;;  %6610 = vpow2.f32 %v3726_v1  ;;  %v13285_v1 = vld [vmem:[#allocation145_spill] sm:$0xff] }
 0xb0a   :  { %13282 = vst [vmem:[#allocation121_spill] sm:$0xff] %v10159_v5  ;;  %6612 = vpow2.f32 %v3772_v61  ;;  %v3573_v24 = vsub.f32 %v13285_v1, %v10073_v32  ;;  %v10181_v61 = vperm.slane %v9809_v41, 5 }
 0xb0c   :  { %4213 = vperm.xlu1 %6489, %v10138_v14   ;;  %v13281_v14 = vld [vmem:[#allocation163_spill] sm:$0xff]  ;;  %v3778_v1 = vmul.f32 1.442695, %v3573_v24 }
 0xb0d   :  { %4156 = vperm.xlu2 %6491, %v10140_v59   ;;  %v3550_v58 = vsub.f32 %v13281_v14, %v9983_v26  ;;  %v3734_v59 = vmul.f32 1.442695, %v3551_v50  ;;  %v13293_v24 = vld [vmem:[#allocation135_spill] sm:$0xff] }
 0xb0e   :  { %4153 = vperm.xlu0 %6490, %v10143_v57   ;;  %v10149_v20 = vpop.permute.xlu1 %4087  ;;  %v10161_v57 = vpop.eup %6608 }
 0xb0f   :  { %v10153_v51 = vpop.permute.xlu2 %4057  ;;  %v3732_v9 = vmul.f32 1.442695, %v3550_v58  ;;  %13283 = vst [vmem:[#allocation175_spill] sm:$0xff] %v10161_v57  ;;  %v10164_v54 = vpop.eup %6610  ;;  %6614 = vpow2.f32 %v3734_v59  ;;  %v3554_v58 = vsub.f32 %v13287_v44, %v9983_v26 }
 0xb10   :  { %v10157_v17 = vpop.permute.xlu0 %4033  ;;  %13284 = vst [vmem:[#allocation141_spill] sm:$0xff] %v10164_v54 }
 0xb11   :  { %6616 = vpow2.f32 %v3732_v9 }
 0xb12   :  { %6618 = vpow2.f32 %v3778_v1 }
 0xb14   :  { %4222 = vperm.xlu1 %6489, %v10159_v5   ;;  %v13288_v5 = vld [vmem:[#allocation137_spill] sm:$0xff] }
 0xb15   :  { %4165 = vperm.xlu2 %6491, %v10161_v57   ;;  %v3553_v34 = vsub.f32 %v13288_v5, %v9983_v26  ;;  %v3740_v57 = vmul.f32 1.442695, %v3554_v58  ;;  %v13292_v5 = vld [vmem:[#allocation148_spill] sm:$0xff] }
 0xb16   :  { %4162 = vperm.xlu0 %6490, %v10164_v54   ;;  %v10170_v14 = vpop.permute.xlu1 %4096  ;;  %v10183_v54 = vpop.eup %6612  ;;  %v3576_v9 = vsub.f32 %v13292_v5, %v10181_v61 }
 0xb17   :  { %13286 = vst [vmem:[#allocation59_spill] sm:$0xff] %v10170_v14  ;;  %v10174_v50 = vpop.permute.xlu2 %4066  ;;  %v3738_v13 = vmul.f32 1.442695, %v3553_v34  ;;  %v10185_v59 = vpop.eup %6614  ;;  %6620 = vpow2.f32 %v3740_v57  ;;  %v3557_v34 = vsub.f32 %v13293_v24, %v9983_v26 }
 0xb18   :  { %v10178_v40 = vpop.permute.xlu0 %4042  ;;  %13289 = vst [vmem:[#allocation245_spill] sm:$0xff] %v10183_v54  ;;  %v10188_v44 = vpop.eup %6616  ;;  %v3784_v1 = vmul.f32 1.442695, %v3576_v9  ;;  %v13300_v9 = vld [vmem:[#allocation58_spill] sm:$0xff] }
 0xb19   :  { %13290 = vst [vmem:[#allocation134_spill] sm:$0xff] %v10185_v59  ;;  %6622 = vpow2.f32 %v3738_v13  ;;  %v10204_v49 = vpop.eup %6618  ;;  %v13299_v13 = vld [vmem:[#allocation118_spill] sm:$0xff] }
 0xb1a   :  { %13291 = vst [vmem:[#allocation54_spill] sm:$0xff] %v10188_v44  ;;  %6624 = vpow2.f32 %v3784_v1  ;;  %v3579_v24 = vsub.f32 %v13299_v13, %v10181_v61 }
 0xb1b   :  { %13296 = vst [vmem:[#allocation57_spill] sm:$0xff] %v10204_v49 }
 0xb1c   :  { %4231 = vperm.xlu1 %6489, %v10183_v54   ;;  %v13294_v54 = vld [vmem:[#allocation69_spill] sm:$0xff]  ;;  %v3790_v1 = vmul.f32 1.442695, %v3579_v24 }
 0xb1d   :  { %4174 = vperm.xlu2 %6491, %v10185_v59   ;;  %v3556_v52 = vsub.f32 %v13294_v54, %v9983_v26  ;;  %v3746_v59 = vmul.f32 1.442695, %v3557_v34 }
 0xb1e   :  { %4171 = vperm.xlu0 %6490, %v10188_v44   ;;  %v10194_v23 = vpop.permute.xlu1 %4105  ;;  %v10206_v44 = vpop.eup %6620 }
 0xb1f   :  { %v10198_v58 = vpop.permute.xlu2 %4075  ;;  %v3744_v5 = vmul.f32 1.442695, %v3556_v52  ;;  %13297 = vst [vmem:[#allocation116_spill] sm:$0xff] %v10206_v44  ;;  %v10209_v57 = vpop.eup %6622  ;;  %6626 = vpow2.f32 %v3746_v59  ;;  %v3560_v52 = vsub.f32 %v13300_v9, %v10073_v32 }
 0xb20   :  { %v10202_v38 = vpop.permute.xlu0 %4048  ;;  %13298 = vst [vmem:[#allocation151_spill] sm:$0xff] %v10209_v57  ;;  %v10225_v56 = vpop.eup %6624 }
 0xb21   :  { %13295 = vst [vmem:[#allocation139_spill] sm:$0xff] %v10202_v38  ;;  %6628 = vpow2.f32 %v3744_v5  ;;  %v13306_v5 = vld [vmem:[#allocation21_spill] sm:$0xff] }
 0xb22   :  { %13303 = vst [vmem:[#allocation142_spill] sm:$0xff] %v10225_v56  ;;  %6630 = vpow2.f32 %v3790_v1  ;;  %v3582_v9 = vsub.f32 %v13306_v5, %v10181_v61 }
 0xb24   :  { %4240 = vperm.xlu1 %6489, %v10204_v49   ;;  %v13301_v49 = vld [vmem:[#allocation192_spill] sm:$0xff]  ;;  %v3796_v1 = vmul.f32 1.442695, %v3582_v9  ;;  %v13315_v9 = vld [vmem:[#allocation147_spill] sm:$0xff] }
 0xb25   :  { %4183 = vperm.xlu2 %6491, %v10206_v44   ;;  %v3559_v62 = vsub.f32 %v13301_v49, %v9983_v26  ;;  %v3752_v44 = vmul.f32 1.442695, %v3560_v52  ;;  %v13307_v26 = vld [vmem:[#allocation144_spill] sm:$0xff]  ;;  %v13309_v52 = vld [vmem:[#allocation71_spill] sm:$0xff] }
 0xb26   :  { %4180 = vperm.xlu0 %6490, %v10209_v57   ;;  %v10215_v54 = vpop.permute.xlu1 %4114  ;;  %v10227_v57 = vpop.eup %6626 }
 0xb27   :  { %v10219_v34 = vpop.permute.xlu2 %4084  ;;  %v3750_v13 = vmul.f32 1.442695, %v3559_v62  ;;  %13304 = vst [vmem:[#allocation130_spill] sm:$0xff] %v10227_v57  ;;  %v10230_v59 = vpop.eup %6628  ;;  %6632 = vpow2.f32 %v3752_v44  ;;  %v3563_v62 = vsub.f32 %v13307_v26, %v10073_v32 }
 0xb28   :  { %v10223_v15 = vpop.permute.xlu0 %4054  ;;  %13305 = vst [vmem:[#allocation233_spill] sm:$0xff] %v10230_v59  ;;  %v10246_v30 = vpop.eup %6630 }
 0xb29   :  { %13302 = vst [vmem:[#allocation114_spill] sm:$0xff] %v10223_v15  ;;  %6634 = vpow2.f32 %v3750_v13  ;;  %v13313_v13 = vld [vmem:[#allocation157_spill] sm:$0xff] }
 0xb2a   :  { %13310 = vst [vmem:[#allocation172_spill] sm:$0xff] %v10246_v30  ;;  %6636 = vpow2.f32 %v3796_v1  ;;  %v3585_v26 = vsub.f32 %v13313_v13, %v10181_v61 }
 0xb2c   :  { %4249 = vperm.xlu1 %6489, %v10225_v56   ;;  %v3562_v56 = vsub.f32 %v13309_v52, %v10073_v32  ;;  %v3802_v1 = vmul.f32 1.442695, %v3585_v26 }
 0xb2d   :  { %4192 = vperm.xlu2 %6491, %v10227_v57   ;;  %v3758_v57 = vmul.f32 1.442695, %v3563_v62 }
 0xb2e   :  { %4189 = vperm.xlu0 %6490, %v10230_v59   ;;  %v10236_v49 = vpop.permute.xlu1 %4123  ;;  %v3756_v5 = vmul.f32 1.442695, %v3562_v56  ;;  %v10248_v59 = vpop.eup %6632  ;;  %v3566_v56 = vsub.f32 %v13315_v9, %v10073_v32 }
 0xb2f   :  { %v10240_v24 = vpop.permute.xlu2 %4093  ;;  %13311 = vst [vmem:[#allocation154_spill] sm:$0xff] %v10248_v59  ;;  %v10251_v44 = vpop.eup %6634  ;;  %6638 = vpow2.f32 %v3758_v57 }
 0xb30   :  { %13308 = vst [vmem:[#allocation214_spill] sm:$0xff] %v10240_v24  ;;  %v10244_v6 = vpop.permute.xlu0 %4063  ;;  %6640 = vpow2.f32 %v3756_v5  ;;  %v10267_v22 = vpop.eup %6636  ;;  %v13321_v5 = vld [vmem:[#allocation160_spill] sm:$0xff] }
 0xb31   :  { %13312 = vst [vmem:[#allocation127_spill] sm:$0xff] %v10251_v44  ;;  %6642 = vpow2.f32 %v3802_v1  ;;  %v3588_v9 = vsub.f32 %v13321_v5, %v10181_v61 }
 0xb32   :  { %13318 = vst [vmem:[#allocation188_spill] sm:$0xff] %v10267_v22 }
 0xb33   :  { %v3808_v1 = vmul.f32 1.442695, %v3588_v9 }
 0xb34   :  { %4258 = vperm.xlu1 %6489, %v10246_v30   ;;  %v13317_v30 = vld [vmem:[#allocation66_spill] sm:$0xff] }
 0xb35   :  { %4201 = vperm.xlu2 %6491, %v10248_v59   ;;  %v3565_v18 = vsub.f32 %v13317_v30, %v10073_v32  ;;  %v3764_v59 = vmul.f32 1.442695, %v3566_v56  ;;  %v13322_v30 = vld [vmem:[#allocation61_spill] sm:$0xff] }
 0xb36   :  { %4198 = vperm.xlu0 %6490, %v10251_v44   ;;  %v10257_v52 = vpop.permute.xlu1 %4132  ;;  %v10269_v44 = vpop.eup %6638  ;;  %v3569_v26 = vsub.f32 %v13322_v30, %v10073_v32 }
 0xb37   :  { %13314 = vst [vmem:[#allocation149_spill] sm:$0xff] %v10257_v52  ;;  %v10261_v62 = vpop.permute.xlu2 %4102  ;;  %v3762_v13 = vmul.f32 1.442695, %v3565_v18  ;;  %v10272_v57 = vpop.eup %6640  ;;  %6644 = vpow2.f32 %v3764_v59 }
 0xb38   :  { %13316 = vst [vmem:[#allocation185_spill] sm:$0xff] %v10261_v62  ;;  %v10265_v39 = vpop.permute.xlu0 %4072  ;;  %v10288_v37 = vpop.eup %6642 }
 0xb39   :  { %13319 = vst [vmem:[#allocation16_spill] sm:$0xff] %v10269_v44  ;;  %6646 = vpow2.f32 %v3762_v13  ;;  %v13328_v13 = vld [vmem:[#allocation24_spill] sm:$0xff] }
 0xb3a   :  { %13320 = vst [vmem:[#allocation133_spill] sm:$0xff] %v10272_v57  ;;  %6648 = vpow2.f32 %v3808_v1  ;;  %v3591_v30 = vsub.f32 %v13328_v13, %v10181_v61 }
 0xb3b   :  { %13325 = vst [vmem:[#allocation22_spill] sm:$0xff] %v10288_v37 }
 0xb3c   :  { %4267 = vperm.xlu1 %6489, %v10267_v22   ;;  %v13324_v22 = vld [vmem:[#allocation179_spill] sm:$0xff]  ;;  %v3814_v13 = vmul.f32 1.442695, %v3591_v30  ;;  %v13336_v30 = vld [vmem:[#allocation244_spill] sm:$0xff] }
 0xb3d   :  { %4210 = vperm.xlu2 %6491, %v10269_v44   ;;  %v3568_v62 = vsub.f32 %v13324_v22, %v10073_v32  ;;  %v3770_v44 = vmul.f32 1.442695, %v3569_v26  ;;  %v13329_v22 = vld [vmem:[#allocation62_spill] sm:$0xff] }
 0xb3e   :  { %4207 = vperm.xlu0 %6490, %v10272_v57   ;;  %v10280_v56 = vpop.permute.xlu1 %4141  ;;  %v10290_v57 = vpop.eup %6644  ;;  %v3572_v9 = vsub.f32 %v13329_v22, %v10073_v32  ;;  %v13335_v22 = vld [vmem:[#allocation25_spill] sm:$0xff] }
 0xb3f   :  { %13323 = vst [vmem:[#allocation191_spill] sm:$0xff] %v10280_v56  ;;  %v10282_v18 = vpop.permute.xlu2 %4111  ;;  %v3768_v5 = vmul.f32 1.442695, %v3568_v62  ;;  %v10293_v59 = vpop.eup %6646  ;;  %6650 = vpow2.f32 %v3770_v44  ;;  %v13330_v62 = vld [vmem:[#allocation75_spill] sm:$0xff] }
 0xb40   :  { %v10286_v15 = vpop.permute.xlu0 %4081  ;;  %13326 = vst [vmem:[#allocation68_spill] sm:$0xff] %v10290_v57  ;;  %v3776_v52 = vmul.f32 1.442695, %v3572_v9  ;;  %v3575_v9 = vsub.f32 %v13336_v30, %v10073_v32 }
 0xb41   :  { %13327 = vst [vmem:[#allocation171_spill] sm:$0xff] %v10293_v59  ;;  %6652 = vpow2.f32 %v3768_v5 }
 0xb42   :  { %6654 = vpow2.f32 %v3814_v13 }
 0xb43   :  { %6656 = vpow2.f32 %v3776_v52 }
 0xb44   :  { %4276 = vperm.xlu1 %6489, %v10288_v37   ;;  %v3571_v37 = vsub.f32 %v13330_v62, %v10073_v32 }
 0xb45   :  { %4219 = vperm.xlu2 %6491, %v10290_v57   ;;  %v10308_v57 = vperm.slane %v9809_v41, 6 }
 0xb46   :  { %4216 = vperm.xlu0 %6490, %v10293_v59   ;;  %v10310_v1 = vpop.permute.xlu1 %4150  ;;  %v10312_v59 = vpop.eup %6648  ;;  %v3774_v44 = vmul.f32 1.442695, %v3571_v37  ;;  %v13338_v37 = vld [vmem:[#allocation79_spill] sm:$0xff] }
 0xb47   :  { %v10301_v26 = vpop.permute.xlu2 %4120  ;;  %13331 = vst [vmem:[#allocation84_spill] sm:$0xff] %v10310_v1  ;;  %v10314_v16 = vpop.eup %6650  ;;  %v3594_v62 = vsub.f32 %v13335_v22, %v10308_v57 }
 0xb48   :  { %v10305_v56 = vpop.permute.xlu0 %4090  ;;  %13332 = vst [vmem:[#allocation168_spill] sm:$0xff] %v10312_v59  ;;  %v10317_v5 = vpop.eup %6652  ;;  %6658 = vpow2.f32 %v3774_v44 }
 0xb49   :  { %13333 = vst [vmem:[#allocation31_spill] sm:$0xff] %v10314_v16  ;;  %v3820_v42 = vmul.f32 1.442695, %v3594_v62  ;;  %v10331_v13 = vpop.eup %6654  ;;  %v13345_v62 = vld [vmem:[#allocation156_spill] sm:$0xff] }
 0xb4a   :  { %13334 = vst [vmem:[#allocation19_spill] sm:$0xff] %v10317_v5  ;;  %v3578_v30 = vsub.f32 %v13345_v62, %v10181_v61 }
 0xb4b   :  { %13340 = vst [vmem:[#allocation198_spill] sm:$0xff] %v10331_v13  ;;  %6660 = vpow2.f32 %v3820_v42 }
 0xb4c   :  { %4285 = vperm.xlu1 %6489, %v10312_v59   ;;  %v3574_v59 = vsub.f32 %v13338_v37, %v10073_v32  ;;  %v13344_v32 = vld [vmem:[#allocation183_spill] sm:$0xff] }
 0xb4d   :  { %4228 = vperm.xlu2 %6491, %v10314_v16   ;;  %v3782_v16 = vmul.f32 1.442695, %v3575_v9  ;;  %v3597_v44 = vsub.f32 %v13344_v32, %v10308_v57 }
 0xb4e   :  { %4225 = vperm.xlu0 %6490, %v10317_v5   ;;  %v10333_v24 = vpop.permute.xlu1 %4159  ;;  %v3780_v22 = vmul.f32 1.442695, %v3574_v59  ;;  %v10335_v5 = vpop.eup %6656  ;;  %v13347_v59 = vld [vmem:[#allocation81_spill] sm:$0xff] }
 0xb4f   :  { %v10325_v1 = vpop.permute.xlu2 %4129  ;;  %13341 = vst [vmem:[#allocation174_spill] sm:$0xff] %v10333_v24  ;;  %v10338_v52 = vpop.eup %6658  ;;  %6662 = vpow2.f32 %v3782_v16  ;;  %v3577_v37 = vsub.f32 %v13347_v59, %v10181_v61  ;;  %v3826_v24 = vmul.f32 1.442695, %v3597_v44  ;;  %v13353_v44 = vld [vmem:[#allocation64_spill] sm:$0xff] }
 0xb50   :  { %13337 = vst [vmem:[#allocation178_spill] sm:$0xff] %v10325_v1  ;;  %v10329_v14 = vpop.permute.xlu0 %4099  ;;  %6664 = vpow2.f32 %v3780_v22  ;;  %v13352_v22 = vld [vmem:[#allocation27_spill] sm:$0xff] }
 0xb51   :  { %13339 = vst [vmem:[#allocation63_spill] sm:$0xff] %v10329_v14  ;;  %v10352_v42 = vpop.eup %6660  ;;  %v3786_v14 = vmul.f32 1.442695, %v3577_v37  ;;  %6666 = vpow2.f32 %v3826_v24  ;;  %v3600_v59 = vsub.f32 %v13352_v22, %v10308_v57 }
 0xb52   :  { %13342 = vst [vmem:[#allocation230_spill] sm:$0xff] %v10335_v5 }
 0xb53   :  { %13343 = vst [vmem:[#allocation128_spill] sm:$0xff] %v10338_v52 }
 0xb54   :  { %4294 = vperm.xlu1 %6489, %v10331_v13   ;;  %13348 = vst [vmem:[#allocation32_spill] sm:$0xff] %v10352_v42 }
 0xb55   :  { %4237 = vperm.xlu2 %6491, %v10335_v5   ;;  %v3788_v5 = vmul.f32 1.442695, %v3578_v30  ;;  %v10354_v32 = vpop.eup %6662  ;;  %v3581_v30 = vsub.f32 %v13353_v44, %v10181_v61 }
 0xb56   :  { %4234 = vperm.xlu0 %6490, %v10338_v52   ;;  %13349 = vst [vmem:[#allocation23_spill] sm:$0xff] %v10354_v32  ;;  %v10357_v16 = vpop.eup %6664  ;;  %v10359_v62 = vpop.permute.xlu1 %4168 }
 0xb57   :  { %v10346_v9 = vpop.permute.xlu2 %4138  ;;  %13350 = vst [vmem:[#allocation20_spill] sm:$0xff] %v10357_v16  ;;  %6668 = vpow2.f32 %v3788_v5  ;;  %v10373_v24 = vpop.eup %6666 }
 0xb58   :  { %13346 = vst [vmem:[#allocation74_spill] sm:$0xff] %v10346_v9  ;;  %v10350_v13 = vpop.permute.xlu0 %4108  ;;  %6670 = vpow2.f32 %v3786_v14  ;;  %v13359_v14 = vld [vmem:[#allocation143_spill] sm:$0xff] }
 0xb59   :  { %13351 = vst [vmem:[#allocation201_spill] sm:$0xff] %v10359_v62  ;;  %v3832_v62 = vmul.f32 1.442695, %v3600_v59  ;;  %v3603_v44 = vsub.f32 %v13359_v14, %v10308_v57 }
 0xb5a   :  { %13356 = vst [vmem:[#allocation152_spill] sm:$0xff] %v10373_v24 }
 0xb5b   :  { %6672 = vpow2.f32 %v3832_v62  ;;  %v3838_v62 = vmul.f32 1.442695, %v3603_v44 }
 0xb5c   :  { %4303 = vperm.xlu1 %6489, %v10352_v42   ;;  %v13355_v42 = vld [vmem:[#allocation193_spill] sm:$0xff] }
 0xb5d   :  { %4246 = vperm.xlu2 %6491, %v10354_v32   ;;  %v3580_v52 = vsub.f32 %v13355_v42, %v10181_v61  ;;  %v3794_v32 = vmul.f32 1.442695, %v3581_v30  ;;  %v10375_v22 = vpop.eup %6668  ;;  %v13360_v42 = vld [vmem:[#allocation65_spill] sm:$0xff] }
 0xb5e   :  { %4243 = vperm.xlu0 %6490, %v10357_v16   ;;  %13357 = vst [vmem:[#allocation88_spill] sm:$0xff] %v10375_v22  ;;  %v10378_v5 = vpop.eup %6670  ;;  %v3584_v59 = vsub.f32 %v13360_v42, %v10181_v61  ;;  %v10386_v30 = vpop.permute.xlu1 %4177 }
 0xb5f   :  { %v10367_v37 = vpop.permute.xlu2 %4147  ;;  %v3792_v1 = vmul.f32 1.442695, %v3580_v52  ;;  %13358 = vst [vmem:[#allocation177_spill] sm:$0xff] %v10378_v5  ;;  %6674 = vpow2.f32 %v3794_v32 }
 0xb60   :  { %13354 = vst [vmem:[#allocation60_spill] sm:$0xff] %v10367_v37  ;;  %v10371_v9 = vpop.permute.xlu0 %4117 }
 0xb61   :  { %13361 = vst [vmem:[#allocation87_spill] sm:$0xff] %v10386_v30  ;;  %6676 = vpow2.f32 %v3792_v1  ;;  %v10394_v38 = vpop.eup %6672  ;;  %v13367_v1 = vld [vmem:[#allocation28_spill] sm:$0xff] }
 0xb62   :  { %13364 = vst [vmem:[#allocation169_spill] sm:$0xff] %v10394_v38  ;;  %6678 = vpow2.f32 %v3838_v62  ;;  %v3606_v42 = vsub.f32 %v13367_v1, %v10308_v57 }
 0xb64   :  { %4312 = vperm.xlu1 %6489, %v10373_v24   ;;  %v13363_v24 = vld [vmem:[#allocation85_spill] sm:$0xff]  ;;  %v3844_v1 = vmul.f32 1.442695, %v3606_v42 }
 0xb65   :  { %4255 = vperm.xlu2 %6491, %v10375_v22   ;;  %v3583_v16 = vsub.f32 %v13363_v24, %v10181_v61  ;;  %v3800_v22 = vmul.f32 1.442695, %v3584_v59  ;;  %v13368_v24 = vld [vmem:[#allocation158_spill] sm:$0xff]  ;;  %v13377_v42 = vld [vmem:[#allocation161_spill] sm:$0xff] }
 0xb66   :  { %4252 = vperm.xlu0 %6490, %v10378_v5   ;;  %v10396_v5 = vpop.eup %6674  ;;  %v3587_v44 = vsub.f32 %v13368_v24, %v10181_v61  ;;  %v10416_v62 = vpop.permute.xlu1 %4186  ;;  %v13376_v24 = vld [vmem:[#allocation181_spill] sm:$0xff] }
 0xb67   :  { %v10388_v52 = vpop.permute.xlu2 %4156  ;;  %v3798_v14 = vmul.f32 1.442695, %v3583_v16  ;;  %13365 = vst [vmem:[#allocation26_spill] sm:$0xff] %v10396_v5  ;;  %v10399_v32 = vpop.eup %6676  ;;  %6680 = vpow2.f32 %v3800_v22  ;;  %v13370_v16 = vld [vmem:[#allocation83_spill] sm:$0xff] }
 0xb68   :  { %13362 = vst [vmem:[#allocation76_spill] sm:$0xff] %v10388_v52  ;;  %v10392_v37 = vpop.permute.xlu0 %4126  ;;  %v3806_v52 = vmul.f32 1.442695, %v3587_v44  ;;  %v3590_v44 = vsub.f32 %v13377_v42, %v10181_v61 }
 0xb69   :  { %13366 = vst [vmem:[#allocation164_spill] sm:$0xff] %v10399_v32  ;;  %6682 = vpow2.f32 %v3798_v14 }
 0xb6a   :  { %13372 = vst [vmem:[#allocation182_spill] sm:$0xff] %v10416_v62  ;;  %6684 = vpow2.f32 %v3844_v1 }
 0xb6b   :  { %6686 = vpow2.f32 %v3806_v52 }
 0xb6c   :  { %4321 = vperm.xlu1 %6489, %v10394_v38   ;;  %v3586_v38 = vsub.f32 %v13370_v16, %v10181_v61 }
 0xb6d   :  { %4264 = vperm.xlu2 %6491, %v10396_v5   ;;  %v10414_v5 = vperm.slane %v9809_v41, 7 }
 0xb6e   :  { %4261 = vperm.xlu0 %6490, %v10399_v32   ;;  %v10418_v32 = vpop.eup %6678  ;;  %v3804_v22 = vmul.f32 1.442695, %v3586_v38  ;;  %v13379_v38 = vld [vmem:[#allocation194_spill] sm:$0xff] }
 0xb6f   :  { %v10407_v59 = vpop.permute.xlu2 %4165  ;;  %13373 = vst [vmem:[#allocation34_spill] sm:$0xff] %v10418_v32  ;;  %v10420_v60 = vpop.eup %6680  ;;  %v3609_v41 = vsub.f32 %v13376_v24, %v10414_v5 }
 0xb70   :  { %13369 = vst [vmem:[#allocation243_spill] sm:$0xff] %v10407_v59  ;;  %v10411_v30 = vpop.permute.xlu0 %4135  ;;  %v10423_v14 = vpop.eup %6682  ;;  %6688 = vpow2.f32 %v3804_v22 }
 0xb71   :  { %13371 = vst [vmem:[#allocation200_spill] sm:$0xff] %v10411_v30  ;;  %v3850_v59 = vmul.f32 1.442695, %v3609_v41  ;;  %v10437_v1 = vpop.eup %6684  ;;  %v10439_v30 = vpop.permute.xlu1 %4195  ;;  %v13386_v41 = vld [vmem:[#allocation70_spill] sm:$0xff] }
 0xb72   :  { %13374 = vst [vmem:[#allocation167_spill] sm:$0xff] %v10420_v60  ;;  %v3593_v42 = vsub.f32 %v13386_v41, %v10308_v57 }
 0xb73   :  { %13375 = vst [vmem:[#allocation78_spill] sm:$0xff] %v10423_v14  ;;  %6690 = vpow2.f32 %v3850_v59 }
 0xb74   :  { %4330 = vperm.xlu1 %6489, %v10418_v32   ;;  %v3589_v32 = vsub.f32 %v13379_v38, %v10181_v61  ;;  %13381 = vst [vmem:[#allocation155_spill] sm:$0xff] %v10437_v1  ;;  %v13385_v61 = vld [vmem:[#allocation184_spill] sm:$0xff] }
 0xb75   :  { %4273 = vperm.xlu2 %6491, %v10420_v60   ;;  %v3812_v60 = vmul.f32 1.442695, %v3590_v44  ;;  %13382 = vst [vmem:[#allocation35_spill] sm:$0xff] %v10439_v30  ;;  %v3612_v22 = vsub.f32 %v13385_v61, %v10414_v5 }
 0xb76   :  { %4270 = vperm.xlu0 %6490, %v10423_v14   ;;  %v3810_v24 = vmul.f32 1.442695, %v3589_v32  ;;  %v10441_v14 = vpop.eup %6686  ;;  %v13388_v32 = vld [vmem:[#allocation196_spill] sm:$0xff] }
 0xb77   :  { %v10431_v16 = vpop.permute.xlu2 %4174  ;;  %13383 = vst [vmem:[#allocation92_spill] sm:$0xff] %v10441_v14  ;;  %v10444_v52 = vpop.eup %6688  ;;  %6692 = vpow2.f32 %v3812_v60  ;;  %v3592_v38 = vsub.f32 %v13388_v32, %v10308_v57 }
 0xb78   :  { %13378 = vst [vmem:[#allocation33_spill] sm:$0xff] %v10431_v16  ;;  %v10435_v62 = vpop.permute.xlu0 %4144  ;;  %6694 = vpow2.f32 %v3810_v24  ;;  %v3856_v16 = vmul.f32 1.442695, %v3612_v22  ;;  %v13393_v24 = vld [vmem:[#allocation211_spill] sm:$0xff]  ;;  %v13394_v22 = vld [vmem:[#allocation165_spill] sm:$0xff] }
 0xb79   :  { %13380 = vst [vmem:[#allocation72_spill] sm:$0xff] %v10435_v62  ;;  %v10458_v59 = vpop.eup %6690  ;;  %v3816_v62 = vmul.f32 1.442695, %v3592_v38  ;;  %v10465_v41 = vpop.permute.xlu1 %4204  ;;  %v3615_v32 = vsub.f32 %v13393_v24, %v10414_v5 }
 0xb7a   :  { %13384 = vst [vmem:[#allocation199_spill] sm:$0xff] %v10444_v52  ;;  %6696 = vpow2.f32 %v3856_v16 }
 0xb7b   :  { %13389 = vst [vmem:[#allocation73_spill] sm:$0xff] %v10458_v59  ;;  %v3862_v30 = vmul.f32 1.442695, %v3615_v32 }
 0xb7c   :  { %4339 = vperm.xlu1 %6489, %v10437_v1   ;;  %13392 = vst [vmem:[#allocation222_spill] sm:$0xff] %v10465_v41 }
 0xb7d   :  { %4282 = vperm.xlu2 %6491, %v10441_v14   ;;  %v3818_v14 = vmul.f32 1.442695, %v3593_v42  ;;  %v10460_v61 = vpop.eup %6692  ;;  %v3596_v42 = vsub.f32 %v13394_v22, %v10308_v57 }
 0xb7e   :  { %4279 = vperm.xlu0 %6490, %v10444_v52   ;;  %13390 = vst [vmem:[#allocation162_spill] sm:$0xff] %v10460_v61  ;;  %v10463_v60 = vpop.eup %6694 }
 0xb7f   :  { %v10452_v44 = vpop.permute.xlu2 %4183  ;;  %13391 = vst [vmem:[#allocation153_spill] sm:$0xff] %v10463_v60  ;;  %6698 = vpow2.f32 %v3818_v14 }
 0xb80   :  { %13387 = vst [vmem:[#allocation202_spill] sm:$0xff] %v10452_v44  ;;  %v10456_v1 = vpop.permute.xlu0 %4153  ;;  %6700 = vpow2.f32 %v3816_v62  ;;  %v10479_v16 = vpop.eup %6696  ;;  %v13401_v62 = vld [vmem:[#allocation77_spill] sm:$0xff] }
 0xb81   :  { %13398 = vst [vmem:[#allocation225_spill] sm:$0xff] %v10479_v16  ;;  %6702 = vpow2.f32 %v3862_v30  ;;  %v3618_v22 = vsub.f32 %v13401_v62, %v10414_v5 }
 0xb83   :  { %v3868_v30 = vmul.f32 1.442695, %v3618_v22 }
 0xb84   :  { %4348 = vperm.xlu1 %6489, %v10458_v59   ;;  %v13396_v59 = vld [vmem:[#allocation189_spill] sm:$0xff] }
 0xb85   :  { %4291 = vperm.xlu2 %6491, %v10460_v61   ;;  %v3595_v52 = vsub.f32 %v13396_v59, %v10308_v57  ;;  %v3824_v61 = vmul.f32 1.442695, %v3596_v42  ;;  %v10481_v24 = vpop.eup %6698  ;;  %v13402_v59 = vld [vmem:[#allocation170_spill] sm:$0xff]  ;;  %v10492_v42 = vpop.permute.xlu1 %4213 }
 0xb86   :  { %4288 = vperm.xlu0 %6490, %v10463_v60   ;;  %13399 = vst [vmem:[#allocation246_spill] sm:$0xff] %v10481_v24  ;;  %v10484_v14 = vpop.eup %6700  ;;  %v3599_v32 = vsub.f32 %v13402_v59, %v10308_v57 }
 0xb87   :  { %v10473_v38 = vpop.permute.xlu2 %4192  ;;  %v3822_v41 = vmul.f32 1.442695, %v3595_v52  ;;  %13400 = vst [vmem:[#allocation95_spill] sm:$0xff] %v10484_v14  ;;  %6704 = vpow2.f32 %v3824_v61 }
 0xb88   :  { %13395 = vst [vmem:[#allocation67_spill] sm:$0xff] %v10473_v38  ;;  %v10477_v44 = vpop.permute.xlu0 %4162 }
 0xb89   :  { %13397 = vst [vmem:[#allocation241_spill] sm:$0xff] %v10477_v44  ;;  %6706 = vpow2.f32 %v3822_v41  ;;  %v10500_v44 = vpop.eup %6702  ;;  %v13410_v41 = vld [vmem:[#allocation187_spill] sm:$0xff] }
 0xb8a   :  { %13403 = vst [vmem:[#allocation50_spill] sm:$0xff] %v10492_v42  ;;  %6708 = vpow2.f32 %v3868_v30  ;;  %v3621_v59 = vsub.f32 %v13410_v41, %v10414_v5 }
 0xb8b   :  { %13407 = vst [vmem:[#allocation125_spill] sm:$0xff] %v10500_v44 }
 0xb8c   :  { %4357 = vperm.xlu1 %6489, %v10479_v16   ;;  %v13405_v16 = vld [vmem:[#allocation91_spill] sm:$0xff]  ;;  %v3874_v30 = vmul.f32 1.442695, %v3621_v59 }
 0xb8d   :  { %4300 = vperm.xlu2 %6491, %v10481_v24   ;;  %v3598_v60 = vsub.f32 %v13405_v16, %v10308_v57  ;;  %v3830_v24 = vmul.f32 1.442695, %v3599_v32  ;;  %v13411_v16 = vld [vmem:[#allocation173_spill] sm:$0xff] }
 0xb8e   :  { %4297 = vperm.xlu0 %6490, %v10484_v14   ;;  %v10502_v14 = vpop.eup %6704  ;;  %v3602_v22 = vsub.f32 %v13411_v16, %v10308_v57 }
 0xb8f   :  { %v10494_v52 = vpop.permute.xlu2 %4201  ;;  %v3828_v62 = vmul.f32 1.442695, %v3598_v60  ;;  %13408 = vst [vmem:[#allocation210_spill] sm:$0xff] %v10502_v14  ;;  %v10505_v61 = vpop.eup %6706  ;;  %6710 = vpow2.f32 %v3830_v24  ;;  %v13413_v60 = vld [vmem:[#allocation93_spill] sm:$0xff] }
 0xb90   :  { %13404 = vst [vmem:[#allocation212_spill] sm:$0xff] %v10494_v52  ;;  %v10498_v38 = vpop.permute.xlu0 %4171  ;;  %v10521_v52 = vpop.eup %6708 }
 0xb91   :  { %13406 = vst [vmem:[#allocation97_spill] sm:$0xff] %v10498_v38  ;;  %6712 = vpow2.f32 %v3828_v62  ;;  %v10519_v38 = vpop.permute.xlu1 %4222  ;;  %v13419_v62 = vld [vmem:[#allocation29_spill] sm:$0xff] }
 0xb92   :  { %13409 = vst [vmem:[#allocation213_spill] sm:$0xff] %v10505_v61  ;;  %6714 = vpow2.f32 %v3874_v30  ;;  %v3605_v16 = vsub.f32 %v13419_v62, %v10308_v57 }
 0xb93   :  { %13415 = vst [vmem:[#allocation251_spill] sm:$0xff] %v10519_v38 }
 0xb94   :  { %4366 = vperm.xlu1 %6489, %v10500_v44   ;;  %v3601_v44 = vsub.f32 %v13413_v60, %v10308_v57  ;;  %13416 = vst [vmem:[#allocation124_spill] sm:$0xff] %v10521_v52 }
 0xb95   :  { %4309 = vperm.xlu2 %6491, %v10502_v14   ;;  %v3836_v14 = vmul.f32 1.442695, %v3602_v22 }
 0xb96   :  { %4306 = vperm.xlu0 %6490, %v10505_v61   ;;  %v3834_v41 = vmul.f32 1.442695, %v3601_v44  ;;  %v10523_v61 = vpop.eup %6710  ;;  %v13421_v44 = vld [vmem:[#allocation209_spill] sm:$0xff] }
 0xb97   :  { %v10513_v32 = vpop.permute.xlu2 %4210  ;;  %13417 = vst [vmem:[#allocation252_spill] sm:$0xff] %v10523_v61  ;;  %v10526_v24 = vpop.eup %6712  ;;  %6716 = vpow2.f32 %v3836_v14  ;;  %v3604_v22 = vsub.f32 %v13421_v44, %v10308_v57  ;;  %v13429_v44 = vld [vmem:[#allocation105_spill] sm:$0xff] }
 0xb98   :  { %13412 = vst [vmem:[#allocation226_spill] sm:$0xff] %v10513_v32  ;;  %v10517_v42 = vpop.permute.xlu0 %4180  ;;  %6718 = vpow2.f32 %v3834_v41  ;;  %v10538_v38 = vpop.eup %6714  ;;  %v13427_v41 = vld [vmem:[#allocation30_spill] sm:$0xff] }
 0xb99   :  { %13414 = vst [vmem:[#allocation101_spill] sm:$0xff] %v10517_v42  ;;  %v10540_v42 = vpop.permute.xlu1 %4231  ;;  %v3840_v30 = vmul.f32 1.442695, %v3604_v22  ;;  %v3608_v62 = vsub.f32 %v13427_v41, %v10414_v5  ;;  %v3607_v22 = vsub.f32 %v13429_v44, %v10308_v57  ;;  %v13436_v57 = vld [vmem:[#allocation99_spill] sm:$0xff] }
 0xb9a   :  { %13418 = vst [vmem:[#allocation217_spill] sm:$0xff] %v10526_v24 }
 0xb9b   :  { %13423 = vst [vmem:[#allocation136_spill] sm:$0xff] %v10538_v38 }
 0xb9c   :  { %4375 = vperm.xlu1 %6489, %v10521_v52   ;;  %v3842_v52 = vmul.f32 1.442695, %v3605_v16  ;;  %13424 = vst [vmem:[#allocation110_spill] sm:$0xff] %v10540_v42  ;;  %v3848_v42 = vmul.f32 1.442695, %v3608_v62  ;;  %v3610_v62 = vsub.f32 %v13436_v57, %v10414_v5 }
 0xb9d   :  { %4318 = vperm.xlu2 %6491, %v10523_v61   ;;  %v10542_v61 = vpop.eup %6716 }
 0xb9e   :  { %4315 = vperm.xlu0 %6490, %v10526_v24   ;;  %13425 = vst [vmem:[#allocation106_spill] sm:$0xff] %v10542_v61  ;;  %v10545_v14 = vpop.eup %6718  ;;  %6720 = vpow2.f32 %v3842_v52  ;;  %v13434_v52 = vld [vmem:[#allocation80_spill] sm:$0xff] }
 0xb9f   :  { %v10532_v59 = vpop.permute.xlu2 %4219  ;;  %13426 = vst [vmem:[#allocation228_spill] sm:$0xff] %v10545_v14  ;;  %6722 = vpow2.f32 %v3840_v30  ;;  %v3611_v30 = vsub.f32 %v13434_v52, %v10414_v5 }
 0xba0   :  { %13420 = vst [vmem:[#allocation126_spill] sm:$0xff] %v10532_v59  ;;  %v10536_v60 = vpop.permute.xlu0 %4189  ;;  %6724 = vpow2.f32 %v3848_v42  ;;  %v13439_v42 = vld [vmem:[#allocation176_spill] sm:$0xff] }
 0xba1   :  { %13422 = vst [vmem:[#allocation254_spill] sm:$0xff] %v10536_v60  ;;  %v3614_v52 = vsub.f32 %v13439_v42, %v10414_v5 }
 0xba4   :  { %4384 = vperm.xlu1 %6489, %v10538_v38   ;;  %v3846_v38 = vmul.f32 1.442695, %v3607_v22  ;;  %v10557_v60 = vpop.eup %6720  ;;  %v3854_v22 = vmul.f32 1.442695, %v3611_v30  ;;  %v13441_v30 = vld [vmem:[#allocation103_spill] sm:$0xff] }
 0xba5   :  { %4327 = vperm.xlu2 %6491, %v10542_v61   ;;  %13431 = vst [vmem:[#allocation255_spill] sm:$0xff] %v10557_v60  ;;  %v10559_v59 = vpop.eup %6722  ;;  %v10561_v61 = vpop.permute.xlu1 %4240  ;;  %v3613_v57 = vsub.f32 %v13441_v30, %v10414_v5  ;;  %v13447_v30 = vld [vmem:[#allocation146_spill] sm:$0xff] }
 0xba6   :  { %4324 = vperm.xlu0 %6490, %v10545_v14   ;;  %13432 = vst [vmem:[#allocation10_spill] sm:$0xff] %v10559_v59  ;;  %6726 = vpow2.f32 %v3846_v38  ;;  %v3852_v14 = vmul.f32 1.442695, %v3610_v62 }
 0xba7   :  { %v10551_v16 = vpop.permute.xlu2 %4228  ;;  %13433 = vst [vmem:[#allocation108_spill] sm:$0xff] %v10561_v61  ;;  %6728 = vpow2.f32 %v3854_v22  ;;  %v13445_v22 = vld [vmem:[#allocation82_spill] sm:$0xff] }
 0xba8   :  { %13428 = vst [vmem:[#allocation8_spill] sm:$0xff] %v10551_v16  ;;  %v10555_v24 = vpop.permute.xlu0 %4198  ;;  %6730 = vpow2.f32 %v3852_v14  ;;  %v3617_v42 = vsub.f32 %v13445_v22, %v10414_v5 }
 0xba9   :  { %13430 = vst [vmem:[#allocation52_spill] sm:$0xff] %v10555_v24  ;;  %v10573_v24 = vpop.eup %6724 }
 0xbaa   :  { %13437 = vst [vmem:[#allocation53_spill] sm:$0xff] %v10573_v24 }
 0xbac   :  { %v10575_v61 = vpop.eup %6726 }
 0xbad   :  { %4336 = vperm.xlu2 %6491, %v10557_v60   ;;  %13438 = vst [vmem:[#allocation51_spill] sm:$0xff] %v10575_v61  ;;  %v10581_v38 = vpop.permute.xlu1 %4249  ;;  %v3860_v60 = vmul.f32 1.442695, %v3614_v52  ;;  %v10589_v16 = vpop.eup %6728 }
 0xbae   :  { %4333 = vperm.xlu0 %6490, %v10559_v59   ;;  %13443 = vst [vmem:[#allocation9_spill] sm:$0xff] %v10589_v16 }
 0xbaf   :  { %v10567_v41 = vpop.permute.xlu2 %4237  ;;  %6732 = vpow2.f32 %v3860_v60  ;;  %v13452_v60 = vld [vmem:[#allocation190_spill] sm:$0xff] }
 0xbb0   :  { %13435 = vst [vmem:[#allocation256_spill] sm:$0xff] %v10567_v41  ;;  %v10571_v44 = vpop.permute.xlu0 %4207  ;;  %v3858_v41 = vmul.f32 1.442695, %v3613_v57 }
 0xbb2   :  { %6734 = vpow2.f32 %v3858_v41  ;;  %v3620_v41 = vsub.f32 %v13452_v60, %v10414_v5 }
 0xbb5   :  { %4345 = vperm.xlu2 %6491, %v10573_v24   ;;  %v10591_v24 = vpop.eup %6730  ;;  %v10603_v57 = vpop.permute.xlu1 %4258 }
 0xbb6   :  { %4342 = vperm.xlu0 %6490, %v10575_v61   ;;  %13444 = vst [vmem:[#allocation258_spill] sm:$0xff] %v10591_v24  ;;  %v3616_v61 = vsub.f32 %v13447_v30, %v10414_v5  ;;  %v10605_v32 = vpop.eup %6732  ;;  %v13454_v30 = vld [vmem:[#allocation229_spill] sm:$0xff] }
 0xbb7   :  { %v10583_v59 = vpop.permute.xlu2 %4246  ;;  %13449 = vst [vmem:[#allocation259_spill] sm:$0xff] %v10603_v57 }
 0xbb8   :  { %13440 = vst [vmem:[#allocation257_spill] sm:$0xff] %v10583_v59  ;;  %v10587_v62 = vpop.permute.xlu0 %4216  ;;  %v3866_v59 = vmul.f32 1.442695, %v3617_v42 }
 0xbb9   :  { %13442 = vst [vmem:[#allocation11_spill] sm:$0xff] %v10587_v62  ;;  %v3864_v62 = vmul.f32 1.442695, %v3616_v61  ;;  %v3872_v61 = vmul.f32 1.442695, %v3620_v41  ;;  %v13461_v41 = vld [vmem:[#allocation129_spill] sm:$0xff] }
 0xbba   :  { %13450 = vst [vmem:[#allocation12_spill] sm:$0xff] %v10605_v32  ;;  %6736 = vpow2.f32 %v3866_v59  ;;  %v13459_v59 = vld [vmem:[#allocation180_spill] sm:$0xff] }
 0xbbb   :  { %6738 = vpow2.f32 %v3864_v62  ;;  %v3623_v62 = vsub.f32 %v13459_v59, %v10414_v5 }
 0xbbc   :  { %6740 = vpow2.f32 %v3872_v61 }
 0xbbd   :  { %4354 = vperm.xlu2 %6491, %v10589_v16   ;;  %v10607_v16 = vpop.eup %6734 }
 0xbbe   :  { %4351 = vperm.xlu0 %6490, %v10591_v24   ;;  %13451 = vst [vmem:[#allocation247_spill] sm:$0xff] %v10607_v16  ;;  %v3619_v24 = vsub.f32 %v13454_v30, %v10414_v5  ;;  %v3622_v30 = vsub.f32 %v13461_v41, %v10414_v5 }
 0xbbf   :  { %v10597_v14 = vpop.permute.xlu2 %4255 }
 0xbc0   :  { %13446 = vst [vmem:[#allocation159_spill] sm:$0xff] %v10597_v14  ;;  %v10601_v52 = vpop.permute.xlu0 %4225  ;;  %v3870_v57 = vmul.f32 1.442695, %v3619_v24  ;;  %v10621_v14 = vpop.eup %6736  ;;  %v3878_v24 = vmul.f32 1.442695, %v3623_v62 }
 0xbc1   :  { %13448 = vst [vmem:[#allocation250_spill] sm:$0xff] %v10601_v52  ;;  %v10619_v52 = vpop.permute.xlu1 %4267 }
 0xbc2   :  { %13456 = vst [vmem:[#allocation123_spill] sm:$0xff] %v10619_v52  ;;  %6742 = vpow2.f32 %v3870_v57 }
 0xbc3   :  { %13457 = vst [vmem:[#allocation261_spill] sm:$0xff] %v10621_v14  ;;  %6744 = vpow2.f32 %v3878_v24 }
 0xbc5   :  { %4363 = vperm.xlu2 %6491, %v10605_v32   ;;  %v10623_v32 = vpop.eup %6738 }
 0xbc6   :  { %4360 = vperm.xlu0 %6490, %v10607_v16   ;;  %13458 = vst [vmem:[#allocation120_spill] sm:$0xff] %v10623_v32  ;;  %v10635_v52 = vpop.eup %6740 }
 0xbc7   :  { %v10613_v22 = vpop.permute.xlu2 %4264  ;;  %13463 = vst [vmem:[#allocation56_spill] sm:$0xff] %v10635_v52 }
 0xbc8   :  { %13453 = vst [vmem:[#allocation260_spill] sm:$0xff] %v10613_v22  ;;  %v10617_v42 = vpop.permute.xlu0 %4234  ;;  %v10637_v22 = vpop.eup %6742 }
 0xbc9   :  { %13455 = vst [vmem:[#allocation55_spill] sm:$0xff] %v10617_v42  ;;  %v3876_v42 = vmul.f32 1.442695, %v3622_v30  ;;  %v10647_v5 = vpop.eup %6744 }
 0xbca   :  { %13464 = vst [vmem:[#allocation249_spill] sm:$0xff] %v10637_v22 }
 0xbcb   :  { %6746 = vpow2.f32 %v3876_v42  ;;  %13467 = vst [vmem:[#allocation112_spill] sm:$0xff] %v10647_v5 }
 0xbcd   :  { %4372 = vperm.xlu2 %6491, %v10621_v14   ;;  %v10639_v14 = vpop.permute.xlu1 %4276 }
 0xbce   :  { %4369 = vperm.xlu0 %6490, %v10623_v32   ;;  %13465 = vst [vmem:[#allocation263_spill] sm:$0xff] %v10639_v14  ;;  %v4426_v14 = vperm.slane %v10244_v6, %v9273_v31 }
 0xbcf   :  { %v10629_v60 = vpop.permute.xlu2 %4273 }
 0xbd0   :  { %13460 = vst [vmem:[#allocation186_spill] sm:$0xff] %v10629_v60  ;;  %v10633_v16 = vpop.permute.xlu0 %4243  ;;  %v4395_v60 = vperm.slane %v10094_v7, %v9273_v31  ;;  %v4428_v7 = vperm.slane %v10174_v50, %v9268_v35  ;;  %v4455_v50 = vperm.slane %v10350_v13, %v9255_v25 }
 0xbd1   :  { %13462 = vst [vmem:[#allocation262_spill] sm:$0xff] %v10633_v16  ;;  %v10649_v59 = vpop.eup %6746 }
 0xbd2   :  { %13468 = vst [vmem:[#allocation264_spill] sm:$0xff] %v10649_v59 }
 0xbd5   :  { %4381 = vperm.xlu2 %6491, %v10635_v52   ;;  %v10653_v62 = vpop.permute.xlu1 %4285 }
 0xbd6   :  { %4378 = vperm.xlu0 %6490, %v10637_v22   ;;  %13469 = vst [vmem:[#allocation15_spill] sm:$0xff] %v10653_v62 }
 0xbd7   :  { %v10643_v61 = vpop.permute.xlu2 %4282 }
 0xbd8   :  { %13466 = vst [vmem:[#allocation138_spill] sm:$0xff] %v10643_v61  ;;  %v10645_v57 = vpop.permute.xlu0 %4252 }
 0xbdd   :  { %4390 = vperm.xlu2 %6491, %v10647_v5   ;;  %v10661_v22 = vpop.permute.xlu1 %4294 }
 0xbde   :  { %4387 = vperm.xlu0 %6490, %v10649_v59   ;;  %13472 = vst [vmem:[#allocation131_spill] sm:$0xff] %v10661_v22  ;;  %v4392_v22 = vperm.slane %v10070_v29, %v9252_v11 }
 0xbdf   :  { %v10657_v30 = vpop.permute.xlu2 %4291 }
 0xbe0   :  { %v10655_v41 = vpop.permute.xlu0 %4261  ;;  %13470 = vst [vmem:[#allocation132_spill] sm:$0xff] %v10657_v30  ;;  %v4423_v30 = vperm.slane %v10153_v51, %v9252_v11 }
 0xbe5   :  { %v10667_v32 = vpop.permute.xlu1 %4303 }
 0xbe7   :  { %v10663_v42 = vpop.permute.xlu2 %4300 }
 0xbe8   :  { %v10659_v24 = vpop.permute.xlu0 %4270 }
 0xbe9   :  { %13471 = vst [vmem:[#allocation265_spill] sm:$0xff] %v10659_v24 }
 0xbed   :  { %v10673_v59 = vpop.permute.xlu1 %4312 }
 0xbee   :  { %13476 = vst [vmem:[#allocation13_spill] sm:$0xff] %v10673_v59  ;;  %v4393_v59 = vperm.slane %v10013_v12, %v9255_v25 }
 0xbef   :  { %v10669_v16 = vpop.permute.xlu2 %4309 }
 0xbf0   :  { %v10665_v52 = vpop.permute.xlu0 %4279  ;;  %13474 = vst [vmem:[#allocation266_spill] sm:$0xff] %v10669_v16  ;;  %v4394_v24 = vsel %vm3187_vm0, %v4393_v59, %v4392_v22  ;;  %v4397_v16 = vperm.slane %v10030_v0, %v9268_v35  ;;  %v4430_v22 = vperm.slane %v10107_v28, %v9300_v21  ;;  %v4401_v0 = vperm.slane %v10047_v53, %v9289_v45 }
 0xbf1   :  { %13473 = vst [vmem:[#allocation205_spill] sm:$0xff] %v10665_v52  ;;  %v4454_v28 = vperm.slane %v10194_v23, %v9252_v11  ;;  %v4407_v53 = vperm.slane %v10157_v17, %v9319_v8 }
 0xbf5   :  { %v10685_v52 = vpop.permute.xlu1 %4321 }
 0xbf6   :  { %13478 = vst [vmem:[#allocation18_spill] sm:$0xff] %v10685_v52  ;;  %v4396_v52 = vsel %vm3191_vm1, %v4395_v60, %v4394_v24 }
 0xbf7   :  { %v10675_v62 = vpop.permute.xlu2 %4318 }
 0xbf8   :  { %v10671_v5 = vpop.permute.xlu0 %4288  ;;  %13477 = vst [vmem:[#allocation267_spill] sm:$0xff] %v10675_v62 }
 0xbf9   :  { %13475 = vst [vmem:[#allocation17_spill] sm:$0xff] %v10671_v5  ;;  %v4424_v5 = vperm.slane %v10086_v10, %v9255_v25  ;;  %v4399_v10 = vperm.slane %v10115_v46, %v9300_v21  ;;  %v4403_v46 = vperm.slane %v10136_v55, %v9283_v43  ;;  %v4434_v55 = vperm.slane %v10198_v58, %v9283_v43 }
 0xbfa   :  { %v4438_v58 = vperm.slane %v10286_v15, %v9319_v8  ;;  %v4409_v15 = vperm.slane %v10090_v63, %v9286_v27 }
 0xbfb   :  { %v4425_v29 = vsel %vm3187_vm0, %v4424_v5, %v4423_v30  ;;  %v4432_v5 = vperm.slane %v10265_v39, %v9289_v45 }
 0xbfc   :  { %v4427_v6 = vsel %vm3191_vm1, %v4426_v14, %v4425_v29  ;;  %v4398_v14 = vsel %vm3195_vm2, %v4397_v16, %v4396_v52  ;;  %v4456_v29 = vsel %vm3187_vm0, %v4455_v50, %v4454_v28  ;;  %v4413_v50 = vperm.slane %v10178_v40, %v9335_v33 }
 0xbfd   :  { %v4429_v12 = vsel %vm3195_vm2, %v4428_v7, %v4427_v6  ;;  %v4400_v60 = vsel %vm3199_vm3, %v4399_v10, %v4398_v14  ;;  %v10723_v30 = vpop.permute.xlu1 %4330  ;;  %v4405_v6 = vperm.slane %v10066_v19, %v9346_v48  ;;  %v4457_v10 = vperm.slane %v10282_v18, %v9273_v31 }
 0xbfe   :  { %v4431_v39 = vsel %vm3199_vm3, %v4430_v22, %v4429_v12  ;;  %v4402_v52 = vsel %vm3203_vm4, %v4401_v0, %v4400_v60  ;;  %v4436_v7 = vperm.slane %v10128_v4, %v9346_v48  ;;  %v4459_v22 = vperm.slane %v10215_v54, %v9268_v35 }
 0xbff   :  { %v10695_v51 = vpop.permute.xlu2 %4327  ;;  %v4433_v16 = vsel %vm3203_vm4, %v4432_v5, %v4431_v39  ;;  %v4404_v24 = vsel %vm12348_vm5, %v4403_v46, %v4402_v52  ;;  %v4458_v17 = vsel %vm3191_vm1, %v4457_v10, %v4456_v29  ;;  %v4461_v5 = vperm.slane %v10371_v9, %v9300_v21  ;;  %v13487_v29 = vld [vmem:[#allocation139_spill] sm:$0xff] }
 0xc00   :  { %v10677_v61 = vpop.permute.xlu0 %4297  ;;  %v4435_v23 = vsel %vm12348_vm5, %v4434_v55, %v4433_v16  ;;  %v4406_v12 = vsel %vm3211_vm6, %v4405_v6, %v4404_v24  ;;  %v4440_v60 = vperm.slane %v10219_v34, %v9286_v27  ;;  %v4460_v46 = vsel %vm3195_vm2, %v4459_v22, %v4458_v17  ;;  %v13492_v22 = vld [vmem:[#allocation63_spill] sm:$0xff] }
 0xc01   :  { %v4408_v19 = vsel %vm13479_vm15, %v4407_v53, %v4406_v12  ;;  %v4437_v18 = vsel %vm3211_vm6, %v4436_v7, %v4435_v23  ;;  %v4462_v54 = vsel %vm3199_vm3, %v4461_v5, %v4460_v46  ;;  %v4411_v39 = vperm.slane %v10062_v2, %v9349_v36  ;;  %vm13482_vm15 = vmmov %vm13481_vm7 }
 0xc02   :  { %v4439_v4 = vsel %vm13480_vm10, %v4438_v58, %v4437_v18  ;;  %v4410_v9 = vsel %vm13481_vm7, %v4409_v15, %v4408_v19  ;;  %v4463_v28 = vperm.slane %v10301_v26, %v9289_v45  ;;  %v4444_v34 = vperm.slane %v10305_v56, %v9335_v33  ;;  %v13489_v58 = vld [vmem:[#allocation214_spill] sm:$0xff]  ;;  %v13491_v19 = vld [vmem:[#allocation36_spill] sm:$0xff] }
 0xc03   :  { %v4441_v63 = vsel %vm13482_vm15, %v4440_v60, %v4439_v4  ;;  %v4442_v16 = vperm.slane %v10149_v20, %v9349_v36  ;;  %vm13483_vm7 = vcmask 720512   ;;  %v4467_v2 = vperm.slane %v10392_v37, %v9346_v48  ;;  %v13486_v20 = vld [vmem:[#allocation37_spill] sm:$0xff]  ;;  %v13493_v4 = vld [vmem:[#allocation59_spill] sm:$0xff] }
 0xc04   :  { %v4412_v40 = vsel %vm13483_vm7, %v4411_v39, %v4410_v9  ;;  %v4464_v55 = vsel %vm3203_vm4, %v4463_v28, %v4462_v54  ;;  %vm13484_vm10 = vcmask 786112   ;;  %v4465_v26 = vperm.slane %v10236_v49, %v9283_v43  ;;  %vm13485_vm15 = vmmov %vm13483_vm7  ;;  %v13494_v9 = vld [vmem:[#allocation49_spill] sm:$0xff]  ;;  %v13495_v54 = vld [vmem:[#allocation76_spill] sm:$0xff] }
 0xc05   :  { %v10766_v0 = vpop.permute.xlu1 %4339  ;;  %v4414_v24 = vsel %vm13484_vm10, %v4413_v50, %v4412_v40  ;;  %v4443_v53 = vsel %vm13485_vm15, %v4442_v16, %v4441_v63  ;;  %v4415_v56 = vperm.slane %v10111_v3, %v9295_v47  ;;  %v4417_v6 = vperm.slane %v13487_v29, %v13486_v20  ;;  %vm13488_vm8 = vmmov %vm13484_vm10  ;;  %v13490_v3 = vld [vmem:[#allocation178_spill] sm:$0xff]  ;;  %v13497_v28 = vld [vmem:[#allocation200_spill] sm:$0xff] }
 0xc06   :  { %v4445_v23 = vsel %vm13488_vm8, %v4444_v34, %v4443_v53  ;;  %v4446_v37 = vperm.slane %v13489_v58, %v9295_v47  ;;  %v4466_v7 = vsel %vm12348_vm5, %v4465_v26, %v4464_v55  ;;  %v4469_v5 = vperm.slane %v13490_v3, %v9319_v8  ;;  %v13499_v53 = vld [vmem:[#allocation241_spill] sm:$0xff]  ;;  %vm13507_vm10 = vmmov %vm13485_vm15 }
 0xc07   :  { %v10731_v13 = vpop.permute.xlu2 %4336  ;;  %v4416_v12 = vsel %vm3231_vm11, %v4415_v56, %v4414_v24  ;;  %v4468_v49 = vsel %vm3211_vm6, %v4467_v2, %v4466_v7  ;;  %v4450_v18 = vperm.slane %v13492_v22, %v13491_v19  ;;  %v4485_v15 = vperm.slane %v10456_v1, %v9252_v11  ;;  %v13498_v1 = vld [vmem:[#allocation149_spill] sm:$0xff] }
 0xc08   :  { %v10691_v62 = vpop.permute.xlu0 %4306  ;;  %v4447_v17 = vsel %vm3231_vm11, %v4446_v37, %v4445_v23  ;;  %v4448_v60 = vperm.slane %v13493_v4, %v13486_v20  ;;  %v4418_v46 = vsel %vm3235_vm12, %v4417_v6, %v4416_v12  ;;  %v4419_v50 = vperm.slane %v13494_v9, %v13491_v19  ;;  %v13500_v6 = vld [vmem:[#allocation90_spill] sm:$0xff]  ;;  %v13502_v37 = vld [vmem:[#allocation185_spill] sm:$0xff] }
 0xc09   :  { %v4486_v39 = vperm.slane %v13495_v54, %v9255_v25  ;;  %vm13496_vm8 = vcmask 589312   ;;  %v4473_v34 = vperm.slane %v13497_v28, %v9349_v36  ;;  %v4471_v40 = vperm.slane %v13498_v1, %v9286_v27  ;;  %v13501_v23 = vld [vmem:[#allocation114_spill] sm:$0xff]  ;;  %v13510_v28 = vld [vmem:[#allocation201_spill] sm:$0xff] }
 0xc0a   :  { %v4470_v63 = vsel %vm13496_vm8, %v4469_v5, %v4468_v49  ;;  %v4449_v55 = vsel %vm3235_vm12, %v4448_v60, %v4447_v17  ;;  %v10822_v2 = vsel %vm3239_vm13, %v4419_v50, %v4418_v46  ;;  %v4490_v56 = vperm.slane %v13499_v53, %v9268_v35  ;;  %v13503_v12 = vld [vmem:[#allocation174_spill] sm:$0xff]  ;;  %v13505_v5 = vld [vmem:[#allocation191_spill] sm:$0xff] }
 0xc0b   :  { %v4451_v24 = vsel %vm3239_vm13, %v4450_v18, %v4449_v55  ;;  %v4487_v26 = vsel %vm3187_vm0, %v4486_v39, %v4485_v15  ;;  %v4452_v7 = vperm.slane %v13502_v37, %v13500_v6  ;;  %v4488_v49 = vperm.slane %v13503_v12, %v9273_v31  ;;  %v13506_v18 = vld [vmem:[#allocation84_spill] sm:$0xff]  ;;  %v13508_v9 = vld [vmem:[#allocation74_spill] sm:$0xff]  ;;  %v13511_v55 = vld [vmem:[#allocation87_spill] sm:$0xff] }
 0xc0c   :  { %vm13504_vm7 = vcmask 654912   ;;  %v4477_v22 = vperm.slane %v13505_v5, %v9295_v47  ;;  %v4548_v60 = vperm.slane %v10645_v57, %v9255_v25  ;;  %v4475_v50 = vperm.slane %v13508_v9, %v9335_v33  ;;  %v13509_v39 = vld [vmem:[#allocation212_spill] sm:$0xff]  ;;  %v13512_v53 = vld [vmem:[#allocation243_spill] sm:$0xff] }
 0xc0d   :  { %v10816_v16 = vpop.permute.xlu1 %4348  ;;  %v4472_v17 = vsel %vm13504_vm7, %v4471_v40, %v4470_v63  ;;  %v10847_v46 = vsel %vm12350_vm14, %v4452_v7, %v4451_v24  ;;  %v4489_v54 = vsel %vm3191_vm1, %v4488_v49, %v4487_v26  ;;  %v4516_v63 = vperm.slane %v13509_v39, %v9252_v11  ;;  %v13514_v7 = vld [vmem:[#allocation222_spill] sm:$0xff]  ;;  %v13515_v49 = vld [vmem:[#allocation60_spill] sm:$0xff]  ;;  %v13517_v9 = vld [vmem:[#allocation35_spill] sm:$0xff] }
 0xc0e   :  { %v4474_v4 = vsel %vm13507_vm10, %v4473_v34, %v4472_v17  ;;  %v4494_v1 = vperm.slane %v13510_v28, %v9289_v45  ;;  %v4491_v40 = vsel %vm3195_vm2, %v4490_v56, %v4489_v54  ;;  %v4547_v34 = vperm.slane %v10581_v38, %v9252_v11  ;;  %v13516_v17 = vld [vmem:[#allocation182_spill] sm:$0xff]  ;;  %v13520_v54 = vld [vmem:[#allocation72_spill] sm:$0xff]  ;;  %vm13537_vm10 = vmmov %vm13496_vm8 }
 0xc0f   :  { %v10777_v52 = vpop.permute.xlu2 %4345  ;;  %v4519_v57 = vperm.slane %v10571_v44, %v9273_v31  ;;  %v4500_v24 = vperm.slane %v13511_v55, %v9319_v8  ;;  %v4492_v26 = vperm.slane %v13512_v53, %v9300_v21  ;;  %vm13513_vm15 = vcmask 786112   ;;  %v13539_v55 = vld [vmem:[#allocation8_spill] sm:$0xff] }
 0xc10   :  { %v10718_v59 = vpop.permute.xlu0 %4315  ;;  %v4476_v37 = vsel %vm13513_vm15, %v4475_v50, %v4474_v4  ;;  %v4517_v12 = vperm.slane %v13514_v7, %v9255_v25  ;;  %v4481_v56 = vperm.slane %v13515_v49, %v13491_v19  ;;  %v4506_v38 = vperm.slane %v13516_v17, %v9335_v33  ;;  %v13518_v50 = vld [vmem:[#allocation159_spill] sm:$0xff]  ;;  %v13519_v7 = vld [vmem:[#allocation97_spill] sm:$0xff]  ;;  %vm13540_vm15 = vmmov %vm13496_vm8 }
 0xc11   :  { %v4549_v5 = vsel %vm3187_vm0, %v4548_v60, %v4547_v34  ;;  %v4578_v44 = vperm.slane %v10677_v61, %v9252_v11  ;;  %v4493_v39 = vsel %vm3199_vm3, %v4492_v26, %v4491_v40  ;;  %v4550_v28 = vperm.slane %v13518_v50, %v9273_v31 }
 0xc12   :  { %v4518_v4 = vsel %vm3187_vm0, %v4517_v12, %v4516_v63  ;;  %v4478_v53 = vsel %vm3231_vm11, %v4477_v22, %v4476_v37  ;;  %v4496_v58 = vperm.slane %v13519_v7, %v9283_v43  ;;  %v4579_v61 = vperm.slane %v10663_v42, %v9255_v25  ;;  %v13521_v63 = vld [vmem:[#allocation226_spill] sm:$0xff] }
 0xc13   :  { %v4520_v60 = vsel %vm3191_vm1, %v4519_v57, %v4518_v4  ;;  %v4479_v40 = vperm.slane %v13520_v54, %v13486_v20  ;;  %v4521_v26 = vperm.slane %v13521_v63, %v9268_v35  ;;  %v4551_v12 = vsel %vm3191_vm1, %v4550_v28, %v4549_v5  ;;  %v13522_v57 = vld [vmem:[#allocation259_spill] sm:$0xff] }
 0xc14   :  { %v4554_v22 = vperm.slane %v10655_v41, %v9300_v21  ;;  %v4495_v50 = vsel %vm3203_vm4, %v4494_v1, %v4493_v39  ;;  %v4552_v4 = vperm.slane %v13522_v57, %v9268_v35  ;;  %v4580_v42 = vsel %vm3187_vm0, %v4579_v61, %v4578_v44  ;;  %v13523_v5 = vld [vmem:[#allocation11_spill] sm:$0xff]  ;;  %v13524_v39 = vld [vmem:[#allocation50_spill] sm:$0xff] }
 0xc15   :  { %v10887_v34 = vpop.permute.xlu1 %4357  ;;  %v4583_v7 = vperm.slane %v10691_v62, %v9268_v35  ;;  %v4522_v63 = vsel %vm3195_vm2, %v4521_v26, %v4520_v60  ;;  %v4525_v28 = vperm.slane %v13523_v5, %v9289_v45  ;;  %v4581_v41 = vperm.slane %v10667_v32, %v9273_v31  ;;  %v13525_v60 = vld [vmem:[#allocation33_spill] sm:$0xff] }
 0xc16   :  { %v4609_v1 = vperm.slane %v10777_v52, %v9252_v11  ;;  %v4523_v57 = vperm.slane %v13524_v39, %v9300_v21  ;;  %v4497_v44 = vsel %vm12348_vm5, %v4496_v58, %v4495_v50  ;;  %v4553_v62 = vsel %vm3195_vm2, %v4552_v4, %v4551_v12  ;;  %v13526_v58 = vld [vmem:[#allocation260_spill] sm:$0xff] }
 0xc17   :  { %v10828_v29 = vpop.permute.xlu2 %4354  ;;  %v4498_v26 = vperm.slane %v13525_v60, %v9346_v48  ;;  %v4555_v5 = vsel %vm3199_vm3, %v4554_v22, %v4553_v62  ;;  %v4610_v32 = vperm.slane %v10816_v16, %v9255_v25  ;;  %v4582_v15 = vsel %vm3191_vm1, %v4581_v41, %v4580_v42  ;;  %v13527_v22 = vld [vmem:[#allocation266_spill] sm:$0xff] }
 0xc18   :  { %v10754_v14 = vpop.permute.xlu0 %4324  ;;  %v10923_v52 = vsel %vm3235_vm12, %v4479_v40, %v4478_v53  ;;  %v4524_v39 = vsel %vm3199_vm3, %v4523_v57, %v4522_v63  ;;  %v4556_v12 = vperm.slane %v13526_v58, %v9289_v45  ;;  %v4585_v62 = vperm.slane %v13527_v22, %v9300_v21  ;;  %v13528_v42 = vld [vmem:[#allocation126_spill] sm:$0xff]  ;;  %v13529_v63 = vld [vmem:[#allocation265_spill] sm:$0xff] }
 0xc19   :  { %v4499_v50 = vsel %vm3211_vm6, %v4498_v26, %v4497_v44  ;;  %v4526_v4 = vsel %vm3203_vm4, %v4525_v28, %v4524_v39  ;;  %v4611_v16 = vsel %vm3187_vm0, %v4610_v32, %v4609_v1  ;;  %v4527_v53 = vperm.slane %v13528_v42, %v9283_v43  ;;  %v13531_v26 = vld [vmem:[#allocation101_spill] sm:$0xff]  ;;  %v13532_v39 = vld [vmem:[#allocation250_spill] sm:$0xff] }
 0xc1a   :  { %v4557_v40 = vsel %vm3203_vm4, %v4556_v12, %v4555_v5  ;;  %v4560_v41 = vperm.slane %v13529_v63, %v9346_v48  ;;  %v4589_v44 = vperm.slane %v10718_v59, %v9283_v43  ;;  %v4614_v1 = vperm.slane %v10828_v29, %v9268_v35  ;;  %v13533_v58 = vld [vmem:[#allocation13_spill] sm:$0xff]  ;;  %v13535_v42 = vld [vmem:[#allocation202_spill] sm:$0xff] }
 0xc1b   :  { %v4502_v5 = vperm.slane %v13531_v26, %v9286_v27  ;;  %v4528_v32 = vsel %vm12348_vm5, %v4527_v53, %v4526_v4  ;;  %v4587_v12 = vperm.slane %v13533_v58, %v9289_v45  ;;  %v4504_v63 = vperm.slane %v13535_v42, %v9349_v36  ;;  %v13544_v42 = vld [vmem:[#allocation254_spill] sm:$0xff] }
 0xc1c   :  { %v4616_v53 = vperm.slane %v10887_v34, %v9300_v21  ;;  %v13538_v34 = vld [vmem:[#allocation267_spill] sm:$0xff] }
 0xc1d   :  { %v4367_v22 = vpop.permute.xlu1 %4366 }
 0xc1f   :  { %v10902_v54 = vpop.permute.xlu2 %4363 }
 0xc20   :  { %v10792_v10 = vpop.permute.xlu0 %4333 }
 0xc27   :  { %v4373_v26 = vpop.permute.xlu2 %4372 }
 0xc28   :  { %v10837_v3 = vpop.permute.xlu0 %4342 }
 0xc30   :  { %v4352_v37 = vpop.permute.xlu0 %4351 }
 0xc31   :  { %v4612_v61 = vperm.slane %v4352_v37, %v9273_v31  ;;  %v4584_v37 = vsel %vm3195_vm2, %v4583_v7, %v4582_v15  ;;  %v13530_v15 = vld [vmem:[#allocation123_spill] sm:$0xff] }
 0xc32   :  { %v4558_v7 = vperm.slane %v13530_v15, %v9283_v43  ;;  %v4586_v28 = vsel %vm3199_vm3, %v4585_v62, %v4584_v37  ;;  %v13534_v37 = vld [vmem:[#allocation251_spill] sm:$0xff] }
 0xc33   :  { %v4613_v57 = vsel %vm3191_vm1, %v4612_v61, %v4611_v16  ;;  %v4531_v61 = vperm.slane %v13532_v39, %v9319_v8  ;;  %v4529_v62 = vperm.slane %v13534_v37, %v9346_v48  ;;  %v4588_v15 = vsel %vm3203_vm4, %v4587_v12, %v4586_v28 }
 0xc34   :  { %v4559_v59 = vsel %vm12348_vm5, %v4558_v7, %v4557_v40  ;;  %v4615_v29 = vsel %vm3195_vm2, %v4614_v1, %v4613_v57  ;;  %v4501_v40 = vsel %vm13496_vm8, %v4500_v24, %v4499_v50  ;;  %v13536_v7 = vld [vmem:[#allocation186_spill] sm:$0xff]  ;;  %v4591_v28 = vperm.slane %v13538_v34, %v9346_v48  ;;  %v13541_v50 = vld [vmem:[#allocation205_spill] sm:$0xff] }
 0xc35   :  { %v4561_v4 = vsel %vm3211_vm6, %v4560_v41, %v4559_v59  ;;  %v4530_v57 = vsel %vm3211_vm6, %v4529_v62, %v4528_v32  ;;  %v4562_v1 = vperm.slane %v13536_v7, %v9319_v8  ;;  %v4503_v41 = vsel %vm13504_vm7, %v4502_v5, %v4501_v40 }
 0xc36   :  { %v4532_v39 = vsel %vm13537_vm10, %v4531_v61, %v4530_v57  ;;  %v4617_v58 = vsel %vm3199_vm3, %v4616_v53, %v4615_v29  ;;  %v4533_v12 = vperm.slane %v13539_v55, %v9286_v27  ;;  %v4566_v32 = vperm.slane %v13541_v50, %v9349_v36  ;;  %v13546_v57 = vld [vmem:[#allocation55_spill] sm:$0xff]  ;;  %vm13547_vm10 = vmmov %vm13504_vm7  ;;  %v4376_v50 = vpop.permute.xlu1 %4375 }
 0xc37   :  { %v4563_v24 = vsel %vm13540_vm15, %v4562_v1, %v4561_v4  ;;  %v4595_v62 = vperm.slane %v10754_v14, %v9286_v27  ;;  %v4620_v59 = vperm.slane %v10902_v54, %v9283_v43  ;;  %vm13543_vm8 = vcmask 720512  }
 0xc38   :  { %v4361_v60 = vpop.permute.xlu0 %4360  ;;  %v4505_v29 = vsel %vm13543_vm8, %v4504_v63, %v4503_v41  ;;  %v4508_v4 = vperm.slane %v13544_v42, %v9295_v47  ;;  %v4534_v53 = vsel %vm13504_vm7, %v4533_v12, %v4532_v39  ;;  %v4537_v7 = vperm.slane %v13546_v57, %v9335_v33  ;;  %v13548_v63 = vld [vmem:[#allocation110_spill] sm:$0xff]  ;;  %vm13549_vm15 = vmmov %vm13543_vm8 }
 0xc39   :  { %v4618_v16 = vperm.slane %v4361_v60, %v9289_v45  ;;  %v4590_v60 = vsel %vm12348_vm5, %v4589_v44, %v4588_v15  ;;  %v13542_v44 = vld [vmem:[#allocation263_spill] sm:$0xff]  ;;  %v4622_v39 = vperm.slane %v4367_v22, %v9346_v48  ;;  %vm13550_vm8 = vcmask 589312   ;;  %v13553_v12 = vld [vmem:[#allocation138_spill] sm:$0xff] }
 0xc3a   :  { %v4564_v5 = vperm.slane %v13542_v44, %v9286_v27  ;;  %v4592_v61 = vsel %vm3211_vm6, %v4591_v28, %v4590_v60  ;;  %v4535_v60 = vperm.slane %v13548_v63, %v9349_v36  ;;  %v13551_v28 = vld [vmem:[#allocation67_spill] sm:$0xff]  ;;  %vm13552_vm7 = vcmask 786112  }
 0xc3b   :  { %v4619_v37 = vsel %vm3203_vm4, %v4618_v16, %v4617_v58  ;;  %v13545_v16 = vld [vmem:[#allocation18_spill] sm:$0xff]  ;;  %v4510_v58 = vperm.slane %v13551_v28, %v13486_v20  ;;  %v4507_v55 = vsel %vm13552_vm7, %v4506_v38, %v4505_v29  ;;  %v4597_v44 = vperm.slane %v10695_v51, %v9349_v36  ;;  %v4382_v29 = vpop.permute.xlu2 %4381  ;;  %v13565_v28 = vld [vmem:[#allocation52_spill] sm:$0xff] }
 0xc3c   :  { %v4593_v15 = vperm.slane %v13545_v16, %v9319_v8  ;;  %v4565_v1 = vsel %vm13547_vm10, %v4564_v5, %v4563_v24  ;;  %v4621_v14 = vsel %vm12348_vm5, %v4620_v59, %v4619_v37  ;;  %v4568_v24 = vperm.slane %v13553_v12, %v9335_v33 }
 0xc3d   :  { %v4567_v41 = vsel %vm13549_vm15, %v4566_v32, %v4565_v1  ;;  %v4509_v32 = vsel %vm3231_vm11, %v4508_v4, %v4507_v55  ;;  %v4536_v22 = vsel %vm13549_vm15, %v4535_v60, %v4534_v53  ;;  %v4623_v5 = vsel %vm3211_vm6, %v4622_v39, %v4621_v14 }
 0xc3e   :  { %v4594_v34 = vsel %vm13550_vm8, %v4593_v15, %v4592_v61  ;;  %v13554_v61 = vld [vmem:[#allocation256_spill] sm:$0xff]  ;;  %vm13555_vm8 = vmmov %vm13552_vm7  ;;  %v4569_v59 = vsel %vm13552_vm7, %v4568_v24, %v4567_v41  ;;  %vm13556_vm5 = vcmask 589312   ;;  %v4601_v51 = vperm.slane %v10792_v10, %v9295_v47 }
 0xc3f   :  { %v4596_v37 = vsel %vm13547_vm10, %v4595_v62, %v4594_v34  ;;  %v4539_v17 = vperm.slane %v13554_v61, %v9295_v47  ;;  %v4538_v38 = vsel %vm13555_vm8, %v4537_v7, %v4536_v22  ;;  %v13557_v62 = vld [vmem:[#allocation17_spill] sm:$0xff]  ;;  %vm13558_vm10 = vmmov %vm13549_vm15  ;;  %v4626_v16 = vperm.slane %v4373_v26, %v9286_v27  ;;  %v13560_v7 = vld [vmem:[#allocation15_spill] sm:$0xff] }
 0xc40   :  { %v4370_v40 = vpop.permute.xlu0 %4369  ;;  %v4572_v4 = vperm.slane %v13557_v62, %v13486_v20  ;;  %v4598_v53 = vsel %vm13558_vm10, %v4597_v44, %v4596_v37  ;;  %v4482_v15 = vsel %vm3239_vm13, %v4481_v56, %v10923_v52  ;;  %v4570_v1 = vperm.slane %v13560_v7, %v9295_v47  ;;  %v13561_v26 = vld [vmem:[#allocation262_spill] sm:$0xff]  ;;  %vm13563_vm15 = vmmov %vm13552_vm7 }
 0xc41   :  { %v4624_v54 = vperm.slane %v4370_v40, %v9319_v8  ;;  %v13559_v40 = vld [vmem:[#allocation108_spill] sm:$0xff]  ;;  %v4599_v14 = vperm.slane %v10723_v30, %v9335_v33  ;;  %v4540_v10 = vsel %vm3231_vm11, %v4539_v17, %v4538_v38  ;;  %v4543_v63 = vperm.slane %v13561_v26, %v13491_v19  ;;  %vm13567_vm8 = vmmov %vm13558_vm10 }
 0xc42   :  { %v4541_v57 = vperm.slane %v13559_v40, %v13486_v20  ;;  %v4571_v56 = vsel %vm3231_vm11, %v4570_v1, %v4569_v59  ;;  %v4628_v52 = vperm.slane %v4376_v50, %v9349_v36  ;;  %v13564_v30 = vperm.slane %v13506_v18, %v13500_v6  ;;  %v13566_v50 = vld [vmem:[#allocation132_spill] sm:$0xff] }
 0xc43   :  { %v4625_v42 = vsel %vm13556_vm5, %v4624_v54, %v4623_v5  ;;  %v4511_v54 = vsel %vm3235_vm12, %v4510_v58, %v4509_v32  ;;  %vm13562_vm5 = vcmask 654912   ;;  %v4600_v41 = vsel %vm13563_vm15, %v4599_v14, %v4598_v53  ;;  %v13569_v5 = vld [vmem:[#allocation257_spill] sm:$0xff] }
 0xc44   :  { %v4627_v49 = vsel %vm13562_vm5, %v4626_v16, %v4625_v42  ;;  %v4484_v34 = vsel %vm12350_vm14, %v13564_v30, %v4482_v15  ;;  %v4514_v58 = vperm.slane %v13565_v28, %v13500_v6  ;;  %v4573_v55 = vsel %vm3235_vm12, %v4572_v4, %v4571_v56  ;;  %v4385_v42 = vpop.permute.xlu1 %4384  ;;  %v13571_v16 = vld [vmem:[#allocation131_spill] sm:$0xff] }
 0xc45   :  { %v4602_v12 = vsel %vm3231_vm11, %v4601_v51, %v4600_v41  ;;  %v4542_v24 = vsel %vm3235_vm12, %v4541_v57, %v4540_v10  ;;  %v4574_v37 = vperm.slane %v13566_v50, %v13491_v19  ;;  %v4603_v32 = vperm.slane %v10731_v13, %v13486_v20 }
 0xc46   :  { %v4629_v22 = vsel %vm13567_vm8, %v4628_v52, %v4627_v49  ;;  %v13568_v18 = vperm.slane %v13517_v9, %v13491_v19  ;;  %v4545_v61 = vperm.slane %v13569_v5, %v13500_v6  ;;  %v4544_v17 = vsel %vm3239_vm13, %v4543_v63, %v4542_v24 }
 0xc47   :  { %v4575_v59 = vsel %vm3239_vm13, %v4574_v37, %v4573_v55  ;;  %v4604_v62 = vsel %vm3235_vm12, %v4603_v32, %v4602_v12  ;;  %v4607_v13 = vperm.slane %v10837_v3, %v13500_v6  ;;  %v4632_v4 = vperm.slane %v4382_v29, %v9295_v47  ;;  %v4391_v29 = vpop.permute.xlu2 %4390 }
 0xc48   :  { %v4379_v60 = vpop.permute.xlu0 %4378  ;;  %v4513_v44 = vsel %vm3239_vm13, %v13568_v18, %v4511_v54  ;;  %v13570_v9 = vperm.slane %v13501_v23, %v13500_v6  ;;  %v4576_v15 = vperm.slane %v13571_v16, %v13500_v6  ;;  %v4605_v40 = vperm.slane %v10766_v0, %v13491_v19 }
 0xc49   :  { %v4630_v39 = vperm.slane %v4379_v60, %v9335_v33  ;;  %v4515_v51 = vsel %vm12350_vm14, %v4514_v58, %v4513_v44  ;;  %vm13572_vm10 = vcmask 1041409   ;;  %v4546_v3 = vsel %vm12350_vm14, %v4545_v61, %v4544_v17 }
 0xc4a   :  { %v4422_v53 = vsel %vm12350_vm14, %v13570_v9, %v10822_v2  ;;  %vm13573_vm5 = vcmask 1042434   ;;  %v4634_v2 = vperm.slane %v4385_v42, %v13486_v20  ;;  %v4577_v14 = vsel %vm12350_vm14, %v4576_v15, %v4575_v59  ;;  %v13579_v9 = vld [vmem:[#allocation197_spill] sm:$0xff] }
 0xc4b   :  { %v4631_v38 = vsel %vm13552_vm7, %v4630_v39, %v4629_v22  ;;  %v4640_v57 = vsel %vm13572_vm10, %v10847_v46, %v4422_v53  ;;  %v4606_v54 = vsel %vm3239_vm13, %v4605_v40, %v4604_v62  ;;  %v4638_v26 = vperm.slane %v4391_v29, %v13500_v6 }
 0xc4c   :  { %v4633_v7 = vsel %vm3231_vm11, %v4632_v4, %v4631_v38  ;;  %v4641_v23 = vsel %vm13573_vm5, %v4484_v34, %v4640_v57  ;;  %v4608_v46 = vsel %vm12350_vm14, %v4607_v13, %v4606_v54  ;;  %vm13574_vm15 = vcmask 1044484   ;;  %v13578_v13 = vld [vmem:[#allocation203_spill] sm:$0xff]  ;;  %v13584_v54 = vld [vmem:[#allocation89_spill] sm:$0xff] }
 0xc4d   :  { %v4642_v10 = vsel %vm12349_vm9, %v4515_v51, %v4641_v23  ;;  %v4635_v63 = vsel %vm3235_vm12, %v4634_v2, %v4633_v7  ;;  %vm13575_vm8 = vcmask 1045509   ;;  %vm13576_vm7 = vcmask 1046534   ;;  %v13580_v51 = vld [vmem:[#allocation94_spill] sm:$0xff]  ;;  %v13583_v2 = vld [vmem:[#allocation195_spill] sm:$0xff] }
 0xc4e   :  { %v4643_v49 = vsel %vm13574_vm15, %v4546_v3, %v4642_v10  ;;  %vm13577_vm10 = vcmask 1047559   ;;  %v13581_v3 = vld [vmem:[#allocation206_spill] sm:$0xff] }
 0xc4f   :  { %v4644_v56 = vsel %vm13575_vm8, %v4577_v14, %v4643_v49  ;;  %v13582_v7 = vld [vmem:[#allocation38_spill] sm:$0xff] }
 0xc50   :  { %v4388_v1 = vpop.permute.xlu0 %4387  ;;  %v4645_v41 = vsel %vm13576_vm7, %v4608_v46, %v4644_v56 }
 0xc51   :  { %v4636_v0 = vperm.slane %v4388_v1, %v13491_v19 }
 0xc53   :  { %v4637_v60 = vsel %vm3239_vm13, %v4636_v0, %v4635_v63  ;;  %v13585_v0 = vld [vmem:[#allocation96_spill] sm:$0xff] }
 0xc54   :  { %v4639_v52 = vsel %vm12350_vm14, %v4638_v26, %v4637_v60  ;;  %v13586_v26 = vld [vmem:[#allocation204_spill] sm:$0xff]  ;;  %v13587_v60 = vld [vmem:[#allocation39_spill] sm:$0xff] }
 0xc55   :  { %v4646_v39 = vsel %vm13577_vm10, %v4639_v52, %v4645_v41  ;;  %v13588_v52 = vld [vmem:[#allocation215_spill] sm:$0xff] }
 0xc56   :  { %4648 = vadd.xlane.f32.xlu1 %v4646_v39  ;;  %v13589_v39 = vld [vmem:[#allocation86_spill] sm:$0xff] }
 0xcc9   :  { %v11108_v30 = vpop.xlane.xlu1 %4648 }
 0xcca   :  { %v4651_v34 = vperm.slane %v11108_v30, 0  ;;  %v4652_v28 = vperm.slane %v11108_v30, 1  ;;  %v4653_v14 = vperm.slane %v11108_v30, 2 }
 0xccc   :  { %6748 = vrcp.f32 %v4651_v34  ;;  %v4678_v18 = vand.u32 2147483648, %v4651_v34  ;;  %vm4672_vm15 = vweird.f32 %v4651_v34  ;;  %v4676_v44 = vand.u32 2147483647, %v4651_v34 }
 0xccd   :  { %6750 = vrcp.f32 %v4652_v28  ;;  %v4708_v42 = vand.u32 2147483648, %v4652_v28  ;;  %vm4702_vm9 = vweird.f32 %v4652_v28  ;;  %v4706_v62 = vand.u32 2147483647, %v4652_v28 }
 0xcce   :  { %v4679_v17 = vor.u32 1.1754944e-38, %v4678_v18  ;;  %vm4677_vm7 = vcmp.eq.f32.partialorder %v4676_v44, 8.507059e+37  ;;  %6752 = vrcp.f32 %v4653_v14  ;;  %v4738_v44 = vand.u32 2147483648, %v4653_v14 }
 0xccf   :  { %v4709_v40 = vor.u32 1.1754944e-38, %v4708_v42 }
 0xcd2   :  { %v6749_v58 = vpop.eup %6748 }
 0xcd3   :  { %v6751_v55 = vpop.eup %6750  ;;  %v4668_v12 = vmul.f32 %v6749_v58, %v4651_v34  ;;  %vm4673_vm5 = vweird.f32 %v6749_v58 }
 0xcd4   :  { %v4698_v24 = vmul.f32 %v6751_v55, %v4652_v28  ;;  %vm4674_vm8 = vmor %vm4672_vm15, %vm4673_vm5  ;;  %vm4703_vm10 = vweird.f32 %v6751_v55  ;;  %vm4707_vm5 = vcmp.eq.f32.partialorder %v4706_v62, 8.507059e+37  ;;  %v6753_v49 = vpop.eup %6752  ;;  %v13595_v62 = vld [vmem:[#allocation100_spill] sm:$0xff] }
 0xcd5   :  { %v4669_v50 = vsub.f32 1.0, %v4668_v12  ;;  %vm4704_vm14 = vmor %vm4702_vm9, %vm4703_vm10  ;;  %v4728_v28 = vmul.f32 %v6753_v49, %v4653_v14  ;;  %vm4733_vm9 = vweird.f32 %v6753_v49 }
 0xcd6   :  { %v4699_v32 = vsub.f32 1.0, %v4698_v24  ;;  %v13591_v24 = vld [vmem:[#allocation207_spill] sm:$0xff] }
 0xcd7   :  { %v4670_v37 = vmul.f32 %v6749_v58, %v4669_v50 }
 0xcd8   :  { %v4700_v61 = vmul.f32 %v6751_v55, %v4699_v32 }
 0xcd9   :  { %v4671_v22 = vadd.f32 %v6749_v58, %v4670_v37  ;;  %v13592_v37 = vld [vmem:[#allocation40_spill] sm:$0xff] }
 0xcda   :  { %v4701_v59 = vadd.f32 %v6751_v55, %v4700_v61  ;;  %v13593_v61 = vld [vmem:[#allocation218_spill] sm:$0xff] }
 0xcdb   :  { %v4675_v5 = vsel %vm4674_vm8, %v6749_v58, %v4671_v22  ;;  %v4729_v58 = vsub.f32 1.0, %v4728_v28 }
 0xcdc   :  { %v11112_v38 = vsel %vm4677_vm7, %v4679_v17, %v4675_v5  ;;  %v4705_v15 = vsel %vm4704_vm14, %v6751_v55, %v4701_v59  ;;  %v13590_v55 = vld [vmem:[#allocation98_spill] sm:$0xff]  ;;  %vm4732_vm14 = vweird.f32 %v4653_v14  ;;  %v4736_v5 = vand.u32 2147483647, %v4653_v14  ;;  %v13594_v59 = vld [vmem:[#allocation208_spill] sm:$0xff] }
 0xcdd   :  { %v4691_v4 = vmul.f32 %v13578_v13, %v11112_v38  ;;  %v4682_v53 = vmul.f32 %v13579_v9, %v11112_v38  ;;  %v4681_v16 = vmul.f32 %v13580_v51, %v11112_v38  ;;  %v11120_v57 = vsel %vm4707_vm5, %v4709_v40, %v4705_v15  ;;  %vm4734_vm15 = vmor %vm4732_vm14, %vm4733_vm9  ;;  %v13596_v51 = vld [vmem:[#allocation122_spill] sm:$0xff]  ;;  %v13597_v15 = vld [vmem:[#allocation41_spill] sm:$0xff] }
 0xcde   :  { %v4712_v29 = vmul.f32 %v13581_v3, %v11120_v57  ;;  %v4684_v23 = vmul.f32 %v13582_v7, %v11112_v38  ;;  %v4683_v1 = vmul.f32 %v13583_v2, %v11112_v38  ;;  %v4715_v10 = vmul.f32 %v13584_v54, %v11120_v57  ;;  %v13598_v3 = vld [vmem:[#allocation216_spill] sm:$0xff]  ;;  %v13599_v7 = vld [vmem:[#allocation42_spill] sm:$0xff]  ;;  %v13600_v2 = vld [vmem:[#allocation219_spill] sm:$0xff] }
 0xcdf   :  { %5087 = vperm.xlu1 %6489, %v4691_v4   ;;  %5042 = vperm.xlu2 %6491, %v4682_v53   ;;  %v4686_v46 = vmul.f32 %v13585_v0, %v11112_v38  ;;  %v4685_v63 = vmul.f32 %v13586_v26, %v11112_v38  ;;  %v4718_v56 = vmul.f32 %v13587_v60, %v11120_v57  ;;  %v4739_v9 = vor.u32 1.1754944e-38, %v4738_v44  ;;  %v13601_v14 = vld [vmem:[#allocation102_spill] sm:$0xff]  ;;  %v13602_v0 = vld [vmem:[#allocation220_spill] sm:$0xff]  ;;  %v13603_v26 = vld [vmem:[#allocation227_spill] sm:$0xff] }
 0xce0   :  { %5037 = vperm.xlu0 %6490, %v4681_v16   ;;  %v4688_v41 = vmul.f32 %v13588_v52, %v11112_v38  ;;  %v4687_v34 = vmul.f32 %v13589_v39, %v11112_v38  ;;  %v4721_v12 = vmul.f32 %v13590_v55, %v11120_v57  ;;  %v4690_v50 = vmul.f32 %v13591_v24, %v11112_v38 }
 0xce1   :  { %v4689_v32 = vmul.f32 %v13592_v37, %v11112_v38  ;;  %v4730_v22 = vmul.f32 %v6753_v49, %v4729_v58  ;;  %v4724_v17 = vmul.f32 %v13593_v61, %v11120_v57  ;;  %v4693_v42 = vmul.f32 %v13594_v59, %v11112_v38 }
 0xce2   :  { %v4692_v13 = vmul.f32 %v13595_v62, %v11112_v38  ;;  %vm4737_vm8 = vcmp.eq.f32.partialorder %v4736_v5, 8.507059e+37  ;;  %v4695_v40 = vmul.f32 %v13597_v15, %v11112_v38  ;;  %v4696_v54 = vmul.f32 %v13601_v14, %v11112_v38 }
 0xce3   :  { %v4731_v18 = vadd.f32 %v6753_v49, %v4730_v22 }
 0xce5   :  { %v4735_v4 = vsel %vm4734_vm15, %v6753_v49, %v4731_v18  ;;  %v13604_v49 = vld [vmem:[#allocation104_spill] sm:$0xff] }
 0xce6   :  { %v11153_v53 = vsel %vm4737_vm8, %v4739_v9, %v4735_v4  ;;  %v4713_v60 = vmul.f32 %v13604_v49, %v11120_v57 }
 0xce7   :  { %5122 = vperm.xlu1 %6489, %v4712_v29   ;;  %5052 = vperm.xlu2 %6491, %v4684_v23   ;;  %v4741_v16 = vmul.f32 %v13596_v51, %v11153_v53  ;;  %v4694_v29 = vmul.f32 %v13598_v3, %v11112_v38  ;;  %v4744_v23 = vmul.f32 %v13599_v7, %v11153_v53  ;;  %v13605_v38 = vld [vmem:[#allocation223_spill] sm:$0xff] }
 0xce8   :  { %5047 = vperm.xlu0 %6490, %v4683_v1   ;;  %v4711_v1 = vmul.f32 %v13600_v2, %v11120_v57  ;;  %v4750_v52 = vmul.f32 %v13605_v38, %v11153_v53 }
 0xcef   :  { %5137 = vperm.xlu1 %6489, %v4715_v10   ;;  %5062 = vperm.xlu2 %6491, %v4686_v46   ;;  %v4654_v10 = vperm.slane %v11108_v30, 3  ;;  %v4747_v46 = vmul.f32 %v13602_v0, %v11153_v53  ;;  %v13618_v0 = vld [vmem:[#allocation150_spill] sm:$0xff] }
 0xcf0   :  { %5057 = vperm.xlu0 %6490, %v4685_v63   ;;  %v4714_v63 = vmul.f32 %v13603_v26, %v11120_v57  ;;  %v13619_v26 = vld [vmem:[#allocation46_spill] sm:$0xff] }
 0xcf1   :  { %6754 = vrcp.f32 %v4654_v10  ;;  %v4768_v5 = vand.u32 2147483648, %v4654_v10  ;;  %vm4762_vm10 = vweird.f32 %v4654_v10  ;;  %v4766_v61 = vand.u32 2147483647, %v4654_v10 }
 0xcf3   :  { %v4769_v51 = vor.u32 1.1754944e-38, %v4768_v5  ;;  %vm4767_vm9 = vcmp.eq.f32.partialorder %v4766_v61, 8.507059e+37  ;;  %v13623_v61 = vld [vmem:[#allocation113_spill] sm:$0xff] }
 0xcf7   :  { %5152 = vperm.xlu1 %6489, %v4718_v56   ;;  %5072 = vperm.xlu2 %6491, %v4688_v41   ;;  %v6755_v56 = vpop.eup %6754  ;;  %v13606_v41 = vld [vmem:[#allocation43_spill] sm:$0xff] }
 0xcf8   :  { %5067 = vperm.xlu0 %6490, %v4687_v34   ;;  %v4717_v39 = vmul.f32 %v13606_v41, %v11120_v57  ;;  %v13607_v34 = vld [vmem:[#allocation140_spill] sm:$0xff]  ;;  %v4758_v58 = vmul.f32 %v6755_v56, %v4654_v10  ;;  %vm4763_vm7 = vweird.f32 %v6755_v56 }
 0xcf9   :  { %v4716_v28 = vmul.f32 %v13607_v34, %v11120_v57  ;;  %vm4764_vm5 = vmor %vm4762_vm10, %vm4763_vm7  ;;  %vm13632_vm10 = vcmask 458112  }
 0xcfa   :  { %v4759_v55 = vsub.f32 1.0, %v4758_v58  ;;  %v4907_v58 = vld [vmem:[#allocation2] sm:$0xff] }
 0xcfc   :  { %v4760_v18 = vmul.f32 %v6755_v56, %v4759_v55 }
 0xcfe   :  { %v4761_v44 = vadd.f32 %v6755_v56, %v4760_v18 }
 0xcff   :  { %5167 = vperm.xlu1 %6489, %v4721_v12   ;;  %5082 = vperm.xlu2 %6491, %v4690_v50   ;;  %v13608_v12 = vld [vmem:[#allocation107_spill] sm:$0xff]  ;;  %v13609_v50 = vld [vmem:[#allocation221_spill] sm:$0xff] }
 0xd00   :  { %5077 = vperm.xlu0 %6490, %v4689_v32   ;;  %v4753_v24 = vmul.f32 %v13608_v12, %v11153_v53  ;;  %v4720_v37 = vmul.f32 %v13609_v50, %v11120_v57  ;;  %v13610_v32 = vld [vmem:[#allocation44_spill] sm:$0xff]  ;;  %v4765_v9 = vsel %vm4764_vm5, %v6755_v56, %v4761_v44  ;;  %vm13637_vm5 = vcmask 589312  }
 0xd01   :  { %v4719_v22 = vmul.f32 %v13610_v32, %v11120_v57 }
 0xd07   :  { %5182 = vperm.xlu1 %6489, %v4724_v17   ;;  %5097 = vperm.xlu2 %6491, %v4693_v42   ;;  %v13611_v17 = vld [vmem:[#allocation231_spill] sm:$0xff]  ;;  %v13612_v42 = vld [vmem:[#allocation109_spill] sm:$0xff] }
 0xd08   :  { %5092 = vperm.xlu0 %6490, %v4692_v13   ;;  %v4756_v59 = vmul.f32 %v13611_v17, %v11153_v53  ;;  %v4723_v62 = vmul.f32 %v13612_v42, %v11120_v57  ;;  %v13613_v13 = vld [vmem:[#allocation224_spill] sm:$0xff] }
 0xd09   :  { %v4722_v4 = vmul.f32 %v13613_v13, %v11120_v57 }
 0xd0f   :  { %5197 = vperm.xlu1 %6489, %v4741_v16   ;;  %5107 = vperm.xlu2 %6491, %v4695_v40   ;;  %v11192_v16 = vsel %vm4767_vm9, %v4769_v51, %v4765_v9  ;;  %v13614_v40 = vld [vmem:[#allocation45_spill] sm:$0xff]  ;;  %v4909_v9 = vld [vmem:[#allocation2 + $0x10] sm:$0xff]  ;;  %vm13638_vm9 = vcmask 654912  }
 0xd10   :  { %5102 = vperm.xlu0 %6490, %v4694_v29   ;;  %v4773_v3 = vmul.f32 %v13614_v40, %v11192_v16  ;;  %v13615_v29 = vld [vmem:[#allocation234_spill] sm:$0xff]  ;;  %v4782_v17 = vmul.f32 %v13623_v61, %v11192_v16 }
 0xd11   :  { %v4726_v7 = vmul.f32 %v13615_v29, %v11120_v57 }
 0xd17   :  { %5212 = vperm.xlu1 %6489, %v4744_v23   ;;  %5117 = vperm.xlu2 %6491, %v4711_v1   ;;  %v13616_v23 = vld [vmem:[#allocation236_spill] sm:$0xff]  ;;  %v11201_v1 = vperm.slane %v11108_v30, 4 }
 0xd18   :  { %5112 = vperm.xlu0 %6490, %v4696_v54   ;;  %v4725_v2 = vmul.f32 %v13616_v23, %v11120_v57  ;;  %v13617_v54 = vld [vmem:[#allocation111_spill] sm:$0xff] }
 0xd19   :  { %6756 = vrcp.f32 %v11201_v1  ;;  %v4776_v10 = vmul.f32 %v13617_v54, %v11192_v16  ;;  %vm4792_vm15 = vweird.f32 %v11201_v1  ;;  %v4798_v54 = vand.u32 2147483648, %v11201_v1 }
 0xd1f   :  { %5227 = vperm.xlu1 %6489, %v4747_v46   ;;  %5132 = vperm.xlu2 %6491, %v4714_v63   ;;  %v4743_v46 = vmul.f32 %v13618_v0, %v11153_v53  ;;  %v4742_v63 = vmul.f32 %v13619_v26, %v11153_v53  ;;  %v6757_v49 = vpop.eup %6756 }
 0xd20   :  { %5127 = vperm.xlu0 %6490, %v4713_v60   ;;  %v13620_v60 = vld [vmem:[#allocation232_spill] sm:$0xff]  ;;  %v4788_v38 = vmul.f32 %v6757_v49, %v11201_v1  ;;  %vm4793_vm14 = vweird.f32 %v6757_v49 }
 0xd21   :  { %v4779_v56 = vmul.f32 %v13620_v60, %v11192_v16  ;;  %vm4794_vm8 = vmor %vm4792_vm15, %vm4793_vm14  ;;  %vm13641_vm14 = vcmask 720512   ;;  %vm13642_vm15 = vcmask 786112  }
 0xd22   :  { %v4789_v12 = vsub.f32 1.0, %v4788_v38 }
 0xd27   :  { %5242 = vperm.xlu1 %6489, %v4750_v52   ;;  %5147 = vperm.xlu2 %6491, %v4717_v39   ;;  %v13621_v52 = vld [vmem:[#allocation47_spill] sm:$0xff] }
 0xd28   :  { %5142 = vperm.xlu0 %6490, %v4716_v28   ;;  %v4746_v41 = vmul.f32 %v13621_v52, %v11153_v53  ;;  %v13622_v39 = vld [vmem:[#allocation235_spill] sm:$0xff]  ;;  %v4908_v28 = vld [vmem:[#allocation2 + $0x8] sm:$0xff]  ;;  %v13628_v52 = vld [vmem:[#allocation48_spill] sm:$0xff] }
 0xd29   :  { %v4745_v34 = vmul.f32 %v13622_v39, %v11153_v53 }
 0xd2f   :  { %5257 = vperm.xlu1 %6489, %v4753_v24   ;;  %5162 = vperm.xlu2 %6491, %v4720_v37  }
 0xd30   :  { %5157 = vperm.xlu0 %6490, %v4719_v22  }
 0xd37   :  { %5272 = vperm.xlu1 %6489, %v4756_v59   ;;  %5177 = vperm.xlu2 %6491, %v4723_v62   ;;  %v13624_v59 = vld [vmem:[#allocation237_spill] sm:$0xff] }
 0xd38   :  { %5172 = vperm.xlu0 %6490, %v4722_v4   ;;  %v4749_v42 = vmul.f32 %v13624_v59, %v11153_v53  ;;  %v13625_v62 = vld [vmem:[#allocation253_spill] sm:$0xff]  ;;  %v4790_v4 = vmul.f32 %v6757_v49, %v4789_v12 }
 0xd39   :  { %v5043_v15 = vpop.permute.xlu2 %5042  ;;  %v4748_v13 = vmul.f32 %v13625_v62, %v11153_v53 }
 0xd3a   :  { %v5676_v37 = vmul.f32 %v5043_v15, %v4908_v28  ;;  %v5989_v32 = vperm.slane %v5043_v15, %v9255_v25  ;;  %v4910_v15 = vld [vmem:[#allocation2 + $0x18] sm:$0xff]  ;;  %v4791_v29 = vadd.f32 %v6757_v49, %v4790_v4  ;;  %v4799_v28 = vor.u32 1.1754944e-38, %v4798_v54 }
 0xd3f   :  { %5287 = vperm.xlu1 %6489, %v4773_v3   ;;  %5192 = vperm.xlu2 %6491, %v4726_v7  }
 0xd40   :  { %5187 = vperm.xlu0 %6490, %v4725_v2   ;;  %v4796_v2 = vand.u32 2147483647, %v11201_v1 }
 0xd41   :  { %v5053_v14 = vpop.permute.xlu2 %5052 }
 0xd42   :  { %v5678_v0 = vmul.f32 %v5053_v14, %v4910_v15  ;;  %vm4797_vm7 = vcmp.eq.f32.partialorder %v4796_v2, 8.507059e+37 }
 0xd47   :  { %5302 = vperm.xlu1 %6489, %v4776_v10   ;;  %5207 = vperm.xlu2 %6491, %v4743_v46   ;;  %v5993_v10 = vperm.slane %v5053_v14, %v9268_v35  ;;  %v4911_v14 = vld [vmem:[#allocation2 + $0x20] sm:$0xff] }
 0xd48   :  { %5202 = vperm.xlu0 %6490, %v4742_v63   ;;  %v13626_v63 = vld [vmem:[#allocation115_spill] sm:$0xff] }
 0xd49   :  { %v11210_v57 = vpop.permute.xlu2 %5062  ;;  %v4785_v60 = vmul.f32 %v13626_v63, %v11192_v16  ;;  %v13633_v63 = vld [vmem:[#allocation248_spill] sm:$0xff] }
 0xd4f   :  { %5317 = vperm.xlu1 %6489, %v4779_v56   ;;  %5222 = vperm.xlu2 %6491, %v4746_v41   ;;  %v13627_v56 = vld [vmem:[#allocation239_spill] sm:$0xff]  ;;  %v4751_v41 = vmul.f32 %v13628_v52, %v11153_v53  ;;  %v13635_v52 = vld [vmem:[#allocation240_spill] sm:$0xff] }
 0xd50   :  { %5217 = vperm.xlu0 %6490, %v4745_v34   ;;  %v4752_v38 = vmul.f32 %v13627_v56, %v11153_v53  ;;  %v4795_v34 = vsel %vm4794_vm8, %v6757_v49, %v4791_v29  ;;  %v5997_v49 = vperm.slane %v11210_v57, %v9289_v45  ;;  %v11270_v29 = vperm.slane %v11108_v30, 5  ;;  %v13634_v56 = vld [vmem:[#allocation119_spill] sm:$0xff] }
 0xd51   :  { %v11219_v55 = vpop.permute.xlu1 %5087  ;;  %v11221_v24 = vpop.permute.xlu2 %5072  ;;  %v11251_v12 = vsel %vm4797_vm7, %v4799_v28, %v4795_v34  ;;  %v4924_v34 = vld [vmem:[#allocation2 + $0x88] sm:$0xff]  ;;  %v4915_v28 = vld [vmem:[#allocation2 + $0x40] sm:$0xff] }
 0xd52   :  { %v5038_v50 = vpop.permute.xlu0 %5037  ;;  %6758 = vrcp.f32 %v11270_v29  ;;  %vm4822_vm7 = vweird.f32 %v11270_v29 }
 0xd53   :  { %v5675_v22 = vmul.f32 %v5038_v50, %v4907_v58  ;;  %v5988_v18 = vperm.slane %v5038_v50, %v9252_v11  ;;  %v4912_v50 = vld [vmem:[#allocation2 + $0x28] sm:$0xff] }
 0xd55   :  { %v5803_v44 = vadd.f32 %v5676_v37, %v5675_v22  ;;  %v5990_v5 = vsel %vm3187_vm0, %v5989_v32, %v5988_v18 }
 0xd57   :  { %5332 = vperm.xlu1 %6489, %v4782_v17   ;;  %5237 = vperm.xlu2 %6491, %v4749_v42   ;;  %v13629_v17 = vld [vmem:[#allocation166_spill] sm:$0xff]  ;;  %v13630_v42 = vld [vmem:[#allocation117_spill] sm:$0xff] }
 0xd58   :  { %5232 = vperm.xlu0 %6490, %v4748_v13   ;;  %v4802_v59 = vmul.f32 %v13629_v17, %v11251_v12  ;;  %v4755_v62 = vmul.f32 %v13630_v42, %v11153_v53  ;;  %v13631_v13 = vld [vmem:[#allocation238_spill] sm:$0xff] }
 0xd59   :  { %v11232_v51 = vpop.permute.xlu1 %5122  ;;  %v11234_v40 = vpop.permute.xlu2 %5082  ;;  %v4754_v4 = vmul.f32 %v13631_v13, %v11153_v53  ;;  %v6001_v53 = vperm.slane %v11221_v24, %v9346_v48  ;;  %v4917_v42 = vld [vmem:[#allocation2 + $0x50] sm:$0xff] }
 0xd5a   :  { %v5048_v3 = vpop.permute.xlu0 %5047 }
 0xd5b   :  { %v5677_v7 = vmul.f32 %v5048_v3, %v4909_v9  ;;  %v5991_v23 = vperm.slane %v5048_v3, %v9273_v31  ;;  %v4913_v3 = vld [vmem:[#allocation2 + $0x30] sm:$0xff] }
 0xd5d   :  { %v5804_v46 = vadd.f32 %v5803_v44, %v5677_v7  ;;  %v5992_v26 = vsel %vm3191_vm1, %v5991_v23, %v5990_v5  ;;  %v5680_v44 = vmul.f32 %v11210_v57, %v4912_v50  ;;  %v4914_v7 = vld [vmem:[#allocation2 + $0x38] sm:$0xff] }
 0xd5e   :  { %v5994_v39 = vsel %vm3195_vm2, %v5993_v10, %v5992_v26 }
 0xd5f   :  { %5347 = vperm.xlu1 %6489, %v4785_v60   ;;  %v5805_v1 = vadd.f32 %v5804_v46, %v5678_v0  ;;  %5252 = vperm.xlu2 %6491, %v4752_v38   ;;  %v5682_v0 = vmul.f32 %v11221_v24, %v4914_v7  ;;  %v4805_v60 = vmul.f32 %v13633_v63, %v11251_v12  ;;  %v4923_v24 = vld [vmem:[#allocation2 + $0x80] sm:$0xff] }
 0xd60   :  { %5247 = vperm.xlu0 %6490, %v4751_v41   ;;  %v4772_v38 = vmul.f32 %v13634_v56, %v11192_v16  ;;  %v4771_v41 = vmul.f32 %v13635_v52, %v11192_v16  ;;  %v4918_v56 = vld [vmem:[#allocation2 + $0x58] sm:$0xff] }
 0xd61   :  { %v11249_v58 = vpop.permute.xlu1 %5137  ;;  %v11253_v37 = vpop.permute.xlu2 %5097 }
 0xd62   :  { %v5058_v32 = vpop.permute.xlu0 %5057 }
 0xd63   :  { %v5679_v22 = vmul.f32 %v5058_v32, %v4911_v14  ;;  %v5995_v18 = vperm.slane %v5058_v32, %v9300_v21  ;;  %v4916_v14 = vld [vmem:[#allocation2 + $0x48] sm:$0xff]  ;;  %v5692_v32 = vmul.f32 %v11232_v51, %v4924_v34 }
 0xd64   :  { %v5684_v13 = vmul.f32 %v11234_v40, %v4916_v14 }
 0xd65   :  { %v5806_v5 = vadd.f32 %v5805_v1, %v5679_v22  ;;  %v5996_v61 = vsel %vm3199_vm3, %v5995_v18, %v5994_v39  ;;  %v6020_v22 = vperm.slane %v11232_v51, %v9255_v25  ;;  %v13636_v51 = vld [vmem:[#allocation121_spill] sm:$0xff] }
 0xd66   :  { %v5998_v9 = vsel %vm3203_vm4, %v5997_v49, %v5996_v61 }
 0xd67   :  { %5362 = vperm.xlu1 %6489, %v4802_v59   ;;  %v5807_v15 = vadd.f32 %v5806_v5, %v5680_v44  ;;  %5267 = vperm.xlu2 %6491, %v4755_v62   ;;  %v11294_v59 = vpop.eup %6758  ;;  %v6007_v62 = vperm.slane %v11219_v55, %v9349_v36 }
 0xd68   :  { %5262 = vperm.xlu0 %6490, %v4754_v4   ;;  %v6005_v4 = vperm.slane %v11234_v40, %v9286_v27  ;;  %v4818_v40 = vmul.f32 %v11294_v59, %v11270_v29  ;;  %vm4823_vm8 = vweird.f32 %v11294_v59 }
 0xd69   :  { %v11267_v57 = vpop.permute.xlu1 %5152  ;;  %v11272_v23 = vpop.permute.xlu2 %5107 }
 0xd6a   :  { %v5068_v2 = vpop.permute.xlu0 %5067 }
 0xd6b   :  { %v5681_v54 = vmul.f32 %v5068_v2, %v4913_v3  ;;  %v5999_v10 = vperm.slane %v5068_v2, %v9283_v43 }
 0xd6d   :  { %v5808_v46 = vadd.f32 %v5807_v15, %v5681_v54  ;;  %v6000_v26 = vsel %vm13632_vm10, %v5999_v10, %v5998_v9  ;;  %v4808_v9 = vmul.f32 %v13636_v51, %v11251_v12  ;;  %v13639_v10 = vld [vmem:[#allocation175_spill] sm:$0xff]  ;;  %v4921_v51 = vld [vmem:[#allocation2 + $0x70] sm:$0xff]  ;;  %vm4824_vm10 = vmor %vm4822_vm7, %vm4823_vm8  ;;  %vm13662_vm8 = vcmask 654912  }
 0xd6e   :  { %v6002_v39 = vsel %vm3211_vm6, %v6001_v53, %v6000_v26  ;;  %v4775_v53 = vmul.f32 %v13639_v10, %v11192_v16  ;;  %v5685_v26 = vmul.f32 %v11219_v55, %v4917_v42  ;;  %v6011_v55 = vperm.slane %v11253_v37, %v9295_v47 }
 0xd6f   :  { %5377 = vperm.xlu1 %6489, %v4805_v60   ;;  %v5809_v1 = vadd.f32 %v5808_v46, %v5682_v0  ;;  %5282 = vperm.xlu2 %6491, %v4772_v38   ;;  %v13640_v0 = vld [vmem:[#allocation141_spill] sm:$0xff]  ;;  %vm13665_vm7 = vcmask 720512  }
 0xd70   :  { %5277 = vperm.xlu0 %6490, %v4771_v41   ;;  %v4774_v46 = vmul.f32 %v13640_v0, %v11192_v16  ;;  %v4919_v41 = vld [vmem:[#allocation2 + $0x60] sm:$0xff]  ;;  %v4828_v0 = vand.u32 2147483648, %v11270_v29 }
 0xd71   :  { %v11287_v50 = vpop.permute.xlu1 %5167  ;;  %v5118_v18 = vpop.permute.xlu2 %5117  ;;  %v5687_v14 = vmul.f32 %v11253_v37, %v4919_v41  ;;  %v4920_v37 = vld [vmem:[#allocation2 + $0x68] sm:$0xff] }
 0xd72   :  { %v5078_v49 = vpop.permute.xlu0 %5077  ;;  %v5691_v44 = vmul.f32 %v5118_v18, %v4923_v24  ;;  %v6019_v5 = vperm.slane %v5118_v18, %v9252_v11  ;;  %v13643_v18 = vld [vmem:[#allocation245_spill] sm:$0xff] }
 0xd73   :  { %v5683_v61 = vmul.f32 %v5078_v49, %v4915_v28  ;;  %v6003_v17 = vperm.slane %v5078_v49, %v9319_v8  ;;  %v4811_v49 = vmul.f32 %v13643_v18, %v11251_v12 }
 0xd74   :  { %v11303_v15 = vadd.f32 %v5692_v32, %v5691_v44  ;;  %v11306_v3 = vsel %vm3187_vm0, %v6020_v22, %v6019_v5  ;;  %v13644_v44 = vld [vmem:[#allocation134_spill] sm:$0xff] }
 0xd75   :  { %v5810_v7 = vadd.f32 %v5809_v1, %v5683_v61  ;;  %v6004_v2 = vsel %vm13637_vm5, %v6003_v17, %v6002_v39  ;;  %v4819_v1 = vsub.f32 1.0, %v4818_v40  ;;  %v4778_v5 = vmul.f32 %v13644_v44, %v11192_v16  ;;  %v13645_v61 = vld [vmem:[#allocation54_spill] sm:$0xff] }
 0xd76   :  { %v6006_v54 = vsel %vm13638_vm9, %v6005_v4, %v6004_v2  ;;  %v4777_v17 = vmul.f32 %v13645_v61, %v11192_v16  ;;  %v5689_v40 = vmul.f32 %v11272_v23, %v4921_v51  ;;  %vm13649_vm9 = vcmask 1048512   ;;  %v13650_v61 = vld [vmem:[#allocation142_spill] sm:$0xff] }
 0xd77   :  { %v5811_v63 = vadd.f32 %v5810_v7, %v5684_v13  ;;  %5392 = vperm.xlu1 %6489, %v4808_v9   ;;  %v6008_v60 = vsel %vm13641_vm14, %v6007_v62, %v6006_v54  ;;  %5297 = vperm.xlu2 %6491, %v4775_v53   ;;  %v4820_v62 = vmul.f32 %v11294_v59, %v4819_v1  ;;  %v4826_v53 = vand.u32 2147483647, %v11270_v29  ;;  %v4925_v51 = vld [vmem:[#allocation2 + $0x90] sm:$0xff] }
 0xd78   :  { %5292 = vperm.xlu0 %6490, %v4774_v46   ;;  %v6015_v46 = vperm.slane %v11272_v23, %v13491_v19  ;;  %v4829_v23 = vor.u32 1.1754944e-38, %v4828_v0  ;;  %v4927_v0 = vld [vmem:[#allocation2 + $0xa0] sm:$0xff]  ;;  %vm13657_vm14 = vcmask 458112  }
 0xd79   :  { %v11318_v38 = vpop.permute.xlu1 %5182  ;;  %v5812_v52 = vadd.f32 %v5811_v63, %v5685_v26  ;;  %v11320_v39 = vpop.permute.xlu2 %5132  ;;  %v4821_v2 = vadd.f32 %v11294_v59, %v4820_v62  ;;  %vm4827_vm5 = vcmp.eq.f32.partialorder %v4826_v53, 8.507059e+37 }
 0xd7a   :  { %v5093_v34 = vpop.permute.xlu0 %5092 }
 0xd7b   :  { %v5686_v24 = vmul.f32 %v5093_v34, %v4918_v56  ;;  %v6009_v28 = vperm.slane %v5093_v34, %v9335_v33  ;;  %v13648_v34 = vld [vmem:[#allocation151_spill] sm:$0xff] }
 0xd7c   :  { %v4780_v1 = vmul.f32 %v13648_v34, %v11192_v16  ;;  %v13654_v34 = vld [vmem:[#allocation154_spill] sm:$0xff] }
 0xd7d   :  { %v5813_v32 = vadd.f32 %v5812_v52, %v5686_v24  ;;  %v6010_v22 = vsel %vm13642_vm15, %v6009_v28, %v6008_v60  ;;  %v13646_v60 = vld [vmem:[#allocation57_spill] sm:$0xff]  ;;  %v13647_v52 = vld [vmem:[#allocation116_spill] sm:$0xff]  ;;  %v4825_v24 = vsel %vm4824_vm10, %v11294_v59, %v4821_v2  ;;  %v4926_v2 = vld [vmem:[#allocation2 + $0x98] sm:$0xff]  ;;  %vm13661_vm15 = vcmask 589312  }
 0xd7e   :  { %v6012_v42 = vsel %vm3231_vm11, %v6011_v55, %v6010_v22  ;;  %v4814_v56 = vmul.f32 %v13646_v60, %v11251_v12  ;;  %v4781_v41 = vmul.f32 %v13647_v52, %v11192_v16  ;;  %v4922_v55 = vld [vmem:[#allocation2 + $0x78] sm:$0xff]  ;;  %v13653_v60 = vld [vmem:[#allocation172_spill] sm:$0xff]  ;;  %v6026_v52 = vperm.slane %v11249_v58, %v9300_v21 }
 0xd7f   :  { %5407 = vperm.xlu1 %6489, %v4811_v49   ;;  %v5814_v13 = vadd.f32 %v5813_v32, %v5687_v14  ;;  %5312 = vperm.xlu2 %6491, %v4778_v5   ;;  %v11359_v32 = vsel %vm4827_vm5, %v4829_v23, %v4825_v24  ;;  %v11397_v23 = vperm.slane %v11108_v30, 6  ;;  %vm13667_vm10 = vcmask 786112  }
 0xd80   :  { %5307 = vperm.xlu0 %6490, %v4777_v17   ;;  %v4831_v17 = vmul.f32 %v13650_v61, %v11359_v32 }
 0xd81   :  { %v11335_v4 = vpop.permute.xlu1 %5197  ;;  %v11337_v9 = vpop.permute.xlu2 %5147  ;;  %6760 = vrcp.f32 %v11397_v23 }
 0xd82   :  { %v5103_v7 = vpop.permute.xlu0 %5102 }
 0xd83   :  { %v5688_v54 = vmul.f32 %v5103_v7, %v4920_v37  ;;  %v6013_v10 = vperm.slane %v5103_v7, %v13486_v20 }
 0xd85   :  { %v5815_v26 = vadd.f32 %v5814_v13, %v5688_v54  ;;  %v6014_v63 = vsel %vm3235_vm12, %v6013_v10, %v6012_v42  ;;  %v13651_v42 = vld [vmem:[#allocation130_spill] sm:$0xff]  ;;  %v13652_v13 = vld [vmem:[#allocation233_spill] sm:$0xff] }
 0xd86   :  { %v6016_v29 = vsel %vm3239_vm13, %v6015_v46, %v6014_v63  ;;  %v4784_v62 = vmul.f32 %v13651_v42, %v11192_v16  ;;  %v4783_v37 = vmul.f32 %v13652_v13, %v11192_v16  ;;  %v4930_v42 = vld [vmem:[#allocation2 + $0xb8] sm:$0xff]  ;;  %v13656_v13 = vld [vmem:[#allocation188_spill] sm:$0xff] }
 0xd87   :  { %5422 = vperm.xlu1 %6489, %v4814_v56   ;;  %v5816_v28 = vadd.f32 %v5815_v26, %v5689_v40  ;;  %5327 = vperm.xlu2 %6491, %v4781_v41   ;;  %v5694_v40 = vmul.f32 %v11320_v39, %v4926_v2  ;;  %v6024_v26 = vperm.slane %v11320_v39, %v9268_v35 }
 0xd88   :  { %5322 = vperm.xlu0 %6490, %v4780_v1   ;;  %v4834_v56 = vmul.f32 %v13653_v60, %v11359_v32  ;;  %v4801_v1 = vmul.f32 %v13654_v34, %v11251_v12  ;;  %v5698_v60 = vmul.f32 %v11267_v57, %v4930_v42 }
 0xd89   :  { %v11357_v14 = vpop.permute.xlu1 %5212  ;;  %v11361_v22 = vpop.permute.xlu2 %5162 }
 0xd8a   :  { %v5113_v18 = vpop.permute.xlu0 %5112 }
 0xd8b   :  { %v5690_v49 = vmul.f32 %v5113_v18, %v4922_v55  ;;  %v6017_v44 = vperm.slane %v5113_v18, %v13500_v6  ;;  %v4928_v55 = vld [vmem:[#allocation2 + $0xa8] sm:$0xff] }
 0xd8d   :  { %v11364_v5 = vadd.f32 %v5816_v28, %v5690_v49  ;;  %v11367_v59 = vsel %vm13649_vm9, %v6017_v44, %v6016_v29  ;;  %v13655_v29 = vld [vmem:[#allocation127_spill] sm:$0xff]  ;;  %v5695_v28 = vmul.f32 %v11249_v58, %v4927_v0  ;;  %v4929_v44 = vld [vmem:[#allocation2 + $0xb0] sm:$0xff]  ;;  %vm4852_vm9 = vweird.f32 %v11397_v23 }
 0xd8e   :  { %v4786_v24 = vmul.f32 %v13655_v29, %v11192_v16  ;;  %v5697_v2 = vmul.f32 %v11337_v9, %v4929_v44  ;;  %v4932_v29 = vld [vmem:[#allocation2 + $0xc8] sm:$0xff]  ;;  %v6038_v44 = vperm.slane %v11287_v50, %v9349_v36 }
 0xd8f   :  { %5437 = vperm.xlu1 %6489, %v4831_v17   ;;  %5342 = vperm.xlu2 %6491, %v4784_v62   ;;  %v6030_v62 = vperm.slane %v11337_v9, %v9283_v43  ;;  %v4931_v9 = vld [vmem:[#allocation2 + $0xc0] sm:$0xff] }
 0xd90   :  { %5337 = vperm.xlu0 %6490, %v4783_v37   ;;  %v4837_v37 = vmul.f32 %v13656_v13, %v11359_v32  ;;  %v13663_v13 = vld [vmem:[#allocation68_spill] sm:$0xff] }
 0xd91   :  { %v11375_v7 = vpop.permute.xlu1 %5227  ;;  %v11377_v54 = vpop.permute.xlu2 %5177 }
 0xd92   :  { %v5128_v10 = vpop.permute.xlu0 %5127 }
 0xd93   :  { %v5693_v53 = vmul.f32 %v5128_v10, %v4925_v51  ;;  %v6022_v46 = vperm.slane %v5128_v10, %v9273_v31  ;;  %v6032_v51 = vperm.slane %v11267_v57, %v9346_v48  ;;  %v4933_v57 = vld [vmem:[#allocation2 + $0xd0] sm:$0xff] }
 0xd95   :  { %v5825_v63 = vadd.f32 %v11303_v15, %v5693_v53  ;;  %v6023_v41 = vsel %vm3191_vm1, %v6022_v46, %v11306_v3  ;;  %v13658_v46 = vld [vmem:[#allocation16_spill] sm:$0xff] }
 0xd96   :  { %v6025_v15 = vsel %vm3195_vm2, %v6024_v26, %v6023_v41  ;;  %v13659_v26 = vld [vmem:[#allocation133_spill] sm:$0xff] }
 0xd97   :  { %v5826_v39 = vadd.f32 %v5825_v63, %v5694_v40  ;;  %5452 = vperm.xlu1 %6489, %v4834_v56   ;;  %5357 = vperm.xlu2 %6491, %v4801_v1   ;;  %v6027_v3 = vsel %vm3199_vm3, %v6026_v52, %v6025_v15  ;;  %v4804_v40 = vmul.f32 %v13658_v46, %v11251_v12  ;;  %v11423_v1 = vpop.eup %6760 }
 0xd98   :  { %5352 = vperm.xlu0 %6490, %v4786_v24   ;;  %v4803_v63 = vmul.f32 %v13659_v26, %v11251_v12  ;;  %v4848_v42 = vmul.f32 %v11423_v1, %v11397_v23  ;;  %vm4853_vm5 = vweird.f32 %v11423_v1 }
 0xd99   :  { %v11400_v18 = vpop.permute.xlu1 %5242  ;;  %v5827_v49 = vadd.f32 %v5826_v39, %v5695_v28  ;;  %v11402_v61 = vpop.permute.xlu2 %5192 }
 0xd9a   :  { %v5143_v16 = vpop.permute.xlu0 %5142  ;;  %v4849_v26 = vsub.f32 1.0, %v4848_v42 }
 0xd9b   :  { %v5696_v58 = vmul.f32 %v5143_v16, %v4928_v55  ;;  %v6028_v17 = vperm.slane %v5143_v16, %v9289_v45  ;;  %v6036_v55 = vperm.slane %v11361_v22, %v9286_v27  ;;  %v5700_v16 = vmul.f32 %v11361_v22, %v4932_v29  ;;  %v13666_v29 = vld [vmem:[#allocation168_spill] sm:$0xff] }
 0xd9d   :  { %v5828_v10 = vadd.f32 %v5827_v49, %v5696_v58  ;;  %v6029_v53 = vsel %vm3203_vm4, %v6028_v17, %v6027_v3  ;;  %v13660_v3 = vld [vmem:[#allocation22_spill] sm:$0xff] }
 0xd9e   :  { %v6031_v0 = vsel %vm13657_vm14, %v6030_v62, %v6029_v53  ;;  %v4840_v49 = vmul.f32 %v13660_v3, %v11359_v32  ;;  %v4850_v3 = vmul.f32 %v11423_v1, %v4849_v26  ;;  %vm11480_vm14 = vmor %vm4852_vm9, %vm4853_vm5  ;;  %vm13684_vm5 = vcmask 458112  }
 0xd9f   :  { %v5829_v56 = vadd.f32 %v5828_v10, %v5697_v2  ;;  %5467 = vperm.xlu1 %6489, %v4837_v37   ;;  %v6033_v52 = vsel %vm3211_vm6, %v6032_v51, %v6031_v0  ;;  %5372 = vperm.xlu2 %6491, %v4804_v40   ;;  %v4807_v37 = vmul.f32 %v13663_v13, %v11251_v12  ;;  %v13664_v51 = vld [vmem:[#allocation171_spill] sm:$0xff]  ;;  %vm13686_vm9 = vcmask 589312  }
 0xda0   :  { %5367 = vperm.xlu0 %6490, %v4803_v63   ;;  %v4806_v2 = vmul.f32 %v13664_v51, %v11251_v12  ;;  %v5701_v10 = vmul.f32 %v11287_v50, %v4933_v57  ;;  %v4934_v0 = vld [vmem:[#allocation2 + $0xd8] sm:$0xff]  ;;  %v4935_v63 = vld [vmem:[#allocation2 + $0xe0] sm:$0xff]  ;;  %v6042_v50 = vperm.slane %v11377_v54, %v9295_v47 }
 0xda1   :  { %v11421_v41 = vpop.permute.xlu1 %5257  ;;  %v5830_v34 = vadd.f32 %v5829_v56, %v5698_v60  ;;  %v11425_v24 = vpop.permute.xlu2 %5207 }
 0xda2   :  { %v5158_v28 = vpop.permute.xlu0 %5157 }
 0xda3   :  { %v5699_v39 = vmul.f32 %v5158_v28, %v4931_v9  ;;  %v6034_v15 = vperm.slane %v5158_v28, %v9319_v8  ;;  %v4843_v28 = vmul.f32 %v13666_v29, %v11359_v32  ;;  %v13672_v29 = vld [vmem:[#allocation198_spill] sm:$0xff] }
 0xda5   :  { %v5831_v58 = vadd.f32 %v5830_v34, %v5699_v39  ;;  %v6035_v17 = vsel %vm13661_vm15, %v6034_v15, %v6033_v52  ;;  %v4936_v34 = vld [vmem:[#allocation2 + $0xe8] sm:$0xff]  ;;  %v6044_v39 = vperm.slane %v11318_v38, %v13486_v20  ;;  %v5703_v15 = vmul.f32 %v11377_v54, %v4935_v63 }
 0xda6   :  { %v6037_v62 = vsel %vm13662_vm8, %v6036_v55, %v6035_v17  ;;  %v5704_v42 = vmul.f32 %v11318_v38, %v4936_v34  ;;  %v4858_v38 = vand.u32 2147483648, %v11397_v23  ;;  %vm13673_vm15 = vcmask 1048512  }
 0xda7   :  { %v5832_v53 = vadd.f32 %v5831_v58, %v5700_v16  ;;  %5482 = vperm.xlu1 %6489, %v4840_v49   ;;  %v6039_v22 = vsel %vm13665_vm7, %v6038_v44, %v6037_v62  ;;  %5387 = vperm.xlu2 %6491, %v4807_v37   ;;  %v13668_v44 = vld [vmem:[#allocation31_spill] sm:$0xff]  ;;  %v5818_v62 = vrot.slane %v11364_v5, 4  ;;  %v4937_v37 = vld [vmem:[#allocation2 + $0xf0] sm:$0xff]  ;;  %vm13676_vm8 = vcmask 1041409  }
 0xda8   :  { %5382 = vperm.xlu0 %6490, %v4806_v2   ;;  %v4810_v16 = vmul.f32 %v13668_v44, %v11251_v12  ;;  %v13669_v58 = vld [vmem:[#allocation19_spill] sm:$0xff]  ;;  %v4851_v2 = vadd.f32 %v11423_v1, %v4850_v3 }
 0xda9   :  { %v11445_v46 = vpop.permute.xlu1 %5272  ;;  %v5833_v40 = vadd.f32 %v5832_v53, %v5701_v10  ;;  %v11447_v60 = vpop.permute.xlu2 %5222  ;;  %v4809_v17 = vmul.f32 %v13669_v58, %v11251_v12  ;;  %v4938_v10 = vld [vmem:[#allocation2 + $0xf8] sm:$0xff]  ;;  %v4939_v58 = vld [vmem:[#allocation2 + $0x100] sm:$0xff] }
 0xdaa   :  { %v5173_v56 = vpop.permute.xlu0 %5172  ;;  %v5706_v34 = vmul.f32 %v11402_v61, %v4938_v10 }
 0xdab   :  { %v5702_v52 = vmul.f32 %v5173_v56, %v4934_v0  ;;  %v6040_v9 = vperm.slane %v5173_v56, %v9335_v33  ;;  %v5819_v0 = vadd.f32 %v5818_v62, %v11364_v5  ;;  %v4856_v56 = vand.u32 2147483647, %v11397_v23  ;;  %v4941_v62 = vld [vmem:[#allocation2 + $0x110] sm:$0xff] }
 0xdad   :  { %v5834_v57 = vadd.f32 %v5833_v40, %v5702_v52  ;;  %v6041_v55 = vsel %vm13667_vm10, %v6040_v9, %v6039_v22  ;;  %v6048_v52 = vperm.slane %v11402_v61, %v13500_v6  ;;  %v5820_v61 = vrot.slane %v5819_v0, 2  ;;  %vm13681_vm10 = vmmov %vm13676_vm8 }
 0xdae   :  { %v6043_v49 = vsel %vm3231_vm11, %v6042_v50, %v6041_v55  ;;  %v13675_v55 = vld [vmem:[#allocation128_spill] sm:$0xff]  ;;  %vm4857_vm7 = vcmp.eq.f32.partialorder %v4856_v56, 8.507059e+37  ;;  %v13678_v56 = vld [vmem:[#allocation23_spill] sm:$0xff]  ;;  %v5709_v9 = vmul.f32 %v11425_v24, %v4941_v62 }
 0xdaf   :  { %v5835_v13 = vadd.f32 %v5834_v57, %v5703_v15  ;;  %5497 = vperm.xlu1 %6489, %v4843_v28   ;;  %v6045_v54 = vsel %vm3235_vm12, %v6044_v39, %v6043_v49  ;;  %5402 = vperm.xlu2 %6491, %v4810_v16   ;;  %v4846_v28 = vmul.f32 %v13672_v29, %v11359_v32  ;;  %v13674_v15 = vld [vmem:[#allocation230_spill] sm:$0xff]  ;;  %v4859_v49 = vor.u32 1.1754944e-38, %v4858_v38 }
 0xdb0   :  { %5397 = vperm.xlu0 %6490, %v4809_v17   ;;  %v4855_v39 = vsel %vm11480_vm14, %v11423_v1, %v4851_v2  ;;  %v4813_v57 = vmul.f32 %v13674_v15, %v11251_v12  ;;  %v4812_v3 = vmul.f32 %v13675_v55, %v11251_v12  ;;  %v4940_v1 = vld [vmem:[#allocation2 + $0x108] sm:$0xff]  ;;  %v5821_v2 = vadd.f32 %v5820_v61, %v5819_v0 }
 0xdb1   :  { %v5836_v51 = vadd.f32 %v5835_v13, %v5704_v42  ;;  %v11469_v53 = vpop.permute.xlu2 %5237  ;;  %v11473_v40 = vpop.permute.xlu1 %5287  ;;  %v11500_v17 = vsel %vm4857_vm7, %v4859_v49, %v4855_v39  ;;  %v13679_v39 = vld [vmem:[#allocation20_spill] sm:$0xff]  ;;  %vm13689_vm14 = vcmask 654912  }
 0xdb2   :  { %v5188_v22 = vpop.permute.xlu0 %5187  ;;  %v5822_v15 = vrot.slane %v5821_v2, 1  ;;  %v4943_v49 = vld [vmem:[#allocation2 + $0x120] sm:$0xff] }
 0xdb3   :  { %v5705_v26 = vmul.f32 %v5188_v22, %v4937_v37  ;;  %v6046_v63 = vperm.slane %v5188_v22, %v13491_v19  ;;  %v5707_v37 = vmul.f32 %v11335_v4, %v4939_v58  ;;  %v6050_v22 = vperm.slane %v11335_v4, %v9252_v11  ;;  %v4944_v58 = vld [vmem:[#allocation2 + $0x128] sm:$0xff] }
 0xdb4   :  { %v6055_v4 = vperm.slane %v11357_v14, %v9268_v35 }
 0xdb5   :  { %v5837_v50 = vadd.f32 %v5836_v51, %v5705_v26  ;;  %v6047_v5 = vsel %vm3239_vm13, %v6046_v63, %v6045_v54  ;;  %v4942_v51 = vld [vmem:[#allocation2 + $0x118] sm:$0xff]  ;;  %v13677_v26 = vld [vmem:[#allocation32_spill] sm:$0xff] }
 0xdb6   :  { %v6049_v23 = vsel %vm13673_vm15, %v6048_v52, %v6047_v5  ;;  %v4863_v63 = vmul.f32 %v13677_v26, %v11500_v17  ;;  %v4816_v52 = vmul.f32 %v13678_v56, %v11251_v12  ;;  %v5710_v29 = vmul.f32 %v11357_v14, %v4942_v51  ;;  %v13680_v51 = vld [vmem:[#allocation152_spill] sm:$0xff] }
 0xdb7   :  { %v5838_v44 = vadd.f32 %v5837_v50, %v5706_v34  ;;  %v11498_v16 = vsel %vm13676_vm8, %v6049_v23, %v11367_v59  ;;  %5512 = vperm.xlu1 %6489, %v4846_v28   ;;  %5417 = vperm.xlu2 %6491, %v4813_v57   ;;  %v6053_v34 = vperm.slane %v11425_v24, %v9273_v31  ;;  %v11525_v24 = vperm.slane %v11108_v30, 7  ;;  %v13682_v56 = vld [vmem:[#allocation88_spill] sm:$0xff] }
 0xdb8   :  { %5412 = vperm.xlu0 %6490, %v4812_v3   ;;  %v4815_v23 = vmul.f32 %v13679_v39, %v11251_v12  ;;  %vm13691_vm15 = vcmask 720512   ;;  %vm13692_vm8 = vcmask 786112  }
 0xdb9   :  { %v5839_v42 = vrot.slane %v5838_v44, 4  ;;  %v11502_v13 = vpop.permute.xlu2 %5252  ;;  %v11515_v0 = vpop.permute.xlu1 %5302  ;;  %6762 = vrcp.f32 %v11525_v24 }
 0xdba   :  { %v5203_v54 = vpop.permute.xlu0 %5202 }
 0xdbb   :  { %v5840_v10 = vadd.f32 %v5839_v42, %v5838_v44  ;;  %v5708_v59 = vmul.f32 %v5203_v54, %v4940_v1  ;;  %v6051_v38 = vperm.slane %v5203_v54, %v9255_v25  ;;  %v5823_v42 = vadd.f32 %v5822_v15, %v5821_v2  ;;  %v4947_v15 = vld [vmem:[#allocation2 + $0x140] sm:$0xff] }
 0xdbc   :  { %v6061_v2 = vperm.slane %v11375_v7, %v9283_v43 }
 0xdbd   :  { %v5841_v50 = vrot.slane %v5840_v10, 2  ;;  %v5845_v5 = vadd.f32 %v5708_v59, %v5707_v37  ;;  %v6052_v28 = vsel %vm3187_vm0, %v6051_v38, %v6050_v22  ;;  %v4945_v37 = vld [vmem:[#allocation2 + $0x130] sm:$0xff]  ;;  %v5712_v59 = vmul.f32 %v11447_v60, %v4944_v58 }
 0xdbe   :  { %v6054_v3 = vsel %vm3191_vm1, %v6053_v34, %v6052_v28  ;;  %v6059_v22 = vperm.slane %v11447_v60, %v9289_v45  ;;  %v6067_v58 = vperm.slane %v11400_v18, %v9286_v27 }
 0xdbf   :  { %v5842_v57 = vadd.f32 %v5841_v50, %v5840_v10  ;;  %v5846_v55 = vadd.f32 %v5845_v5, %v5709_v9  ;;  %5527 = vperm.xlu1 %6489, %v4863_v63   ;;  %5432 = vperm.xlu2 %6491, %v4816_v52   ;;  %v6056_v61 = vsel %vm3195_vm2, %v6055_v4, %v6054_v3  ;;  %v13683_v9 = vld [vmem:[#allocation177_spill] sm:$0xff]  ;;  %v4946_v4 = vld [vmem:[#allocation2 + $0x138] sm:$0xff] }
 0xdc0   :  { %5427 = vperm.xlu0 %6490, %v4815_v23   ;;  %v4866_v10 = vmul.f32 %v13680_v51, %v11500_v17  ;;  %v4833_v52 = vmul.f32 %v13682_v56, %v11359_v32  ;;  %v4832_v34 = vmul.f32 %v13683_v9, %v11359_v32  ;;  %v5713_v50 = vmul.f32 %v11375_v7, %v4945_v37  ;;  %v11552_v23 = vpop.eup %6762  ;;  %v4950_v9 = vld [vmem:[#allocation2 + $0x158] sm:$0xff] }
 0xdc1   :  { %v5843_v14 = vrot.slane %v5842_v57, 1  ;;  %v5847_v44 = vadd.f32 %v5846_v55, %v5710_v29  ;;  %v11528_v1 = vpop.permute.xlu2 %5267  ;;  %v11548_v5 = vpop.permute.xlu1 %5317  ;;  %vm4883_vm7 = vweird.f32 %v11552_v23 }
 0xdc2   :  { %v5218_v12 = vpop.permute.xlu0 %5217 }
 0xdc3   :  { %v5844_v62 = vadd.f32 %v5843_v14, %v5842_v57  ;;  %v5711_v54 = vmul.f32 %v5218_v12, %v4943_v49  ;;  %v6057_v30 = vperm.slane %v5218_v12, %v9300_v21  ;;  %v4948_v49 = vld [vmem:[#allocation2 + $0x148] sm:$0xff]  ;;  %v5715_v12 = vmul.f32 %v11469_v53, %v4947_v15 }
 0xdc4   :  { %v13685_v14 = vld [vmem:[#allocation169_spill] sm:$0xff]  ;;  %v6073_v15 = vperm.slane %v11421_v41, %v9295_v47 }
 0xdc5   :  { %v11538_v38 = vsel %vm13681_vm10, %v5844_v62, %v5823_v42  ;;  %v5848_v26 = vadd.f32 %v5847_v44, %v5711_v54  ;;  %v6058_v63 = vsel %vm3199_vm3, %v6057_v30, %v6056_v61  ;;  %v6065_v61 = vperm.slane %v11469_v53, %v9319_v8  ;;  %v13687_v30 = vld [vmem:[#allocation26_spill] sm:$0xff] }
 0xdc6   :  { %v6060_v29 = vsel %vm3203_vm4, %v6059_v22, %v6058_v63  ;;  %v4869_v44 = vmul.f32 %v13685_v14, %v11500_v17  ;;  %v4878_v54 = vmul.f32 %v11552_v23, %v11525_v24  ;;  %v4836_v51 = vmul.f32 %v13687_v30, %v11359_v32  ;;  %v13693_v14 = vld [vmem:[#allocation167_spill] sm:$0xff] }
 0xdc7   :  { %v5849_v60 = vadd.f32 %v5848_v26, %v5712_v59  ;;  %5542 = vperm.xlu1 %6489, %v4866_v10   ;;  %5447 = vperm.xlu2 %6491, %v4833_v52   ;;  %v6062_v28 = vsel %vm13684_vm5, %v6061_v2, %v6060_v29  ;;  %v13688_v10 = vld [vmem:[#allocation164_spill] sm:$0xff]  ;;  %v5716_v22 = vmul.f32 %v11400_v18, %v4948_v49  ;;  %v4949_v2 = vld [vmem:[#allocation2 + $0x150] sm:$0xff]  ;;  %vm4882_vm10 = vweird.f32 %v11525_v24 }
 0xdc8   :  { %5442 = vperm.xlu0 %6490, %v4832_v34   ;;  %v4835_v59 = vmul.f32 %v13688_v10, %v11359_v32  ;;  %v4879_v52 = vsub.f32 1.0, %v4878_v54  ;;  %v6071_v18 = vperm.slane %v11502_v13, %v9335_v33  ;;  %vm11609_vm5 = vmor %vm4882_vm10, %vm4883_vm7  ;;  %vm13710_vm7 = vcmask 458112  }
 0xdc9   :  { %v5850_v39 = vadd.f32 %v5849_v60, %v5713_v50  ;;  %v11554_v57 = vpop.permute.xlu2 %5282  ;;  %v11574_v63 = vpop.permute.xlu1 %5332  ;;  %vm13713_vm10 = vcmask 589312  }
 0xdca   :  { %v5233_v55 = vpop.permute.xlu0 %5232  ;;  %v4880_v49 = vmul.f32 %v11552_v23, %v4879_v52  ;;  %v6077_v52 = vperm.slane %v11528_v1, %v13491_v19 }
 0xdcb   :  { %v5714_v3 = vmul.f32 %v5233_v55, %v4946_v4  ;;  %v6063_v7 = vperm.slane %v5233_v55, %v9346_v48  ;;  %v4951_v4 = vld [vmem:[#allocation2 + $0x160] sm:$0xff]  ;;  %v5718_v55 = vmul.f32 %v11502_v13, %v4950_v9  ;;  %v4952_v13 = vld [vmem:[#allocation2 + $0x168] sm:$0xff]  ;;  %v13695_v9 = vld [vmem:[#allocation155_spill] sm:$0xff] }
 0xdcc   :  { %v4881_v30 = vadd.f32 %v11552_v23, %v4880_v49 }
 0xdcd   :  { %v5851_v42 = vadd.f32 %v5850_v39, %v5714_v3  ;;  %v6064_v62 = vsel %vm3211_vm6, %v6063_v7, %v6062_v28  ;;  %v13690_v28 = vld [vmem:[#allocation34_spill] sm:$0xff] }
 0xdce   :  { %v6066_v37 = vsel %vm13686_vm9, %v6065_v61, %v6064_v62  ;;  %v4872_v39 = vmul.f32 %v13690_v28, %v11500_v17  ;;  %vm13700_vm9 = vcmask 1048512  }
 0xdcf   :  { %v5852_v26 = vadd.f32 %v5851_v42, %v5715_v12  ;;  %5557 = vperm.xlu1 %6489, %v4869_v44   ;;  %v6068_v53 = vsel %vm13689_vm14, %v6067_v58, %v6066_v37  ;;  %5462 = vperm.xlu2 %6491, %v4836_v51   ;;  %v4839_v44 = vmul.f32 %v13693_v14, %v11359_v32  ;;  %v13694_v58 = vld [vmem:[#allocation78_spill] sm:$0xff] }
 0xdd0   :  { %5457 = vperm.xlu0 %6490, %v4835_v59   ;;  %v4838_v12 = vmul.f32 %v13694_v58, %v11359_v32  ;;  %v5719_v42 = vmul.f32 %v11421_v41, %v4951_v4  ;;  %v4953_v51 = vld [vmem:[#allocation2 + $0x170] sm:$0xff] }
 0xdd1   :  { %v5853_v56 = vadd.f32 %v5852_v26, %v5716_v22  ;;  %v11576_v34 = vpop.permute.xlu2 %5297  ;;  %v4888_v22 = vand.u32 2147483648, %v11525_v24  ;;  %v11600_v26 = vpop.permute.xlu1 %5347  ;;  %v5721_v4 = vmul.f32 %v11528_v1, %v4953_v51 }
 0xdd2   :  { %v5248_v50 = vpop.permute.xlu0 %5247 }
 0xdd3   :  { %v5717_v60 = vmul.f32 %v5248_v50, %v4949_v2  ;;  %v6069_v29 = vperm.slane %v5248_v50, %v9349_v36  ;;  %v4886_v2 = vand.u32 2147483647, %v11525_v24  ;;  %v4875_v50 = vmul.f32 %v13695_v9, %v11500_v17 }
 0xdd4   :  { %v4885_v24 = vsel %vm11609_vm5, %v11552_v23, %v4881_v30  ;;  %v4889_v49 = vor.u32 1.1754944e-38, %v4888_v22  ;;  %v4955_v23 = vld [vmem:[#allocation2 + $0x180] sm:$0xff]  ;;  %v6082_v30 = vperm.slane %v11554_v57, %v9255_v25  ;;  %vm13715_vm5 = vcmask 654912  }
 0xdd5   :  { %v5854_v3 = vadd.f32 %v5853_v56, %v5717_v60  ;;  %v6070_v7 = vsel %vm13691_vm15, %v6069_v29, %v6068_v53  ;;  %v4954_v56 = vld [vmem:[#allocation2 + $0x178] sm:$0xff]  ;;  %v6079_v29 = vperm.slane %v11445_v46, %v13500_v6  ;;  %vm4887_vm14 = vcmp.eq.f32.partialorder %v4886_v2, 8.507059e+37 }
 0xdd6   :  { %v6072_v61 = vsel %vm13692_vm8, %v6071_v18, %v6070_v7  ;;  %v11627_v58 = vsel %vm4887_vm14, %v4889_v49, %v4885_v24  ;;  %v4958_v24 = vld [vmem:[#allocation2 + $0x198] sm:$0xff]  ;;  %v4960_v49 = vld [vmem:[#allocation2 + $0x1a8] sm:$0xff]  ;;  %vm13705_vm15 = vcmask 1042434   ;;  %vm13719_vm14 = vcmask 786112  }
 0xdd7   :  { %v5855_v62 = vadd.f32 %v5854_v3, %v5718_v55  ;;  %5572 = vperm.xlu1 %6489, %v4872_v39   ;;  %v6074_v54 = vsel %vm3231_vm11, %v6073_v15, %v6072_v61  ;;  %5477 = vperm.xlu2 %6491, %v4839_v44   ;;  %v13698_v15 = vld [vmem:[#allocation92_spill] sm:$0xff]  ;;  %v13699_v3 = vld [vmem:[#allocation199_spill] sm:$0xff]  ;;  %v5722_v61 = vmul.f32 %v11445_v46, %v4954_v56  ;;  %v4956_v44 = vld [vmem:[#allocation2 + $0x188] sm:$0xff] }
 0xdd8   :  { %5472 = vperm.xlu0 %6490, %v4838_v12   ;;  %v4842_v55 = vmul.f32 %v13698_v15, %v11359_v32  ;;  %v4841_v7 = vmul.f32 %v13699_v3, %v11359_v32  ;;  %vm13708_vm8 = vmmov %vm13705_vm15 }
 0xdd9   :  { %v5856_v37 = vadd.f32 %v5855_v62, %v5719_v42  ;;  %v11597_v10 = vpop.permute.xlu2 %5312  ;;  %v4957_v42 = vld [vmem:[#allocation2 + $0x190] sm:$0xff]  ;;  %v5363_v2 = vpop.permute.xlu1 %5362 }
 0xdda   :  { %v5263_v59 = vpop.permute.xlu0 %5262 }
 0xddb   :  { %v5720_v41 = vmul.f32 %v5263_v59, %v4952_v13  ;;  %v6075_v53 = vperm.slane %v5263_v59, %v13486_v20  ;;  %v5724_v13 = vmul.f32 %v11554_v57, %v4956_v44  ;;  %v13701_v59 = vld [vmem:[#allocation73_spill] sm:$0xff] }
 0xddc   :  { %v4892_v22 = vmul.f32 %v13701_v59, %v11627_v58  ;;  %v13703_v57 = vld [vmem:[#allocation153_spill] sm:$0xff] }
 0xddd   :  { %v5857_v18 = vadd.f32 %v5856_v37, %v5720_v41  ;;  %v6076_v28 = vsel %vm3235_vm12, %v6075_v53, %v6074_v54  ;;  %v5725_v41 = vmul.f32 %v11473_v40, %v4957_v42  ;;  %v6084_v53 = vperm.slane %v11473_v40, %v9273_v31 }
 0xdde   :  { %v6078_v39 = vsel %vm3239_vm13, %v6077_v52, %v6076_v28 }
 0xddf   :  { %v5858_v14 = vadd.f32 %v5857_v18, %v5721_v4  ;;  %v6080_v1 = vsel %vm13700_vm9, %v6079_v29, %v6078_v39  ;;  %5587 = vperm.xlu1 %6489, %v4875_v50   ;;  %5492 = vperm.xlu2 %6491, %v4842_v55   ;;  %v13702_v50 = vld [vmem:[#allocation162_spill] sm:$0xff]  ;;  %v4844_v29 = vmul.f32 %v13703_v57, %v11359_v32  ;;  %v4959_v39 = vld [vmem:[#allocation2 + $0x1a0] sm:$0xff]  ;;  %vm13716_vm9 = vcmask 720512  }
 0xde0   :  { %5487 = vperm.xlu0 %6490, %v4841_v7   ;;  %v4845_v60 = vmul.f32 %v13702_v50, %v11359_v32  ;;  %v13704_v32 = vld [vmem:[#allocation225_spill] sm:$0xff]  ;;  %v11653_v44 = vsel %vm13705_vm15, %v6080_v1, %v11498_v16  ;;  %v5728_v16 = vmul.f32 %v11515_v0, %v4960_v49  ;;  %v4962_v50 = vld [vmem:[#allocation2 + $0x1b8] sm:$0xff]  ;;  %v6113_v57 = vperm.slane %v5363_v2, %v9255_v25 }
 0xde1   :  { %v5859_v12 = vadd.f32 %v5858_v14, %v5722_v61  ;;  %v11629_v62 = vpop.permute.xlu2 %5327  ;;  %v4895_v14 = vmul.f32 %v13704_v32, %v11627_v58  ;;  %v4972_v1 = vld [vmem:[#allocation2 + $0x208] sm:$0xff]  ;;  %vm13723_vm15 = vcmask 1048512  }
 0xde2   :  { %v5278_v54 = vpop.permute.xlu0 %5277 }
 0xde3   :  { %v5860_v37 = vrot.slane %v5859_v12, 4  ;;  %v5723_v46 = vmul.f32 %v5278_v54, %v4955_v23  ;;  %v6081_v51 = vperm.slane %v5278_v54, %v9252_v11  ;;  %v5727_v23 = vmul.f32 %v11576_v34, %v4959_v39 }
 0xde4   :  { %v6096_v39 = vperm.slane %v11548_v5, %v9319_v8 }
 0xde5   :  { %v5861_v56 = vadd.f32 %v5860_v37, %v5859_v12  ;;  %v5866_v52 = vadd.f32 %v5724_v13, %v5723_v46  ;;  %v6083_v9 = vsel %vm3187_vm0, %v6082_v30, %v6081_v51  ;;  %v6088_v12 = vperm.slane %v11576_v34, %v9300_v21  ;;  %v13706_v46 = vld [vmem:[#allocation246_spill] sm:$0xff]  ;;  %v13707_v51 = vld [vmem:[#allocation95_spill] sm:$0xff] }
 0xde6   :  { %v6085_v28 = vsel %vm3191_vm1, %v6084_v53, %v6083_v9  ;;  %v6090_v13 = vperm.slane %v11515_v0, %v9289_v45  ;;  %v4862_v30 = vmul.f32 %v13706_v46, %v11500_v17  ;;  %v4861_v59 = vmul.f32 %v13707_v51, %v11500_v17 }
 0xde7   :  { %v5862_v4 = vrot.slane %v5861_v56, 2  ;;  %5602 = vperm.xlu1 %6489, %v4892_v22   ;;  %v5867_v18 = vadd.f32 %v5866_v52, %v5725_v41  ;;  %5507 = vperm.xlu2 %6491, %v4845_v60   ;;  %v11666_v22 = vpop.permute.xlu1 %5377  ;;  %v4961_v52 = vld [vmem:[#allocation2 + $0x1b0] sm:$0xff]  ;;  %v5740_v0 = vmul.f32 %v5363_v2, %v4972_v1 }
 0xde8   :  { %5502 = vperm.xlu0 %6490, %v4844_v29  }
 0xde9   :  { %v5863_v40 = vadd.f32 %v5862_v4, %v5861_v56  ;;  %v11646_v15 = vpop.permute.xlu2 %5342  ;;  %v4971_v56 = vld [vmem:[#allocation2 + $0x200] sm:$0xff] }
 0xdea   :  { %v5293_v55 = vpop.permute.xlu0 %5292 }
 0xdeb   :  { %v5864_v3 = vrot.slane %v5863_v40, 1  ;;  %v5726_v7 = vmul.f32 %v5293_v55, %v4958_v24  ;;  %v6086_v61 = vperm.slane %v5293_v55, %v9268_v35  ;;  %v5730_v55 = vmul.f32 %v11597_v10, %v4962_v50 }
 0xded   :  { %v5865_v42 = vadd.f32 %v5864_v3, %v5863_v40  ;;  %v5868_v54 = vadd.f32 %v5867_v18, %v5726_v7  ;;  %v6087_v37 = vsel %vm3195_vm2, %v6086_v61, %v6085_v28  ;;  %v4963_v40 = vld [vmem:[#allocation2 + $0x1c0] sm:$0xff]  ;;  %v6094_v3 = vperm.slane %v11597_v10, %v9346_v48  ;;  %v13709_v7 = vld [vmem:[#allocation125_spill] sm:$0xff] }
 0xdee   :  { %v6089_v34 = vsel %vm3199_vm3, %v6088_v12, %v6087_v37  ;;  %v4898_v2 = vmul.f32 %v13709_v7, %v11627_v58  ;;  %v13711_v12 = vld [vmem:[#allocation210_spill] sm:$0xff]  ;;  %v5731_v10 = vmul.f32 %v11548_v5, %v4963_v40  ;;  %v6100_v5 = vperm.slane %v11629_v62, %v9349_v36  ;;  %v4968_v7 = vld [vmem:[#allocation2 + $0x1e8] sm:$0xff] }
 0xdef   :  { %v5869_v41 = vadd.f32 %v5868_v54, %v5727_v23  ;;  %5617 = vperm.xlu1 %6489, %v4895_v14   ;;  %v11671_v53 = vsel %vm13708_vm8, %v5865_v42, %v11538_v38  ;;  %5522 = vperm.xlu2 %6491, %v4862_v30   ;;  %v6091_v9 = vsel %vm3203_vm4, %v6090_v13, %v6089_v34  ;;  %v13712_v54 = vld [vmem:[#allocation213_spill] sm:$0xff]  ;;  %v11697_v51 = vpop.permute.xlu1 %5392  ;;  %vm13724_vm8 = vcmask 1043459  }
 0xdf0   :  { %5517 = vperm.xlu0 %6490, %v4861_v59   ;;  %v4865_v42 = vmul.f32 %v13711_v12, %v11500_v17  ;;  %v4864_v13 = vmul.f32 %v13712_v54, %v11500_v17  ;;  %v4964_v30 = vld [vmem:[#allocation2 + $0x1c8] sm:$0xff]  ;;  %v13720_v54 = vld [vmem:[#allocation136_spill] sm:$0xff] }
 0xdf1   :  { %v5870_v60 = vadd.f32 %v5869_v41, %v5728_v16  ;;  %v5358_v29 = vpop.permute.xlu2 %5357  ;;  %v4965_v16 = vld [vmem:[#allocation2 + $0x1d0] sm:$0xff] }
 0xdf2   :  { %v5308_v4 = vpop.permute.xlu0 %5307  ;;  %v5739_v18 = vmul.f32 %v5358_v29, %v4971_v56  ;;  %v6112_v28 = vperm.slane %v5358_v29, %v9252_v11 }
 0xdf3   :  { %v5729_v24 = vmul.f32 %v5308_v4, %v4961_v52  ;;  %v6092_v38 = vperm.slane %v5308_v4, %v9283_v43  ;;  %v4966_v52 = vld [vmem:[#allocation2 + $0x1d8] sm:$0xff] }
 0xdf4   :  { %v11684_v49 = vadd.f32 %v5740_v0, %v5739_v18  ;;  %v11687_v61 = vsel %vm3187_vm0, %v6113_v57, %v6112_v28  ;;  %v5733_v0 = vmul.f32 %v11629_v62, %v4965_v16  ;;  %v13717_v18 = vld [vmem:[#allocation252_spill] sm:$0xff]  ;;  %v5734_v40 = vmul.f32 %v11574_v63, %v4966_v52  ;;  %v13721_v16 = vld [vmem:[#allocation106_spill] sm:$0xff] }
 0xdf5   :  { %v5871_v32 = vadd.f32 %v5870_v60, %v5729_v24  ;;  %v6093_v14 = vsel %vm13710_vm7, %v6092_v38, %v6091_v9  ;;  %v13714_v9 = vld [vmem:[#allocation124_spill] sm:$0xff]  ;;  %v6102_v60 = vperm.slane %v11574_v63, %v9335_v33  ;;  %v4868_v28 = vmul.f32 %v13717_v18, %v11500_v17  ;;  %v13718_v24 = vld [vmem:[#allocation217_spill] sm:$0xff]  ;;  %vm13729_vm7 = vmmov %vm13724_vm8 }
 0xdf6   :  { %v6095_v23 = vsel %vm3211_vm6, %v6094_v3, %v6093_v14  ;;  %v4901_v50 = vmul.f32 %v13714_v9, %v11627_v58  ;;  %v4867_v38 = vmul.f32 %v13718_v24, %v11500_v17  ;;  %v4967_v62 = vld [vmem:[#allocation2 + $0x1e0] sm:$0xff]  ;;  %v6106_v63 = vperm.slane %v11646_v15, %v13486_v20  ;;  %v13725_v24 = vld [vmem:[#allocation255_spill] sm:$0xff] }
 0xdf7   :  { %v5872_v37 = vadd.f32 %v5871_v32, %v5730_v55  ;;  %5632 = vperm.xlu1 %6489, %v4898_v2   ;;  %v6097_v46 = vsel %vm13713_vm10, %v6096_v39, %v6095_v23  ;;  %5537 = vperm.xlu2 %6491, %v4865_v42   ;;  %v11719_v14 = vpop.permute.xlu1 %5407  ;;  %v4969_v42 = vld [vmem:[#allocation2 + $0x1f0] sm:$0xff]  ;;  %vm13732_vm10 = vcmask 458112  }
 0xdf8   :  { %5532 = vperm.xlu0 %6490, %v4864_v13   ;;  %v4904_v13 = vmul.f32 %v13720_v54, %v11627_v58  ;;  %v5737_v52 = vmul.f32 %v11600_v26, %v4969_v42 }
 0xdf9   :  { %v5873_v59 = vadd.f32 %v5872_v37, %v5731_v10  ;;  %v11699_v1 = vpop.permute.xlu2 %5372  ;;  %v6108_v10 = vperm.slane %v11600_v26, %v13491_v19  ;;  %v5736_v37 = vmul.f32 %v11646_v15, %v4968_v7  ;;  %v4970_v15 = vld [vmem:[#allocation2 + $0x1f8] sm:$0xff] }
 0xdfa   :  { %v5323_v41 = vpop.permute.xlu0 %5322  ;;  %v4974_v7 = vld [vmem:[#allocation2 + $0x218] sm:$0xff] }
 0xdfb   :  { %v5732_v34 = vmul.f32 %v5323_v41, %v4964_v30  ;;  %v6098_v56 = vperm.slane %v5323_v41, %v9286_v27  ;;  %v4871_v41 = vmul.f32 %v13721_v16, %v11500_v17  ;;  %v5742_v54 = vmul.f32 %v11699_v1, %v4974_v7 }
 0xdfd   :  { %v5874_v57 = vadd.f32 %v5873_v59, %v5732_v34  ;;  %v6099_v29 = vsel %vm13715_vm5, %v6098_v56, %v6097_v46  ;;  %v13722_v34 = vld [vmem:[#allocation228_spill] sm:$0xff]  ;;  %vm13733_vm5 = vcmask 589312  }
 0xdfe   :  { %v6101_v4 = vsel %vm13716_vm9, %v6100_v5, %v6099_v29  ;;  %v4870_v56 = vmul.f32 %v13722_v34, %v11500_v17  ;;  %vm13734_vm9 = vcmask 654912  }
 0xdff   :  { %v5875_v39 = vadd.f32 %v5874_v57, %v5733_v0  ;;  %5647 = vperm.xlu1 %6489, %v4901_v50   ;;  %v6103_v55 = vsel %vm13719_vm14, %v6102_v60, %v6101_v4  ;;  %5552 = vperm.xlu2 %6491, %v4868_v28   ;;  %v11740_v4 = vpop.permute.xlu1 %5422  ;;  %vm13737_vm14 = vcmask 720512  }
 0xe00   :  { %5547 = vperm.xlu0 %6490, %v4867_v38   ;;  %v4874_v38 = vmul.f32 %v13725_v24, %v11500_v17 }
 0xe01   :  { %v5876_v3 = vadd.f32 %v5875_v39, %v5734_v40  ;;  %v11717_v2 = vpop.permute.xlu2 %5387  ;;  %v13726_v40 = vld [vmem:[#allocation10_spill] sm:$0xff] }
 0xe02   :  { %v5338_v32 = vpop.permute.xlu0 %5337  ;;  %v4873_v39 = vmul.f32 %v13726_v40, %v11500_v17 }
 0xe03   :  { %v5735_v23 = vmul.f32 %v5338_v32, %v4967_v62  ;;  %v6104_v12 = vperm.slane %v5338_v32, %v9295_v47  ;;  %v4973_v62 = vld [vmem:[#allocation2 + $0x210] sm:$0xff] }
 0xe05   :  { %v5877_v46 = vadd.f32 %v5876_v3, %v5735_v23  ;;  %v6105_v30 = vsel %vm3231_vm11, %v6104_v12, %v6103_v55 }
 0xe06   :  { %v6107_v59 = vsel %vm3235_vm12, %v6106_v63, %v6105_v30  ;;  %v4975_v63 = vld [vmem:[#allocation2 + $0x220] sm:$0xff] }
 0xe07   :  { %v5878_v5 = vadd.f32 %v5877_v46, %v5736_v37  ;;  %5662 = vperm.xlu1 %6489, %v4904_v13   ;;  %v6109_v9 = vsel %vm3239_vm13, %v6108_v10, %v6107_v59  ;;  %5567 = vperm.xlu2 %6491, %v4871_v41   ;;  %v6117_v13 = vperm.slane %v11699_v1, %v9268_v35  ;;  %v13727_v59 = vld [vmem:[#allocation53_spill] sm:$0xff]  ;;  %v13728_v41 = vld [vmem:[#allocation51_spill] sm:$0xff] }
 0xe08   :  { %5562 = vperm.xlu0 %6490, %v4870_v56   ;;  %v6119_v46 = vperm.slane %v11666_v22, %v9300_v21  ;;  %v4891_v16 = vmul.f32 %v13727_v59, %v11627_v58  ;;  %v4876_v34 = vmul.f32 %v13728_v41, %v11500_v17  ;;  %v5743_v56 = vmul.f32 %v11666_v22, %v4975_v63  ;;  %v4981_v59 = vld [vmem:[#allocation2 + $0x250] sm:$0xff] }
 0xe09   :  { %v5879_v50 = vadd.f32 %v5878_v5, %v5737_v52  ;;  %v11737_v60 = vpop.permute.xlu2 %5402  ;;  %v11767_v52 = vpop.permute.xlu1 %5437 }
 0xe0a   :  { %v5353_v0 = vpop.permute.xlu0 %5352 }
 0xe0b   :  { %v5738_v57 = vmul.f32 %v5353_v0, %v4970_v15  ;;  %v6110_v29 = vperm.slane %v5353_v0, %v13500_v6  ;;  %v4977_v0 = vld [vmem:[#allocation2 + $0x230] sm:$0xff] }
 0xe0c   :  { %v5745_v24 = vmul.f32 %v11717_v2, %v4977_v0 }
 0xe0d   :  { %v5880_v18 = vadd.f32 %v5879_v50, %v5738_v57  ;;  %v6111_v28 = vsel %vm13723_vm15, %v6110_v29, %v6109_v9  ;;  %v4976_v9 = vld [vmem:[#allocation2 + $0x228] sm:$0xff]  ;;  %vm13738_vm15 = vcmask 786112  }
 0xe0e   :  { %v11745_v26 = vsel %vm13724_vm8, %v6111_v28, %v11653_v44  ;;  %vm13741_vm8 = vcmask 1048512  }
 0xe0f   :  { %v5881_v55 = vrot.slane %v5880_v18, 4  ;;  %5582 = vperm.xlu2 %6491, %v4874_v38   ;;  %v6123_v38 = vperm.slane %v11717_v2, %v9283_v43  ;;  %v4979_v2 = vld [vmem:[#allocation2 + $0x240] sm:$0xff] }
 0xe10   :  { %5577 = vperm.xlu0 %6490, %v4873_v39   ;;  %v6125_v39 = vperm.slane %v11697_v51, %v9346_v48 }
 0xe11   :  { %v5882_v3 = vadd.f32 %v5881_v55, %v5880_v18  ;;  %v11751_v32 = vpop.permute.xlu2 %5417  ;;  %v4978_v18 = vld [vmem:[#allocation2 + $0x238] sm:$0xff] }
 0xe12   :  { %v5368_v23 = vpop.permute.xlu0 %5367 }
 0xe13   :  { %v5883_v12 = vrot.slane %v5882_v3, 2  ;;  %v5741_v42 = vmul.f32 %v5368_v23, %v4973_v62  ;;  %v6115_v44 = vperm.slane %v5368_v23, %v9273_v31  ;;  %v13730_v62 = vld [vmem:[#allocation9_spill] sm:$0xff]  ;;  %v5746_v23 = vmul.f32 %v11697_v51, %v4978_v18 }
 0xe14   :  { %v6129_v51 = vperm.slane %v11737_v60, %v9286_v27 }
 0xe15   :  { %v5884_v10 = vadd.f32 %v5883_v12, %v5882_v3  ;;  %v5888_v37 = vadd.f32 %v11684_v49, %v5741_v42  ;;  %v6116_v30 = vsel %vm3191_vm1, %v6115_v44, %v11687_v61  ;;  %v4894_v3 = vmul.f32 %v13730_v62, %v11627_v58  ;;  %v11791_v44 = vpop.permute.xlu1 %5452 }
 0xe16   :  { %v6118_v49 = vsel %vm3195_vm2, %v6117_v13, %v6116_v30  ;;  %v4980_v13 = vld [vmem:[#allocation2 + $0x248] sm:$0xff] }
 0xe17   :  { %v5885_v1 = vrot.slane %v5884_v10, 1  ;;  %v5889_v5 = vadd.f32 %v5888_v37, %v5742_v54  ;;  %5597 = vperm.xlu2 %6491, %v4891_v16   ;;  %v6120_v15 = vsel %vm3199_vm3, %v6119_v46, %v6118_v49  ;;  %v6131_v16 = vperm.slane %v11719_v14, %v9349_v36 }
 0xe18   :  { %5592 = vperm.xlu0 %6490, %v4876_v34   ;;  %v5748_v41 = vmul.f32 %v11737_v60, %v4980_v13 }
 0xe19   :  { %v5886_v61 = vadd.f32 %v5885_v1, %v5884_v10  ;;  %v5890_v50 = vadd.f32 %v5889_v5, %v5743_v56  ;;  %v11771_v57 = vpop.permute.xlu2 %5432  ;;  %v13735_v5 = vld [vmem:[#allocation12_spill] sm:$0xff] }
 0xe1a   :  { %v5383_v29 = vpop.permute.xlu0 %5382  ;;  %v4897_v49 = vmul.f32 %v13735_v5, %v11627_v58 }
 0xe1b   :  { %v11775_v17 = vsel %vm13729_vm7, %v5886_v61, %v11671_v53  ;;  %v5744_v22 = vmul.f32 %v5383_v29, %v4976_v9  ;;  %v6121_v28 = vperm.slane %v5383_v29, %v9289_v45  ;;  %v13731_v53 = vld [vmem:[#allocation258_spill] sm:$0xff]  ;;  %v13736_v9 = vld [vmem:[#allocation247_spill] sm:$0xff]  ;;  %v5749_v61 = vmul.f32 %v11719_v14, %v4981_v59 }
 0xe1c   :  { %v4893_v7 = vmul.f32 %v13731_v53, %v11627_v58  ;;  %v4982_v29 = vld [vmem:[#allocation2 + $0x258] sm:$0xff]  ;;  %v6135_v14 = vperm.slane %v11751_v32, %v9295_v47  ;;  %vm13744_vm7 = vcmask 1044484  }
 0xe1d   :  { %v5891_v40 = vadd.f32 %v5890_v50, %v5744_v22  ;;  %v6122_v55 = vsel %vm3203_vm4, %v6121_v28, %v6120_v15  ;;  %v4896_v15 = vmul.f32 %v13736_v9, %v11627_v58  ;;  %v4983_v22 = vld [vmem:[#allocation2 + $0x260] sm:$0xff] }
 0xe1e   :  { %v6124_v42 = vsel %vm13732_vm10, %v6123_v38, %v6122_v55  ;;  %v6137_v55 = vperm.slane %v11740_v4, %v13486_v20  ;;  %v5751_v62 = vmul.f32 %v11751_v32, %v4983_v22  ;;  %v4989_v22 = vld [vmem:[#allocation2 + $0x290] sm:$0xff]  ;;  %vm13747_vm10 = vmmov %vm13744_vm7 }
 0xe1f   :  { %v5892_v12 = vadd.f32 %v5891_v40, %v5745_v24  ;;  %5612 = vperm.xlu2 %6491, %v4894_v3   ;;  %v6126_v63 = vsel %vm3211_vm6, %v6125_v39, %v6124_v42  ;;  %v4984_v40 = vld [vmem:[#allocation2 + $0x268] sm:$0xff]  ;;  %v11812_v39 = vpop.permute.xlu1 %5467  ;;  %v13740_v42 = vld [vmem:[#allocation120_spill] sm:$0xff] }
 0xe20   :  { %5607 = vperm.xlu0 %6490, %v4893_v7  }
 0xe21   :  { %v5893_v54 = vadd.f32 %v5892_v12, %v5746_v23  ;;  %v11793_v10 = vpop.permute.xlu2 %5447  ;;  %v13739_v23 = vld [vmem:[#allocation261_spill] sm:$0xff] }
 0xe22   :  { %v5398_v37 = vpop.permute.xlu0 %5397  ;;  %v4900_v12 = vmul.f32 %v13739_v23, %v11627_v58 }
 0xe23   :  { %v5747_v46 = vmul.f32 %v5398_v37, %v4979_v2  ;;  %v6127_v30 = vperm.slane %v5398_v37, %v9319_v8  ;;  %v4899_v2 = vmul.f32 %v13740_v42, %v11627_v58  ;;  %v4985_v37 = vld [vmem:[#allocation2 + $0x270] sm:$0xff] }
 0xe25   :  { %v5894_v34 = vadd.f32 %v5893_v54, %v5747_v46  ;;  %v6128_v56 = vsel %vm13733_vm5, %v6127_v30, %v6126_v63  ;;  %v5752_v63 = vmul.f32 %v11740_v4, %v4984_v40  ;;  %v4986_v46 = vld [vmem:[#allocation2 + $0x278] sm:$0xff]  ;;  %vm13748_vm5 = vcmask 458112  }
 0xe26   :  { %v6130_v1 = vsel %vm13734_vm9, %v6129_v51, %v6128_v56  ;;  %vm13749_vm9 = vcmask 589312  }
 0xe27   :  { %v5895_v50 = vadd.f32 %v5894_v34, %v5748_v41  ;;  %v6132_v0 = vsel %vm13737_vm14, %v6131_v16, %v6130_v1  ;;  %5627 = vperm.xlu2 %6491, %v4897_v49   ;;  %v6141_v41 = vperm.slane %v11771_v57, %v13500_v6  ;;  %v5754_v34 = vmul.f32 %v11771_v57, %v4986_v46  ;;  %v11834_v1 = vpop.permute.xlu1 %5482  ;;  %v13742_v49 = vld [vmem:[#allocation56_spill] sm:$0xff]  ;;  %v4988_v57 = vld [vmem:[#allocation2 + $0x288] sm:$0xff] }
 0xe28   :  { %5622 = vperm.xlu0 %6490, %v4896_v15   ;;  %v4903_v9 = vmul.f32 %v13742_v49, %v11627_v58  ;;  %v13743_v15 = vld [vmem:[#allocation249_spill] sm:$0xff]  ;;  %v4993_v49 = vld [vmem:[#allocation2 + $0x2b0] sm:$0xff]  ;;  %vm13750_vm14 = vcmask 654912  }
 0xe29   :  { %v5896_v60 = vadd.f32 %v5895_v50, %v5749_v61  ;;  %v11809_v18 = vpop.permute.xlu2 %5462  ;;  %v4902_v61 = vmul.f32 %v13743_v15, %v11627_v58 }
 0xe2a   :  { %v5413_v28 = vpop.permute.xlu0 %5412  ;;  %v6152_v15 = vperm.slane %v11809_v18, %v9289_v45 }
 0xe2b   :  { %v5750_v24 = vmul.f32 %v5413_v28, %v4982_v29  ;;  %v6133_v38 = vperm.slane %v5413_v28, %v9335_v33  ;;  %v4987_v29 = vld [vmem:[#allocation2 + $0x280] sm:$0xff] }
 0xe2d   :  { %v5897_v3 = vadd.f32 %v5896_v60, %v5750_v24  ;;  %v6134_v53 = vsel %vm13738_vm15, %v6133_v38, %v6132_v0  ;;  %v5755_v38 = vmul.f32 %v11767_v52, %v4987_v29  ;;  %v6154_v29 = vperm.slane %v11812_v39, %v9283_v43 }
 0xe2e   :  { %v6136_v7 = vsel %vm3231_vm11, %v6135_v14, %v6134_v53  ;;  %v6146_v53 = vperm.slane %v11793_v10, %v9273_v31  ;;  %vm13751_vm15 = vcmask 720512  }
 0xe2f   :  { %v5898_v54 = vadd.f32 %v5897_v3, %v5751_v62  ;;  %v6138_v13 = vsel %vm3235_vm12, %v6137_v55, %v6136_v7  ;;  %5642 = vperm.xlu2 %6491, %v4900_v12   ;;  %v6143_v55 = vperm.slane %v11767_v52, %v9252_v11  ;;  %v4990_v62 = vld [vmem:[#allocation2 + $0x298] sm:$0xff]  ;;  %v5757_v3 = vmul.f32 %v11793_v10, %v4989_v22  ;;  %v13746_v52 = vld [vmem:[#allocation264_spill] sm:$0xff]  ;;  %v5498_v10 = vpop.permute.xlu1 %5497 }
 0xe30   :  { %5637 = vperm.xlu0 %6490, %v4899_v2   ;;  %v6148_v12 = vperm.slane %v11791_v44, %v9268_v35  ;;  %v13745_v2 = vld [vmem:[#allocation112_spill] sm:$0xff] }
 0xe31   :  { %v5899_v32 = vadd.f32 %v5898_v54, %v5752_v63  ;;  %v11827_v30 = vpop.permute.xlu2 %5477  ;;  %v4906_v63 = vmul.f32 %v13745_v2, %v11627_v58  ;;  %v4905_v54 = vmul.f32 %v13746_v52, %v11627_v58 }
 0xe32   :  { %v5428_v59 = vpop.permute.xlu0 %5427 }
 0xe33   :  { %v5753_v51 = vmul.f32 %v5428_v59, %v4985_v37  ;;  %v6139_v16 = vperm.slane %v5428_v59, %v13491_v19  ;;  %v4991_v59 = vld [vmem:[#allocation2 + $0x2a0] sm:$0xff] }
 0xe35   :  { %v5900_v4 = vadd.f32 %v5899_v32, %v5753_v51  ;;  %v6140_v56 = vsel %vm3239_vm13, %v6139_v16, %v6138_v13  ;;  %v5758_v13 = vmul.f32 %v11791_v44, %v4990_v62 }
 0xe36   :  { %v6142_v5 = vsel %vm13741_vm8, %v6141_v41, %v6140_v56  ;;  %vm13752_vm8 = vcmask 786112  }
 0xe37   :  { %v5901_v50 = vadd.f32 %v5900_v4, %v5754_v34  ;;  %v11843_v0 = vsel %vm13744_vm7, %v6142_v5, %v11745_v26  ;;  %5657 = vperm.xlu2 %6491, %v4903_v9   ;;  %v4992_v34 = vld [vmem:[#allocation2 + $0x2a8] sm:$0xff]  ;;  %vm13753_vm7 = vcmask 1048512  }
 0xe38   :  { %5652 = vperm.xlu0 %6490, %v4902_v61   ;;  %v5760_v9 = vmul.f32 %v11809_v18, %v4992_v34  ;;  %v5513_v18 = vpop.permute.xlu1 %5512  ;;  %v6166_v34 = vperm.slane %v5498_v10, %v9295_v47 }
 0xe39   :  { %v5902_v60 = vrot.slane %v5901_v50, 4  ;;  %v11845_v28 = vpop.permute.xlu2 %5492 }
 0xe3a   :  { %v5443_v24 = vpop.permute.xlu0 %5442 }
 0xe3b   :  { %v5903_v40 = vadd.f32 %v5902_v60, %v5901_v50  ;;  %v5756_v14 = vmul.f32 %v5443_v24, %v4988_v57  ;;  %v6144_v26 = vperm.slane %v5443_v24, %v9255_v25  ;;  %v5761_v60 = vmul.f32 %v11812_v39, %v4993_v49 }
 0xe3c   :  { %v6160_v39 = vperm.slane %v11834_v1, %v9286_v27 }
 0xe3d   :  { %v5904_v7 = vrot.slane %v5903_v40, 2  ;;  %v5908_v23 = vadd.f32 %v5756_v14, %v5755_v38  ;;  %v6145_v42 = vsel %vm3187_vm0, %v6144_v26, %v6143_v55  ;;  %v4994_v38 = vld [vmem:[#allocation2 + $0x2b8] sm:$0xff]  ;;  %v4995_v55 = vld [vmem:[#allocation2 + $0x2c0] sm:$0xff] }
 0xe3e   :  { %v6147_v46 = vsel %vm3191_vm1, %v6146_v53, %v6145_v42  ;;  %v6158_v53 = vperm.slane %v11827_v30, %v9319_v8 }
 0xe3f   :  { %v5905_v37 = vadd.f32 %v5904_v7, %v5903_v40  ;;  %v5909_v32 = vadd.f32 %v5908_v23, %v5757_v3  ;;  %5672 = vperm.xlu2 %6491, %v4906_v63   ;;  %v6149_v51 = vsel %vm3195_vm2, %v6148_v12, %v6147_v46  ;;  %v4996_v3 = vld [vmem:[#allocation2 + $0x2c8] sm:$0xff]  ;;  %v5763_v7 = vmul.f32 %v11827_v30, %v4995_v55  ;;  %v4999_v30 = vld [vmem:[#allocation2 + $0x2e0] sm:$0xff] }
 0xe40   :  { %5667 = vperm.xlu0 %6490, %v4905_v54   ;;  %v5764_v63 = vmul.f32 %v11834_v1, %v4996_v3  ;;  %v5767_v49 = vmul.f32 %v5498_v10, %v4999_v30 }
 0xe41   :  { %v5906_v16 = vrot.slane %v5905_v37, 1  ;;  %v5910_v41 = vadd.f32 %v5909_v32, %v5758_v13  ;;  %v11864_v5 = vpop.permute.xlu2 %5507  ;;  %v4997_v13 = vld [vmem:[#allocation2 + $0x2d0] sm:$0xff]  ;;  %v4998_v32 = vld [vmem:[#allocation2 + $0x2d8] sm:$0xff] }
 0xe42   :  { %v5458_v4 = vpop.permute.xlu0 %5457  ;;  %v5766_v1 = vmul.f32 %v11845_v28, %v4998_v32 }
 0xe43   :  { %v5907_v56 = vadd.f32 %v5906_v16, %v5905_v37  ;;  %v5759_v58 = vmul.f32 %v5458_v4, %v4991_v59  ;;  %v6150_v44 = vperm.slane %v5458_v4, %v9300_v21  ;;  %v11893_v16 = vpop.permute.xlu1 %5527 }
 0xe45   :  { %v11872_v61 = vsel %vm13747_vm10, %v5907_v56, %v11775_v17  ;;  %v5911_v50 = vadd.f32 %v5910_v41, %v5759_v58  ;;  %v6151_v57 = vsel %vm3199_vm3, %v6150_v44, %v6149_v51  ;;  %v6164_v41 = vperm.slane %v11845_v28, %v9335_v33 }
 0xe46   :  { %v6153_v24 = vsel %vm3203_vm4, %v6152_v15, %v6151_v57  ;;  %v5001_v57 = vld [vmem:[#allocation2 + $0x2f0] sm:$0xff]  ;;  %v6170_v28 = vperm.slane %v11864_v5, %v13491_v19  ;;  %vm13754_vm10 = vcmask 1045509  }
 0xe47   :  { %v5912_v22 = vadd.f32 %v5911_v50, %v5760_v9  ;;  %v6155_v40 = vsel %vm13748_vm5, %v6154_v29, %v6153_v24  ;;  %v5000_v50 = vld [vmem:[#allocation2 + $0x2e8] sm:$0xff]  ;;  %v5769_v10 = vmul.f32 %v11864_v5, %v5001_v57  ;;  %vm13755_vm5 = vmmov %vm13754_vm10 }
 0xe49   :  { %v5913_v14 = vadd.f32 %v5912_v22, %v5761_v60  ;;  %v11886_v23 = vpop.permute.xlu2 %5522 }
 0xe4a   :  { %v5473_v62 = vpop.permute.xlu0 %5472 }
 0xe4b   :  { %v5762_v17 = vmul.f32 %v5473_v62, %v4994_v38  ;;  %v6156_v26 = vperm.slane %v5473_v62, %v9346_v48  ;;  %v5002_v38 = vld [vmem:[#allocation2 + $0x2f8] sm:$0xff]  ;;  %v11910_v62 = vpop.permute.xlu1 %5542 }
 0xe4d   :  { %v5914_v12 = vadd.f32 %v5913_v14, %v5762_v17  ;;  %v6157_v42 = vsel %vm3211_vm6, %v6156_v26, %v6155_v40  ;;  %v6172_v40 = vperm.slane %v5513_v18, %v13500_v6  ;;  %v5770_v26 = vmul.f32 %v5513_v18, %v5002_v38  ;;  %v5005_v38 = vld [vmem:[#allocation2 + $0x310] sm:$0xff] }
 0xe4e   :  { %v6159_v2 = vsel %vm13749_vm9, %v6158_v53, %v6157_v42  ;;  %vm13756_vm9 = vcmask 458112  }
 0xe4f   :  { %v5915_v52 = vadd.f32 %v5914_v12, %v5763_v7  ;;  %v6161_v54 = vsel %vm13750_vm14, %v6160_v39, %v6159_v2  ;;  %v6175_v2 = vperm.slane %v11886_v23, %v9255_v25  ;;  %vm13757_vm14 = vcmask 589312  }
 0xe51   :  { %v5916_v37 = vadd.f32 %v5915_v52, %v5764_v63  ;;  %v11901_v44 = vpop.permute.xlu2 %5537 }
 0xe52   :  { %v5488_v46 = vpop.permute.xlu0 %5487 }
 0xe53   :  { %v5765_v59 = vmul.f32 %v5488_v46, %v4997_v13  ;;  %v6162_v51 = vperm.slane %v5488_v46, %v9349_v36  ;;  %v11920_v13 = vpop.permute.xlu1 %5557 }
 0xe55   :  { %v5917_v4 = vadd.f32 %v5916_v37, %v5765_v59  ;;  %v6163_v56 = vsel %vm13751_vm15, %v6162_v51, %v6161_v54  ;;  %vm13758_vm15 = vcmask 654912  }
 0xe56   :  { %v6165_v58 = vsel %vm13752_vm8, %v6164_v41, %v6163_v56  ;;  %v6177_v41 = vperm.slane %v11893_v16, %v9273_v31  ;;  %vm13759_vm8 = vcmask 720512  }
 0xe57   :  { %v5918_v9 = vadd.f32 %v5917_v4, %v5766_v1  ;;  %v6167_v15 = vsel %vm3231_vm11, %v6166_v34, %v6165_v58 }
 0xe59   :  { %v5919_v29 = vadd.f32 %v5918_v9, %v5767_v49  ;;  %v11914_v39 = vpop.permute.xlu2 %5552  ;;  %v5003_v49 = vld [vmem:[#allocation2 + $0x300] sm:$0xff] }
 0xe5a   :  { %v5503_v60 = vpop.permute.xlu0 %5502 }
 0xe5b   :  { %v5768_v22 = vmul.f32 %v5503_v60, %v5000_v50  ;;  %v6168_v24 = vperm.slane %v5503_v60, %v13486_v20  ;;  %v11937_v56 = vpop.permute.xlu1 %5572  ;;  %v6183_v50 = vperm.slane %v11910_v62, %v9289_v45 }
 0xe5d   :  { %v5920_v14 = vadd.f32 %v5919_v29, %v5768_v22  ;;  %v6169_v55 = vsel %vm3235_vm12, %v6168_v24, %v6167_v15 }
 0xe5e   :  { %v6171_v17 = vsel %vm3239_vm13, %v6170_v28, %v6169_v55  ;;  %v6187_v28 = vperm.slane %v11914_v39, %v9346_v48 }
 0xe5f   :  { %v5921_v3 = vadd.f32 %v5920_v14, %v5769_v10  ;;  %v6173_v53 = vsel %vm13753_vm7, %v6172_v40, %v6171_v17  ;;  %v5006_v40 = vld [vmem:[#allocation2 + $0x318] sm:$0xff]  ;;  %vm13760_vm7 = vcmask 786112  }
 0xe60   :  { %v11926_v59 = vsel %vm13754_vm10, %v6173_v53, %v11843_v0  ;;  %v6181_v0 = vperm.slane %v11901_v44, %v9300_v21  ;;  %vm13761_vm10 = vcmask 1048512  }
 0xe61   :  { %v5922_v7 = vadd.f32 %v5921_v3, %v5770_v26  ;;  %v11922_v46 = vpop.permute.xlu2 %5567  ;;  %v5773_v26 = vmul.f32 %v11893_v16, %v5005_v38  ;;  %v6189_v3 = vperm.slane %v11920_v13, %v9319_v8  ;;  %v5019_v38 = vld [vmem:[#allocation2 + $0x380] sm:$0xff] }
 0xe62   :  { %v5518_v12 = vpop.permute.xlu0 %5517 }
 0xe63   :  { %v5923_v42 = vrot.slane %v5922_v7, 4  ;;  %v6174_v5 = vperm.slane %v5518_v12, %v9252_v11  ;;  %v5771_v57 = vmul.f32 %v5518_v12, %v5003_v49  ;;  %v11957_v53 = vpop.permute.xlu1 %5587 }
 0xe65   :  { %v5924_v63 = vadd.f32 %v5923_v42, %v5922_v7  ;;  %v6176_v52 = vsel %vm3187_vm0, %v6175_v2, %v6174_v5  ;;  %v5007_v42 = vld [vmem:[#allocation2 + $0x320] sm:$0xff] }
 0xe66   :  { %v6178_v1 = vsel %vm3191_vm1, %v6177_v41, %v6176_v52 }
 0xe67   :  { %v5925_v54 = vrot.slane %v5924_v63, 2 }
 0xe69   :  { %v5926_v18 = vadd.f32 %v5925_v54, %v5924_v63  ;;  %v11945_v29 = vpop.permute.xlu2 %5582  ;;  %v6193_v63 = vperm.slane %v11922_v46, %v9349_v36  ;;  %v5775_v54 = vmul.f32 %v11901_v44, %v5007_v42 }
 0xe6a   :  { %v5533_v37 = vpop.permute.xlu0 %5532  ;;  %v6199_v44 = vperm.slane %v11945_v29, %v13486_v20 }
 0xe6b   :  { %v5927_v32 = vrot.slane %v5926_v18, 1  ;;  %v6179_v30 = vperm.slane %v5533_v37, %v9268_v35 }
 0xe6d   :  { %v5928_v51 = vadd.f32 %v5927_v32, %v5926_v18  ;;  %v6180_v4 = vsel %vm3195_vm2, %v6179_v30, %v6178_v1  ;;  %v5008_v32 = vld [vmem:[#allocation2 + $0x328] sm:$0xff] }
 0xe6e   :  { %v6182_v9 = vsel %vm3199_vm3, %v6181_v0, %v6180_v4  ;;  %v5776_v4 = vmul.f32 %v11910_v62, %v5008_v32  ;;  %v5603_v0 = vpop.permute.xlu1 %5602 }
 0xe6f   :  { %v11933_v34 = vsel %vm13755_vm5, %v5928_v51, %v11872_v61  ;;  %v5004_v61 = vld [vmem:[#allocation2 + $0x308] sm:$0xff]  ;;  %v6184_v60 = vsel %vm3203_vm4, %v6183_v50, %v6182_v9  ;;  %v5009_v51 = vld [vmem:[#allocation2 + $0x330] sm:$0xff]  ;;  %v5010_v50 = vld [vmem:[#allocation2 + $0x338] sm:$0xff]  ;;  %vm13762_vm5 = vcmask 1046534  }
 0xe70   :  { %v5772_v22 = vmul.f32 %v11886_v23, %v5004_v61  ;;  %v5774_v23 = vmul.f32 %v5533_v37, %v5006_v40  ;;  %v6195_v37 = vperm.slane %v11937_v56, %v9335_v33  ;;  %v5011_v40 = vld [vmem:[#allocation2 + $0x340] sm:$0xff] }
 0xe71   :  { %v5598_v2 = vpop.permute.xlu2 %5597 }
 0xe72   :  { %v5548_v58 = vpop.permute.xlu0 %5547  ;;  %v5929_v10 = vadd.f32 %v5772_v22, %v5771_v57 }
 0xe73   :  { %v6185_v15 = vperm.slane %v5548_v58, %v9283_v43  ;;  %v5777_v49 = vmul.f32 %v5548_v58, %v5009_v51  ;;  %v5778_v58 = vmul.f32 %v11914_v39, %v5010_v50 }
 0xe74   :  { %v5930_v7 = vadd.f32 %v5929_v10, %v5773_v26  ;;  %v5012_v10 = vld [vmem:[#allocation2 + $0x348] sm:$0xff] }
 0xe75   :  { %v6186_v24 = vsel %vm13756_vm9, %v6185_v15, %v6184_v60  ;;  %v6201_v60 = vperm.slane %v11957_v53, %v13491_v19 }
 0xe76   :  { %v6188_v55 = vsel %vm3211_vm6, %v6187_v28, %v6186_v24  ;;  %v5931_v52 = vadd.f32 %v5930_v7, %v5774_v23  ;;  %v5787_v23 = vmul.f32 %v5598_v2, %v5019_v38  ;;  %v5779_v7 = vmul.f32 %v11920_v13, %v5011_v40 }
 0xe77   :  { %v6190_v12 = vsel %vm13757_vm14, %v6189_v3, %v6188_v55  ;;  %v6206_v13 = vperm.slane %v5603_v0, %v9255_v25 }
 0xe78   :  { %v5932_v41 = vadd.f32 %v5931_v52, %v5775_v54 }
 0xe79   :  { %v5613_v61 = vpop.permute.xlu2 %5612 }
 0xe7a   :  { %v5563_v14 = vpop.permute.xlu0 %5562  ;;  %v5933_v15 = vadd.f32 %v5932_v41, %v5776_v4 }
 0xe7b   :  { %v6191_v17 = vperm.slane %v5563_v14, %v9286_v27  ;;  %v5780_v42 = vmul.f32 %v5563_v14, %v5012_v10 }
 0xe7c   :  { %v5934_v22 = vadd.f32 %v5933_v15, %v5777_v49  ;;  %v5023_v49 = vld [vmem:[#allocation2 + $0x3a0] sm:$0xff] }
 0xe7d   :  { %v6192_v5 = vsel %vm13758_vm15, %v6191_v17, %v6190_v12  ;;  %v5020_v17 = vld [vmem:[#allocation2 + $0x388] sm:$0xff]  ;;  %v5618_v12 = vpop.permute.xlu1 %5617 }
 0xe7e   :  { %v6194_v16 = vsel %vm13759_vm8, %v6193_v63, %v6192_v5  ;;  %v5935_v26 = vadd.f32 %v5934_v22, %v5778_v58  ;;  %v5021_v5 = vld [vmem:[#allocation2 + $0x390] sm:$0xff]  ;;  %v5788_v39 = vmul.f32 %v5603_v0, %v5020_v17  ;;  %v5022_v63 = vld [vmem:[#allocation2 + $0x398] sm:$0xff]  ;;  %v5791_v22 = vmul.f32 %v5618_v12, %v5023_v49  ;;  %v5016_v17 = vld [vmem:[#allocation2 + $0x368] sm:$0xff] }
 0xe7f   :  { %v6196_v1 = vsel %vm13760_vm7, %v6195_v37, %v6194_v16  ;;  %v5013_v16 = vld [vmem:[#allocation2 + $0x350] sm:$0xff] }
 0xe80   :  { %v5936_v52 = vadd.f32 %v5935_v26, %v5779_v7  ;;  %v5950_v32 = vadd.f32 %v5788_v39, %v5787_v23  ;;  %v5781_v14 = vmul.f32 %v11922_v46, %v5013_v16  ;;  %v5025_v58 = vld [vmem:[#allocation2 + $0x3b0] sm:$0xff]  ;;  %v5027_v39 = vld [vmem:[#allocation2 + $0x3c0] sm:$0xff] }
 0xe81   :  { %v5628_v37 = vpop.permute.xlu2 %5627 }
 0xe82   :  { %v5578_v18 = vpop.permute.xlu0 %5577  ;;  %v5937_v41 = vadd.f32 %v5936_v52, %v5780_v42  ;;  %v5793_v26 = vmul.f32 %v5628_v37, %v5025_v58 }
 0xe83   :  { %v6197_v30 = vperm.slane %v5578_v18, %v9295_v47 }
 0xe85   :  { %v6198_v9 = vsel %vm3231_vm11, %v6197_v30, %v6196_v1  ;;  %v6205_v30 = vperm.slane %v5598_v2, %v9252_v11  ;;  %v5790_v1 = vmul.f32 %v5613_v61, %v5022_v63  ;;  %v5017_v63 = vld [vmem:[#allocation2 + $0x370] sm:$0xff] }
 0xe86   :  { %v6200_v57 = vsel %vm3235_vm12, %v6199_v44, %v6198_v9  ;;  %v5014_v9 = vld [vmem:[#allocation2 + $0x358] sm:$0xff]  ;;  %v5015_v44 = vld [vmem:[#allocation2 + $0x360] sm:$0xff] }
 0xe87   :  { %v6202_v28 = vsel %vm3239_vm13, %v6201_v60, %v6200_v57  ;;  %v6207_v50 = vsel %vm3187_vm0, %v6206_v13, %v6205_v30  ;;  %v5938_v57 = vadd.f32 %v5937_v41, %v5781_v14  ;;  %v5024_v60 = vld [vmem:[#allocation2 + $0x3a8] sm:$0xff]  ;;  %v5782_v2 = vmul.f32 %v11937_v56, %v5014_v9  ;;  %v5026_v56 = vld [vmem:[#allocation2 + $0x3b8] sm:$0xff]  ;;  %vm13763_vm0 = vmmov %vm13756_vm9 }
 0xe88   :  { %v5783_v25 = vmul.f32 %v5578_v18, %v5015_v44  ;;  %v5784_v18 = vmul.f32 %v11945_v29, %v5016_v17 }
 0xe89   :  { %v5643_v23 = vpop.permute.xlu2 %5642 }
 0xe8a   :  { %v11976_v24 = vpop.permute.xlu0 %5592 }
 0xe8b   :  { %v6203_v62 = vperm.slane %v11976_v24, %v13500_v6 }
 0xe8d   :  { %v6204_v55 = vsel %vm13761_vm10, %v6203_v62, %v6202_v28  ;;  %v5633_v62 = vpop.permute.xlu1 %5632  ;;  %v5939_v28 = vadd.f32 %v5938_v57, %v5782_v2  ;;  %v5030_v57 = vld [vmem:[#allocation2 + $0x3d8] sm:$0xff] }
 0xe8e   :  { %v11985_v3 = vsel %vm13762_vm5, %v6204_v55, %v11926_v59  ;;  %v6212_v55 = vperm.slane %v5618_v12, %v9300_v21  ;;  %v5794_v52 = vmul.f32 %v5633_v62, %v5026_v56  ;;  %v5028_v12 = vld [vmem:[#allocation2 + $0x3c8] sm:$0xff]  ;;  %v6218_v29 = vperm.slane %v5633_v62, %v9346_v48 }
 0xe8f   :  { %v5940_v42 = vadd.f32 %v5939_v28, %v5783_v25  ;;  %v5796_v13 = vmul.f32 %v5643_v23, %v5028_v12 }
 0xe91   :  { %v5941_v21 = vadd.f32 %v5940_v42, %v5784_v18  ;;  %v5658_v9 = vpop.permute.xlu2 %5657 }
 0xe92   :  { %v5608_v54 = vpop.permute.xlu0 %5607  ;;  %v6228_v28 = vperm.slane %v5658_v9, %v9295_v47 }
 0xe93   :  { %v5789_v51 = vmul.f32 %v5608_v54, %v5021_v5  ;;  %v6208_v4 = vperm.slane %v5608_v54, %v9273_v31  ;;  %v6210_v31 = vperm.slane %v5613_v61, %v9268_v35  ;;  %v5018_v54 = vld [vmem:[#allocation2 + $0x378] sm:$0xff] }
 0xe95   :  { %v5951_v59 = vadd.f32 %v5950_v32, %v5789_v51  ;;  %v6209_v11 = vsel %vm3191_vm1, %v6208_v4, %v6207_v50  ;;  %v5786_v4 = vmul.f32 %v11976_v24, %v5018_v54  ;;  %vm13764_vm1 = vmmov %vm13757_vm14  ;;  %v6222_v50 = vperm.slane %v5643_v23, %v9286_v27  ;;  %v5034_v23 = vld [vmem:[#allocation2 + $0x3f8] sm:$0xff] }
 0xe96   :  { %v6211_v40 = vsel %vm3195_vm2, %v6210_v31, %v6209_v11  ;;  %vm13765_vm2 = vmmov %vm13758_vm15 }
 0xe97   :  { %v5952_v15 = vadd.f32 %v5951_v59, %v5790_v1  ;;  %v6213_v35 = vsel %vm3199_vm3, %v6212_v55, %v6211_v40  ;;  %v5785_v1 = vmul.f32 %v11957_v53, %v5017_v63  ;;  %v5648_v59 = vpop.permute.xlu1 %5647  ;;  %vm13766_vm3 = vmmov %vm13759_vm8  ;;  %v5033_v55 = vld [vmem:[#allocation2 + $0x3f0] sm:$0xff] }
 0xe98   :  { %v6224_v24 = vperm.slane %v5648_v59, %v9349_v36 }
 0xe99   :  { %v5953_v38 = vadd.f32 %v5952_v15, %v5791_v22  ;;  %v5673_v36 = vpop.permute.xlu2 %5672 }
 0xe9a   :  { %v5623_v0 = vpop.permute.xlu0 %5622  ;;  %v6234_v18 = vperm.slane %v5673_v36, %v13500_v6 }
 0xe9b   :  { %v5792_v46 = vmul.f32 %v5623_v0, %v5024_v60  ;;  %v6214_v10 = vperm.slane %v5623_v0, %v9289_v45  ;;  %v6216_v45 = vperm.slane %v5628_v37, %v9283_v43  ;;  %v5029_v43 = vld [vmem:[#allocation2 + $0x3d0] sm:$0xff]  ;;  %v5942_v37 = vadd.f32 %v5941_v21, %v5785_v1  ;;  %v5031_v60 = vld [vmem:[#allocation2 + $0x3e0] sm:$0xff] }
 0xe9c   :  { %v5797_v53 = vmul.f32 %v5648_v59, %v5029_v43  ;;  %v5799_v58 = vmul.f32 %v5658_v9, %v5031_v60 }
 0xe9d   :  { %v5954_v7 = vadd.f32 %v5953_v38, %v5792_v46  ;;  %v6215_v5 = vsel %vm3203_vm4, %v6214_v10, %v6213_v35  ;;  %v5032_v38 = vld [vmem:[#allocation2 + $0x3e8] sm:$0xff]  ;;  %vm13767_vm4 = vmmov %vm13760_vm7 }
 0xe9e   :  { %v6217_v32 = vsel %vm13763_vm0, %v6216_v45, %v6215_v5  ;;  %v5802_v5 = vmul.f32 %v5673_v36, %v5034_v23 }
 0xe9f   :  { %v5955_v61 = vadd.f32 %v5954_v7, %v5793_v26  ;;  %v6219_v14 = vsel %vm3211_vm6, %v6218_v29, %v6217_v32  ;;  %v5663_v27 = vpop.permute.xlu1 %5662  ;;  %vm13768_vm6 = vmmov %vm13761_vm10 }
 0xea0   :  { %v5800_v17 = vmul.f32 %v5663_v27, %v5032_v38 }
 0xea1   :  { %v5956_v51 = vadd.f32 %v5955_v61, %v5794_v52 }
 0xea2   :  { %v5638_v16 = vpop.permute.xlu0 %5637 }
 0xea3   :  { %v5795_v30 = vmul.f32 %v5638_v16, %v5027_v39  ;;  %v6220_v41 = vperm.slane %v5638_v16, %v9319_v8  ;;  %v5943_v8 = vadd.f32 %v5942_v37, %v5786_v4  ;;  %v6245_v39 = vld [vmem:[%s12046_s5] sm:$0xff] }
 0xea5   :  { %v5957_v49 = vadd.f32 %v5956_v51, %v5795_v30  ;;  %v6221_v15 = vsel %vm13764_vm1, %v6220_v41, %v6219_v14  ;;  %v5944_v31 = vrot.slane %v5943_v8, 4 }
 0xea6   :  { %v6223_v48 = vsel %vm13765_vm2, %v6222_v50, %v6221_v15 }
 0xea7   :  { %v5958_v44 = vadd.f32 %v5957_v49, %v5796_v13  ;;  %v6225_v25 = vsel %vm13766_vm3, %v6224_v24, %v6223_v48  ;;  %v5945_v10 = vadd.f32 %v5944_v31, %v5943_v8 }
 0xea9   :  { %v5959_v11 = vadd.f32 %v5958_v44, %v5797_v53  ;;  %v5946_v61 = vrot.slane %v5945_v10, 2 }
 0xeaa   :  { %v5653_v22 = vpop.permute.xlu0 %5652 }
 0xeab   :  { %v5798_v2 = vmul.f32 %v5653_v22, %v5030_v57  ;;  %v6226_v62 = vperm.slane %v5653_v22, %v9335_v33  ;;  %v6230_v33 = vperm.slane %v5663_v27, %v13486_v20 }
 0xead   :  { %v5960_v0 = vadd.f32 %v5959_v11, %v5798_v2  ;;  %v6227_v46 = vsel %vm13767_vm4, %v6226_v62, %v6225_v25 }
 0xeae   :  { %v6229_v26 = vsel %vm3231_vm11, %v6228_v28, %v6227_v46  ;;  %vm13769_vm11 = vcmask 1047559  }
 0xeaf   :  { %v5961_v40 = vadd.f32 %v5960_v0, %v5799_v58  ;;  %v6231_v47 = vsel %vm3235_vm12, %v6230_v33, %v6229_v26  ;;  %vm13770_vm12 = vmmov %vm13762_vm5 }
 0xeb1   :  { %v5962_v56 = vadd.f32 %v5961_v40, %v5800_v17 }
 0xeb2   :  { %v5668_v7 = vpop.permute.xlu0 %5667 }
 0xeb3   :  { %v5801_v42 = vmul.f32 %v5668_v7, %v5033_v55  ;;  %v6232_v35 = vperm.slane %v5668_v7, %v13491_v19  ;;  %v5947_v19 = vadd.f32 %v5946_v61, %v5945_v10 }
 0xeb5   :  { %v5963_v63 = vadd.f32 %v5962_v56, %v5801_v42  ;;  %v6233_v52 = vsel %vm3239_vm13, %v6232_v35, %v6231_v47  ;;  %v5948_v16 = vrot.slane %v5947_v19, 1  ;;  %vm13771_vm13 = vmmov %vm13769_vm11 }
 0xeb6   :  { %v6235_v20 = vsel %vm13768_vm6, %v6234_v18, %v6233_v52 }
 0xeb7   :  { %v5964_v45 = vadd.f32 %v5963_v63, %v5802_v5  ;;  %v6242_v54 = vsel %vm13769_vm11, %v6235_v20, %v11985_v3  ;;  %v5949_v30 = vadd.f32 %v5948_v16, %v5947_v19 }
 0xeb8   :  { %6244 = vst [vmem:[%s12048_s7] sm:$0xff] %v6242_v54  ;;  %v6246_v6 = vadd.f32 %v6245_v39, %v6242_v54 }
 0xeb9   :  { %v5965_v21 = vrot.slane %v5964_v45, 4  ;;  %v5984_v3 = vsel %vm13770_vm12, %v5949_v30, %v11933_v34 }
 0xeba   :  { %6247 = vst [vmem:[%s12049_s8] sm:$0xff] %v6246_v6 }
 0xebb   :  { %v5966_v12 = vadd.f32 %v5965_v21, %v5964_v45 }
 0xebd   :  { %v5967_v32 = vrot.slane %v5966_v12, 2 }
 0xebf   :  { %v5968_v51 = vadd.f32 %v5967_v32, %v5966_v12 }
 0xec1   :  { %v5969_v41 = vrot.slane %v5968_v51, 1 }
 0xec3   :  { %v5970_v1 = vadd.f32 %v5969_v41, %v5968_v51 }
 0xec5   :  { %v5985_v29 = vsel %vm13771_vm13, %v5970_v1, %v5984_v3 }
 0xec6   :  { %5987 = vst [vmem:[%s12047_s6] sm:$0xff] %v5985_v29 }
 0xec7   :  { %6260 = vsyncpa [#allocation3], 1 }
 0xec8   :  { %6261 = vsyncpa [#allocation5], 1 }

</bundles_post_ra>
